<compile_context>
chip_gen: v5e
topology: v5e:2x2
jax: 0.10.0
libtpu: 0.0.40
codegen_flags: <defaults>
</compile_context>

<pallas_src>
import functools

import jax
import jax.numpy as jnp
from jax.experimental import pallas as pl
from jax.experimental.pallas import tpu as pltpu


def _pick_row_block(r):
    """Largest sublane-aligned row block (<=72) that divides r."""
    for cand in (72, 64, 56, 48, 40, 32, 24, 16, 8):
        if r % cand == 0:
            return cand
    return r


def _fused_head_kernel(x_ref, w1_ref, bias_ref, w2_ref, b2_ref, out_ref,
                       *, num_classes, wp, cin, row_block):
    # x_ref   : (1, Hp*Wp + 2, Cin)  flattened padded input (+1 halo row each end)
    # w1_ref  : (9*Cin, Cmid_pad)    fused 3x3 conv weight (BN scale folded in)
    # bias_ref: (1, Cmid_pad)        folded BatchNorm bias (all heads concat, 0-padded)
    # w2_ref  : (Cmid_pad, Cout_pad) block-diagonal fused 1x1 conv weight
    # b2_ref  : (1, Cout_pad)        fused 1x1 conv bias (zero in padding lanes)
    # out_ref : (1, H*Wp, Cout_pad)  lane-dense output (padded-width flat layout)
    r_total = out_ref.shape[1]
    cout_pad = out_ref.shape[2]
    n_blocks = r_total // row_block

    # Per-lane sigmoid mask (cls-head channels only) — broadcast by jnp.where.
    lane_ids = jax.lax.broadcasted_iota(jnp.int32, (1, cout_pad), 1)
    is_cls = lane_ids < num_classes

    for blk in range(n_blocks):
        r0 = blk * row_block

        # 3x3 conv for all heads: 9 shifted contiguous-row matmuls, accumulated
        # in f32 registers.  Output row r (padded-flat index Wp + r) needs input
        # rows starting at dy*Wp + dx + r in x_ref (halo-row pad makes all
        # offsets in range and non-negative).
        acc = None
        for t in range(9):
            dy, dx = divmod(t, 3)
            start = dy * wp + dx + r0                       # static Python int
            xs = x_ref[0, start:start + row_block, :]       # (rb, Cin) contiguous
            wt = w1_ref[t * cin:(t + 1) * cin, :]           # (Cin, Cmid_pad)
            d = jnp.dot(xs, wt, preferred_element_type=jnp.float32)
            acc = d if acc is None else acc + d

        # BatchNorm (scale already folded into w1) + ReLU.
        y = jnp.maximum(acc + bias_ref[...], 0.0)           # (rb, Cmid_pad)

        # Fused block-diagonal 1x1 convs + bias (output lanes padded to 128).
        o = jnp.dot(y, w2_ref[...], preferred_element_type=jnp.float32)
        o = o + b2_ref[...]

        # Sigmoid only on the cls-head channels.
        o = jnp.where(is_cls, jax.nn.sigmoid(o), o)

        # Lane-dense (128) and sublane-aligned store.
        out_ref[0, r0:r0 + row_block, :] = o.astype(out_ref.dtype)


def _run_fused_head(x_flat, w1_flat, bn_bias, w2_block, b2_pad, *,
                    num_classes, h, wp):
    n, r_tot, cin = x_flat.shape
    k, cmid_pad = w1_flat.shape
    cout_pad = w2_block.shape[1]
    r_out = h * wp
    row_block = _pick_row_block(r_out)

    kernel = functools.partial(_fused_head_kernel, num_classes=num_classes,
                               wp=wp, cin=cin, row_block=row_block)

    return pl.pallas_call(
        kernel,
        out_shape=jax.ShapeDtypeStruct((n, r_out, cout_pad), jnp.float32),
        grid_spec=pltpu.PrefetchScalarGridSpec(
            num_scalar_prefetch=0,
            grid=(n,),
            in_specs=[
                pl.BlockSpec((1, r_tot, cin), lambda i: (i, 0, 0)),
                pl.BlockSpec((k, cmid_pad), lambda i: (0, 0)),
                pl.BlockSpec((1, cmid_pad), lambda i: (0, 0)),
                pl.BlockSpec((cmid_pad, cout_pad), lambda i: (0, 0)),
                pl.BlockSpec((1, cout_pad), lambda i: (0, 0)),
            ],
            out_specs=pl.BlockSpec((1, r_out, cout_pad), lambda i: (i, 0, 0)),
        ),
        compiler_params=pltpu.CompilerParams(
            dimension_semantics=("parallel",)),
    )(x_flat, w1_flat, bn_bias.reshape(1, cmid_pad), w2_block,
      b2_pad.reshape(1, cout_pad))


def _fuse_head_params(p_cls, p_wh, p_reg):
    """Concatenate / block-diagonalize the three heads into one set of params."""
    heads = (p_cls, p_wh, p_reg)
    cin = p_cls["w1"].shape[2]
    cmid = p_cls["w1"].shape[3]
    num_classes = p_cls["w2"].shape[1]
    couts = [p["w2"].shape[1] for p in heads]                # [80, 2, 2]
    cmid_tot = 3 * cmid                                      # 192
    cmid_pad = ((cmid_tot + 127) // 128) * 128               # 256 (MXU-clean)
    cout_total = sum(couts)
    cout_pad = max(128, ((cout_total + 127) // 128) * 128)   # lane-dense store

    # Fold BN scale into the 3x3 weights, concat along Cmid, pad to 256,
    # flatten tap-major so w1_flat[t*cin:(t+1)*cin] is tap t's weight.
    w1 = jnp.concatenate(
        [p["w1"] * p["scale"][None, None, None, :] for p in heads], axis=3)
    w1 = jnp.pad(w1, ((0, 0), (0, 0), (0, 0), (0, cmid_pad - cmid_tot)))
    w1_flat = w1.reshape(9 * cin, cmid_pad)                  # (576, 256)
    bn_bias = jnp.pad(jnp.concatenate([p["bias"] for p in heads]),
                      (0, cmid_pad - cmid_tot))              # (256,)

    # Block-diagonal 1x1 conv weight + bias, zero-padded rows/lanes.
    w2_block = jnp.zeros((cmid_pad, cout_pad), jnp.float32)
    b2_pad = jnp.zeros((cout_pad,), jnp.float32)
    r0, c0 = 0, 0
    for p, co in zip(heads, couts):
        w2_block = w2_block.at[r0:r0 + cmid, c0:c0 + co].set(p["w2"])
        b2_pad = b2_pad.at[c0:c0 + co].set(p["b2"])
        r0 += cmid
        c0 += co
    return w1_flat, bn_bias, w2_block, b2_pad, num_classes, couts


@jax.jit
def resnet50_head_forward(x_nchw, params_cls, params_wh, params_reg):
    """x_nchw: (N, 64, H, W) float32 -> (hm, wh, offset) in NCHW."""
    n, cin, h, w = x_nchw.shape
    hp, wp = h + 2, w + 2

    x_nhwc = jnp.transpose(x_nchw, (0, 2, 3, 1))
    x_pad = jnp.pad(x_nhwc, ((0, 0), (1, 1), (1, 1), (0, 0)))   # (N, Hp, Wp, Cin)
    x_flat = x_pad.reshape(n, hp * wp, cin)
    x_flat = jnp.pad(x_flat, ((0, 0), (1, 1), (0, 0)))          # halo rows

    (w1_flat, bn_bias, w2_block, b2_pad, num_classes,
     couts) = _fuse_head_params(params_cls, params_wh, params_reg)

    out = _run_fused_head(x_flat, w1_flat, bn_bias, w2_block, b2_pad,
                          num_classes=num_classes, h=h, wp=wp)  # (N, H*Wp, 128)
    # Padded-width flat layout -> (N, H, W, 128): drop the two halo columns.
    out = out.reshape(n, h, wp, -1)[:, :, 1:w + 1, :]

    c_cls, c_wh, c_reg = couts
    hm = jnp.transpose(out[..., :c_cls], (0, 3, 1, 2))
    wh = jnp.transpose(out[..., c_cls:c_cls + c_wh], (0, 3, 1, 2))
    offset = jnp.transpose(
        out[..., c_cls + c_wh:c_cls + c_wh + c_reg], (0, 3, 1, 2))
    return hm, wh, offset


def _fold_bn(gamma, beta, running_mean, running_var, eps=1e-5):
    scale = gamma / jnp.sqrt(running_var + eps)
    bias = beta - running_mean * scale
    return scale, bias


def _make_head_params(key, cin, cmid, cout):
    k1, k2, k3, k4, k5, k6, k7 = jax.random.split(key, 7)
    # 3x3 conv (no bias), stored as HWIO
    w1 = jax.random.normal(k1, (3, 3, cin, cmid), jnp.float32) * 0.05
    # BatchNorm params (deterministic, non-trivial)
    gamma = 1.0 + 0.1 * jax.random.normal(k2, (cmid,), jnp.float32)
    beta = 0.1 * jax.random.normal(k3, (cmid,), jnp.float32)
    r_mean = 0.05 * jax.random.normal(k4, (cmid,), jnp.float32)
    r_var = jnp.abs(1.0 + 0.1 * jax.random.normal(k5, (cmid,), jnp.float32))
    # 1x1 conv with bias, stored as (Cmid, Cout)
    w2 = jax.random.normal(k6, (cmid, cout), jnp.float32) * 0.05
    b2 = 0.1 * jax.random.normal(k7, (cout,), jnp.float32)
    scale, bias = _fold_bn(gamma, beta, r_mean, r_var)
    return dict(w1=w1, scale=scale, bias=bias, w2=w2, b2=b2)


def _reference_head(x_nhwc, p, apply_sigmoid):
    y = jax.lax.conv_general_dilated(
        x_nhwc, p["w1"], window_strides=(1, 1), padding="SAME",
        dimension_numbers=("NHWC", "HWIO", "NHWC"))
    y = y * p["scale"] + p["bias"]
    y = jnp.maximum(y, 0.0)
    y = jnp.einsum("nhwc,co->nhwo", y, p["w2"]) + p["b2"]
    if apply_sigmoid:
        y = jax.nn.sigmoid(y)
    return jnp.transpose(y, (0, 3, 1, 2))


if __name__ == "__main__":
    N, CIN, H, W = 2, 64, 16, 16      # Cin=64 is fixed by the module
    CHANNEL = 64
    NUM_CLASSES = 80

    key = jax.random.PRNGKey(0)
    kx, kc, kw, kr = jax.random.split(key, 4)

    x = jax.random.normal(kx, (N, CIN, H, W), jnp.float32)
    p_cls = _make_head_params(kc, CIN, CHANNEL, NUM_CLASSES)
    p_wh = _make_head_params(kw, CIN, CHANNEL, 2)
    p_reg = _make_head_params(kr, CIN, CHANNEL, 2)

    hm, wh, offset = resnet50_head_forward(x, p_cls, p_wh, p_reg)
    jax.block_until_ready((hm, wh, offset))

    # Sanity-check against a pure-JAX reference.
    x_nhwc = jnp.transpose(x, (0, 2, 3, 1))
    hm_ref = _reference_head(x_nhwc, p_cls, True)
    wh_ref = _reference_head(x_nhwc, p_wh, False)
    off_ref = _reference_head(x_nhwc, p_reg, False)

    assert hm.shape == (N, NUM_CLASSES, H, W)
    assert wh.shape == (N, 2, H, W)
    assert offset.shape == (N, 2, H, W)
    assert jnp.allclose(hm, hm_ref, atol=1e-4, rtol=1e-4)
    assert jnp.allclose(wh, wh_ref, atol=1e-4, rtol=1e-4)
    assert jnp.allclose(offset, off_ref, atol=1e-4, rtol=1e-4)

    print("KERNEL_OK")
</pallas_src>

<mosaic_0001>
module attributes {stable_mosaic.version = 11 : i64} {
  func.func @_fused_head_kernel(%arg0: i32, %arg1: memref<1x326x64xf32, #tpu.memory_space<vmem>>, %arg2: memref<576x256xf32, #tpu.memory_space<vmem>>, %arg3: memref<1x256xf32, #tpu.memory_space<vmem>>, %arg4: memref<256x128xf32, #tpu.memory_space<vmem>>, %arg5: memref<1x128xf32, #tpu.memory_space<vmem>>, %arg6: memref<1x288x128xf32, #tpu.memory_space<vmem>>) attributes {dimension_semantics = [#tpu.dimension_semantics<parallel>], iteration_bounds = array<i64: 2>, scalar_prefetch = 0 : i64, scratch_operands = 0 : i64, tpu.core_type = #tpu.core_type<tc>, window_params = [{transform_indices = @transform_0, window_bounds = array<i64: 1, 326, 64>}, {pipeline_mode = #tpu.pipeline_mode<synchronous>, transform_indices = @transform_1, window_bounds = array<i64: 576, 256>}, {pipeline_mode = #tpu.pipeline_mode<synchronous>, transform_indices = @transform_2, window_bounds = array<i64: 1, 256>}, {pipeline_mode = #tpu.pipeline_mode<synchronous>, transform_indices = @transform_3, window_bounds = array<i64: 256, 128>}, {pipeline_mode = #tpu.pipeline_mode<synchronous>, transform_indices = @transform_4, window_bounds = array<i64: 1, 128>}, {transform_indices = @transform_5, window_bounds = array<i64: 1, 288, 128>}]} {
    %0 = tpu.iota {dimensions = array<i32: 1>} : vector<1x128xi32>
    %c80_i32 = arith.constant 80 : i32
    %1 = vector.broadcast %c80_i32 : i32 to vector<1x128xi32>
    %2 = arith.cmpi slt, %0, %1 : vector<1x128xi32>
    %c0 = arith.constant 0 : index
    %c0_0 = arith.constant 0 : index
    %c0_1 = arith.constant 0 : index
    %3 = vector.load %arg1[%c0, %c0_0, %c0_1] : memref<1x326x64xf32, #tpu.memory_space<vmem>>, vector<1x72x64xf32>
    %4 = vector.shape_cast %3 : vector<1x72x64xf32> to vector<72x64xf32>
    %c0_2 = arith.constant 0 : index
    %c0_3 = arith.constant 0 : index
    %5 = vector.load %arg2[%c0_2, %c0_3] : memref<576x256xf32, #tpu.memory_space<vmem>>, vector<64x256xf32>
    %cst = arith.constant dense<0.000000e+00> : vector<72x256xf32>
    %6 = tpu.matmul %4, %5, %cst {dimension_numbers = #tpu.dot_dimension_numbers<[1], [0], [0], [1], [0, 0, 1, 1], [], []>} : vector<72x64xf32>, vector<64x256xf32>, vector<72x256xf32> -> vector<72x256xf32>
    %c0_4 = arith.constant 0 : index
    %c1 = arith.constant 1 : index
    %c0_5 = arith.constant 0 : index
    %7 = vector.load %arg1[%c0_4, %c1, %c0_5] : memref<1x326x64xf32, #tpu.memory_space<vmem>>, vector<1x72x64xf32>
    %8 = vector.shape_cast %7 : vector<1x72x64xf32> to vector<72x64xf32>
    %c64 = arith.constant 64 : index
    %c0_6 = arith.constant 0 : index
    %9 = vector.load %arg2[%c64, %c0_6] : memref<576x256xf32, #tpu.memory_space<vmem>>, vector<64x256xf32>
    %cst_7 = arith.constant dense<0.000000e+00> : vector<72x256xf32>
    %10 = tpu.matmul %8, %9, %cst_7 {dimension_numbers = #tpu.dot_dimension_numbers<[1], [0], [0], [1], [0, 0, 1, 1], [], []>} : vector<72x64xf32>, vector<64x256xf32>, vector<72x256xf32> -> vector<72x256xf32>
    %11 = arith.addf %6, %10 : vector<72x256xf32>
    %c0_8 = arith.constant 0 : index
    %c2 = arith.constant 2 : index
    %c0_9 = arith.constant 0 : index
    %12 = vector.load %arg1[%c0_8, %c2, %c0_9] : memref<1x326x64xf32, #tpu.memory_space<vmem>>, vector<1x72x64xf32>
    %13 = vector.shape_cast %12 : vector<1x72x64xf32> to vector<72x64xf32>
    %c128 = arith.constant 128 : index
    %c0_10 = arith.constant 0 : index
    %14 = vector.load %arg2[%c128, %c0_10] : memref<576x256xf32, #tpu.memory_space<vmem>>, vector<64x256xf32>
    %cst_11 = arith.constant dense<0.000000e+00> : vector<72x256xf32>
    %15 = tpu.matmul %13, %14, %cst_11 {dimension_numbers = #tpu.dot_dimension_numbers<[1], [0], [0], [1], [0, 0, 1, 1], [], []>} : vector<72x64xf32>, vector<64x256xf32>, vector<72x256xf32> -> vector<72x256xf32>
    %16 = arith.addf %11, %15 : vector<72x256xf32>
    %c0_12 = arith.constant 0 : index
    %c18 = arith.constant 18 : index
    %c0_13 = arith.constant 0 : index
    %17 = vector.load %arg1[%c0_12, %c18, %c0_13] : memref<1x326x64xf32, #tpu.memory_space<vmem>>, vector<1x72x64xf32>
    %18 = vector.shape_cast %17 : vector<1x72x64xf32> to vector<72x64xf32>
    %c192 = arith.constant 192 : index
    %c0_14 = arith.constant 0 : index
    %19 = vector.load %arg2[%c192, %c0_14] : memref<576x256xf32, #tpu.memory_space<vmem>>, vector<64x256xf32>
    %cst_15 = arith.constant dense<0.000000e+00> : vector<72x256xf32>
    %20 = tpu.matmul %18, %19, %cst_15 {dimension_numbers = #tpu.dot_dimension_numbers<[1], [0], [0], [1], [0, 0, 1, 1], [], []>} : vector<72x64xf32>, vector<64x256xf32>, vector<72x256xf32> -> vector<72x256xf32>
    %21 = arith.addf %16, %20 : vector<72x256xf32>
    %c0_16 = arith.constant 0 : index
    %c19 = arith.constant 19 : index
    %c0_17 = arith.constant 0 : index
    %22 = vector.load %arg1[%c0_16, %c19, %c0_17] : memref<1x326x64xf32, #tpu.memory_space<vmem>>, vector<1x72x64xf32>
    %23 = vector.shape_cast %22 : vector<1x72x64xf32> to vector<72x64xf32>
    %c256 = arith.constant 256 : index
    %c0_18 = arith.constant 0 : index
    %24 = vector.load %arg2[%c256, %c0_18] : memref<576x256xf32, #tpu.memory_space<vmem>>, vector<64x256xf32>
    %cst_19 = arith.constant dense<0.000000e+00> : vector<72x256xf32>
    %25 = tpu.matmul %23, %24, %cst_19 {dimension_numbers = #tpu.dot_dimension_numbers<[1], [0], [0], [1], [0, 0, 1, 1], [], []>} : vector<72x64xf32>, vector<64x256xf32>, vector<72x256xf32> -> vector<72x256xf32>
    %26 = arith.addf %21, %25 : vector<72x256xf32>
    %c0_20 = arith.constant 0 : index
    %c20 = arith.constant 20 : index
    %c0_21 = arith.constant 0 : index
    %27 = vector.load %arg1[%c0_20, %c20, %c0_21] : memref<1x326x64xf32, #tpu.memory_space<vmem>>, vector<1x72x64xf32>
    %28 = vector.shape_cast %27 : vector<1x72x64xf32> to vector<72x64xf32>
    %c320 = arith.constant 320 : index
    %c0_22 = arith.constant 0 : index
    %29 = vector.load %arg2[%c320, %c0_22] : memref<576x256xf32, #tpu.memory_space<vmem>>, vector<64x256xf32>
    %cst_23 = arith.constant dense<0.000000e+00> : vector<72x256xf32>
    %30 = tpu.matmul %28, %29, %cst_23 {dimension_numbers = #tpu.dot_dimension_numbers<[1], [0], [0], [1], [0, 0, 1, 1], [], []>} : vector<72x64xf32>, vector<64x256xf32>, vector<72x256xf32> -> vector<72x256xf32>
    %31 = arith.addf %26, %30 : vector<72x256xf32>
    %c0_24 = arith.constant 0 : index
    %c36 = arith.constant 36 : index
    %c0_25 = arith.constant 0 : index
    %32 = vector.load %arg1[%c0_24, %c36, %c0_25] : memref<1x326x64xf32, #tpu.memory_space<vmem>>, vector<1x72x64xf32>
    %33 = vector.shape_cast %32 : vector<1x72x64xf32> to vector<72x64xf32>
    %c384 = arith.constant 384 : index
    %c0_26 = arith.constant 0 : index
    %34 = vector.load %arg2[%c384, %c0_26] : memref<576x256xf32, #tpu.memory_space<vmem>>, vector<64x256xf32>
    %cst_27 = arith.constant dense<0.000000e+00> : vector<72x256xf32>
    %35 = tpu.matmul %33, %34, %cst_27 {dimension_numbers = #tpu.dot_dimension_numbers<[1], [0], [0], [1], [0, 0, 1, 1], [], []>} : vector<72x64xf32>, vector<64x256xf32>, vector<72x256xf32> -> vector<72x256xf32>
    %36 = arith.addf %31, %35 : vector<72x256xf32>
    %c0_28 = arith.constant 0 : index
    %c37 = arith.constant 37 : index
    %c0_29 = arith.constant 0 : index
    %37 = vector.load %arg1[%c0_28, %c37, %c0_29] : memref<1x326x64xf32, #tpu.memory_space<vmem>>, vector<1x72x64xf32>
    %38 = vector.shape_cast %37 : vector<1x72x64xf32> to vector<72x64xf32>
    %c448 = arith.constant 448 : index
    %c0_30 = arith.constant 0 : index
    %39 = vector.load %arg2[%c448, %c0_30] : memref<576x256xf32, #tpu.memory_space<vmem>>, vector<64x256xf32>
    %cst_31 = arith.constant dense<0.000000e+00> : vector<72x256xf32>
    %40 = tpu.matmul %38, %39, %cst_31 {dimension_numbers = #tpu.dot_dimension_numbers<[1], [0], [0], [1], [0, 0, 1, 1], [], []>} : vector<72x64xf32>, vector<64x256xf32>, vector<72x256xf32> -> vector<72x256xf32>
    %41 = arith.addf %36, %40 : vector<72x256xf32>
    %c0_32 = arith.constant 0 : index
    %c38 = arith.constant 38 : index
    %c0_33 = arith.constant 0 : index
    %42 = vector.load %arg1[%c0_32, %c38, %c0_33] : memref<1x326x64xf32, #tpu.memory_space<vmem>>, vector<1x72x64xf32>
    %43 = vector.shape_cast %42 : vector<1x72x64xf32> to vector<72x64xf32>
    %c512 = arith.constant 512 : index
    %c0_34 = arith.constant 0 : index
    %44 = vector.load %arg2[%c512, %c0_34] : memref<576x256xf32, #tpu.memory_space<vmem>>, vector<64x256xf32>
    %cst_35 = arith.constant dense<0.000000e+00> : vector<72x256xf32>
    %45 = tpu.matmul %43, %44, %cst_35 {dimension_numbers = #tpu.dot_dimension_numbers<[1], [0], [0], [1], [0, 0, 1, 1], [], []>} : vector<72x64xf32>, vector<64x256xf32>, vector<72x256xf32> -> vector<72x256xf32>
    %46 = arith.addf %41, %45 : vector<72x256xf32>
    %c0_36 = arith.constant 0 : index
    %c0_37 = arith.constant 0 : index
    %47 = vector.load %arg3[%c0_36, %c0_37] : memref<1x256xf32, #tpu.memory_space<vmem>>, vector<1x256xf32>
    %48 = vector.broadcast %47 : vector<1x256xf32> to vector<72x256xf32>
    %49 = arith.addf %46, %48 : vector<72x256xf32>
    %cst_38 = arith.constant 0.000000e+00 : f32
    %50 = vector.broadcast %cst_38 : f32 to vector<72x256xf32>
    %51 = arith.maximumf %49, %50 : vector<72x256xf32>
    %c0_39 = arith.constant 0 : index
    %c0_40 = arith.constant 0 : index
    %52 = vector.load %arg4[%c0_39, %c0_40] : memref<256x128xf32, #tpu.memory_space<vmem>>, vector<256x128xf32>
    %cst_41 = arith.constant dense<0.000000e+00> : vector<72x128xf32>
    %53 = tpu.matmul %51, %52, %cst_41 {dimension_numbers = #tpu.dot_dimension_numbers<[1], [0], [0], [1], [0, 0, 1, 1], [], []>} : vector<72x256xf32>, vector<256x128xf32>, vector<72x128xf32> -> vector<72x128xf32>
    %c0_42 = arith.constant 0 : index
    %c0_43 = arith.constant 0 : index
    %54 = vector.load %arg5[%c0_42, %c0_43] : memref<1x128xf32, #tpu.memory_space<vmem>>, vector<1x128xf32>
    %55 = vector.broadcast %54 : vector<1x128xf32> to vector<72x128xf32>
    %56 = arith.addf %53, %55 : vector<72x128xf32>
    %57 = arith.negf %56 : vector<72x128xf32>
    %58 = math.exp %57 : vector<72x128xf32>
    %cst_44 = arith.constant 1.000000e+00 : f32
    %59 = vector.broadcast %cst_44 : f32 to vector<72x128xf32>
    %60 = arith.addf %59, %58 : vector<72x128xf32>
    %61 = arith.divf %59, %60 : vector<72x128xf32>
    %62 = vector.shape_cast %2 : vector<1x128xi1> to vector<1x128xi1>
    %63 = vector.broadcast %62 : vector<1x128xi1> to vector<72x128xi1>
    %64 = arith.select %63, %61, %56 : vector<72x128xi1>, vector<72x128xf32>
    %c0_45 = arith.constant 0 : index
    %c0_46 = arith.constant 0 : index
    %c0_47 = arith.constant 0 : index
    %65 = vector.load %arg6[%c0_45, %c0_46, %c0_47] : memref<1x288x128xf32, #tpu.memory_space<vmem>>, vector<1x72x128xf32>
    %66 = vector.shape_cast %65 : vector<1x72x128xf32> to vector<72x128xf32>
    %67 = vector.shape_cast %64 : vector<72x128xf32> to vector<1x72x128xf32>
    tpu.vector_store %arg6[%c0_45, %c0_46, %c0_47], %67 {strides = array<i32>} : memref<1x288x128xf32, #tpu.memory_space<vmem>>, vector<1x72x128xf32>,
    %c0_48 = arith.constant 0 : index
    %c72 = arith.constant 72 : index
    %c0_49 = arith.constant 0 : index
    %68 = vector.load %arg1[%c0_48, %c72, %c0_49] : memref<1x326x64xf32, #tpu.memory_space<vmem>>, vector<1x72x64xf32>
    %69 = vector.shape_cast %68 : vector<1x72x64xf32> to vector<72x64xf32>
    %c0_50 = arith.constant 0 : index
    %c0_51 = arith.constant 0 : index
    %70 = vector.load %arg2[%c0_50, %c0_51] : memref<576x256xf32, #tpu.memory_space<vmem>>, vector<64x256xf32>
    %cst_52 = arith.constant dense<0.000000e+00> : vector<72x256xf32>
    %71 = tpu.matmul %69, %70, %cst_52 {dimension_numbers = #tpu.dot_dimension_numbers<[1], [0], [0], [1], [0, 0, 1, 1], [], []>} : vector<72x64xf32>, vector<64x256xf32>, vector<72x256xf32> -> vector<72x256xf32>
    %c0_53 = arith.constant 0 : index
    %c73 = arith.constant 73 : index
    %c0_54 = arith.constant 0 : index
    %72 = vector.load %arg1[%c0_53, %c73, %c0_54] : memref<1x326x64xf32, #tpu.memory_space<vmem>>, vector<1x72x64xf32>
    %73 = vector.shape_cast %72 : vector<1x72x64xf32> to vector<72x64xf32>
    %c64_55 = arith.constant 64 : index
    %c0_56 = arith.constant 0 : index
    %74 = vector.load %arg2[%c64_55, %c0_56] : memref<576x256xf32, #tpu.memory_space<vmem>>, vector<64x256xf32>
    %cst_57 = arith.constant dense<0.000000e+00> : vector<72x256xf32>
    %75 = tpu.matmul %73, %74, %cst_57 {dimension_numbers = #tpu.dot_dimension_numbers<[1], [0], [0], [1], [0, 0, 1, 1], [], []>} : vector<72x64xf32>, vector<64x256xf32>, vector<72x256xf32> -> vector<72x256xf32>
    %76 = arith.addf %71, %75 : vector<72x256xf32>
    %c0_58 = arith.constant 0 : index
    %c74 = arith.constant 74 : index
    %c0_59 = arith.constant 0 : index
    %77 = vector.load %arg1[%c0_58, %c74, %c0_59] : memref<1x326x64xf32, #tpu.memory_space<vmem>>, vector<1x72x64xf32>
    %78 = vector.shape_cast %77 : vector<1x72x64xf32> to vector<72x64xf32>
    %c128_60 = arith.constant 128 : index
    %c0_61 = arith.constant 0 : index
    %79 = vector.load %arg2[%c128_60, %c0_61] : memref<576x256xf32, #tpu.memory_space<vmem>>, vector<64x256xf32>
    %cst_62 = arith.constant dense<0.000000e+00> : vector<72x256xf32>
    %80 = tpu.matmul %78, %79, %cst_62 {dimension_numbers = #tpu.dot_dimension_numbers<[1], [0], [0], [1], [0, 0, 1, 1], [], []>} : vector<72x64xf32>, vector<64x256xf32>, vector<72x256xf32> -> vector<72x256xf32>
    %81 = arith.addf %76, %80 : vector<72x256xf32>
    %c0_63 = arith.constant 0 : index
    %c90 = arith.constant 90 : index
    %c0_64 = arith.constant 0 : index
    %82 = vector.load %arg1[%c0_63, %c90, %c0_64] : memref<1x326x64xf32, #tpu.memory_space<vmem>>, vector<1x72x64xf32>
    %83 = vector.shape_cast %82 : vector<1x72x64xf32> to vector<72x64xf32>
    %c192_65 = arith.constant 192 : index
    %c0_66 = arith.constant 0 : index
    %84 = vector.load %arg2[%c192_65, %c0_66] : memref<576x256xf32, #tpu.memory_space<vmem>>, vector<64x256xf32>
    %cst_67 = arith.constant dense<0.000000e+00> : vector<72x256xf32>
    %85 = tpu.matmul %83, %84, %cst_67 {dimension_numbers = #tpu.dot_dimension_numbers<[1], [0], [0], [1], [0, 0, 1, 1], [], []>} : vector<72x64xf32>, vector<64x256xf32>, vector<72x256xf32> -> vector<72x256xf32>
    %86 = arith.addf %81, %85 : vector<72x256xf32>
    %c0_68 = arith.constant 0 : index
    %c91 = arith.constant 91 : index
    %c0_69 = arith.constant 0 : index
    %87 = vector.load %arg1[%c0_68, %c91, %c0_69] : memref<1x326x64xf32, #tpu.memory_space<vmem>>, vector<1x72x64xf32>
    %88 = vector.shape_cast %87 : vector<1x72x64xf32> to vector<72x64xf32>
    %c256_70 = arith.constant 256 : index
    %c0_71 = arith.constant 0 : index
    %89 = vector.load %arg2[%c256_70, %c0_71] : memref<576x256xf32, #tpu.memory_space<vmem>>, vector<64x256xf32>
    %cst_72 = arith.constant dense<0.000000e+00> : vector<72x256xf32>
    %90 = tpu.matmul %88, %89, %cst_72 {dimension_numbers = #tpu.dot_dimension_numbers<[1], [0], [0], [1], [0, 0, 1, 1], [], []>} : vector<72x64xf32>, vector<64x256xf32>, vector<72x256xf32> -> vector<72x256xf32>
    %91 = arith.addf %86, %90 : vector<72x256xf32>
    %c0_73 = arith.constant 0 : index
    %c92 = arith.constant 92 : index
    %c0_74 = arith.constant 0 : index
    %92 = vector.load %arg1[%c0_73, %c92, %c0_74] : memref<1x326x64xf32, #tpu.memory_space<vmem>>, vector<1x72x64xf32>
    %93 = vector.shape_cast %92 : vector<1x72x64xf32> to vector<72x64xf32>
    %c320_75 = arith.constant 320 : index
    %c0_76 = arith.constant 0 : index
    %94 = vector.load %arg2[%c320_75, %c0_76] : memref<576x256xf32, #tpu.memory_space<vmem>>, vector<64x256xf32>
    %cst_77 = arith.constant dense<0.000000e+00> : vector<72x256xf32>
    %95 = tpu.matmul %93, %94, %cst_77 {dimension_numbers = #tpu.dot_dimension_numbers<[1], [0], [0], [1], [0, 0, 1, 1], [], []>} : vector<72x64xf32>, vector<64x256xf32>, vector<72x256xf32> -> vector<72x256xf32>
    %96 = arith.addf %91, %95 : vector<72x256xf32>
    %c0_78 = arith.constant 0 : index
    %c108 = arith.constant 108 : index
    %c0_79 = arith.constant 0 : index
    %97 = vector.load %arg1[%c0_78, %c108, %c0_79] : memref<1x326x64xf32, #tpu.memory_space<vmem>>, vector<1x72x64xf32>
    %98 = vector.shape_cast %97 : vector<1x72x64xf32> to vector<72x64xf32>
    %c384_80 = arith.constant 384 : index
    %c0_81 = arith.constant 0 : index
    %99 = vector.load %arg2[%c384_80, %c0_81] : memref<576x256xf32, #tpu.memory_space<vmem>>, vector<64x256xf32>
    %cst_82 = arith.constant dense<0.000000e+00> : vector<72x256xf32>
    %100 = tpu.matmul %98, %99, %cst_82 {dimension_numbers = #tpu.dot_dimension_numbers<[1], [0], [0], [1], [0, 0, 1, 1], [], []>} : vector<72x64xf32>, vector<64x256xf32>, vector<72x256xf32> -> vector<72x256xf32>
    %101 = arith.addf %96, %100 : vector<72x256xf32>
    %c0_83 = arith.constant 0 : index
    %c109 = arith.constant 109 : index
    %c0_84 = arith.constant 0 : index
    %102 = vector.load %arg1[%c0_83, %c109, %c0_84] : memref<1x326x64xf32, #tpu.memory_space<vmem>>, vector<1x72x64xf32>
    %103 = vector.shape_cast %102 : vector<1x72x64xf32> to vector<72x64xf32>
    %c448_85 = arith.constant 448 : index
    %c0_86 = arith.constant 0 : index
    %104 = vector.load %arg2[%c448_85, %c0_86] : memref<576x256xf32, #tpu.memory_space<vmem>>, vector<64x256xf32>
    %cst_87 = arith.constant dense<0.000000e+00> : vector<72x256xf32>
    %105 = tpu.matmul %103, %104, %cst_87 {dimension_numbers = #tpu.dot_dimension_numbers<[1], [0], [0], [1], [0, 0, 1, 1], [], []>} : vector<72x64xf32>, vector<64x256xf32>, vector<72x256xf32> -> vector<72x256xf32>
    %106 = arith.addf %101, %105 : vector<72x256xf32>
    %c0_88 = arith.constant 0 : index
    %c110 = arith.constant 110 : index
    %c0_89 = arith.constant 0 : index
    %107 = vector.load %arg1[%c0_88, %c110, %c0_89] : memref<1x326x64xf32, #tpu.memory_space<vmem>>, vector<1x72x64xf32>
    %108 = vector.shape_cast %107 : vector<1x72x64xf32> to vector<72x64xf32>
    %c512_90 = arith.constant 512 : index
    %c0_91 = arith.constant 0 : index
    %109 = vector.load %arg2[%c512_90, %c0_91] : memref<576x256xf32, #tpu.memory_space<vmem>>, vector<64x256xf32>
    %cst_92 = arith.constant dense<0.000000e+00> : vector<72x256xf32>
    %110 = tpu.matmul %108, %109, %cst_92 {dimension_numbers = #tpu.dot_dimension_numbers<[1], [0], [0], [1], [0, 0, 1, 1], [], []>} : vector<72x64xf32>, vector<64x256xf32>, vector<72x256xf32> -> vector<72x256xf32>
    %111 = arith.addf %106, %110 : vector<72x256xf32>
    %c0_93 = arith.constant 0 : index
    %c0_94 = arith.constant 0 : index
    %112 = vector.load %arg3[%c0_93, %c0_94] : memref<1x256xf32, #tpu.memory_space<vmem>>, vector<1x256xf32>
    %113 = vector.broadcast %112 : vector<1x256xf32> to vector<72x256xf32>
    %114 = arith.addf %111, %113 : vector<72x256xf32>
    %cst_95 = arith.constant 0.000000e+00 : f32
    %115 = vector.broadcast %cst_95 : f32 to vector<72x256xf32>
    %116 = arith.maximumf %114, %115 : vector<72x256xf32>
    %c0_96 = arith.constant 0 : index
    %c0_97 = arith.constant 0 : index
    %117 = vector.load %arg4[%c0_96, %c0_97] : memref<256x128xf32, #tpu.memory_space<vmem>>, vector<256x128xf32>
    %cst_98 = arith.constant dense<0.000000e+00> : vector<72x128xf32>
    %118 = tpu.matmul %116, %117, %cst_98 {dimension_numbers = #tpu.dot_dimension_numbers<[1], [0], [0], [1], [0, 0, 1, 1], [], []>} : vector<72x256xf32>, vector<256x128xf32>, vector<72x128xf32> -> vector<72x128xf32>
    %c0_99 = arith.constant 0 : index
    %c0_100 = arith.constant 0 : index
    %119 = vector.load %arg5[%c0_99, %c0_100] : memref<1x128xf32, #tpu.memory_space<vmem>>, vector<1x128xf32>
    %120 = vector.broadcast %119 : vector<1x128xf32> to vector<72x128xf32>
    %121 = arith.addf %118, %120 : vector<72x128xf32>
    %122 = arith.negf %121 : vector<72x128xf32>
    %123 = math.exp %122 : vector<72x128xf32>
    %cst_101 = arith.constant 1.000000e+00 : f32
    %124 = vector.broadcast %cst_101 : f32 to vector<72x128xf32>
    %125 = arith.addf %124, %123 : vector<72x128xf32>
    %126 = arith.divf %124, %125 : vector<72x128xf32>
    %127 = vector.shape_cast %2 : vector<1x128xi1> to vector<1x128xi1>
    %128 = vector.broadcast %127 : vector<1x128xi1> to vector<72x128xi1>
    %129 = arith.select %128, %126, %121 : vector<72x128xi1>, vector<72x128xf32>
    %c0_102 = arith.constant 0 : index
    %c72_103 = arith.constant 72 : index
    %c0_104 = arith.constant 0 : index
    %130 = vector.load %arg6[%c0_102, %c72_103, %c0_104] : memref<1x288x128xf32, #tpu.memory_space<vmem>>, vector<1x72x128xf32>
    %131 = vector.shape_cast %130 : vector<1x72x128xf32> to vector<72x128xf32>
    %132 = vector.shape_cast %129 : vector<72x128xf32> to vector<1x72x128xf32>
    tpu.vector_store %arg6[%c0_102, %c72_103, %c0_104], %132 {strides = array<i32>} : memref<1x288x128xf32, #tpu.memory_space<vmem>>, vector<1x72x128xf32>,
    %c0_105 = arith.constant 0 : index
    %c144 = arith.constant 144 : index
    %c0_106 = arith.constant 0 : index
    %133 = vector.load %arg1[%c0_105, %c144, %c0_106] : memref<1x326x64xf32, #tpu.memory_space<vmem>>, vector<1x72x64xf32>
    %134 = vector.shape_cast %133 : vector<1x72x64xf32> to vector<72x64xf32>
    %c0_107 = arith.constant 0 : index
    %c0_108 = arith.constant 0 : index
    %135 = vector.load %arg2[%c0_107, %c0_108] : memref<576x256xf32, #tpu.memory_space<vmem>>, vector<64x256xf32>
    %cst_109 = arith.constant dense<0.000000e+00> : vector<72x256xf32>
    %136 = tpu.matmul %134, %135, %cst_109 {dimension_numbers = #tpu.dot_dimension_numbers<[1], [0], [0], [1], [0, 0, 1, 1], [], []>} : vector<72x64xf32>, vector<64x256xf32>, vector<72x256xf32> -> vector<72x256xf32>
    %c0_110 = arith.constant 0 : index
    %c145 = arith.constant 145 : index
    %c0_111 = arith.constant 0 : index
    %137 = vector.load %arg1[%c0_110, %c145, %c0_111] : memref<1x326x64xf32, #tpu.memory_space<vmem>>, vector<1x72x64xf32>
    %138 = vector.shape_cast %137 : vector<1x72x64xf32> to vector<72x64xf32>
    %c64_112 = arith.constant 64 : index
    %c0_113 = arith.constant 0 : index
    %139 = vector.load %arg2[%c64_112, %c0_113] : memref<576x256xf32, #tpu.memory_space<vmem>>, vector<64x256xf32>
    %cst_114 = arith.constant dense<0.000000e+00> : vector<72x256xf32>
    %140 = tpu.matmul %138, %139, %cst_114 {dimension_numbers = #tpu.dot_dimension_numbers<[1], [0], [0], [1], [0, 0, 1, 1], [], []>} : vector<72x64xf32>, vector<64x256xf32>, vector<72x256xf32> -> vector<72x256xf32>
    %141 = arith.addf %136, %140 : vector<72x256xf32>
    %c0_115 = arith.constant 0 : index
    %c146 = arith.constant 146 : index
    %c0_116 = arith.constant 0 : index
    %142 = vector.load %arg1[%c0_115, %c146, %c0_116] : memref<1x326x64xf32, #tpu.memory_space<vmem>>, vector<1x72x64xf32>
    %143 = vector.shape_cast %142 : vector<1x72x64xf32> to vector<72x64xf32>
    %c128_117 = arith.constant 128 : index
    %c0_118 = arith.constant 0 : index
    %144 = vector.load %arg2[%c128_117, %c0_118] : memref<576x256xf32, #tpu.memory_space<vmem>>, vector<64x256xf32>
    %cst_119 = arith.constant dense<0.000000e+00> : vector<72x256xf32>
    %145 = tpu.matmul %143, %144, %cst_119 {dimension_numbers = #tpu.dot_dimension_numbers<[1], [0], [0], [1], [0, 0, 1, 1], [], []>} : vector<72x64xf32>, vector<64x256xf32>, vector<72x256xf32> -> vector<72x256xf32>
    %146 = arith.addf %141, %145 : vector<72x256xf32>
    %c0_120 = arith.constant 0 : index
    %c162 = arith.constant 162 : index
    %c0_121 = arith.constant 0 : index
    %147 = vector.load %arg1[%c0_120, %c162, %c0_121] : memref<1x326x64xf32, #tpu.memory_space<vmem>>, vector<1x72x64xf32>
    %148 = vector.shape_cast %147 : vector<1x72x64xf32> to vector<72x64xf32>
    %c192_122 = arith.constant 192 : index
    %c0_123 = arith.constant 0 : index
    %149 = vector.load %arg2[%c192_122, %c0_123] : memref<576x256xf32, #tpu.memory_space<vmem>>, vector<64x256xf32>
    %cst_124 = arith.constant dense<0.000000e+00> : vector<72x256xf32>
    %150 = tpu.matmul %148, %149, %cst_124 {dimension_numbers = #tpu.dot_dimension_numbers<[1], [0], [0], [1], [0, 0, 1, 1], [], []>} : vector<72x64xf32>, vector<64x256xf32>, vector<72x256xf32> -> vector<72x256xf32>
    %151 = arith.addf %146, %150 : vector<72x256xf32>
    %c0_125 = arith.constant 0 : index
    %c163 = arith.constant 163 : index
    %c0_126 = arith.constant 0 : index
    %152 = vector.load %arg1[%c0_125, %c163, %c0_126] : memref<1x326x64xf32, #tpu.memory_space<vmem>>, vector<1x72x64xf32>
    %153 = vector.shape_cast %152 : vector<1x72x64xf32> to vector<72x64xf32>
    %c256_127 = arith.constant 256 : index
    %c0_128 = arith.constant 0 : index
    %154 = vector.load %arg2[%c256_127, %c0_128] : memref<576x256xf32, #tpu.memory_space<vmem>>, vector<64x256xf32>
    %cst_129 = arith.constant dense<0.000000e+00> : vector<72x256xf32>
    %155 = tpu.matmul %153, %154, %cst_129 {dimension_numbers = #tpu.dot_dimension_numbers<[1], [0], [0], [1], [0, 0, 1, 1], [], []>} : vector<72x64xf32>, vector<64x256xf32>, vector<72x256xf32> -> vector<72x256xf32>
    %156 = arith.addf %151, %155 : vector<72x256xf32>
    %c0_130 = arith.constant 0 : index
    %c164 = arith.constant 164 : index
    %c0_131 = arith.constant 0 : index
    %157 = vector.load %arg1[%c0_130, %c164, %c0_131] : memref<1x326x64xf32, #tpu.memory_space<vmem>>, vector<1x72x64xf32>
    %158 = vector.shape_cast %157 : vector<1x72x64xf32> to vector<72x64xf32>
    %c320_132 = arith.constant 320 : index
    %c0_133 = arith.constant 0 : index
    %159 = vector.load %arg2[%c320_132, %c0_133] : memref<576x256xf32, #tpu.memory_space<vmem>>, vector<64x256xf32>
    %cst_134 = arith.constant dense<0.000000e+00> : vector<72x256xf32>
    %160 = tpu.matmul %158, %159, %cst_134 {dimension_numbers = #tpu.dot_dimension_numbers<[1], [0], [0], [1], [0, 0, 1, 1], [], []>} : vector<72x64xf32>, vector<64x256xf32>, vector<72x256xf32> -> vector<72x256xf32>
    %161 = arith.addf %156, %160 : vector<72x256xf32>
    %c0_135 = arith.constant 0 : index
    %c180 = arith.constant 180 : index
    %c0_136 = arith.constant 0 : index
    %162 = vector.load %arg1[%c0_135, %c180, %c0_136] : memref<1x326x64xf32, #tpu.memory_space<vmem>>, vector<1x72x64xf32>
    %163 = vector.shape_cast %162 : vector<1x72x64xf32> to vector<72x64xf32>
    %c384_137 = arith.constant 384 : index
    %c0_138 = arith.constant 0 : index
    %164 = vector.load %arg2[%c384_137, %c0_138] : memref<576x256xf32, #tpu.memory_space<vmem>>, vector<64x256xf32>
    %cst_139 = arith.constant dense<0.000000e+00> : vector<72x256xf32>
    %165 = tpu.matmul %163, %164, %cst_139 {dimension_numbers = #tpu.dot_dimension_numbers<[1], [0], [0], [1], [0, 0, 1, 1], [], []>} : vector<72x64xf32>, vector<64x256xf32>, vector<72x256xf32> -> vector<72x256xf32>
    %166 = arith.addf %161, %165 : vector<72x256xf32>
    %c0_140 = arith.constant 0 : index
    %c181 = arith.constant 181 : index
    %c0_141 = arith.constant 0 : index
    %167 = vector.load %arg1[%c0_140, %c181, %c0_141] : memref<1x326x64xf32, #tpu.memory_space<vmem>>, vector<1x72x64xf32>
    %168 = vector.shape_cast %167 : vector<1x72x64xf32> to vector<72x64xf32>
    %c448_142 = arith.constant 448 : index
    %c0_143 = arith.constant 0 : index
    %169 = vector.load %arg2[%c448_142, %c0_143] : memref<576x256xf32, #tpu.memory_space<vmem>>, vector<64x256xf32>
    %cst_144 = arith.constant dense<0.000000e+00> : vector<72x256xf32>
    %170 = tpu.matmul %168, %169, %cst_144 {dimension_numbers = #tpu.dot_dimension_numbers<[1], [0], [0], [1], [0, 0, 1, 1], [], []>} : vector<72x64xf32>, vector<64x256xf32>, vector<72x256xf32> -> vector<72x256xf32>
    %171 = arith.addf %166, %170 : vector<72x256xf32>
    %c0_145 = arith.constant 0 : index
    %c182 = arith.constant 182 : index
    %c0_146 = arith.constant 0 : index
    %172 = vector.load %arg1[%c0_145, %c182, %c0_146] : memref<1x326x64xf32, #tpu.memory_space<vmem>>, vector<1x72x64xf32>
    %173 = vector.shape_cast %172 : vector<1x72x64xf32> to vector<72x64xf32>
    %c512_147 = arith.constant 512 : index
    %c0_148 = arith.constant 0 : index
    %174 = vector.load %arg2[%c512_147, %c0_148] : memref<576x256xf32, #tpu.memory_space<vmem>>, vector<64x256xf32>
    %cst_149 = arith.constant dense<0.000000e+00> : vector<72x256xf32>
    %175 = tpu.matmul %173, %174, %cst_149 {dimension_numbers = #tpu.dot_dimension_numbers<[1], [0], [0], [1], [0, 0, 1, 1], [], []>} : vector<72x64xf32>, vector<64x256xf32>, vector<72x256xf32> -> vector<72x256xf32>
    %176 = arith.addf %171, %175 : vector<72x256xf32>
    %c0_150 = arith.constant 0 : index
    %c0_151 = arith.constant 0 : index
    %177 = vector.load %arg3[%c0_150, %c0_151] : memref<1x256xf32, #tpu.memory_space<vmem>>, vector<1x256xf32>
    %178 = vector.broadcast %177 : vector<1x256xf32> to vector<72x256xf32>
    %179 = arith.addf %176, %178 : vector<72x256xf32>
    %cst_152 = arith.constant 0.000000e+00 : f32
    %180 = vector.broadcast %cst_152 : f32 to vector<72x256xf32>
    %181 = arith.maximumf %179, %180 : vector<72x256xf32>
    %c0_153 = arith.constant 0 : index
    %c0_154 = arith.constant 0 : index
    %182 = vector.load %arg4[%c0_153, %c0_154] : memref<256x128xf32, #tpu.memory_space<vmem>>, vector<256x128xf32>
    %cst_155 = arith.constant dense<0.000000e+00> : vector<72x128xf32>
    %183 = tpu.matmul %181, %182, %cst_155 {dimension_numbers = #tpu.dot_dimension_numbers<[1], [0], [0], [1], [0, 0, 1, 1], [], []>} : vector<72x256xf32>, vector<256x128xf32>, vector<72x128xf32> -> vector<72x128xf32>
    %c0_156 = arith.constant 0 : index
    %c0_157 = arith.constant 0 : index
    %184 = vector.load %arg5[%c0_156, %c0_157] : memref<1x128xf32, #tpu.memory_space<vmem>>, vector<1x128xf32>
    %185 = vector.broadcast %184 : vector<1x128xf32> to vector<72x128xf32>
    %186 = arith.addf %183, %185 : vector<72x128xf32>
    %187 = arith.negf %186 : vector<72x128xf32>
    %188 = math.exp %187 : vector<72x128xf32>
    %cst_158 = arith.constant 1.000000e+00 : f32
    %189 = vector.broadcast %cst_158 : f32 to vector<72x128xf32>
    %190 = arith.addf %189, %188 : vector<72x128xf32>
    %191 = arith.divf %189, %190 : vector<72x128xf32>
    %192 = vector.shape_cast %2 : vector<1x128xi1> to vector<1x128xi1>
    %193 = vector.broadcast %192 : vector<1x128xi1> to vector<72x128xi1>
    %194 = arith.select %193, %191, %186 : vector<72x128xi1>, vector<72x128xf32>
    %c0_159 = arith.constant 0 : index
    %c144_160 = arith.constant 144 : index
    %c0_161 = arith.constant 0 : index
    %195 = vector.load %arg6[%c0_159, %c144_160, %c0_161] : memref<1x288x128xf32, #tpu.memory_space<vmem>>, vector<1x72x128xf32>
    %196 = vector.shape_cast %195 : vector<1x72x128xf32> to vector<72x128xf32>
    %197 = vector.shape_cast %194 : vector<72x128xf32> to vector<1x72x128xf32>
    tpu.vector_store %arg6[%c0_159, %c144_160, %c0_161], %197 {strides = array<i32>} : memref<1x288x128xf32, #tpu.memory_space<vmem>>, vector<1x72x128xf32>,
    %c0_162 = arith.constant 0 : index
    %c216 = arith.constant 216 : index
    %c0_163 = arith.constant 0 : index
    %198 = vector.load %arg1[%c0_162, %c216, %c0_163] : memref<1x326x64xf32, #tpu.memory_space<vmem>>, vector<1x72x64xf32>
    %199 = vector.shape_cast %198 : vector<1x72x64xf32> to vector<72x64xf32>
    %c0_164 = arith.constant 0 : index
    %c0_165 = arith.constant 0 : index
    %200 = vector.load %arg2[%c0_164, %c0_165] : memref<576x256xf32, #tpu.memory_space<vmem>>, vector<64x256xf32>
    %cst_166 = arith.constant dense<0.000000e+00> : vector<72x256xf32>
    %201 = tpu.matmul %199, %200, %cst_166 {dimension_numbers = #tpu.dot_dimension_numbers<[1], [0], [0], [1], [0, 0, 1, 1], [], []>} : vector<72x64xf32>, vector<64x256xf32>, vector<72x256xf32> -> vector<72x256xf32>
    %c0_167 = arith.constant 0 : index
    %c217 = arith.constant 217 : index
    %c0_168 = arith.constant 0 : index
    %202 = vector.load %arg1[%c0_167, %c217, %c0_168] : memref<1x326x64xf32, #tpu.memory_space<vmem>>, vector<1x72x64xf32>
    %203 = vector.shape_cast %202 : vector<1x72x64xf32> to vector<72x64xf32>
    %c64_169 = arith.constant 64 : index
    %c0_170 = arith.constant 0 : index
    %204 = vector.load %arg2[%c64_169, %c0_170] : memref<576x256xf32, #tpu.memory_space<vmem>>, vector<64x256xf32>
    %cst_171 = arith.constant dense<0.000000e+00> : vector<72x256xf32>
    %205 = tpu.matmul %203, %204, %cst_171 {dimension_numbers = #tpu.dot_dimension_numbers<[1], [0], [0], [1], [0, 0, 1, 1], [], []>} : vector<72x64xf32>, vector<64x256xf32>, vector<72x256xf32> -> vector<72x256xf32>
    %206 = arith.addf %201, %205 : vector<72x256xf32>
    %c0_172 = arith.constant 0 : index
    %c218 = arith.constant 218 : index
    %c0_173 = arith.constant 0 : index
    %207 = vector.load %arg1[%c0_172, %c218, %c0_173] : memref<1x326x64xf32, #tpu.memory_space<vmem>>, vector<1x72x64xf32>
    %208 = vector.shape_cast %207 : vector<1x72x64xf32> to vector<72x64xf32>
    %c128_174 = arith.constant 128 : index
    %c0_175 = arith.constant 0 : index
    %209 = vector.load %arg2[%c128_174, %c0_175] : memref<576x256xf32, #tpu.memory_space<vmem>>, vector<64x256xf32>
    %cst_176 = arith.constant dense<0.000000e+00> : vector<72x256xf32>
    %210 = tpu.matmul %208, %209, %cst_176 {dimension_numbers = #tpu.dot_dimension_numbers<[1], [0], [0], [1], [0, 0, 1, 1], [], []>} : vector<72x64xf32>, vector<64x256xf32>, vector<72x256xf32> -> vector<72x256xf32>
    %211 = arith.addf %206, %210 : vector<72x256xf32>
    %c0_177 = arith.constant 0 : index
    %c234 = arith.constant 234 : index
    %c0_178 = arith.constant 0 : index
    %212 = vector.load %arg1[%c0_177, %c234, %c0_178] : memref<1x326x64xf32, #tpu.memory_space<vmem>>, vector<1x72x64xf32>
    %213 = vector.shape_cast %212 : vector<1x72x64xf32> to vector<72x64xf32>
    %c192_179 = arith.constant 192 : index
    %c0_180 = arith.constant 0 : index
    %214 = vector.load %arg2[%c192_179, %c0_180] : memref<576x256xf32, #tpu.memory_space<vmem>>, vector<64x256xf32>
    %cst_181 = arith.constant dense<0.000000e+00> : vector<72x256xf32>
    %215 = tpu.matmul %213, %214, %cst_181 {dimension_numbers = #tpu.dot_dimension_numbers<[1], [0], [0], [1], [0, 0, 1, 1], [], []>} : vector<72x64xf32>, vector<64x256xf32>, vector<72x256xf32> -> vector<72x256xf32>
    %216 = arith.addf %211, %215 : vector<72x256xf32>
    %c0_182 = arith.constant 0 : index
    %c235 = arith.constant 235 : index
    %c0_183 = arith.constant 0 : index
    %217 = vector.load %arg1[%c0_182, %c235, %c0_183] : memref<1x326x64xf32, #tpu.memory_space<vmem>>, vector<1x72x64xf32>
    %218 = vector.shape_cast %217 : vector<1x72x64xf32> to vector<72x64xf32>
    %c256_184 = arith.constant 256 : index
    %c0_185 = arith.constant 0 : index
    %219 = vector.load %arg2[%c256_184, %c0_185] : memref<576x256xf32, #tpu.memory_space<vmem>>, vector<64x256xf32>
    %cst_186 = arith.constant dense<0.000000e+00> : vector<72x256xf32>
    %220 = tpu.matmul %218, %219, %cst_186 {dimension_numbers = #tpu.dot_dimension_numbers<[1], [0], [0], [1], [0, 0, 1, 1], [], []>} : vector<72x64xf32>, vector<64x256xf32>, vector<72x256xf32> -> vector<72x256xf32>
    %221 = arith.addf %216, %220 : vector<72x256xf32>
    %c0_187 = arith.constant 0 : index
    %c236 = arith.constant 236 : index
    %c0_188 = arith.constant 0 : index
    %222 = vector.load %arg1[%c0_187, %c236, %c0_188] : memref<1x326x64xf32, #tpu.memory_space<vmem>>, vector<1x72x64xf32>
    %223 = vector.shape_cast %222 : vector<1x72x64xf32> to vector<72x64xf32>
    %c320_189 = arith.constant 320 : index
    %c0_190 = arith.constant 0 : index
    %224 = vector.load %arg2[%c320_189, %c0_190] : memref<576x256xf32, #tpu.memory_space<vmem>>, vector<64x256xf32>
    %cst_191 = arith.constant dense<0.000000e+00> : vector<72x256xf32>
    %225 = tpu.matmul %223, %224, %cst_191 {dimension_numbers = #tpu.dot_dimension_numbers<[1], [0], [0], [1], [0, 0, 1, 1], [], []>} : vector<72x64xf32>, vector<64x256xf32>, vector<72x256xf32> -> vector<72x256xf32>
    %226 = arith.addf %221, %225 : vector<72x256xf32>
    %c0_192 = arith.constant 0 : index
    %c252 = arith.constant 252 : index
    %c0_193 = arith.constant 0 : index
    %227 = vector.load %arg1[%c0_192, %c252, %c0_193] : memref<1x326x64xf32, #tpu.memory_space<vmem>>, vector<1x72x64xf32>
    %228 = vector.shape_cast %227 : vector<1x72x64xf32> to vector<72x64xf32>
    %c384_194 = arith.constant 384 : index
    %c0_195 = arith.constant 0 : index
    %229 = vector.load %arg2[%c384_194, %c0_195] : memref<576x256xf32, #tpu.memory_space<vmem>>, vector<64x256xf32>
    %cst_196 = arith.constant dense<0.000000e+00> : vector<72x256xf32>
    %230 = tpu.matmul %228, %229, %cst_196 {dimension_numbers = #tpu.dot_dimension_numbers<[1], [0], [0], [1], [0, 0, 1, 1], [], []>} : vector<72x64xf32>, vector<64x256xf32>, vector<72x256xf32> -> vector<72x256xf32>
    %231 = arith.addf %226, %230 : vector<72x256xf32>
    %c0_197 = arith.constant 0 : index
    %c253 = arith.constant 253 : index
    %c0_198 = arith.constant 0 : index
    %232 = vector.load %arg1[%c0_197, %c253, %c0_198] : memref<1x326x64xf32, #tpu.memory_space<vmem>>, vector<1x72x64xf32>
    %233 = vector.shape_cast %232 : vector<1x72x64xf32> to vector<72x64xf32>
    %c448_199 = arith.constant 448 : index
    %c0_200 = arith.constant 0 : index
    %234 = vector.load %arg2[%c448_199, %c0_200] : memref<576x256xf32, #tpu.memory_space<vmem>>, vector<64x256xf32>
    %cst_201 = arith.constant dense<0.000000e+00> : vector<72x256xf32>
    %235 = tpu.matmul %233, %234, %cst_201 {dimension_numbers = #tpu.dot_dimension_numbers<[1], [0], [0], [1], [0, 0, 1, 1], [], []>} : vector<72x64xf32>, vector<64x256xf32>, vector<72x256xf32> -> vector<72x256xf32>
    %236 = arith.addf %231, %235 : vector<72x256xf32>
    %c0_202 = arith.constant 0 : index
    %c254 = arith.constant 254 : index
    %c0_203 = arith.constant 0 : index
    %237 = vector.load %arg1[%c0_202, %c254, %c0_203] : memref<1x326x64xf32, #tpu.memory_space<vmem>>, vector<1x72x64xf32>
    %238 = vector.shape_cast %237 : vector<1x72x64xf32> to vector<72x64xf32>
    %c512_204 = arith.constant 512 : index
    %c0_205 = arith.constant 0 : index
    %239 = vector.load %arg2[%c512_204, %c0_205] : memref<576x256xf32, #tpu.memory_space<vmem>>, vector<64x256xf32>
    %cst_206 = arith.constant dense<0.000000e+00> : vector<72x256xf32>
    %240 = tpu.matmul %238, %239, %cst_206 {dimension_numbers = #tpu.dot_dimension_numbers<[1], [0], [0], [1], [0, 0, 1, 1], [], []>} : vector<72x64xf32>, vector<64x256xf32>, vector<72x256xf32> -> vector<72x256xf32>
    %241 = arith.addf %236, %240 : vector<72x256xf32>
    %c0_207 = arith.constant 0 : index
    %c0_208 = arith.constant 0 : index
    %242 = vector.load %arg3[%c0_207, %c0_208] : memref<1x256xf32, #tpu.memory_space<vmem>>, vector<1x256xf32>
    %243 = vector.broadcast %242 : vector<1x256xf32> to vector<72x256xf32>
    %244 = arith.addf %241, %243 : vector<72x256xf32>
    %cst_209 = arith.constant 0.000000e+00 : f32
    %245 = vector.broadcast %cst_209 : f32 to vector<72x256xf32>
    %246 = arith.maximumf %244, %245 : vector<72x256xf32>
    %c0_210 = arith.constant 0 : index
    %c0_211 = arith.constant 0 : index
    %247 = vector.load %arg4[%c0_210, %c0_211] : memref<256x128xf32, #tpu.memory_space<vmem>>, vector<256x128xf32>
    %cst_212 = arith.constant dense<0.000000e+00> : vector<72x128xf32>
    %248 = tpu.matmul %246, %247, %cst_212 {dimension_numbers = #tpu.dot_dimension_numbers<[1], [0], [0], [1], [0, 0, 1, 1], [], []>} : vector<72x256xf32>, vector<256x128xf32>, vector<72x128xf32> -> vector<72x128xf32>
    %c0_213 = arith.constant 0 : index
    %c0_214 = arith.constant 0 : index
    %249 = vector.load %arg5[%c0_213, %c0_214] : memref<1x128xf32, #tpu.memory_space<vmem>>, vector<1x128xf32>
    %250 = vector.broadcast %249 : vector<1x128xf32> to vector<72x128xf32>
    %251 = arith.addf %248, %250 : vector<72x128xf32>
    %252 = arith.negf %251 : vector<72x128xf32>
    %253 = math.exp %252 : vector<72x128xf32>
    %cst_215 = arith.constant 1.000000e+00 : f32
    %254 = vector.broadcast %cst_215 : f32 to vector<72x128xf32>
    %255 = arith.addf %254, %253 : vector<72x128xf32>
    %256 = arith.divf %254, %255 : vector<72x128xf32>
    %257 = vector.shape_cast %2 : vector<1x128xi1> to vector<1x128xi1>
    %258 = vector.broadcast %257 : vector<1x128xi1> to vector<72x128xi1>
    %259 = arith.select %258, %256, %251 : vector<72x128xi1>, vector<72x128xf32>
    %c0_216 = arith.constant 0 : index
    %c216_217 = arith.constant 216 : index
    %c0_218 = arith.constant 0 : index
    %260 = vector.load %arg6[%c0_216, %c216_217, %c0_218] : memref<1x288x128xf32, #tpu.memory_space<vmem>>, vector<1x72x128xf32>
    %261 = vector.shape_cast %260 : vector<1x72x128xf32> to vector<72x128xf32>
    %262 = vector.shape_cast %259 : vector<72x128xf32> to vector<1x72x128xf32>
    tpu.vector_store %arg6[%c0_216, %c216_217, %c0_218], %262 {strides = array<i32>} : memref<1x288x128xf32, #tpu.memory_space<vmem>>, vector<1x72x128xf32>,
    return
  }
  func.func @transform_0(%arg0: i32) -> (i32, i32, i32) {
    %c0_i32 = arith.constant 0 : i32
    %c0_i32_0 = arith.constant 0 : i32
    %c0_i32_1 = arith.constant 0 : i32
    return %arg0, %c0_i32, %c0_i32_0 : i32, i32, i32
  }
  func.func @transform_1(%arg0: i32) -> (i32, i32) {
    %c0_i32 = arith.constant 0 : i32
    %c0_i32_0 = arith.constant 0 : i32
    %c0_i32_1 = arith.constant 0 : i32
    return %c0_i32, %c0_i32_0 : i32, i32
  }
  func.func @transform_2(%arg0: i32) -> (i32, i32) {
    %c0_i32 = arith.constant 0 : i32
    %c0_i32_0 = arith.constant 0 : i32
    %c0_i32_1 = arith.constant 0 : i32
    return %c0_i32, %c0_i32_0 : i32, i32
  }
  func.func @transform_3(%arg0: i32) -> (i32, i32) {
    %c0_i32 = arith.constant 0 : i32
    %c0_i32_0 = arith.constant 0 : i32
    %c0_i32_1 = arith.constant 0 : i32
    return %c0_i32, %c0_i32_0 : i32, i32
  }
  func.func @transform_4(%arg0: i32) -> (i32, i32) {
    %c0_i32 = arith.constant 0 : i32
    %c0_i32_0 = arith.constant 0 : i32
    %c0_i32_1 = arith.constant 0 : i32
    return %c0_i32, %c0_i32_0 : i32, i32
  }
  func.func @transform_5(%arg0: i32) -> (i32, i32, i32) {
    %c0_i32 = arith.constant 0 : i32
    %c0_i32_0 = arith.constant 0 : i32
    %c0_i32_1 = arith.constant 0 : i32
    return %arg0, %c0_i32, %c0_i32_0 : i32, i32, i32
  }
}

</mosaic_0001>

<bundles_post_ra>
// kernel: resnet50_head_forward.1
= control target key start
LH: loop header
LB: loop body
LE: loop exit
PB: predicated region body
PF: predicated region fallthrough
CT: control target
= control target key end

     0   :  { %s8139_s18 = smov 0   ;;  %s13436_s0 = inlined_call_operand.vmem [shape: f32[2,326,64], index: 0, kind: input, shape index: {}]   ;;  %s13437_s1 = inlined_call_operand.vmem [shape: f32[576,256], index: 1, kind: input, shape index: {}]   ;;  %s13438_s2 = inlined_call_operand.vmem [shape: f32[1,256], index: 2, kind: input, shape index: {}]   ;;  %s13439_s3 = inlined_call_operand.vmem [shape: f32[256,128], index: 3, kind: input, shape index: {}]   ;;  %s13440_s4 = inlined_call_operand.vmem [shape: f32[1,128], index: 4, kind: input, shape index: {}]   ;;  %s13441_s5 = inlined_call_operand.vmem [shape: f32[2,288,128], index: 5, kind: output, shape index: {}]  }
   0x1 LB: > { %s7250_s19 = sadd.s32 4294967295, %s8107_s18   ;;  %p7254_p0 = scmp.ge.s32.totalorder %s8107_s18, 1  ;;  %s8107_s18 = sphi %s8139_s18, %s15_s18  }
   0x2   : > { %p187_p1 = scmp.lt.s32.totalorder %s8107_s18, 3 }
   0x4   : > { %p188_p2 = pnand %p7254_p0, %p187_p1 }
   0x6   : > { %191 = sbr.rel (%p188_p2) target bundleno = 1962 (0x7aa), region = 40 }
   0xb   : > { %v276_v0 = vld [vmem:[%s13437_s1 + $0xf0] sm:$0xff]  ;;  %v277_v1 = vld [vmem:[%s13437_s1 + $0xf8] sm:$0xff]  ;;  %p8156_p3 = scmp.lt.s32.totalorder %s7250_s19, 1  ;;  %v274_v4 = vld [vmem:[%s13437_s1 + $0xe0] sm:$0xff]  ;;  %vm278_vm0 = vcmask 523264  }
   0xc   : > { %v251_v2 = vld [vmem:[%s13437_s1 + $0x70] sm:$0xff]  ;;  %314 = vmatpush.msra.mxu0 %v276_v0  ;;  %358 = vmatpush.msra.mxu1 %v277_v1  ;;  %v252_v3 = vld [vmem:[%s13437_s1 + $0x78] sm:$0xff]  ;;  %v275_v5 = vld [vmem:[%s13437_s1 + $0xe8] sm:$0xff] }
   0xd   : > { %429 = vmatpush.msra.mxu2 %v251_v2  ;;  %473 = vmatpush.msra.mxu3 %v252_v3  ;;  %v249_v6 = vld [vmem:[%s13437_s1 + $0x60] sm:$0xff]  ;;  %v250_v7 = vld [vmem:[%s13437_s1 + $0x68] sm:$0xff]  ;;  %v272_v8 = vld [vmem:[%s13437_s1 + $0xd0] sm:$0xff]  ;;  %s13658_s19 = smov (!%p8156_p3, %s7250_s19), 1 }
   0xe   : > { %315 = vmatpush.msra.mxu0 %v274_v4  ;;  %359 = vmatpush.msra.mxu1 %v275_v5  ;;  %v273_v9 = vld [vmem:[%s13437_s1 + $0xd8] sm:$0xff]  ;;  %v247_v10 = vld [vmem:[%s13437_s1 + $0x50] sm:$0xff]  ;;  %v270_v12 = vld [vmem:[%s13437_s1 + $0xc0] sm:$0xff]  ;;  %s7943_s13 = smul.u32 328, %s13658_s19 }
   0xf   : > { %v248_v11 = vld [vmem:[%s13437_s1 + $0x58] sm:$0xff]  ;;  %430 = vmatpush.msra.mxu2 %v249_v6  ;;  %474 = vmatpush.msra.mxu3 %v250_v7  ;;  %v271_v13 = vld [vmem:[%s13437_s1 + $0xc8] sm:$0xff]  ;;  %v245_v14 = vld [vmem:[%s13437_s1 + $0x40] sm:$0xff]  ;;  %s7944_s27 = smul.u32 288, %s13658_s19 }
  0x10   : > { %316 = vmatpush.msra.mxu0 %v272_v8  ;;  %360 = vmatpush.msra.mxu1 %v273_v9  ;;  %v246_v15 = vld [vmem:[%s13437_s1 + $0x48] sm:$0xff]  ;;  %v268_v16 = vld [vmem:[%s13437_s1 + $0xb0] sm:$0xff]  ;;  %v269_v17 = vld [vmem:[%s13437_s1 + $0xb8] sm:$0xff]  ;;  %s8243_s9 = scalar_lea.vmem %s13436_s0, %s7943_s13 }
  0x11   : > { %431 = vmatpush.msra.mxu2 %v247_v10  ;;  %475 = vmatpush.msra.mxu3 %v248_v11  ;;  %v243_v18 = vld [vmem:[%s13437_s1 + $0x30] sm:$0xff]  ;;  %v244_v19 = vld [vmem:[%s13437_s1 + $0x38] sm:$0xff]  ;;  %v266_v20 = vld [vmem:[%s13437_s1 + $0xa0] sm:$0xff]  ;;  %s9771_s26 = scalar_lea.vmem %s13441_s5, %s7944_s27 }
  0x12   : > { %317 = vmatpush.msra.mxu0 %v270_v12  ;;  %361 = vmatpush.msra.mxu1 %v271_v13  ;;  %v267_v21 = vld [vmem:[%s13437_s1 + $0xa8] sm:$0xff]  ;;  %v241_v22 = vld [vmem:[%s13437_s1 + $0x20] sm:$0xff]  ;;  %v264_v24 = vld [vmem:[%s13437_s1 + $0x90] sm:$0xff] }
  0x13   : > { %432 = vmatpush.msra.mxu2 %v245_v14  ;;  %476 = vmatpush.msra.mxu3 %v246_v15  ;;  %v242_v23 = vld [vmem:[%s13437_s1 + $0x28] sm:$0xff]  ;;  %v265_v25 = vld [vmem:[%s13437_s1 + $0x98] sm:$0xff]  ;;  %v239_v26 = vld [vmem:[%s13437_s1 + $0x10] sm:$0xff] }
  0x14   : > { %318 = vmatpush.msra.mxu0 %v268_v16  ;;  %362 = vmatpush.msra.mxu1 %v269_v17  ;;  %v240_v27 = vld [vmem:[%s13437_s1 + $0x18] sm:$0xff]  ;;  %v262_v28 = vld [vmem:[%s13437_s1 + $0x80] sm:$0xff]  ;;  %v263_v29 = vld [vmem:[%s13437_s1 + $0x88] sm:$0xff] }
  0x15   : > { %433 = vmatpush.msra.mxu2 %v243_v18  ;;  %477 = vmatpush.msra.mxu3 %v244_v19  ;;  %v237_v30 = vld [vmem:[%s13437_s1] sm:$0xff]  ;;  %v238_v31 = vld [vmem:[%s13437_s1 + $0x8] sm:$0xff]  ;;  %v532_v34 = vld [vmem:[%s13437_s1 + $0x170] sm:$0xff] }
  0x16   : > { %319 = vmatpush.msra.mxu0 %v266_v20  ;;  %363 = vmatpush.msra.mxu1 %v267_v21  ;;  %v253_v32 = vld [vmem:[%s8243_s9 + $0x1] sm:$0xff]  ;;  %v533_v35 = vld [vmem:[%s13437_s1 + $0x178] sm:$0xff]  ;;  %v528_v38 = vld [vmem:[%s13437_s1 + $0x150] sm:$0xff] }
  0x17   : > { %434 = vmatpush.msra.mxu2 %v241_v22  ;;  %478 = vmatpush.msra.mxu3 %v242_v23  ;;  %v228_v33 = vld [vmem:[%s8243_s9] sm:$0xff]  ;;  %v531_v37 = vld [vmem:[%s13437_s1 + $0x168] sm:$0xff]  ;;  %v529_v39 = vld [vmem:[%s13437_s1 + $0x158] sm:$0xff] }
  0x18   : > { %320 = vmatpush.msra.mxu0 %v264_v24  ;;  %364 = vmatpush.msra.mxu1 %v265_v25  ;;  %v530_v36 = vld [vmem:[%s13437_s1 + $0x160] sm:$0xff]  ;;  %v254_v40 = vld [vmem:[%s8243_s9 + $0x9] sm:$0xff]  ;;  %v525_v45 = vld [vmem:[%s13437_s1 + $0x138] sm:$0xff] }
  0x19   : > { %435 = vmatpush.msra.mxu2 %v239_v26  ;;  %479 = vmatpush.msra.mxu3 %v240_v27  ;;  %v229_v41 = vld [vmem:[%s8243_s9 + $0x8] sm:$0xff]  ;;  %v526_v42 = vld [vmem:[%s13437_s1 + $0x140] sm:$0xff]  ;;  %v524_v44 = vld [vmem:[%s13437_s1 + $0x130] sm:$0xff] }
  0x1a   : > { %321 = vmatpush.msra.mxu0 %v262_v28  ;;  %365 = vmatpush.msra.mxu1 %v263_v29  ;;  %v527_v43 = vld [vmem:[%s13437_s1 + $0x148] sm:$0xff]  ;;  %v522_v46 = vld [vmem:[%s13437_s1 + $0x120] sm:$0xff]  ;;  %v255_v48 = vld [vmem:[%s8243_s9 + $0x11] sm:$0xff] }
  0x1b   : > { %436 = vmatpush.msra.mxu2 %v237_v30  ;;  %480 = vmatpush.msra.mxu3 %v238_v31  ;;  %v523_v47 = vld [vmem:[%s13437_s1 + $0x128] sm:$0xff]  ;;  %v230_v49 = vld [vmem:[%s8243_s9 + $0x10] sm:$0xff]  ;;  %v256_v51 = vld [vmem:[%s8243_s9 + $0x19] sm:$0xff] }
  0x1c   : > { %7257 = vmatmul.msk.f32.vlgmr.msra.gmra.mxu0 %vm278_vm0, %v253_v32  ;;  %7266 = vmatmul.msk.f32.vlgmr.msra.gmra.mxu1 %vm278_vm0, %v253_v32  ;;  %v520_v50 = vld [vmem:[%s13437_s1 + $0x110] sm:$0xff]  ;;  %v231_v52 = vld [vmem:[%s8243_s9 + $0x18] sm:$0xff]  ;;  %v688_v56 = vld [vmem:[%s13437_s1 + $0x1e0] sm:$0xff] }
  0x1d   : > { %7275 = vmatmul.msk.f32.vlgmr.msra.gmra.mxu2 %vm278_vm0, %v228_v33  ;;  %7284 = vmatmul.msk.f32.vlgmr.msra.gmra.mxu3 %vm278_vm0, %v228_v33  ;;  %v521_v53 = vld [vmem:[%s13437_s1 + $0x118] sm:$0xff]  ;;  %v690_v54 = vld [vmem:[%s13437_s1 + $0x1f0] sm:$0xff]  ;;  %v689_v57 = vld [vmem:[%s13437_s1 + $0x1e8] sm:$0xff] }
  0x1e   : > { %569 = vmatpush.msrb.mxu0 %v532_v34  ;;  %613 = vmatpush.msrb.mxu1 %v533_v35  ;;  %v691_v55 = vld [vmem:[%s13437_s1 + $0x1f8] sm:$0xff]  ;;  %v686_v58 = vld [vmem:[%s13437_s1 + $0x1d0] sm:$0xff]  ;;  %v518_v59 = vld [vmem:[%s13437_s1 + $0x100] sm:$0xff] }
  0x1f   : > { %727 = vmatpush.msrb.mxu2 %v690_v54  ;;  %771 = vmatpush.msrb.mxu3 %v691_v55  ;;  %v687_v60 = vld [vmem:[%s13437_s1 + $0x1d8] sm:$0xff]  ;;  %v257_v61 = vld [vmem:[%s8243_s9 + $0x21] sm:$0xff]  ;;  %v682_v2 = vld [vmem:[%s13437_s1 + $0x1b0] sm:$0xff] }
  0x20   : > { %570 = vmatpush.msrb.mxu0 %v530_v36  ;;  %614 = vmatpush.msrb.mxu1 %v531_v37  ;;  %v232_v62 = vld [vmem:[%s8243_s9 + $0x20] sm:$0xff]  ;;  %v685_v0 = vld [vmem:[%s13437_s1 + $0x1c8] sm:$0xff]  ;;  %v683_v3 = vld [vmem:[%s13437_s1 + $0x1b8] sm:$0xff] }
  0x21   : > { %728 = vmatpush.msrb.mxu2 %v688_v56  ;;  %772 = vmatpush.msrb.mxu3 %v689_v57  ;;  %v684_v63 = vld [vmem:[%s13437_s1 + $0x1c0] sm:$0xff]  ;;  %v519_v1 = vld [vmem:[%s13437_s1 + $0x108] sm:$0xff]  ;;  %v678_v8 = vld [vmem:[%s13437_s1 + $0x190] sm:$0xff] }
  0x22   : > { %571 = vmatpush.msrb.mxu0 %v528_v38  ;;  %615 = vmatpush.msrb.mxu1 %v529_v39  ;;  %v680_v4 = vld [vmem:[%s13437_s1 + $0x1a0] sm:$0xff]  ;;  %v681_v5 = vld [vmem:[%s13437_s1 + $0x1a8] sm:$0xff]  ;;  %v679_v9 = vld [vmem:[%s13437_s1 + $0x198] sm:$0xff] }
  0x23   : > { %729 = vmatpush.msrb.mxu2 %v686_v58  ;;  %773 = vmatpush.msrb.mxu3 %v687_v60  ;;  %v258_v6 = vld [vmem:[%s8243_s9 + $0x29] sm:$0xff]  ;;  %v676_v10 = vld [vmem:[%s13437_s1 + $0x180] sm:$0xff]  ;;  %v849_v13 = vld [vmem:[%s13437_s1 + $0x278] sm:$0xff] }
  0x24   : > { %7258 = vmatmul.msk.f32.gmra.mxu0 %vm278_vm0, %v254_v40  ;;  %7267 = vmatmul.msk.f32.gmra.mxu1 %vm278_vm0, %v254_v40  ;;  %v233_v7 = vld [vmem:[%s8243_s9 + $0x28] sm:$0xff]  ;;  %v848_v12 = vld [vmem:[%s13437_s1 + $0x270] sm:$0xff]  ;;  %v846_v16 = vld [vmem:[%s13437_s1 + $0x260] sm:$0xff] }
  0x25   : > { %7276 = vmatmul.msk.f32.gmra.mxu2 %vm278_vm0, %v229_v41  ;;  %7285 = vmatmul.msk.f32.gmra.mxu3 %vm278_vm0, %v229_v41  ;;  %v677_v11 = vld [vmem:[%s13437_s1 + $0x188] sm:$0xff]  ;;  %v259_v14 = vld [vmem:[%s8243_s9 + $0x31] sm:$0xff]  ;;  %v260_v18 = vld [vmem:[%s8243_s9 + $0x39] sm:$0xff] }
  0x26   : > { %572 = vmatpush.msrb.mxu0 %v526_v42  ;;  %616 = vmatpush.msrb.mxu1 %v527_v43  ;;  %v234_v15 = vld [vmem:[%s8243_s9 + $0x30] sm:$0xff]  ;;  %v847_v17 = vld [vmem:[%s13437_s1 + $0x268] sm:$0xff]  ;;  %v235_v19 = vld [vmem:[%s8243_s9 + $0x38] sm:$0xff] }
  0x27   : > { %730 = vmatpush.msrb.mxu2 %v684_v63  ;;  %774 = vmatpush.msrb.mxu3 %v685_v0  ;;  %v844_v20 = vld [vmem:[%s13437_s1 + $0x250] sm:$0xff]  ;;  %v845_v21 = vld [vmem:[%s13437_s1 + $0x258] sm:$0xff]  ;;  %v261_v22 = vld [vmem:[%s8243_s9 + $0x41] sm:$0xff] }
  0x28   : > { %573 = vmatpush.msrb.mxu0 %v524_v44  ;;  %617 = vmatpush.msrb.mxu1 %v525_v45  ;;  %v236_v23 = vld [vmem:[%s8243_s9 + $0x40] sm:$0xff]  ;;  %v843_v25 = vld [vmem:[%s13437_s1 + $0x248] sm:$0xff]  ;;  %v667_v27 = vld [vmem:[%s8243_s9 + $0x12] sm:$0xff] }
  0x29   : > { %731 = vmatpush.msrb.mxu2 %v682_v2  ;;  %775 = vmatpush.msrb.mxu3 %v683_v3  ;;  %v842_v24 = vld [vmem:[%s13437_s1 + $0x240] sm:$0xff]  ;;  %v840_v28 = vld [vmem:[%s13437_s1 + $0x230] sm:$0xff]  ;;  %v841_v29 = vld [vmem:[%s13437_s1 + $0x238] sm:$0xff] }
  0x2a   : > { %574 = vmatpush.msrb.mxu0 %v522_v46  ;;  %618 = vmatpush.msrb.mxu1 %v523_v47  ;;  %v509_v26 = vld [vmem:[%s8243_s9 + $0x2] sm:$0xff]  ;;  %v510_v30 = vld [vmem:[%s8243_s9 + $0xa] sm:$0xff]  ;;  %v668_v31 = vld [vmem:[%s8243_s9 + $0x1a] sm:$0xff] }
  0x2b   : > { %732 = vmatpush.msrb.mxu2 %v680_v4  ;;  %776 = vmatpush.msrb.mxu3 %v681_v5  ;;  %v838_v32 = vld [vmem:[%s13437_s1 + $0x220] sm:$0xff]  ;;  %v839_v33 = vld [vmem:[%s13437_s1 + $0x228] sm:$0xff]  ;;  %v836_v35 = vld [vmem:[%s13437_s1 + $0x210] sm:$0xff] }
  0x2c   : > { %7259 = vmatmul.msk.f32.gmra.mxu0 %vm278_vm0, %v255_v48  ;;  %7268 = vmatmul.msk.f32.gmra.mxu1 %vm278_vm0, %v255_v48  ;;  %v669_v34 = vld [vmem:[%s8243_s9 + $0x22] sm:$0xff]  ;;  %v670_v36 = vld [vmem:[%s8243_s9 + $0x2a] sm:$0xff]  ;;  %v837_v37 = vld [vmem:[%s13437_s1 + $0x218] sm:$0xff] }
  0x2d   : > { %7277 = vmatmul.msk.f32.gmra.mxu2 %vm278_vm0, %v230_v49  ;;  %7286 = vmatmul.msk.f32.gmra.mxu3 %vm278_vm0, %v230_v49  ;;  %v1006_v38 = vld [vmem:[%s13437_s1 + $0x2f0] sm:$0xff]  ;;  %v1007_v39 = vld [vmem:[%s13437_s1 + $0x2f8] sm:$0xff]  ;;  %v1004_v40 = vld [vmem:[%s13437_s1 + $0x2e0] sm:$0xff] }
  0x2e   : > { %575 = vmatpush.msrb.mxu0 %v520_v50  ;;  %619 = vmatpush.msrb.mxu1 %v521_v53  ;;  %v1005_v41 = vld [vmem:[%s13437_s1 + $0x2e8] sm:$0xff]  ;;  %v1002_v42 = vld [vmem:[%s13437_s1 + $0x2d0] sm:$0xff]  ;;  %v1003_v43 = vld [vmem:[%s13437_s1 + $0x2d8] sm:$0xff] }
  0x2f   : > { %733 = vmatpush.msrb.mxu2 %v678_v8  ;;  %777 = vmatpush.msrb.mxu3 %v679_v9  ;;  %v834_v44 = vld [vmem:[%s13437_s1 + $0x200] sm:$0xff]  ;;  %v671_v45 = vld [vmem:[%s8243_s9 + $0x32] sm:$0xff]  ;;  %v1001_v47 = vld [vmem:[%s13437_s1 + $0x2c8] sm:$0xff] }
  0x30   : > { %576 = vmatpush.msrb.mxu0 %v518_v59  ;;  %620 = vmatpush.msrb.mxu1 %v519_v1  ;;  %v1000_v46 = vld [vmem:[%s13437_s1 + $0x2c0] sm:$0xff]  ;;  %v835_v48 = vld [vmem:[%s13437_s1 + $0x208] sm:$0xff]  ;;  %v998_v49 = vld [vmem:[%s13437_s1 + $0x2b0] sm:$0xff] }
  0x31   : > { %734 = vmatpush.msrb.mxu2 %v676_v10  ;;  %778 = vmatpush.msrb.mxu3 %v677_v11  ;;  %v999_v50 = vld [vmem:[%s13437_s1 + $0x2b8] sm:$0xff]  ;;  %v994_v54 = vld [vmem:[%s13437_s1 + $0x290] sm:$0xff]  ;;  %v992_v56 = vld [vmem:[%s13437_s1 + $0x280] sm:$0xff] }
  0x32   : > { %885 = vmatpush.msra.mxu0 %v848_v12  ;;  %929 = vmatpush.msra.mxu1 %v849_v13  ;;  %v672_v53 = vld [vmem:[%s8243_s9 + $0x3a] sm:$0xff]  ;;  %v993_v57 = vld [vmem:[%s13437_s1 + $0x288] sm:$0xff]  ;;  %v1164_v58 = vld [vmem:[%s13437_s1 + $0x370] sm:$0xff] }
  0x33   : > { %1043 = vmatpush.msra.mxu2 %v1006_v38  ;;  %1087 = vmatpush.msra.mxu3 %v1007_v39  ;;  %v995_v55 = vld [vmem:[%s13437_s1 + $0x298] sm:$0xff]  ;;  %v673_v60 = vld [vmem:[%s8243_s9 + $0x42] sm:$0xff]  ;;  %v674_v1 = vld [vmem:[%s8243_s9 + $0x4a] sm:$0xff] }
  0x34   : > { %7260 = vmatmul.msk.f32.gmra.mxu0 %vm278_vm0, %v256_v51  ;;  %7269 = vmatmul.msk.f32.gmra.mxu1 %vm278_vm0, %v256_v51  ;;  %v996_v51 = vld [vmem:[%s13437_s1 + $0x2a0] sm:$0xff]  ;;  %v1165_v59 = vld [vmem:[%s13437_s1 + $0x378] sm:$0xff]  ;;  %v1163_v0 = vld [vmem:[%s13437_s1 + $0x368] sm:$0xff] }
  0x35   : > { %7278 = vmatmul.msk.f32.gmra.mxu2 %vm278_vm0, %v231_v52  ;;  %7287 = vmatmul.msk.f32.gmra.mxu3 %vm278_vm0, %v231_v52  ;;  %v997_v52 = vld [vmem:[%s13437_s1 + $0x2a8] sm:$0xff]  ;;  %v1160_v2 = vld [vmem:[%s13437_s1 + $0x350] sm:$0xff]  ;;  %v1161_v9 = vld [vmem:[%s13437_s1 + $0x358] sm:$0xff] }
  0x36   : > { %886 = vmatpush.msra.mxu0 %v846_v16  ;;  %930 = vmatpush.msra.mxu1 %v847_v17  ;;  %v675_v10 = vld [vmem:[%s8243_s9 + $0x52] sm:$0xff]  ;;  %v1154_v38 = vld [vmem:[%s13437_s1 + $0x320] sm:$0xff]  ;;  %v1155_v39 = vld [vmem:[%s13437_s1 + $0x328] sm:$0xff] }
  0x37   : > { %1044 = vmatpush.msra.mxu2 %v1004_v40  ;;  %1088 = vmatpush.msra.mxu3 %v1005_v41  ;;  %v825_v17 = vld [vmem:[%s8243_s9 + $0x13] sm:$0xff]  ;;  %v8616_v40 = vld [vmem:[%s8243_s9 + $0x24] sm:$0xff] }
  0x38   : > { %887 = vmatpush.msra.mxu0 %v844_v20  ;;  %931 = vmatpush.msra.mxu1 %v845_v21  ;;  %v983_v20 = vld [vmem:[%s8243_s9 + $0x14] sm:$0xff] }
  0x39   : > { %1045 = vmatpush.msra.mxu2 %v1002_v42  ;;  %1089 = vmatpush.msra.mxu3 %v1003_v43 }
  0x3a   : > { %888 = vmatpush.msra.mxu0 %v842_v24  ;;  %932 = vmatpush.msra.mxu1 %v843_v25 }
  0x3b   : > { %1046 = vmatpush.msra.mxu2 %v1000_v46  ;;  %1090 = vmatpush.msra.mxu3 %v1001_v47  ;;  %v828_v47 = vld [vmem:[%s8243_s9 + $0x2b] sm:$0xff] }
  0x3c   : > { %7261 = vmatmul.msk.f32.gmra.mxu0 %vm278_vm0, %v257_v61  ;;  %7270 = vmatmul.msk.f32.gmra.mxu1 %vm278_vm0, %v257_v61  ;;  %v1162_v61 = vld [vmem:[%s13437_s1 + $0x360] sm:$0xff] }
  0x3d   : > { %7279 = vmatmul.msk.f32.gmra.mxu2 %vm278_vm0, %v232_v62  ;;  %7288 = vmatmul.msk.f32.gmra.mxu3 %vm278_vm0, %v232_v62 }
  0x3e   : > { %889 = vmatpush.msra.mxu0 %v840_v28  ;;  %933 = vmatpush.msra.mxu1 %v841_v29  ;;  %v1156_v28 = vld [vmem:[%s13437_s1 + $0x330] sm:$0xff]  ;;  %v1157_v29 = vld [vmem:[%s13437_s1 + $0x338] sm:$0xff] }
  0x3f   : > { %1047 = vmatpush.msra.mxu2 %v998_v49  ;;  %1091 = vmatpush.msra.mxu3 %v999_v50  ;;  %v1152_v49 = vld [vmem:[%s13437_s1 + $0x310] sm:$0xff]  ;;  %v1153_v50 = vld [vmem:[%s13437_s1 + $0x318] sm:$0xff] }
  0x40   : > { %890 = vmatpush.msra.mxu0 %v838_v32  ;;  %934 = vmatpush.msra.mxu1 %v839_v33 }
  0x41   : > { %1048 = vmatpush.msra.mxu2 %v996_v51  ;;  %1092 = vmatpush.msra.mxu3 %v997_v52  ;;  %v1322_v51 = vld [vmem:[%s13437_s1 + $0x3f0] sm:$0xff]  ;;  %v1323_v52 = vld [vmem:[%s13437_s1 + $0x3f8] sm:$0xff] }
  0x42   : > { %891 = vmatpush.msra.mxu0 %v836_v35  ;;  %935 = vmatpush.msra.mxu1 %v837_v37  ;;  %v827_v37 = vld [vmem:[%s8243_s9 + $0x23] sm:$0xff] }
  0x43   : > { %1049 = vmatpush.msra.mxu2 %v994_v54  ;;  %1093 = vmatpush.msra.mxu3 %v995_v55  ;;  %v1321_v54 = vld [vmem:[%s13437_s1 + $0x3e8] sm:$0xff] }
  0x44   : > { %7262 = vmatmul.msk.f32.gmra.mxu0 %vm278_vm0, %v258_v6  ;;  %7271 = vmatmul.msk.f32.gmra.mxu1 %vm278_vm0, %v258_v6 }
  0x45   : > { %7280 = vmatmul.msk.f32.gmra.mxu2 %vm278_vm0, %v233_v7  ;;  %7289 = vmatmul.msk.f32.gmra.mxu3 %vm278_vm0, %v233_v7 }
  0x46   : > { %892 = vmatpush.msra.mxu0 %v834_v44  ;;  %936 = vmatpush.msra.mxu1 %v835_v48  ;;  %v8630_v48 = vld [vmem:[%s8243_s9 + $0x2c] sm:$0xff] }
  0x47   : > { %1050 = vmatpush.msra.mxu2 %v992_v56  ;;  %1094 = vmatpush.msra.mxu3 %v993_v57 }
  0x4c   : > { %7263 = vmatmul.msk.f32.gmra.mxu0 %vm278_vm0, %v259_v14  ;;  %7272 = vmatmul.msk.f32.gmra.mxu1 %vm278_vm0, %v259_v14 }
  0x4d   : > { %7281 = vmatmul.msk.f32.gmra.mxu2 %vm278_vm0, %v234_v15  ;;  %7290 = vmatmul.msk.f32.gmra.mxu3 %vm278_vm0, %v234_v15 }
  0x54   : > { %7264 = vmatmul.msk.f32.gmra.mxu0 %vm278_vm0, %v260_v18  ;;  %7273 = vmatmul.msk.f32.gmra.mxu1 %vm278_vm0, %v260_v18  ;;  %v1158_v18 = vld [vmem:[%s13437_s1 + $0x340] sm:$0xff] }
  0x55   : > { %7282 = vmatmul.msk.f32.gmra.mxu2 %vm278_vm0, %v235_v19  ;;  %7291 = vmatmul.msk.f32.gmra.mxu3 %vm278_vm0, %v235_v19  ;;  %v1159_v19 = vld [vmem:[%s13437_s1 + $0x348] sm:$0xff] }
  0x5c   : > { %7265 = vmatmul.msk.f32.gmra.mxu0 %vm278_vm0, %v261_v22  ;;  %7274 = vmatmul.msk.f32.gmra.mxu1 %vm278_vm0, %v261_v22 }
  0x5d   : > { %7283 = vmatmul.msk.f32.gmra.mxu2 %vm278_vm0, %v236_v23  ;;  %7292 = vmatmul.msk.f32.gmra.mxu3 %vm278_vm0, %v236_v23 }
  0x64   : > { %7293 = vmatmul.msk.f32.vlgmr.msrb.gmra.mxu0 %vm278_vm0, %v509_v26  ;;  %7302 = vmatmul.msk.f32.vlgmr.msrb.gmra.mxu1 %vm278_vm0, %v509_v26 }
  0x65   : > { %7311 = vmatmul.msk.f32.vlgmr.msrb.gmra.mxu2 %vm278_vm0, %v667_v27  ;;  %7320 = vmatmul.msk.f32.vlgmr.msrb.gmra.mxu3 %vm278_vm0, %v667_v27 }
  0x66   : > { %1201 = vmatpush.msrb.mxu0 %v1164_v58  ;;  %1245 = vmatpush.msrb.mxu1 %v1165_v59 }
  0x67   : > { %1359 = vmatpush.msrb.mxu2 %v1322_v51  ;;  %1403 = vmatpush.msrb.mxu3 %v1323_v52  ;;  %v1479_v51 = vld [vmem:[%s13437_s1 + $0x468] sm:$0xff] }
  0x68   : > { %1202 = vmatpush.msrb.mxu0 %v1162_v61  ;;  %1246 = vmatpush.msrb.mxu1 %v1163_v0  ;;  %v829_v61 = vld [vmem:[%s8243_s9 + $0x33] sm:$0xff] }
  0x69   : > { %1404 = vmatpush.msrb.mxu3 %v1321_v54  ;;  %v8668_v0 = vld [vmem:[%s8243_s9 + $0x34] sm:$0xff]  ;;  %v8758_v52 = vld [vmem:[%s8243_s9 + $0x4c] sm:$0xff] }
  0x6a   : > { %1203 = vmatpush.msrb.mxu0 %v1160_v2  ;;  %1247 = vmatpush.msrb.mxu1 %v1161_v9  ;;  %v1316_v2 = vld [vmem:[%s13437_s1 + $0x3c0] sm:$0xff] }
  0x6b   : > { %v1312_v9 = vld [vmem:[%s13437_s1 + $0x3a0] sm:$0xff] }
  0x6c   : > { %7294 = vmatmul.msk.f32.gmra.mxu0 %vm278_vm0, %v510_v30  ;;  %7303 = vmatmul.msk.f32.gmra.mxu1 %vm278_vm0, %v510_v30  ;;  %v984_v30 = vld [vmem:[%s8243_s9 + $0x1c] sm:$0xff] }
  0x6d   : > { %7312 = vmatmul.msk.f32.gmra.mxu2 %vm278_vm0, %v668_v31  ;;  %7321 = vmatmul.msk.f32.gmra.mxu3 %vm278_vm0, %v668_v31 }
  0x6e   : > { %1204 = vmatpush.msrb.mxu0 %v1158_v18  ;;  %1248 = vmatpush.msrb.mxu1 %v1159_v19  ;;  %v830_v19 = vld [vmem:[%s8243_s9 + $0x3b] sm:$0xff] }
  0x70   : > { %1205 = vmatpush.msrb.mxu0 %v1156_v28  ;;  %1249 = vmatpush.msrb.mxu1 %v1157_v29  ;;  %v1481_v28 = vld [vmem:[%s13437_s1 + $0x478] sm:$0xff] }
  0x72   : > { %1206 = vmatpush.msrb.mxu0 %v1154_v38  ;;  %1250 = vmatpush.msrb.mxu1 %v1155_v39  ;;  %v8738_v38 = vld [vmem:[%s8243_s9 + $0x44] sm:$0xff] }
  0x73   : > { %v1478_v39 = vld [vmem:[%s13437_s1 + $0x460] sm:$0xff] }
  0x74   : > { %7295 = vmatmul.msk.f32.gmra.mxu0 %vm278_vm0, %v667_v27  ;;  %7304 = vmatmul.msk.f32.gmra.mxu1 %vm278_vm0, %v667_v27  ;;  %v826_v27 = vld [vmem:[%s8243_s9 + $0x1b] sm:$0xff] }
  0x75   : > { %7313 = vmatmul.msk.f32.gmra.mxu2 %vm278_vm0, %v669_v34  ;;  %7322 = vmatmul.msk.f32.gmra.mxu3 %vm278_vm0, %v669_v34 }
  0x76   : > { %1207 = vmatpush.msrb.mxu0 %v1152_v49  ;;  %1251 = vmatpush.msrb.mxu1 %v1153_v50  ;;  %v832_v50 = vld [vmem:[%s8243_s9 + $0x4b] sm:$0xff] }
  0x7c   : > { %7296 = vmatmul.msk.f32.gmra.mxu0 %vm278_vm0, %v668_v31  ;;  %7305 = vmatmul.msk.f32.gmra.mxu1 %vm278_vm0, %v668_v31 }
  0x7d   : > { %7314 = vmatmul.msk.f32.gmra.mxu2 %vm278_vm0, %v670_v36  ;;  %7323 = vmatmul.msk.f32.gmra.mxu3 %vm278_vm0, %v670_v36 }
  0x84   : > { %7297 = vmatmul.msk.f32.gmra.mxu0 %vm278_vm0, %v669_v34  ;;  %7306 = vmatmul.msk.f32.gmra.mxu1 %vm278_vm0, %v669_v34 }
  0x85   : > { %7315 = vmatmul.msk.f32.gmra.mxu2 %vm278_vm0, %v671_v45  ;;  %7324 = vmatmul.msk.f32.gmra.mxu3 %vm278_vm0, %v671_v45 }
  0x8c   : > { %7298 = vmatmul.msk.f32.gmra.mxu0 %vm278_vm0, %v670_v36  ;;  %7307 = vmatmul.msk.f32.gmra.mxu1 %vm278_vm0, %v670_v36 }
  0x8d   : > { %7316 = vmatmul.msk.f32.gmra.mxu2 %vm278_vm0, %v672_v53  ;;  %7325 = vmatmul.msk.f32.gmra.mxu3 %vm278_vm0, %v672_v53 }
  0x94   : > { %7299 = vmatmul.msk.f32.gmra.mxu0 %vm278_vm0, %v671_v45  ;;  %7308 = vmatmul.msk.f32.gmra.mxu1 %vm278_vm0, %v671_v45 }
  0x95   : > { %7317 = vmatmul.msk.f32.gmra.mxu2 %vm278_vm0, %v673_v60  ;;  %7326 = vmatmul.msk.f32.gmra.mxu3 %vm278_vm0, %v673_v60 }
  0x99   : > { %v323_v62 = vpop.f32.mrf.mxu0  ;;  %v367_v63 = vpop.f32.mrf.mxu1 }
  0x9c   : > { %7300 = vmatmul.msk.f32.gmra.mxu0 %vm278_vm0, %v672_v53  ;;  %7309 = vmatmul.msk.f32.gmra.mxu1 %vm278_vm0, %v672_v53  ;;  %v1320_v53 = vld [vmem:[%s13437_s1 + $0x3e0] sm:$0xff] }
  0x9d   : > { %7318 = vmatmul.msk.f32.gmra.mxu2 %vm278_vm0, %v674_v1  ;;  %7327 = vmatmul.msk.f32.gmra.mxu3 %vm278_vm0, %v674_v1  ;;  %v1150_v1 = vld [vmem:[%s13437_s1 + $0x300] sm:$0xff] }
  0x9e   : > { %1360 = vmatpush.msrb.mxu2 %v1320_v53  ;;  %1208 = vmatpush.msrb.mxu0 %v1150_v1  ;;  %v1476_v53 = vld [vmem:[%s13437_s1 + $0x450] sm:$0xff] }
  0x9f   : > { %v833_v1 = vld [vmem:[%s8243_s9 + $0x53] sm:$0xff] }
  0xa0   : > { %v438_v3 = vpop.f32.mrf.mxu2  ;;  %v482_v4 = vpop.f32.mrf.mxu3 }
  0xa1   : > { %v8560_v5 = vadd.f32 %v438_v3, %v323_v62  ;;  %v8562_v6 = vadd.f32 %v482_v4, %v367_v63  ;;  %v326_v7 = vpop.f32.mrf.mxu0  ;;  %v370_v8 = vpop.f32.mrf.mxu1  ;;  %v1318_v62 = vld [vmem:[%s13437_s1 + $0x3d0] sm:$0xff]  ;;  %v1319_v63 = vld [vmem:[%s13437_s1 + $0x3d8] sm:$0xff]  ;;  %v1317_v3 = vld [vmem:[%s13437_s1 + $0x3c8] sm:$0xff] }
  0xa2   : > { %1361 = vmatpush.msrb.mxu2 %v1318_v62  ;;  %1405 = vmatpush.msrb.mxu3 %v1319_v63  ;;  %v1151_v4 = vld [vmem:[%s13437_s1 + $0x308] sm:$0xff] }
  0xa3   : > { %1252 = vmatpush.msrb.mxu1 %v1151_v4 }
  0xa4   : > { %7301 = vmatmul.msk.f32.gmra.mxu0 %vm278_vm0, %v673_v60  ;;  %7310 = vmatmul.msk.f32.gmra.mxu1 %vm278_vm0, %v673_v60 }
  0xa5   : > { %7319 = vmatmul.msk.f32.gmra.mxu2 %vm278_vm0, %v675_v10  ;;  %7328 = vmatmul.msk.f32.gmra.mxu3 %vm278_vm0, %v675_v10  ;;  %v1313_v10 = vld [vmem:[%s13437_s1 + $0x3a8] sm:$0xff] }
  0xa6   : > { %1362 = vmatpush.msrb.mxu2 %v1316_v2  ;;  %1406 = vmatpush.msrb.mxu3 %v1317_v3  ;;  %v1477_v2 = vld [vmem:[%s13437_s1 + $0x458] sm:$0xff] }
  0xa7   : > { %v8780_v3 = vld [vmem:[%s8243_s9 + $0x54] sm:$0xff] }
  0xa8   : > { %v441_v11 = vpop.f32.mrf.mxu2  ;;  %v485_v12 = vpop.f32.mrf.mxu3 }
  0xa9   : > { %v8572_v13 = vadd.f32 %v441_v11, %v326_v7  ;;  %v8574_v14 = vadd.f32 %v485_v12, %v370_v8  ;;  %v329_v15 = vpop.f32.mrf.mxu0  ;;  %v373_v16 = vpop.f32.mrf.mxu1  ;;  %v1314_v7 = vld [vmem:[%s13437_s1 + $0x3b0] sm:$0xff]  ;;  %v1315_v8 = vld [vmem:[%s13437_s1 + $0x3b8] sm:$0xff] }
  0xaa   : > { %1363 = vmatpush.msrb.mxu2 %v1314_v7  ;;  %1407 = vmatpush.msrb.mxu3 %v1315_v8 }
  0xac   : > { %7329 = vmatmul.msk.f32.vlgmr.msra.gmra.mxu0 %vm278_vm0, %v825_v17  ;;  %7338 = vmatmul.msk.f32.vlgmr.msra.gmra.mxu1 %vm278_vm0, %v825_v17 }
  0xad   : > { %7347 = vmatmul.msk.f32.vlgmr.msra.gmra.mxu2 %vm278_vm0, %v983_v20  ;;  %7356 = vmatmul.msk.f32.vlgmr.msra.gmra.mxu3 %vm278_vm0, %v983_v20  ;;  %v8706_v20 = vld [vmem:[%s8243_s9 + $0x3c] sm:$0xff] }
  0xae   : > { %1364 = vmatpush.msrb.mxu2 %v1312_v9  ;;  %1408 = vmatpush.msrb.mxu3 %v1313_v10 }
  0xaf   : > { %1561 = vmatpush.msra.mxu1 %v1481_v28  ;;  %v1300_v28 = vld [vmem:[%s8243_s9 + $0x2d] sm:$0xff] }
  0xb0   : > { %v444_v21 = vpop.f32.mrf.mxu2  ;;  %v488_v22 = vpop.f32.mrf.mxu3 }
  0xb1   : > { %v8588_v23 = vadd.f32 %v444_v21, %v329_v15  ;;  %v8590_v24 = vadd.f32 %v488_v22, %v373_v16  ;;  %v332_v25 = vpop.f32.mrf.mxu0  ;;  %v376_v26 = vpop.f32.mrf.mxu1  ;;  %v1310_v21 = vld [vmem:[%s13437_s1 + $0x390] sm:$0xff]  ;;  %v1311_v22 = vld [vmem:[%s13437_s1 + $0x398] sm:$0xff]  ;;  %1562 = vmatpush.msra.mxu1 %v1479_v51  ;;  %v1303_v51 = vld [vmem:[%s8243_s9 + $0x45] sm:$0xff] }
  0xb2   : > { %1365 = vmatpush.msrb.mxu2 %v1310_v21  ;;  %1409 = vmatpush.msrb.mxu3 %v1311_v22 }
  0xb3   : > { %1563 = vmatpush.msra.mxu1 %v1477_v2 }
  0xb4   : > { %7330 = vmatmul.msk.f32.gmra.mxu0 %vm278_vm0, %v826_v27  ;;  %7339 = vmatmul.msk.f32.gmra.mxu1 %vm278_vm0, %v826_v27  ;;  %v1480_v27 = vld [vmem:[%s13437_s1 + $0x470] sm:$0xff] }
  0xb5   : > { %7348 = vmatmul.msk.f32.gmra.mxu2 %vm278_vm0, %v984_v30  ;;  %7357 = vmatmul.msk.f32.gmra.mxu3 %vm278_vm0, %v984_v30 }
  0xb6   : > { %1517 = vmatpush.msra.mxu0 %v1480_v27 }
  0xb8   : > { %v447_v31 = vpop.f32.mrf.mxu2  ;;  %v491_v32 = vpop.f32.mrf.mxu3  ;;  %1518 = vmatpush.msra.mxu0 %v1478_v39  ;;  %v1302_v39 = vld [vmem:[%s8243_s9 + $0x3d] sm:$0xff] }
  0xb9   : > { %v8604_v33 = vadd.f32 %v447_v31, %v332_v25  ;;  %v8606_v34 = vadd.f32 %v491_v32, %v376_v26  ;;  %v335_v35 = vpop.f32.mrf.mxu0  ;;  %v379_v36 = vpop.f32.mrf.mxu1  ;;  %v1308_v25 = vld [vmem:[%s13437_s1 + $0x380] sm:$0xff]  ;;  %v1309_v26 = vld [vmem:[%s13437_s1 + $0x388] sm:$0xff] }
  0xba   : > { %1366 = vmatpush.msrb.mxu2 %v1308_v25  ;;  %1410 = vmatpush.msrb.mxu3 %v1309_v26 }
  0xbb   : > { %1519 = vmatpush.msra.mxu0 %v1476_v53  ;;  %v1467_v53 = vld [vmem:[%s13437_s1 + $0x408] sm:$0xff] }
  0xbc   : > { %7331 = vmatmul.msk.f32.gmra.mxu0 %vm278_vm0, %v827_v37  ;;  %7340 = vmatmul.msk.f32.gmra.mxu1 %vm278_vm0, %v827_v37  ;;  %v831_v37 = vld [vmem:[%s8243_s9 + $0x43] sm:$0xff] }
  0xbd   : > { %7349 = vmatmul.msk.f32.gmra.mxu2 %vm278_vm0, %v8616_v40  ;;  %7358 = vmatmul.msk.f32.gmra.mxu3 %vm278_vm0, %v8616_v40 }
  0xc0   : > { %v450_v41 = vpop.f32.mrf.mxu2  ;;  %v494_v42 = vpop.f32.mrf.mxu3 }
  0xc1   : > { %v8624_v43 = vadd.f32 %v450_v41, %v335_v35  ;;  %v8626_v44 = vadd.f32 %v494_v42, %v379_v36  ;;  %v338_v45 = vpop.f32.mrf.mxu0  ;;  %v382_v46 = vpop.f32.mrf.mxu1 }
  0xc4   : > { %7332 = vmatmul.msk.f32.gmra.mxu0 %vm278_vm0, %v828_v47  ;;  %7341 = vmatmul.msk.f32.gmra.mxu1 %vm278_vm0, %v828_v47 }
  0xc5   : > { %7350 = vmatmul.msk.f32.gmra.mxu2 %vm278_vm0, %v8630_v48  ;;  %7359 = vmatmul.msk.f32.gmra.mxu3 %vm278_vm0, %v8630_v48 }
  0xc8   : > { %v453_v55 = vpop.f32.mrf.mxu2  ;;  %v497_v56 = vpop.f32.mrf.mxu3 }
  0xc9   : > { %v8656_v57 = vadd.f32 %v453_v55, %v338_v45  ;;  %v8658_v58 = vadd.f32 %v497_v56, %v382_v46  ;;  %v341_v59 = vpop.f32.mrf.mxu0  ;;  %v385_v60 = vpop.f32.mrf.mxu1 }
  0xcc   : > { %7333 = vmatmul.msk.f32.gmra.mxu0 %vm278_vm0, %v829_v61  ;;  %7342 = vmatmul.msk.f32.gmra.mxu1 %vm278_vm0, %v829_v61 }
  0xcd   : > { %7351 = vmatmul.msk.f32.gmra.mxu2 %vm278_vm0, %v8668_v0  ;;  %7360 = vmatmul.msk.f32.gmra.mxu3 %vm278_vm0, %v8668_v0 }
  0xd0   : > { %v456_v11 = vpop.f32.mrf.mxu2  ;;  %v500_v12 = vpop.f32.mrf.mxu3 }
  0xd1   : > { %v8700_v15 = vadd.f32 %v456_v11, %v341_v59  ;;  %v8702_v16 = vadd.f32 %v500_v12, %v385_v60  ;;  %v344_v17 = vpop.f32.mrf.mxu0  ;;  %v388_v18 = vpop.f32.mrf.mxu1  ;;  %v1474_v12 = vld [vmem:[%s13437_s1 + $0x440] sm:$0xff] }
  0xd2   : > { %1520 = vmatpush.msra.mxu0 %v1474_v12 }
  0xd3   : > { %13446 = vst [vmem:[#allocation2_spill] sm:$0xff] %v8700_v15 }
  0xd4   : > { %13447 = vst [vmem:[#allocation3_spill] sm:$0xff] %v8702_v16  ;;  %7334 = vmatmul.msk.f32.gmra.mxu0 %vm278_vm0, %v830_v19  ;;  %7343 = vmatmul.msk.f32.gmra.mxu1 %vm278_vm0, %v830_v19 }
  0xd5   : > { %7352 = vmatmul.msk.f32.gmra.mxu2 %vm278_vm0, %v8706_v20  ;;  %7361 = vmatmul.msk.f32.gmra.mxu3 %vm278_vm0, %v8706_v20 }
  0xd8   : > { %v459_v29 = vpop.f32.mrf.mxu2  ;;  %v503_v30 = vpop.f32.mrf.mxu3 }
  0xd9   : > { %v8732_v31 = vadd.f32 %v459_v29, %v344_v17  ;;  %v8734_v32 = vadd.f32 %v503_v30, %v388_v18  ;;  %v347_v35 = vpop.f32.mrf.mxu0  ;;  %v391_v36 = vpop.f32.mrf.mxu1  ;;  %v1299_v17 = vld [vmem:[%s8243_s9 + $0x25] sm:$0xff]  ;;  %v1301_v30 = vld [vmem:[%s8243_s9 + $0x35] sm:$0xff] }
  0xdb   : > { %13448 = vst [vmem:[#allocation4_spill] sm:$0xff] %v8732_v31 }
  0xdc   : > { %13449 = vst [vmem:[#allocation5_spill] sm:$0xff] %v8734_v32  ;;  %7335 = vmatmul.msk.f32.gmra.mxu0 %vm278_vm0, %v831_v37  ;;  %7344 = vmatmul.msk.f32.gmra.mxu1 %vm278_vm0, %v831_v37  ;;  %v2017_v32 = vld [vmem:[%s13437_s1 + $0xd8] sm:$0xff] }
  0xdd   : > { %7353 = vmatmul.msk.f32.gmra.mxu2 %vm278_vm0, %v8738_v38  ;;  %7362 = vmatmul.msk.f32.gmra.mxu3 %vm278_vm0, %v8738_v38 }
  0xe0   : > { %v462_v41 = vpop.f32.mrf.mxu2  ;;  %v506_v42 = vpop.f32.mrf.mxu3 }
  0xe1   : > { %v8749_v45 = vadd.f32 %v462_v41, %v347_v35  ;;  %v8751_v46 = vadd.f32 %v506_v42, %v391_v36  ;;  %v578_v47 = vpop.f32.mrf.mxu0  ;;  %v622_v49 = vpop.f32.mrf.mxu1  ;;  %v1470_v35 = vld [vmem:[%s13437_s1 + $0x420] sm:$0xff]  ;;  %v1471_v36 = vld [vmem:[%s13437_s1 + $0x428] sm:$0xff]  ;;  %v1468_v41 = vld [vmem:[%s13437_s1 + $0x410] sm:$0xff] }
  0xe2   : > { %v649_v54 = vadd.f32 %v578_v47, %v8560_v5  ;;  %v650_v55 = vadd.f32 %v622_v49, %v8562_v6 }
  0xe3   : > { %13450 = vst [vmem:[#allocation6_spill] sm:$0xff] %v8749_v45  ;;  %v1686_v45 = vld [vmem:[%s13439_s3 + $0xe8] sm:$0xff] }
  0xe4   : > { %13451 = vst [vmem:[#allocation7_spill] sm:$0xff] %v8751_v46  ;;  %7336 = vmatmul.msk.f32.gmra.mxu0 %vm278_vm0, %v832_v50  ;;  %7345 = vmatmul.msk.f32.gmra.mxu1 %vm278_vm0, %v832_v50  ;;  %v1462_v46 = vld [vmem:[%s8243_s9 + $0x4e] sm:$0xff] }
  0xe5   : > { %7354 = vmatmul.msk.f32.gmra.mxu2 %vm278_vm0, %v8758_v52  ;;  %7363 = vmatmul.msk.f32.gmra.mxu3 %vm278_vm0, %v8758_v52 }
  0xe8   : > { %v736_v56 = vpop.f32.mrf.mxu2  ;;  %v780_v59 = vpop.f32.mrf.mxu3 }
  0xe9   : > { %v8771_v60 = vadd.f32 %v736_v56, %v649_v54  ;;  %v8773_v61 = vadd.f32 %v780_v59, %v650_v55  ;;  %v581_v62 = vpop.f32.mrf.mxu0  ;;  %v625_v63 = vpop.f32.mrf.mxu1 }
  0xea   : > { %v651_v5 = vadd.f32 %v581_v62, %v8572_v13  ;;  %v652_v6 = vadd.f32 %v625_v63, %v8574_v14  ;;  %v1475_v13 = vld [vmem:[%s13437_s1 + $0x448] sm:$0xff] }
  0xeb   : > { %1564 = vmatpush.msra.mxu1 %v1475_v13  ;;  %v1304_v62 = vld [vmem:[%s8243_s9 + $0x4d] sm:$0xff]  ;;  %v1307_v13 = vld [vmem:[%s8243_s9 + $0x65] sm:$0xff] }
  0xec   : > { %7337 = vmatmul.msk.f32.gmra.mxu0 %vm278_vm0, %v833_v1  ;;  %7346 = vmatmul.msk.f32.gmra.mxu1 %vm278_vm0, %v833_v1 }
  0xed   : > { %7355 = vmatmul.msk.f32.gmra.mxu2 %vm278_vm0, %v8780_v3  ;;  %7364 = vmatmul.msk.f32.gmra.mxu3 %vm278_vm0, %v8780_v3 }
  0xf0   : > { %v739_v4 = vpop.f32.mrf.mxu2  ;;  %v783_v7 = vpop.f32.mrf.mxu3 }
  0xf1   : > { %v8790_v8 = vadd.f32 %v739_v4, %v651_v5  ;;  %v8792_v9 = vadd.f32 %v783_v7, %v652_v6  ;;  %v584_v10 = vpop.f32.mrf.mxu0  ;;  %v628_v11 = vpop.f32.mrf.mxu1  ;;  %v1305_v5 = vld [vmem:[%s8243_s9 + $0x55] sm:$0xff]  ;;  %v1306_v7 = vld [vmem:[%s8243_s9 + $0x5d] sm:$0xff] }
  0xf2   : > { %v653_v14 = vadd.f32 %v584_v10, %v8588_v23  ;;  %v654_v18 = vadd.f32 %v628_v11, %v8590_v24  ;;  %v1473_v23 = vld [vmem:[%s13437_s1 + $0x438] sm:$0xff] }
  0xf3   : > { %1565 = vmatpush.msra.mxu1 %v1473_v23  ;;  %v1148_v4 = vld [vmem:[%s8243_s9 + $0x5c] sm:$0xff] }
  0xf4   : > { %7365 = vmatmul.msk.f32.vlgmr.msrb.gmra.mxu0 %vm278_vm0, %v8616_v40  ;;  %7374 = vmatmul.msk.f32.vlgmr.msrb.gmra.mxu1 %vm278_vm0, %v8616_v40  ;;  %v1472_v40 = vld [vmem:[%s13437_s1 + $0x430] sm:$0xff] }
  0xf5   : > { %7383 = vmatmul.msk.f32.vlgmr.msrb.gmra.mxu2 %vm278_vm0, %v1299_v17  ;;  %7392 = vmatmul.msk.f32.vlgmr.msrb.gmra.mxu3 %vm278_vm0, %v1299_v17  ;;  %v1149_v17 = vld [vmem:[%s8243_s9 + $0x64] sm:$0xff] }
  0xf6   : > { %1521 = vmatpush.msra.mxu0 %v1472_v40  ;;  %1566 = vmatpush.msra.mxu1 %v1471_v36  ;;  %v1457_v40 = vld [vmem:[%s8243_s9 + $0x26] sm:$0xff]  ;;  %v1458_v36 = vld [vmem:[%s8243_s9 + $0x2e] sm:$0xff] }
  0xf8   : > { %v742_v19 = vpop.f32.mrf.mxu2  ;;  %v786_v21 = vpop.f32.mrf.mxu3  ;;  %1522 = vmatpush.msra.mxu0 %v1470_v35 }
  0xf9   : > { %v8809_v22 = vadd.f32 %v742_v19, %v653_v14  ;;  %v8811_v25 = vadd.f32 %v786_v21, %v654_v18  ;;  %v8813_v26 = vpop.f32.mrf.mxu0  ;;  %v8815_v27 = vpop.f32.mrf.mxu1 }
  0xfa   : > { %1523 = vmatpush.msra.mxu0 %v1468_v41 }
  0xfc   : > { %7366 = vmatmul.msk.f32.gmra.mxu0 %vm278_vm0, %v8630_v48  ;;  %7375 = vmatmul.msk.f32.gmra.mxu1 %vm278_vm0, %v8630_v48 }
  0xfd   : > { %7384 = vmatmul.msk.f32.gmra.mxu2 %vm278_vm0, %v1300_v28  ;;  %7393 = vmatmul.msk.f32.gmra.mxu3 %vm278_vm0, %v1300_v28 }
 0x100   : > { %v8864_v42 = vpop.f32.mrf.mxu2  ;;  %v8866_v47 = vpop.f32.mrf.mxu3 }
 0x101   : > { %v8830_v24 = vpop.f32.mrf.mxu0  ;;  %v8832_v29 = vpop.f32.mrf.mxu1 }
 0x104   : > { %7367 = vmatmul.msk.f32.gmra.mxu0 %vm278_vm0, %v8668_v0  ;;  %7376 = vmatmul.msk.f32.gmra.mxu1 %vm278_vm0, %v8668_v0  ;;  %v1469_v0 = vld [vmem:[%s13437_s1 + $0x418] sm:$0xff] }
 0x105   : > { %7385 = vmatmul.msk.f32.gmra.mxu2 %vm278_vm0, %v1301_v30  ;;  %7394 = vmatmul.msk.f32.gmra.mxu3 %vm278_vm0, %v1301_v30 }
 0x106   : > { %1567 = vmatpush.msra.mxu1 %v1469_v0  ;;  %v1459_v0 = vld [vmem:[%s8243_s9 + $0x36] sm:$0xff] }
 0x108   : > { %1568 = vmatpush.msra.mxu1 %v1467_v53  ;;  %v8885_v54 = vpop.f32.mrf.mxu2  ;;  %v8887_v55 = vpop.f32.mrf.mxu3 }
 0x109   : > { %v8847_v48 = vpop.f32.mrf.mxu0  ;;  %v8849_v37 = vpop.f32.mrf.mxu1 }
 0x10c   : > { %7368 = vmatmul.msk.f32.gmra.mxu0 %vm278_vm0, %v8706_v20  ;;  %7377 = vmatmul.msk.f32.gmra.mxu1 %vm278_vm0, %v8706_v20  ;;  %v1466_v20 = vld [vmem:[%s13437_s1 + $0x400] sm:$0xff] }
 0x10d   : > { %7386 = vmatmul.msk.f32.gmra.mxu2 %vm278_vm0, %v1302_v39  ;;  %7395 = vmatmul.msk.f32.gmra.mxu3 %vm278_vm0, %v1302_v39 }
 0x10e   : > { %1524 = vmatpush.msra.mxu0 %v1466_v20 }
 0x110   : > { %v8904_v1 = vpop.f32.mrf.mxu2  ;;  %v8906_v2 = vpop.f32.mrf.mxu3 }
 0x111   : > { %v8868_v49 = vpop.f32.mrf.mxu0  ;;  %v8870_v50 = vpop.f32.mrf.mxu1  ;;  %13458 = vst [vmem:[#allocation14_spill] sm:$0xff] %v8904_v1 }
 0x112   : > { %13452 = vst [vmem:[#allocation8_spill] sm:$0xff] %v8868_v49 }
 0x113   : > { %13453 = vst [vmem:[#allocation9_spill] sm:$0xff] %v8870_v50  ;;  %v2012_v50 = vld [vmem:[%s13437_s1 + $0xb0] sm:$0xff] }
 0x114   : > { %7369 = vmatmul.msk.f32.gmra.mxu0 %vm278_vm0, %v8738_v38  ;;  %7378 = vmatmul.msk.f32.gmra.mxu1 %vm278_vm0, %v8738_v38  ;;  %13459 = vst [vmem:[#allocation15_spill] sm:$0xff] %v8906_v2 }
 0x115   : > { %7387 = vmatmul.msk.f32.gmra.mxu2 %vm278_vm0, %v1303_v51  ;;  %7396 = vmatmul.msk.f32.gmra.mxu3 %vm278_vm0, %v1303_v51 }
 0x118   : > { %v8921_v10 = vpop.f32.mrf.mxu2  ;;  %v8923_v11 = vpop.f32.mrf.mxu3 }
 0x119   : > { %v8889_v56 = vpop.f32.mrf.mxu0  ;;  %v8891_v59 = vpop.f32.mrf.mxu1  ;;  %13460 = vst [vmem:[#allocation16_spill] sm:$0xff] %v8921_v10  ;;  %v1679_v10 = vld [vmem:[%s13439_s3 + $0xb0] sm:$0xff] }
 0x11a   : > { %13454 = vst [vmem:[#allocation10_spill] sm:$0xff] %v8889_v56 }
 0x11b   : > { %13455 = vst [vmem:[#allocation11_spill] sm:$0xff] %v8891_v59 }
 0x11c   : > { %7370 = vmatmul.msk.f32.gmra.mxu0 %vm278_vm0, %v8758_v52  ;;  %7379 = vmatmul.msk.f32.gmra.mxu1 %vm278_vm0, %v8758_v52  ;;  %13461 = vst [vmem:[#allocation17_spill] sm:$0xff] %v8923_v11  ;;  %v1663_v11 = vld [vmem:[%s13439_s3 + $0x30] sm:$0xff] }
 0x11d   : > { %7388 = vmatmul.msk.f32.gmra.mxu2 %vm278_vm0, %v1304_v62  ;;  %7397 = vmatmul.msk.f32.gmra.mxu3 %vm278_vm0, %v1304_v62 }
 0x120   : > { %v8939_v14 = vpop.f32.mrf.mxu2  ;;  %v8941_v18 = vpop.f32.mrf.mxu3 }
 0x121   : > { %v8900_v38 = vpop.f32.mrf.mxu0  ;;  %v8902_v63 = vpop.f32.mrf.mxu1  ;;  %13462 = vst [vmem:[#allocation18_spill] sm:$0xff] %v8939_v14  ;;  %v1464_v14 = vld [vmem:[%s8243_s9 + $0x5e] sm:$0xff] }
 0x122   : > { %13456 = vst [vmem:[#allocation12_spill] sm:$0xff] %v8900_v38  ;;  %v2021_v38 = vld [vmem:[%s13437_s1 + $0xf8] sm:$0xff] }
 0x123   : > { %13457 = vst [vmem:[#allocation13_spill] sm:$0xff] %v8902_v63  ;;  %2101 = vmatpush.msrb.mxu1 %v2021_v38  ;;  %v1463_v38 = vld [vmem:[%s8243_s9 + $0x56] sm:$0xff] }
 0x124   : > { %7371 = vmatmul.msk.f32.gmra.mxu0 %vm278_vm0, %v8780_v3  ;;  %7380 = vmatmul.msk.f32.gmra.mxu1 %vm278_vm0, %v8780_v3  ;;  %13463 = vst [vmem:[#allocation19_spill] sm:$0xff] %v8941_v18 }
 0x125   : > { %7389 = vmatmul.msk.f32.gmra.mxu2 %vm278_vm0, %v1305_v5  ;;  %7398 = vmatmul.msk.f32.gmra.mxu3 %vm278_vm0, %v1305_v5  ;;  %v1460_v5 = vld [vmem:[%s8243_s9 + $0x3e] sm:$0xff] }
 0x128   : > { %v8950_v28 = vpop.f32.mrf.mxu2  ;;  %v8952_v23 = vpop.f32.mrf.mxu3 }
 0x129   : > { %v8915_v52 = vpop.f32.mrf.mxu0  ;;  %v8917_v6 = vpop.f32.mrf.mxu1  ;;  %13464 = vst [vmem:[#allocation20_spill] sm:$0xff] %v8950_v28 }
 0x12a   : > { %13465 = vst [vmem:[#allocation21_spill] sm:$0xff] %v8952_v23  ;;  %v965_v2 = vadd.f32 %v8915_v52, %v8771_v60  ;;  %v966_v1 = vadd.f32 %v8917_v6, %v8773_v61  ;;  %v2274_v60 = vld [vmem:[%s13437_s1 + $0x168] sm:$0xff]  ;;  %v1615_v61 = vld [vmem:[%s13438_s2] sm:$0x3] }
 0x12c   : > { %7372 = vmatmul.msk.f32.gmra.mxu0 %vm278_vm0, %v1148_v4  ;;  %7381 = vmatmul.msk.f32.gmra.mxu1 %vm278_vm0, %v1148_v4 }
 0x12d   : > { %7390 = vmatmul.msk.f32.gmra.mxu2 %vm278_vm0, %v1306_v7  ;;  %7399 = vmatmul.msk.f32.gmra.mxu3 %vm278_vm0, %v1306_v7 }
 0x130   : > { %v8966_v51 = vpop.f32.mrf.mxu2  ;;  %v8968_v20 = vpop.f32.mrf.mxu3 }
 0x131   : > { %v8929_v3 = vpop.f32.mrf.mxu0  ;;  %v8931_v12 = vpop.f32.mrf.mxu1 }
 0x134   : > { %7373 = vmatmul.msk.f32.gmra.mxu0 %vm278_vm0, %v1149_v17  ;;  %7382 = vmatmul.msk.f32.gmra.mxu1 %vm278_vm0, %v1149_v17 }
 0x135   : > { %7391 = vmatmul.msk.f32.gmra.mxu2 %vm278_vm0, %v1307_v13  ;;  %7400 = vmatmul.msk.f32.gmra.mxu3 %vm278_vm0, %v1307_v13 }
 0x138   : > { %v8977_v4 = vpop.f32.mrf.mxu2  ;;  %v8979_v7 = vpop.f32.mrf.mxu3 }
 0x139   : > { %v8943_v19 = vpop.f32.mrf.mxu0  ;;  %v8945_v21 = vpop.f32.mrf.mxu1 }
 0x13c   : > { %7401 = vmatmul.msk.f32.vlgmr.msra.gmra.mxu0 %vm278_vm0, %v1457_v40  ;;  %7410 = vmatmul.msk.f32.vlgmr.msra.gmra.mxu1 %vm278_vm0, %v1457_v40  ;;  %v1461_v40 = vld [vmem:[%s8243_s9 + $0x46] sm:$0xff] }
 0x140   : > { %v8999_v23 = vpop.f32.mrf.mxu2  ;;  %v9001_v28 = vpop.f32.mrf.mxu3 }
 0x141   : > { %v8954_v30 = vpop.f32.mrf.mxu0  ;;  %v8956_v35 = vpop.f32.mrf.mxu1 }
 0x144   : > { %7402 = vmatmul.msk.f32.gmra.mxu0 %vm278_vm0, %v1458_v36  ;;  %7411 = vmatmul.msk.f32.gmra.mxu1 %vm278_vm0, %v1458_v36  ;;  %v1672_v36 = vld [vmem:[%s13439_s3 + $0x78] sm:$0xff] }
 0x145   : > { %1693 = vmatpush.msra.mxu2 %v1672_v36 }
 0x149   : > { %v8961_v39 = vpop.f32.mrf.mxu0  ;;  %v8963_v41 = vpop.f32.mrf.mxu1 }
 0x14c   : > { %7403 = vmatmul.msk.f32.gmra.mxu0 %vm278_vm0, %v1459_v0  ;;  %7412 = vmatmul.msk.f32.gmra.mxu1 %vm278_vm0, %v1459_v0  ;;  %v1688_v0 = vld [vmem:[%s13439_s3 + $0xf8] sm:$0xff] }
 0x14d   : > { %1737 = vmatpush.msra.mxu3 %v1688_v0  ;;  %v1687_v0 = vld [vmem:[%s13439_s3 + $0xf0] sm:$0xff] }
 0x14f   : > { %1738 = vmatpush.msra.mxu3 %v1687_v0  ;;  %v1669_v0 = vld [vmem:[%s13439_s3 + $0x60] sm:$0xff] }
 0x151   : > { %v8972_v53 = vpop.f32.mrf.mxu0  ;;  %v8974_v62 = vpop.f32.mrf.mxu1  ;;  %1739 = vmatpush.msra.mxu3 %v1686_v45  ;;  %v2018_v45 = vld [vmem:[%s13437_s1 + $0xe0] sm:$0xff] }
 0x152   : > { %13466 = vst [vmem:[#allocation22_spill] sm:$0xff] %v8972_v53  ;;  %v1998_v53 = vld [vmem:[%s8243_s9 + $0x51] sm:$0xff] }
 0x153   : > { %13467 = vst [vmem:[#allocation23_spill] sm:$0xff] %v8974_v62 }
 0x154   : > { %7404 = vmatmul.msk.f32.gmra.mxu0 %vm278_vm0, %v1460_v5  ;;  %7413 = vmatmul.msk.f32.gmra.mxu1 %vm278_vm0, %v1460_v5  ;;  %v1671_v5 = vld [vmem:[%s13439_s3 + $0x70] sm:$0xff] }
 0x155   : > { %1694 = vmatpush.msra.mxu2 %v1671_v5  ;;  %v1670_v5 = vld [vmem:[%s13439_s3 + $0x68] sm:$0xff] }
 0x157   : > { %1695 = vmatpush.msra.mxu2 %v1670_v5  ;;  %v1685_v5 = vld [vmem:[%s13439_s3 + $0xe0] sm:$0xff] }
 0x158   : > { %1740 = vmatpush.msra.mxu3 %v1685_v5 }
 0x159   : > { %v8983_v17 = vpop.f32.mrf.mxu0  ;;  %v8985_v13 = vpop.f32.mrf.mxu1  ;;  %1696 = vmatpush.msra.mxu2 %v1669_v0  ;;  %v2019_v0 = vld [vmem:[%s13437_s1 + $0xe8] sm:$0xff] }
 0x15a   : > { %13468 = vst [vmem:[#allocation24_spill] sm:$0xff] %v8983_v17  ;;  %2102 = vmatpush.msrb.mxu1 %v2019_v0  ;;  %v1666_v0 = vld [vmem:[%s13439_s3 + $0x48] sm:$0xff] }
 0x15b   : > { %13469 = vst [vmem:[#allocation25_spill] sm:$0xff] %v8985_v13  ;;  %v1681_v13 = vld [vmem:[%s13439_s3 + $0xc0] sm:$0xff] }
 0x15c   : > { %7405 = vmatmul.msk.f32.gmra.mxu0 %vm278_vm0, %v1461_v40  ;;  %7414 = vmatmul.msk.f32.gmra.mxu1 %vm278_vm0, %v1461_v40  ;;  %v2020_v40 = vld [vmem:[%s13437_s1 + $0xf0] sm:$0xff] }
 0x15d   : > { %2057 = vmatpush.msrb.mxu0 %v2020_v40  ;;  %v9028_v40 = vpop.f32.mrf.mxu2  ;;  %2103 = vmatpush.msrb.mxu1 %v2017_v32  ;;  %v1664_v32 = vld [vmem:[%s13439_s3 + $0x38] sm:$0xff] }
 0x15f   : > { %2058 = vmatpush.msrb.mxu0 %v2018_v45  ;;  %v1667_v45 = vld [vmem:[%s13439_s3 + $0x50] sm:$0xff] }
 0x161   : > { %v9003_v63 = vpop.f32.mrf.mxu0  ;;  %v9005_v36 = vpop.f32.mrf.mxu1 }
 0x162   : > { %13470 = vst [vmem:[#allocation26_spill] sm:$0xff] %v9003_v63 }
 0x163   : > { %13471 = vst [vmem:[#allocation27_spill] sm:$0xff] %v9005_v36  ;;  %v9030_v36 = vpop.f32.mrf.mxu3 }
 0x164   : > { %7406 = vmatmul.msk.f32.gmra.mxu0 %vm278_vm0, %v1462_v46  ;;  %7415 = vmatmul.msk.f32.gmra.mxu1 %vm278_vm0, %v1462_v46  ;;  %v1668_v46 = vld [vmem:[%s13439_s3 + $0x58] sm:$0xff] }
 0x165   : > { %1697 = vmatpush.msra.mxu2 %v1668_v46  ;;  %v9062_v46 = vpop.f32.mrf.mxu2 }
 0x167   : > { %1698 = vmatpush.msra.mxu2 %v1667_v45  ;;  %v1682_v45 = vld [vmem:[%s13439_s3 + $0xc8] sm:$0xff] }
 0x169   : > { %v9032_v63 = vpop.f32.mrf.mxu0  ;;  %v9034_v18 = vpop.f32.mrf.mxu1  ;;  %1699 = vmatpush.msra.mxu2 %v1666_v0  ;;  %v2015_v0 = vld [vmem:[%s13437_s1 + $0xc8] sm:$0xff] }
 0x16a   : > { %13472 = vst [vmem:[#allocation28_spill] sm:$0xff] %v9032_v63  ;;  %2104 = vmatpush.msrb.mxu1 %v2015_v0 }
 0x16b   : > { %13473 = vst [vmem:[#allocation29_spill] sm:$0xff] %v9034_v18  ;;  %v1684_v18 = vld [vmem:[%s13439_s3 + $0xd8] sm:$0xff]  ;;  %v9064_v59 = vpop.f32.mrf.mxu3 }
 0x16c   : > { %7407 = vmatmul.msk.f32.gmra.mxu0 %vm278_vm0, %v1463_v38  ;;  %7416 = vmatmul.msk.f32.gmra.mxu1 %vm278_vm0, %v1463_v38  ;;  %v1683_v38 = vld [vmem:[%s13439_s3 + $0xd0] sm:$0xff] }
 0x16d   : > { %1741 = vmatpush.msra.mxu3 %v1684_v18  ;;  %v2016_v18 = vld [vmem:[%s13437_s1 + $0xd0] sm:$0xff] }
 0x16e   : > { %2059 = vmatpush.msrb.mxu0 %v2016_v18  ;;  %v1665_v18 = vld [vmem:[%s13439_s3 + $0x40] sm:$0xff] }
 0x16f   : > { %1742 = vmatpush.msra.mxu3 %v1683_v38  ;;  %v1465_v38 = vld [vmem:[%s8243_s9 + $0x66] sm:$0xff]  ;;  %1700 = vmatpush.msra.mxu2 %v1665_v18  ;;  %v9106_v18 = vpop.f32.mrf.mxu2 }
 0x170   : > { %13474 = vst [vmem:[#allocation30_spill] sm:$0xff] %v9106_v18 }
 0x171   : > { %v9054_v5 = vpop.f32.mrf.mxu0  ;;  %v9056_v63 = vpop.f32.mrf.mxu1  ;;  %1743 = vmatpush.msra.mxu3 %v1682_v45  ;;  %v1680_v45 = vld [vmem:[%s13439_s3 + $0xb8] sm:$0xff]  ;;  %1701 = vmatpush.msra.mxu2 %v1664_v32 }
 0x172   : > { %v2013_v32 = vld [vmem:[%s13437_s1 + $0xb8] sm:$0xff] }
 0x173   : > { %1744 = vmatpush.msra.mxu3 %v1681_v13  ;;  %v9108_v17 = vpop.f32.mrf.mxu3  ;;  %1702 = vmatpush.msra.mxu2 %v1663_v11  ;;  %v1661_v11 = vld [vmem:[%s13439_s3 + $0x20] sm:$0xff] }
 0x174   : > { %7408 = vmatmul.msk.f32.gmra.mxu0 %vm278_vm0, %v1464_v14  ;;  %7417 = vmatmul.msk.f32.gmra.mxu1 %vm278_vm0, %v1464_v14  ;;  %v2014_v14 = vld [vmem:[%s13437_s1 + $0xc0] sm:$0xff]  ;;  %13475 = vst [vmem:[#allocation31_spill] sm:$0xff] %v9108_v17  ;;  %v2011_v17 = vld [vmem:[%s13437_s1 + $0xa8] sm:$0xff] }
 0x175   : > { %2060 = vmatpush.msrb.mxu0 %v2014_v14  ;;  %1745 = vmatpush.msra.mxu3 %v1680_v45 }
 0x176   : > { %2105 = vmatpush.msrb.mxu1 %v2013_v32  ;;  %v1660_v32 = vld [vmem:[%s13439_s3 + $0x18] sm:$0xff] }
 0x177   : > { %1746 = vmatpush.msra.mxu3 %v1679_v10  ;;  %2061 = vmatpush.msrb.mxu0 %v2012_v50  ;;  %v9131_v0 = vpop.f32.mrf.mxu2  ;;  %v1678_v10 = vld [vmem:[%s13439_s3 + $0xa8] sm:$0xff]  ;;  %v1677_v50 = vld [vmem:[%s13439_s3 + $0xa0] sm:$0xff] }
 0x178   : > { %13476 = vst [vmem:[#allocation32_spill] sm:$0xff] %v9131_v0  ;;  %2106 = vmatpush.msrb.mxu1 %v2011_v17  ;;  %v1658_v17 = vld [vmem:[%s13439_s3 + $0x8] sm:$0xff] }
 0x179   : > { %v9083_v56 = vpop.f32.mrf.mxu0  ;;  %v9085_v31 = vpop.f32.mrf.mxu1  ;;  %1747 = vmatpush.msra.mxu3 %v1678_v10 }
 0x17b   : > { %v9133_v45 = vpop.f32.mrf.mxu3  ;;  %1748 = vmatpush.msra.mxu3 %v1677_v50  ;;  %v1659_v50 = vld [vmem:[%s13439_s3 + $0x10] sm:$0xff] }
 0x17c   : > { %7409 = vmatmul.msk.f32.gmra.mxu0 %vm278_vm0, %v1465_v38  ;;  %7418 = vmatmul.msk.f32.gmra.mxu1 %vm278_vm0, %v1465_v38  ;;  %v1662_v38 = vld [vmem:[%s13439_s3 + $0x28] sm:$0xff]  ;;  %13477 = vst [vmem:[#allocation33_spill] sm:$0xff] %v9133_v45 }
 0x17d   : > { %1703 = vmatpush.msra.mxu2 %v1662_v38  ;;  %v2010_v38 = vld [vmem:[%s13437_s1 + $0xa0] sm:$0xff] }
 0x17e   : > { %2062 = vmatpush.msrb.mxu0 %v2010_v38  ;;  %v1675_v38 = vld [vmem:[%s13439_s3 + $0x90] sm:$0xff] }
 0x17f   : > { %1704 = vmatpush.msra.mxu2 %v1661_v11  ;;  %v9154_v10 = vpop.f32.mrf.mxu2  ;;  %v1676_v11 = vld [vmem:[%s13439_s3 + $0x98] sm:$0xff] }
 0x180   : > { %13478 = vst [vmem:[#allocation34_spill] sm:$0xff] %v9154_v10  ;;  %1749 = vmatpush.msra.mxu3 %v1676_v11  ;;  %v2009_v11 = vld [vmem:[%s13437_s1 + $0x98] sm:$0xff] }
 0x181   : > { %v9112_v13 = vpop.f32.mrf.mxu0  ;;  %v9114_v14 = vpop.f32.mrf.mxu1  ;;  %1705 = vmatpush.msra.mxu2 %v1660_v32  ;;  %v2008_v32 = vld [vmem:[%s13437_s1 + $0x90] sm:$0xff]  ;;  %2107 = vmatpush.msrb.mxu1 %v2009_v11 }
 0x182   : > { %2063 = vmatpush.msrb.mxu0 %v2008_v32  ;;  %1750 = vmatpush.msra.mxu3 %v1675_v38  ;;  %v1657_v38 = vld [vmem:[%s13439_s3] sm:$0xff] }
 0x183   : > { %v9156_v45 = vpop.f32.mrf.mxu3  ;;  %1706 = vmatpush.msra.mxu2 %v1659_v50  ;;  %v1674_v50 = vld [vmem:[%s13439_s3 + $0x88] sm:$0xff]  ;;  %v1673_v32 = vld [vmem:[%s13439_s3 + $0x80] sm:$0xff] }
 0x184   : > { %13479 = vst [vmem:[#allocation35_spill] sm:$0xff] %v9156_v45  ;;  %1751 = vmatpush.msra.mxu3 %v1674_v50 }
 0x185   : > { %1707 = vmatpush.msra.mxu2 %v1658_v17  ;;  %v1995_v17 = vld [vmem:[%s13437_s1 + $0x70] sm:$0xff] }
 0x186   : > { %1752 = vmatpush.msra.mxu3 %v1673_v32  ;;  %v2275_v32 = vld [vmem:[%s13437_s1 + $0x170] sm:$0xff] }
 0x187   : > { %v9187_v18 = vpop.f32.mrf.mxu2  ;;  %1708 = vmatpush.msra.mxu2 %v1657_v38  ;;  %v1997_v38 = vld [vmem:[%s8243_s9 + $0x49] sm:$0xff] }
 0x188   : > { %13484 = vst [vmem:[#allocation40_spill] sm:$0xff] %v9187_v18 }
 0x189   : > { %v9135_v16 = vpop.f32.mrf.mxu0  ;;  %v9137_v49 = vpop.f32.mrf.mxu1  ;;  %2172 = vmatpush.msrb.mxu2 %v1995_v17 }
 0x18b   : > { %v9189_v62 = vpop.f32.mrf.mxu3 }
 0x18c   : > { %13485 = vst [vmem:[#allocation41_spill] sm:$0xff] %v9189_v62  ;;  %v2006_v62 = vld [vmem:[%s13437_s1 + $0x80] sm:$0xff] }
 0x18d   : > { %2064 = vmatpush.msrb.mxu0 %v2006_v62  ;;  %v1996_v62 = vld [vmem:[%s13437_s1 + $0x78] sm:$0xff] }
 0x18e   : > { %2216 = vmatpush.msrb.mxu3 %v1996_v62  ;;  %7428 = vmatmul.msk.f32.vlgmr.msrb.gmra.mxu0 %vm278_vm0, %v1997_v38  ;;  %v2276_v62 = vld [vmem:[%s13437_s1 + $0x178] sm:$0xff] }
 0x18f   : > { %v1368_v18 = vpop.f32.mrf.mxu2  ;;  %2312 = vmatpush.msra.mxu0 %v2275_v32 }
 0x191   : > { %v9158_v0 = vpop.f32.mrf.mxu0  ;;  %v9160_v15 = vpop.f32.mrf.mxu1 }
 0x192   : > { %13480 = vst [vmem:[#allocation36_spill] sm:$0xff] %v9158_v0 }
 0x193   : > { %13481 = vst [vmem:[#allocation37_spill] sm:$0xff] %v9160_v15 }
 0x196   : > { %7429 = vmatmul.msk.f32.gmra.mxu0 %vm278_vm0, %v1998_v53 }
 0x199   : > { %v9177_v45 = vpop.f32.mrf.mxu0  ;;  %v9179_v10 = vpop.f32.mrf.mxu1 }
 0x19a   : > { %13482 = vst [vmem:[#allocation38_spill] sm:$0xff] %v9177_v45  ;;  %v2007_v45 = vld [vmem:[%s13437_s1 + $0x88] sm:$0xff] }
 0x19b   : > { %13483 = vst [vmem:[#allocation39_spill] sm:$0xff] %v9179_v10  ;;  %v1412_v10 = vpop.f32.mrf.mxu3  ;;  %2108 = vmatpush.msrb.mxu1 %v2007_v45  ;;  %v1993_v45 = vld [vmem:[%s13437_s1 + $0x60] sm:$0xff] }
 0x19c   : > { %7437 = vmatmul.msk.f32.vlgmr.msrb.gmra.mxu1 %vm278_vm0, %v1997_v38  ;;  %2173 = vmatpush.msrb.mxu2 %v1993_v45  ;;  %v1123_v45 = vadd.f32 %v8966_v51, %v965_v2 }
 0x19d   : > { %2356 = vmatpush.msra.mxu1 %v2276_v62  ;;  %v1124_v62 = vadd.f32 %v8968_v20, %v966_v1  ;;  %v1992_v1 = vld [vmem:[%s13437_s1 + $0x58] sm:$0xff] }
 0x19e   : > { %v1281_v2 = vadd.f32 %v9054_v5, %v1123_v45  ;;  %v968_v5 = vadd.f32 %v8931_v12, %v8792_v9  ;;  %v1990_v9 = vld [vmem:[%s13437_s1 + $0x48] sm:$0xff] }
 0x19f   : > { %v1282_v52 = vadd.f32 %v9056_v63, %v1124_v62  ;;  %2357 = vmatpush.msra.mxu1 %v2274_v60  ;;  %v967_v63 = vadd.f32 %v8929_v3, %v8790_v8  ;;  %v1989_v8 = vld [vmem:[%s13437_s1 + $0x40] sm:$0xff] }
 0x1a0   : > { %v1439_v6 = vadd.f32 %v1368_v18, %v1281_v2  ;;  %v1126_v62 = vadd.f32 %v8979_v7, %v968_v5 }
 0x1a1   : > { %v9206_v11 = vpop.f32.mrf.mxu0  ;;  %v9208_v50 = vpop.f32.mrf.mxu1  ;;  %v1440_v51 = vadd.f32 %v1412_v10, %v1282_v52  ;;  %v1125_v45 = vadd.f32 %v8977_v4, %v967_v63  ;;  %v2000_v52 = vld [vmem:[%s8243_s9 + $0x61] sm:$0xff] }
 0x1a2   : > { %13486 = vst [vmem:[#allocation42_spill] sm:$0xff] %v9206_v11  ;;  %v1994_v11 = vld [vmem:[%s13437_s1 + $0x68] sm:$0xff]  ;;  %v1284_v12 = vadd.f32 %v9085_v31, %v1126_v62  ;;  %v970_v31 = vadd.f32 %v8945_v21, %v8811_v25  ;;  %v2269_v62 = vld [vmem:[%s13437_s1 + $0x140] sm:$0xff]  ;;  %v656_v21 = vadd.f32 %v8815_v27, %v8606_v34 }
 0x1a3   : > { %13487 = vst [vmem:[#allocation43_spill] sm:$0xff] %v9208_v50  ;;  %2217 = vmatpush.msrb.mxu3 %v1994_v11  ;;  %v2273_v11 = vld [vmem:[%s13437_s1 + $0x160] sm:$0xff]  ;;  %v1283_v3 = vadd.f32 %v9083_v56, %v1125_v45  ;;  %v969_v56 = vadd.f32 %v8943_v19, %v8809_v22  ;;  %v1987_v22 = vld [vmem:[%s13437_s1 + $0x30] sm:$0xff]  ;;  %v2270_v25 = vld [vmem:[%s13437_s1 + $0x148] sm:$0xff]  ;;  %v655_v19 = vadd.f32 %v8813_v26, %v8604_v33 }
 0x1a4   : > { %7438 = vmatmul.msk.f32.gmra.mxu1 %vm278_vm0, %v1998_v53  ;;  %2313 = vmatpush.msra.mxu0 %v2273_v11  ;;  %v9271_v11 = vperm.slane %v1615_v61, 1  ;;  %v814_v26 = vadd.f32 %v8866_v47, %v656_v21 }
 0x1a5   : > { %2218 = vmatpush.msrb.mxu3 %v1992_v1  ;;  %v2271_v1 = vld [vmem:[%s13437_s1 + $0x150] sm:$0xff]  ;;  %v813_v33 = vadd.f32 %v8864_v42, %v655_v19 }
 0x1a6   : > { %2314 = vmatpush.msra.mxu0 %v2271_v1 }
 0x1a7   : > { %2219 = vmatpush.msrb.mxu3 %v1990_v9 }
 0x1a8   : > { %2315 = vmatpush.msra.mxu0 %v2269_v62 }
 0x1a9   : > { %v9220_v50 = vpop.f32.mrf.mxu0  ;;  %v9222_v17 = vpop.f32.mrf.mxu1 }
 0x1aa   : > { %13488 = vst [vmem:[#allocation44_spill] sm:$0xff] %v9220_v50  ;;  %v1415_v50 = vpop.f32.mrf.mxu3 }
 0x1ab   : > { %13489 = vst [vmem:[#allocation45_spill] sm:$0xff] %v9222_v17  ;;  %v1371_v17 = vpop.f32.mrf.mxu2  ;;  %v1442_v2 = vadd.f32 %v1415_v50, %v1284_v12  ;;  %v1127_v50 = vadd.f32 %v8999_v23, %v969_v56 }
 0x1ad   : > { %v1285_v23 = vadd.f32 %v9112_v13, %v1127_v50  ;;  %v971_v13 = vadd.f32 %v8954_v30, %v813_v33  ;;  %v1985_v30 = vld [vmem:[%s13437_s1 + $0x20] sm:$0xff] }
 0x1af   : > { %v1129_v47 = vadd.f32 %v9028_v40, %v971_v13  ;;  %v658_v40 = vadd.f32 %v8832_v29, %v8626_v44 }
 0x1b1   : > { %v9236_v38 = vpop.f32.mrf.mxu0  ;;  %v9238_v32 = vpop.f32.mrf.mxu1 }
 0x1b2   : > { %13490 = vst [vmem:[#allocation46_spill] sm:$0xff] %v9236_v38  ;;  %v9267_v53 = vpop.f32.mrf.mxu3  ;;  %v9269_v38 = vperm.slane %v1615_v61, 0 }
 0x1b3   : > { %13491 = vst [vmem:[#allocation47_spill] sm:$0xff] %v9238_v32  ;;  %v1991_v32 = vld [vmem:[%s13437_s1 + $0x50] sm:$0xff]  ;;  %v9265_v20 = vpop.f32.mrf.mxu2 }
 0x1b4   : > { %2174 = vmatpush.msrb.mxu2 %v1991_v32  ;;  %v1999_v32 = vld [vmem:[%s8243_s9 + $0x59] sm:$0xff]  ;;  %v1443_v34 = vadd.f32 %v9265_v20, %v1285_v23 }
 0x1b5   : > { %7430 = vmatmul.msk.f32.gmra.mxu0 %vm278_vm0, %v1999_v32  ;;  %7439 = vmatmul.msk.f32.gmra.mxu1 %vm278_vm0, %v1999_v32 }
 0x1b6   : > { %2175 = vmatpush.msrb.mxu2 %v1989_v8  ;;  %v2001_v8 = vld [vmem:[%s8243_s9 + $0x69] sm:$0xff] }
 0x1b8   : > { %2176 = vmatpush.msrb.mxu2 %v1987_v22  ;;  %v13493_v22 = vld [vmem:[#allocation37_spill] sm:$0xff] }
 0x1b9   : > { %v1526_v15 = vpop.f32.mrf.mxu0  ;;  %v1570_v0 = vpop.f32.mrf.mxu1 }
 0x1ba   : > { %v1597_v18 = vadd.f32 %v1526_v15, %v1439_v6  ;;  %v1598_v10 = vadd.f32 %v1570_v0, %v1440_v51  ;;  %v2272_v15 = vld [vmem:[%s13437_s1 + $0x158] sm:$0xff]  ;;  %v1441_v0 = vadd.f32 %v1371_v17, %v1283_v3  ;;  %v1421_v63 = vpop.f32.mrf.mxu3  ;;  %2177 = vmatpush.msrb.mxu2 %v1985_v30  ;;  %v13501_v30 = vld [vmem:[#allocation8_spill] sm:$0xff] }
 0x1bb   : > { %2358 = vmatpush.msra.mxu1 %v2272_v15  ;;  %v1377_v32 = vpop.f32.mrf.mxu2 }
 0x1bc   : > { %v1621_v60 = vadd.f32 %v9269_v38, %v1597_v18  ;;  %v1622_v61 = vadd.f32 %v9271_v11, %v1598_v10  ;;  %v1128_v18 = vadd.f32 %v9001_v28, %v970_v31  ;;  %v1988_v28 = vld [vmem:[%s13437_s1 + $0x38] sm:$0xff] }
 0x1bd   : > { %7431 = vmatmul.msk.f32.gmra.mxu0 %vm278_vm0, %v2000_v52  ;;  %7440 = vmatmul.msk.f32.gmra.mxu1 %vm278_vm0, %v2000_v52  ;;  %v1287_v52 = vadd.f32 %v9135_v16, %v1129_v47  ;;  %v2002_v31 = vld [vmem:[%s8243_s9 + $0x71] sm:$0xff]  ;;  %v13499_v47 = vld [vmem:[#allocation31_spill] sm:$0xff] }
 0x1be   : > { %v1639_v4 = vmax.f32 %v1621_v60, 0.0  ;;  %v1640_v7 = vmax.f32 %v1622_v61, 0.0  ;;  %v1286_v60 = vadd.f32 %v9114_v14, %v1128_v18  ;;  %2359 = vmatpush.msra.mxu1 %v2270_v25  ;;  %2220 = vmatpush.msrb.mxu3 %v1988_v28  ;;  %v972_v14 = vadd.f32 %v8956_v35, %v814_v26  ;;  %v2268_v35 = vld [vmem:[%s13437_s1 + $0x138] sm:$0xff] }
 0x1bf   : > { %v1445_v44 = vadd.f32 %v1377_v32, %v1287_v52  ;;  %v13504_v52 = vld [vmem:[#allocation38_spill] sm:$0xff] }
 0x1c0   : > { %1709 = vmatmul.f32.vlgmr.msra.gmra.mxu2 %v1639_v4  ;;  %1753 = vmatmul.f32.vlgmr.msra.gmra.mxu3 %v1640_v7  ;;  %v1444_v27 = vadd.f32 %v9267_v53, %v1286_v60  ;;  %v1130_v20 = vadd.f32 %v9030_v36, %v972_v14  ;;  %v657_v36 = vadd.f32 %v8830_v24, %v8624_v43  ;;  %v13494_v60 = vld [vmem:[#allocation14_spill] sm:$0xff] }
 0x1c1   : > { %v1529_v6 = vpop.f32.mrf.mxu0  ;;  %v1573_v51 = vpop.f32.mrf.mxu1  ;;  %2360 = vmatpush.msra.mxu1 %v2268_v35  ;;  %v816_v24 = vadd.f32 %v8887_v55, %v658_v40  ;;  %v13503_v40 = vld [vmem:[#allocation9_spill] sm:$0xff] }
 0x1c2   : > { %v1599_v5 = vadd.f32 %v1529_v6, %v1441_v0  ;;  %v1600_v17 = vadd.f32 %v1573_v51, %v1442_v2  ;;  %v1424_v12 = vpop.f32.mrf.mxu3  ;;  %v2267_v0 = vld [vmem:[%s13437_s1 + $0x130] sm:$0xff]  ;;  %v1986_v2 = vld [vmem:[%s13437_s1 + $0x28] sm:$0xff]  ;;  %v1288_v6 = vadd.f32 %v9137_v49, %v1130_v20  ;;  %v815_v43 = vadd.f32 %v8885_v54, %v657_v36 }
 0x1c3   : > { %v1380_v53 = vpop.f32.mrf.mxu2  ;;  %2316 = vmatpush.msra.mxu0 %v2267_v0  ;;  %2221 = vmatpush.msrb.mxu3 %v1986_v2  ;;  %v974_v49 = vadd.f32 %v8963_v41, %v816_v24  ;;  %v2266_v41 = vld [vmem:[%s13437_s1 + $0x128] sm:$0xff]  ;;  %v13500_v0 = vld [vmem:[#allocation2_spill] sm:$0xff] }
 0x1c4   : > { %v1623_v10 = vadd.f32 %v9269_v38, %v1599_v5  ;;  %v1624_v45 = vadd.f32 %v9271_v11, %v1600_v17  ;;  %v1446_v29 = vadd.f32 %v1421_v63, %v1288_v6  ;;  %v973_v16 = vadd.f32 %v8961_v39, %v815_v43  ;;  %v1983_v39 = vld [vmem:[%s13437_s1 + $0x10] sm:$0xff]  ;;  %2361 = vmatpush.msra.mxu1 %v2266_v41  ;;  %v13502_v36 = vld [vmem:[#allocation3_spill] sm:$0xff]  ;;  %v2261_v41 = vld [vmem:[%s13437_s1 + $0x100] sm:$0xff] }
 0x1c5   : > { %7432 = vmatmul.msk.f32.gmra.mxu0 %vm278_vm0, %v2001_v8  ;;  %7441 = vmatmul.msk.f32.gmra.mxu1 %vm278_vm0, %v2001_v8  ;;  %v1132_v55 = vadd.f32 %v9064_v59, %v974_v49  ;;  %v660_v59 = vadd.f32 %v8849_v37, %v8658_v58  ;;  %v2003_v58 = vld [vmem:[%s8243_s9 + $0x79] sm:$0xff]  ;;  %v661_v35 = vadd.f32 %v13501_v30, %v13500_v0 }
 0x1c6   : > { %v1641_v61 = vmax.f32 %v1623_v10, 0.0  ;;  %v1642_v1 = vmax.f32 %v1624_v45, 0.0  ;;  %v1131_v54 = vadd.f32 %v9062_v46, %v973_v16  ;;  %v2265_v10 = vld [vmem:[%s13437_s1 + $0x120] sm:$0xff]  ;;  %v659_v46 = vadd.f32 %v8847_v48, %v8656_v57  ;;  %2178 = vmatpush.msrb.mxu2 %v1983_v39  ;;  %v13492_v45 = vld [vmem:[#allocation36_spill] sm:$0xff]  ;;  %v1984_v37 = vld [vmem:[%s13437_s1 + $0x18] sm:$0xff] }
 0x1c7   : > { %2317 = vmatpush.msra.mxu0 %v2265_v10  ;;  %v1290_v25 = vadd.f32 %v13493_v22, %v1132_v55  ;;  %2222 = vmatpush.msrb.mxu3 %v1984_v37  ;;  %v662_v2 = vadd.f32 %v13503_v40, %v13502_v36  ;;  %v1982_v55 = vld [vmem:[%s13437_s1 + $0x8] sm:$0xff]  ;;  %v13510_v22 = vld [vmem:[#allocation32_spill] sm:$0xff] }
 0x1c8   : > { %1712 = vmatmul.f32.gmra.mxu2 %v1641_v61  ;;  %1756 = vmatmul.f32.gmra.mxu3 %v1642_v1  ;;  %v1289_v62 = vadd.f32 %v13492_v45, %v1131_v54  ;;  %v817_v61 = vadd.f32 %v13494_v60, %v659_v46  ;;  %v13495_v1 = vld [vmem:[#allocation15_spill] sm:$0xff]  ;;  %v2264_v54 = vld [vmem:[%s13437_s1 + $0x118] sm:$0xff]  ;;  %v13512_v60 = vld [vmem:[#allocation4_spill] sm:$0xff] }
 0x1c9   : > { %v1532_v15 = vpop.f32.mrf.mxu0  ;;  %v1576_v9 = vpop.f32.mrf.mxu1  ;;  %v818_v33 = vadd.f32 %v13495_v1, %v660_v59  ;;  %v1448_v48 = vadd.f32 %v1424_v12, %v1290_v25  ;;  %v13509_v46 = vld [vmem:[#allocation25_spill] sm:$0xff]  ;;  %2362 = vmatpush.msra.mxu1 %v2264_v54  ;;  %2223 = vmatpush.msrb.mxu3 %v1982_v55 }
 0x1ca   : > { %v1601_v42 = vadd.f32 %v1532_v15, %v1443_v34  ;;  %v1602_v3 = vadd.f32 %v1576_v9, %v1444_v27  ;;  %v1427_v21 = vpop.f32.mrf.mxu3  ;;  %v1447_v57 = vadd.f32 %v1380_v53, %v1289_v62  ;;  %v13496_v27 = vld [vmem:[#allocation22_spill] sm:$0xff]  ;;  %v13497_v15 = vld [vmem:[#allocation23_spill] sm:$0xff]  ;;  %v13529_v55 = vld [vmem:[#allocation45_spill] sm:$0xff] }
 0x1cb   : > { %v1383_v19 = vpop.f32.mrf.mxu2  ;;  %v975_v8 = vadd.f32 %v13496_v27, %v817_v61  ;;  %v976_v9 = vadd.f32 %v13497_v15, %v818_v33  ;;  %v13513_v61 = vld [vmem:[#allocation10_spill] sm:$0xff]  ;;  %v13514_v33 = vld [vmem:[#allocation5_spill] sm:$0xff]  ;;  %v2005_v15 = vld [vmem:[%s8243_s9 + $0x89] sm:$0xff] }
 0x1cc   : > { %v1625_v4 = vadd.f32 %v9269_v38, %v1601_v42  ;;  %v1626_v7 = vadd.f32 %v9271_v11, %v1602_v3  ;;  %v13498_v42 = vld [vmem:[#allocation30_spill] sm:$0xff]  ;;  %v663_v1 = vadd.f32 %v13513_v61, %v13512_v60  ;;  %v2592_v61 = vld [vmem:[%s13437_s1 + $0x278] sm:$0xff] }
 0x1cd   : > { %7433 = vmatmul.msk.f32.gmra.mxu0 %vm278_vm0, %v2002_v31  ;;  %7442 = vmatmul.msk.f32.gmra.mxu1 %vm278_vm0, %v2002_v31  ;;  %v1133_v3 = vadd.f32 %v13498_v42, %v975_v8  ;;  %v1134_v20 = vadd.f32 %v13499_v47, %v976_v9  ;;  %v13507_v31 = vld [vmem:[#allocation17_spill] sm:$0xff]  ;;  %v13518_v9 = vld [vmem:[#allocation18_spill] sm:$0xff] }
 0x1ce   : > { %v1643_v51 = vmax.f32 %v1625_v4, 0.0  ;;  %v1644_v56 = vmax.f32 %v1626_v7, 0.0  ;;  %v2263_v4 = vld [vmem:[%s13437_s1 + $0x110] sm:$0xff]  ;;  %v1981_v7 = vld [vmem:[%s13437_s1] sm:$0xff] }
 0x1cf   : > { %2318 = vmatpush.msra.mxu0 %v2263_v4  ;;  %2179 = vmatpush.msrb.mxu2 %v1981_v7  ;;  %v1291_v6 = vadd.f32 %v13504_v52, %v1133_v3  ;;  %v13520_v4 = vld [vmem:[#allocation26_spill] sm:$0xff] }
 0x1d0   : > { %1715 = vmatmul.f32.gmra.mxu2 %v1643_v51  ;;  %1759 = vmatmul.f32.gmra.mxu3 %v1644_v56  ;;  %v13505_v51 = vld [vmem:[#allocation39_spill] sm:$0xff] }
 0x1d1   : > { %v1535_v5 = vpop.f32.mrf.mxu0  ;;  %v1579_v17 = vpop.f32.mrf.mxu1  ;;  %v1292_v56 = vadd.f32 %v13505_v51, %v1134_v20  ;;  %2319 = vmatpush.msra.mxu0 %v2261_v41  ;;  %v2433_v20 = vld [vmem:[%s13437_s1 + $0x1f0] sm:$0xff]  ;;  %v13522_v51 = vld [vmem:[#allocation34_spill] sm:$0xff] }
 0x1d2   : > { %v1603_v50 = vadd.f32 %v1535_v5, %v1445_v44  ;;  %v1604_v18 = vadd.f32 %v1579_v17, %v1446_v29  ;;  %v13506_v44 = vld [vmem:[#allocation16_spill] sm:$0xff]  ;;  %v820_v5 = vadd.f32 %v13507_v31, %v662_v2  ;;  %v1449_v17 = vadd.f32 %v1383_v19, %v1291_v6  ;;  %v13511_v19 = vld [vmem:[#allocation33_spill] sm:$0xff]  ;;  %2470 = vmatpush.msra.mxu2 %v2433_v20  ;;  %v13524_v31 = vld [vmem:[#allocation6_spill] sm:$0xff] }
 0x1d3   : > { %v819_v29 = vadd.f32 %v13506_v44, %v661_v35  ;;  %v1450_v16 = vadd.f32 %v1427_v21, %v1292_v56  ;;  %v1386_v49 = vpop.f32.mrf.mxu2  ;;  %v13521_v35 = vld [vmem:[#allocation27_spill] sm:$0xff] }
 0x1d4   : > { %v1627_v32 = vadd.f32 %v9269_v38, %v1603_v50  ;;  %v1628_v63 = vadd.f32 %v9271_v11, %v1604_v18  ;;  %v1430_v50 = vpop.f32.mrf.mxu3  ;;  %v2004_v18 = vld [vmem:[%s8243_s9 + $0x81] sm:$0xff]  ;;  %v978_v59 = vadd.f32 %v13509_v46, %v820_v5  ;;  %v13525_v5 = vld [vmem:[#allocation12_spill] sm:$0xff]  ;;  %v13531_v46 = vld [vmem:[#allocation21_spill] sm:$0xff] }
 0x1d5   : > { %7434 = vmatmul.msk.f32.gmra.mxu0 %vm278_vm0, %v2003_v58  ;;  %7443 = vmatmul.msk.f32.gmra.mxu1 %vm278_vm0, %v2003_v58  ;;  %v13516_v58 = vld [vmem:[#allocation42_spill] sm:$0xff] }
 0x1d6   : > { %v1645_v28 = vmax.f32 %v1627_v32, 0.0  ;;  %v1646_v23 = vmax.f32 %v1628_v63, 0.0  ;;  %v13508_v32 = vld [vmem:[#allocation24_spill] sm:$0xff]  ;;  %v1136_v21 = vadd.f32 %v13511_v19, %v978_v59  ;;  %v2431_v19 = vld [vmem:[%s13437_s1 + $0x1e0] sm:$0xff] }
 0x1d7   : > { %v977_v63 = vadd.f32 %v13508_v32, %v819_v29  ;;  %2471 = vmatpush.msra.mxu2 %v2431_v19  ;;  %v2422_v19 = vld [vmem:[%s13437_s1 + $0x198] sm:$0xff] }
 0x1d8   : > { %1718 = vmatmul.f32.gmra.mxu2 %v1645_v28  ;;  %1762 = vmatmul.f32.gmra.mxu3 %v1646_v23 }
 0x1d9   : > { %v1538_v26 = vpop.f32.mrf.mxu0  ;;  %v1582_v34 = vpop.f32.mrf.mxu1  ;;  %v1135_v25 = vadd.f32 %v13510_v22, %v977_v63  ;;  %v2252_v22 = vld [vmem:[%s8243_s9 + $0x4a] sm:$0xff] }
 0x1da   : > { %v1605_v13 = vadd.f32 %v1538_v26, %v1447_v57  ;;  %v1606_v14 = vadd.f32 %v1582_v34, %v1448_v48  ;;  %v13515_v57 = vld [vmem:[#allocation11_spill] sm:$0xff] }
 0x1db   : > { %v664_v48 = vadd.f32 %v13515_v57, %v13514_v33  ;;  %v1293_v37 = vadd.f32 %v13516_v58, %v1135_v25  ;;  %v13517_v26 = vld [vmem:[#allocation43_spill] sm:$0xff]  ;;  %v1389_v52 = vpop.f32.mrf.mxu2  ;;  %v2591_v25 = vld [vmem:[%s13437_s1 + $0x270] sm:$0xff]  ;;  %v13533_v33 = vld [vmem:[#allocation29_spill] sm:$0xff] }
 0x1dc   : > { %v1629_v53 = vadd.f32 %v9269_v38, %v1605_v13  ;;  %v1630_v12 = vadd.f32 %v9271_v11, %v1606_v14  ;;  %v1294_v34 = vadd.f32 %v13517_v26, %v1136_v21  ;;  %v821_v13 = vadd.f32 %v13518_v9, %v663_v1  ;;  %v13519_v14 = vld [vmem:[#allocation19_spill] sm:$0xff]  ;;  %v1433_v6 = vpop.f32.mrf.mxu3  ;;  %v13532_v21 = vld [vmem:[#allocation28_spill] sm:$0xff]  ;;  %2628 = vmatpush.msrb.mxu0 %v2591_v25  ;;  %v9590_v25 = vld [vmem:[%s8243_s9 + $0x7a] sm:$0xff] }
 0x1dd   : > { %7435 = vmatmul.msk.f32.gmra.mxu0 %vm278_vm0, %v2004_v18  ;;  %7444 = vmatmul.msk.f32.gmra.mxu1 %vm278_vm0, %v2004_v18  ;;  %v822_v42 = vadd.f32 %v13519_v14, %v664_v48  ;;  %v1451_v3 = vadd.f32 %v1386_v49, %v1293_v37  ;;  %v13527_v49 = vld [vmem:[#allocation13_spill] sm:$0xff]  ;;  %v13528_v18 = vld [vmem:[#allocation44_spill] sm:$0xff]  ;;  %v2432_v1 = vld [vmem:[%s13437_s1 + $0x1e8] sm:$0xff] }
 0x1de   : > { %v1647_v43 = vmax.f32 %v1629_v53, 0.0  ;;  %v1648_v24 = vmax.f32 %v1630_v12, 0.0  ;;  %v1452_v47 = vadd.f32 %v1430_v50, %v1294_v34  ;;  %v2262_v53 = vld [vmem:[%s13437_s1 + $0x108] sm:$0xff]  ;;  %v2434_v12 = vld [vmem:[%s13437_s1 + $0x1f8] sm:$0xff]  ;;  %v979_v7 = vadd.f32 %v13520_v4, %v821_v13  ;;  %v13534_v37 = vld [vmem:[#allocation40_spill] sm:$0xff] }
 0x1df   : > { %v980_v36 = vadd.f32 %v13521_v35, %v822_v42  ;;  %2363 = vmatpush.msra.mxu1 %v2262_v53  ;;  %2514 = vmatpush.msra.mxu3 %v2434_v12  ;;  %v13535_v34 = vld [vmem:[#allocation41_spill] sm:$0xff]  ;;  %v13536_v14 = vld [vmem:[#allocation46_spill] sm:$0xff] }
 0x1e0   : > { %1721 = vmatmul.f32.gmra.mxu2 %v1647_v43  ;;  %1765 = vmatmul.f32.gmra.mxu3 %v1648_v24  ;;  %v1137_v56 = vadd.f32 %v13522_v51, %v979_v7  ;;  %v13523_v43 = vld [vmem:[#allocation35_spill] sm:$0xff]  ;;  %v2253_v7 = vld [vmem:[%s8243_s9 + $0x52] sm:$0xff] }
 0x1e1   : > { %v1541_v10 = vpop.f32.mrf.mxu0  ;;  %v1585_v39 = vpop.f32.mrf.mxu1  ;;  %v1138_v24 = vadd.f32 %v13523_v43, %v980_v36  ;;  %2672 = vmatpush.msrb.mxu1 %v2592_v61  ;;  %2515 = vmatpush.msra.mxu3 %v2432_v1  ;;  %v1977_v61 = vld [vmem:[%s8243_s9 + $0x70] sm:$0xff] }
 0x1e2   : > { %v1607_v45 = vadd.f32 %v1541_v10, %v1449_v17  ;;  %v1608_v62 = vadd.f32 %v1585_v39, %v1450_v16  ;;  %v665_v17 = vadd.f32 %v13525_v5, %v13524_v31  ;;  %v13526_v16 = vld [vmem:[#allocation7_spill] sm:$0xff]  ;;  %v1295_v54 = vadd.f32 %v13528_v18, %v1137_v56  ;;  %v13530_v39 = vld [vmem:[#allocation20_spill] sm:$0xff]  ;;  %v2427_v31 = vld [vmem:[%s13437_s1 + $0x1c0] sm:$0xff] }
 0x1e3   : > { %v666_v50 = vadd.f32 %v13527_v49, %v13526_v16  ;;  %v1296_v32 = vadd.f32 %v13529_v55, %v1138_v24  ;;  %v1392_v9 = vpop.f32.mrf.mxu2  ;;  %v1972_v5 = vld [vmem:[%s8243_s9 + $0x48] sm:$0xff]  ;;  %v2585_v16 = vld [vmem:[%s13437_s1 + $0x240] sm:$0xff]  ;;  %v2425_v49 = vld [vmem:[%s13437_s1 + $0x1b0] sm:$0xff] }
 0x1e4   : > { %v1631_v28 = vadd.f32 %v9269_v38, %v1607_v45  ;;  %v1632_v23 = vadd.f32 %v9271_v11, %v1608_v62  ;;  %v823_v41 = vadd.f32 %v13530_v39, %v665_v17  ;;  %v1453_v45 = vadd.f32 %v1389_v52, %v1295_v54  ;;  %v1436_v13 = vpop.f32.mrf.mxu3  ;;  %v9527_v17 = vld [vmem:[%s8243_s9 + $0x62] sm:$0xff]  ;;  %v2426_v18 = vld [vmem:[%s13437_s1 + $0x1b8] sm:$0xff]  ;;  %v1973_v54 = vld [vmem:[%s8243_s9 + $0x50] sm:$0xff] }
 0x1e5   : > { %7436 = vmatmul.msk.f32.gmra.mxu0 %vm278_vm0, %v2005_v15  ;;  %7445 = vmatmul.msk.f32.gmra.mxu1 %vm278_vm0, %v2005_v15  ;;  %v824_v59 = vadd.f32 %v13531_v46, %v666_v50  ;;  %v1454_v62 = vadd.f32 %v1433_v6, %v1296_v32  ;;  %v2586_v50 = vld [vmem:[%s13437_s1 + $0x248] sm:$0xff]  ;;  %v2583_v32 = vld [vmem:[%s13437_s1 + $0x230] sm:$0xff] }
 0x1e6   : > { %v1649_v27 = vmax.f32 %v1631_v28, 0.0  ;;  %v1650_v8 = vmax.f32 %v1632_v23, 0.0  ;;  %v981_v28 = vadd.f32 %v13532_v21, %v823_v41  ;;  %v9549_v55 = vld [vmem:[%s8243_s9 + $0x6a] sm:$0xff]  ;;  %v1974_v41 = vld [vmem:[%s8243_s9 + $0x58] sm:$0xff] }
 0x1e7   : > { %v982_v57 = vadd.f32 %v13533_v33, %v824_v59  ;;  %v2424_v39 = vld [vmem:[%s13437_s1 + $0x1a8] sm:$0xff]  ;;  %v9571_v46 = vld [vmem:[%s8243_s9 + $0x72] sm:$0xff]  ;;  %v2581_v59 = vld [vmem:[%s13437_s1 + $0x220] sm:$0xff] }
 0x1e8   : > { %1724 = vmatmul.f32.gmra.mxu2 %v1649_v27  ;;  %1768 = vmatmul.f32.gmra.mxu3 %v1650_v8  ;;  %v1139_v26 = vadd.f32 %v13534_v37, %v981_v28  ;;  %v1976_v21 = vld [vmem:[%s8243_s9 + $0x68] sm:$0xff]  ;;  %v1978_v37 = vld [vmem:[%s8243_s9 + $0x78] sm:$0xff] }
 0x1e9   : > { %v1544_v0 = vpop.f32.mrf.mxu0  ;;  %v1588_v30 = vpop.f32.mrf.mxu1  ;;  %v1140_v27 = vadd.f32 %v13535_v34, %v982_v57  ;;  %v2419_v57 = vld [vmem:[%s13437_s1 + $0x180] sm:$0xff]  ;;  %v2580_v34 = vld [vmem:[%s13437_s1 + $0x218] sm:$0xff] }
 0x1ea   : > { %v1609_v40 = vadd.f32 %v1544_v0, %v1451_v3  ;;  %v1610_v2 = vadd.f32 %v1588_v30, %v1452_v47  ;;  %v1297_v42 = vadd.f32 %v13536_v14, %v1139_v26  ;;  %v13537_v3 = vld [vmem:[#allocation47_spill] sm:$0xff]  ;;  %v2589_v0 = vld [vmem:[%s13437_s1 + $0x260] sm:$0xff]  ;;  %v2429_v30 = vld [vmem:[%s13437_s1 + $0x1d0] sm:$0xff] }
 0x1eb   : > { %v1298_v47 = vadd.f32 %v13537_v3, %v1140_v27  ;;  %2629 = vmatpush.msrb.mxu0 %v2589_v0  ;;  %2472 = vmatpush.msra.mxu2 %v2429_v30  ;;  %v2579_v26 = vld [vmem:[%s13437_s1 + $0x210] sm:$0xff]  ;;  %v1979_v14 = vld [vmem:[%s8243_s9 + $0x80] sm:$0xff] }
 0x1ec   : > { %v1633_v44 = vadd.f32 %v9269_v38, %v1609_v40  ;;  %v1634_v29 = vadd.f32 %v9271_v11, %v1610_v2  ;;  %v1455_v12 = vadd.f32 %v1392_v9, %v1297_v42  ;;  %v2590_v40 = vld [vmem:[%s13437_s1 + $0x268] sm:$0xff]  ;;  %v2430_v2 = vld [vmem:[%s13437_s1 + $0x1d8] sm:$0xff] }
 0x1ed   : > { %7464 = vmatmul.msk.f32.vlgmr.msra.gmra.mxu0 %vm278_vm0, %v2252_v22  ;;  %7473 = vmatmul.msk.f32.vlgmr.msra.gmra.mxu1 %vm278_vm0, %v2252_v22  ;;  %v1456_v4 = vadd.f32 %v1436_v13, %v1298_v47  ;;  %v1975_v22 = vld [vmem:[%s8243_s9 + $0x60] sm:$0xff]  ;;  %v2578_v9 = vld [vmem:[%s13437_s1 + $0x208] sm:$0xff] }
 0x1ee   : > { %v1651_v63 = vmax.f32 %v1633_v44, 0.0  ;;  %v1652_v10 = vmax.f32 %v1634_v29, 0.0  ;;  %2673 = vmatpush.msrb.mxu1 %v2590_v40  ;;  %2516 = vmatpush.msra.mxu3 %v2430_v2  ;;  %v9505_v44 = vld [vmem:[%s8243_s9 + $0x5a] sm:$0xff]  ;;  %v2587_v29 = vld [vmem:[%s13437_s1 + $0x250] sm:$0xff] }
 0x1ef   : > { %2630 = vmatpush.msrb.mxu0 %v2587_v29  ;;  %2473 = vmatpush.msra.mxu2 %v2427_v31  ;;  %v2568_v13 = vld [vmem:[%s8243_s9 + $0x5b] sm:$0xff]  ;;  %v2570_v40 = vld [vmem:[%s8243_s9 + $0x6b] sm:$0xff] }
 0x1f0   : > { %1727 = vmatmul.f32.gmra.mxu2 %v1651_v63  ;;  %1771 = vmatmul.f32.gmra.mxu3 %v1652_v10  ;;  %v2423_v63 = vld [vmem:[%s13437_s1 + $0x1a0] sm:$0xff]  ;;  %v2584_v10 = vld [vmem:[%s13437_s1 + $0x238] sm:$0xff] }
 0x1f1   : > { %v1547_v23 = vpop.f32.mrf.mxu0  ;;  %v1591_v60 = vpop.f32.mrf.mxu1  ;;  %2631 = vmatpush.msrb.mxu0 %v2585_v16  ;;  %2474 = vmatpush.msra.mxu2 %v2425_v49  ;;  %v9665_v47 = vld [vmem:[%s13440_s4] ss:$0 sm:$0xff] }
 0x1f2   : > { %v1611_v48 = vadd.f32 %v1547_v23, %v1453_v45  ;;  %v1612_v58 = vadd.f32 %v1591_v60, %v1454_v62  ;;  %v2421_v45 = vld [vmem:[%s13437_s1 + $0x190] sm:$0xff]  ;;  %v2582_v62 = vld [vmem:[%s13437_s1 + $0x228] sm:$0xff] }
 0x1f3   : > { %2632 = vmatpush.msrb.mxu0 %v2583_v32  ;;  %2475 = vmatpush.msra.mxu2 %v2423_v63  ;;  %v9607_v60 = vld [vmem:[%s8243_s9 + $0x82] sm:$0xff] }
 0x1f4   : > { %v1635_v8 = vadd.f32 %v9269_v38, %v1611_v48  ;;  %v1636_v15 = vadd.f32 %v9271_v11, %v1612_v58  ;;  %v2420_v48 = vld [vmem:[%s13437_s1 + $0x188] sm:$0xff] }
 0x1f5   : > { %7465 = vmatmul.msk.f32.gmra.mxu0 %vm278_vm0, %v2253_v7  ;;  %7474 = vmatmul.msk.f32.gmra.mxu1 %vm278_vm0, %v2253_v7  ;;  %v9627_v58 = vld [vmem:[%s8243_s9 + $0x8a] sm:$0xff] }
 0x1f6   : > { %v1653_v20 = vmax.f32 %v1635_v8, 0.0  ;;  %v1654_v53 = vmax.f32 %v1636_v15, 0.0  ;;  %2633 = vmatpush.msrb.mxu0 %v2581_v59  ;;  %2476 = vmatpush.msra.mxu2 %v2421_v45  ;;  %v2577_v15 = vld [vmem:[%s13437_s1 + $0x200] sm:$0xff]  ;;  %v1980_v7 = vld [vmem:[%s8243_s9 + $0x88] sm:$0xff] }
 0x1f7   : > { %v2572_v59 = vld [vmem:[%s8243_s9 + $0x7b] sm:$0xff] }
 0x1f8   : > { %1730 = vmatmul.f32.gmra.mxu2 %v1653_v20  ;;  %1774 = vmatmul.f32.gmra.mxu3 %v1654_v53  ;;  %v2569_v20 = vld [vmem:[%s8243_s9 + $0x63] sm:$0xff] }
 0x1f9   : > { %v1550_v35 = vpop.f32.mrf.mxu0  ;;  %v1594_v36 = vpop.f32.mrf.mxu1  ;;  %2477 = vmatpush.msra.mxu2 %v2419_v57  ;;  %2634 = vmatpush.msrb.mxu0 %v2579_v26  ;;  %v2748_v26 = vld [vmem:[%s13437_s1 + $0x2e8] sm:$0xff] }
 0x1fa   : > { %v1613_v52 = vadd.f32 %v1550_v35, %v1455_v12  ;;  %v1614_v6 = vadd.f32 %v1594_v36, %v1456_v4 }
 0x1fb   : > { %2635 = vmatpush.msrb.mxu0 %v2577_v15  ;;  %v2745_v15 = vld [vmem:[%s13437_s1 + $0x2d0] sm:$0xff] }
 0x1fc   : > { %v1637_v51 = vadd.f32 %v9269_v38, %v1613_v52  ;;  %v1638_v56 = vadd.f32 %v9271_v11, %v1614_v6  ;;  %v2588_v38 = vld [vmem:[%s13437_s1 + $0x258] sm:$0xff]  ;;  %v2428_v11 = vld [vmem:[%s13437_s1 + $0x1c8] sm:$0xff] }
 0x1fd   : > { %7466 = vmatmul.msk.f32.gmra.mxu0 %vm278_vm0, %v9505_v44  ;;  %7475 = vmatmul.msk.f32.gmra.mxu1 %vm278_vm0, %v9505_v44 }
 0x1fe   : > { %v1655_v43 = vmax.f32 %v1637_v51, 0.0  ;;  %v1656_v24 = vmax.f32 %v1638_v56, 0.0  ;;  %2674 = vmatpush.msrb.mxu1 %v2588_v38  ;;  %2517 = vmatpush.msra.mxu3 %v2428_v11  ;;  %v2749_v51 = vld [vmem:[%s13437_s1 + $0x2f0] sm:$0xff]  ;;  %v2750_v56 = vld [vmem:[%s13437_s1 + $0x2f8] sm:$0xff] }
 0x1ff   : > { %v2571_v11 = vld [vmem:[%s8243_s9 + $0x73] sm:$0xff] }
 0x200   : > { %1733 = vmatmul.f32.gmra.mxu2 %v1655_v43  ;;  %1777 = vmatmul.f32.gmra.mxu3 %v1656_v24 }
 0x201   : > { %2675 = vmatpush.msrb.mxu1 %v2586_v50  ;;  %2518 = vmatpush.msra.mxu3 %v2426_v18  ;;  %v2907_v18 = vld [vmem:[%s13437_s1 + $0x370] sm:$0xff] }
 0x202   : > { %2944 = vmatpush.msra.mxu0 %v2907_v18  ;;  %v2903_v18 = vld [vmem:[%s13437_s1 + $0x350] sm:$0xff] }
 0x203   : > { %2676 = vmatpush.msrb.mxu1 %v2584_v10  ;;  %2519 = vmatpush.msra.mxu3 %v2424_v39 }
 0x205   : > { %7467 = vmatmul.msk.f32.gmra.mxu0 %vm278_vm0, %v9527_v17  ;;  %7476 = vmatmul.msk.f32.gmra.mxu1 %vm278_vm0, %v9527_v17 }
 0x206   : > { %2677 = vmatpush.msrb.mxu1 %v2582_v62  ;;  %2520 = vmatpush.msra.mxu3 %v2422_v19  ;;  %v225_v62 = vlaneseq }
 0x208   : > { %7446 = vmatmul.msk.f32.vlgmr.msrb.gmra.mxu2 %vm278_vm0, %v1972_v5  ;;  %7455 = vmatmul.msk.f32.vlgmr.msrb.gmra.mxu3 %vm278_vm0, %v1972_v5 }
 0x209   : > { %2521 = vmatpush.msra.mxu3 %v2420_v48  ;;  %2678 = vmatpush.msrb.mxu1 %v2580_v34  ;;  %v9737_v48 = vand.u32 127, %v225_v62  ;;  %v2905_v34 = vld [vmem:[%s13437_s1 + $0x360] sm:$0xff] }
 0x20a   : > { %2786 = vmatpush.msrb.mxu2 %v2749_v51  ;;  %2945 = vmatpush.msra.mxu0 %v2905_v34 }
 0x20b   : > { %v9600_v28 = vpop.f32.mrf.mxu0  ;;  %2679 = vmatpush.msrb.mxu1 %v2578_v9  ;;  %2830 = vmatpush.msrb.mxu3 %v2750_v56  ;;  %13538 = vst [vmem:[#allocation36_spill] sm:$0xff] %v9737_v48  ;;  %vm227_vm3 = vcmp.lt.s32.totalorder %v9737_v48, 80 }
 0x20c   : > { %2946 = vmatpush.msra.mxu0 %v2903_v18 }
 0x20d   : > { %7468 = vmatmul.msk.f32.gmra.mxu0 %vm278_vm0, %v9549_v55  ;;  %7477 = vmatmul.msk.f32.gmra.mxu1 %vm278_vm0, %v9549_v55 }
 0x20e   : > { %2831 = vmatpush.msrb.mxu3 %v2748_v26 }
 0x210   : > { %7447 = vmatmul.msk.f32.gmra.mxu2 %vm278_vm0, %v1973_v54  ;;  %7456 = vmatmul.msk.f32.gmra.mxu3 %vm278_vm0, %v1973_v54  ;;  %v2908_v54 = vld [vmem:[%s13437_s1 + $0x378] sm:$0xff] }
 0x211   : > { %2988 = vmatpush.msra.mxu1 %v2908_v54 }
 0x213   : > { %v9614_v1 = vpop.f32.mrf.mxu0 }
 0x215   : > { %7469 = vmatmul.msk.f32.gmra.mxu0 %vm278_vm0, %v9571_v46  ;;  %7478 = vmatmul.msk.f32.gmra.mxu1 %vm278_vm0, %v9571_v46 }
 0x218   : > { %7448 = vmatmul.msk.f32.gmra.mxu2 %vm278_vm0, %v1974_v41  ;;  %7457 = vmatmul.msk.f32.gmra.mxu3 %vm278_vm0, %v1974_v41 }
 0x219   : > { %v9602_v23 = vpop.f32.mrf.mxu1 }
 0x21d   : > { %7470 = vmatmul.msk.f32.gmra.mxu0 %vm278_vm0, %v9590_v25  ;;  %7479 = vmatmul.msk.f32.gmra.mxu1 %vm278_vm0, %v9590_v25 }
 0x220   : > { %7449 = vmatmul.msk.f32.gmra.mxu2 %vm278_vm0, %v1975_v22  ;;  %7458 = vmatmul.msk.f32.gmra.mxu3 %vm278_vm0, %v1975_v22 }
 0x221   : > { %v9616_v33 = vpop.f32.mrf.mxu1 }
 0x225   : > { %7471 = vmatmul.msk.f32.gmra.mxu0 %vm278_vm0, %v9607_v60  ;;  %7480 = vmatmul.msk.f32.gmra.mxu1 %vm278_vm0, %v9607_v60 }
 0x228   : > { %7450 = vmatmul.msk.f32.gmra.mxu2 %vm278_vm0, %v1976_v21  ;;  %7459 = vmatmul.msk.f32.gmra.mxu3 %vm278_vm0, %v1976_v21 }
 0x22d   : > { %7472 = vmatmul.msk.f32.gmra.mxu0 %vm278_vm0, %v9627_v58  ;;  %7481 = vmatmul.msk.f32.gmra.mxu1 %vm278_vm0, %v9627_v58 }
 0x230   : > { %7451 = vmatmul.msk.f32.gmra.mxu2 %vm278_vm0, %v1977_v61  ;;  %7460 = vmatmul.msk.f32.gmra.mxu3 %vm278_vm0, %v1977_v61 }
 0x232   : > { %v9640_v27 = vpop.f32.mrf.mxu0  ;;  %v9642_v8 = vpop.f32.mrf.mxu1 }
 0x235   : > { %7500 = vmatmul.msk.f32.vlgmr.msrb.gmra.mxu0 %vm278_vm0, %v2568_v13  ;;  %7509 = vmatmul.msk.f32.vlgmr.msrb.gmra.mxu1 %vm278_vm0, %v2568_v13 }
 0x238   : > { %7452 = vmatmul.msk.f32.gmra.mxu2 %vm278_vm0, %v1978_v37  ;;  %7461 = vmatmul.msk.f32.gmra.mxu3 %vm278_vm0, %v1978_v37 }
 0x23a   : > { %v9656_v42 = vpop.f32.mrf.mxu0  ;;  %v9658_v3 = vpop.f32.mrf.mxu1 }
 0x23d   : > { %7501 = vmatmul.msk.f32.gmra.mxu0 %vm278_vm0, %v2569_v20  ;;  %7510 = vmatmul.msk.f32.gmra.mxu1 %vm278_vm0, %v2569_v20 }
 0x240   : > { %7453 = vmatmul.msk.f32.gmra.mxu2 %vm278_vm0, %v1979_v14  ;;  %7462 = vmatmul.msk.f32.gmra.mxu3 %vm278_vm0, %v1979_v14 }
 0x242   : > { %v9674_v30 = vpop.f32.mrf.mxu0  ;;  %v9676_v35 = vpop.f32.mrf.mxu1 }
 0x243   : > { %v1710_v53 = vpop.f32.mrf.mxu2  ;;  %v1754_v12 = vpop.f32.mrf.mxu3 }
 0x244   : > { %v1711_v4 = vadd.f32 %v9665_v47, %v1710_v53 }
 0x245   : > { %7502 = vmatmul.msk.f32.gmra.mxu0 %vm278_vm0, %v2570_v40  ;;  %7511 = vmatmul.msk.f32.gmra.mxu1 %vm278_vm0, %v2570_v40 }
 0x246   : > { %v9672_v0 = vadd.f32 %v1754_v12, %v1711_v4 }
 0x248   : > { %v7419_v36 = vmul.f32 -1.442695, %v9672_v0  ;;  %7454 = vmatmul.msk.f32.gmra.mxu2 %vm278_vm0, %v1980_v7  ;;  %7463 = vmatmul.msk.f32.gmra.mxu3 %vm278_vm0, %v1980_v7 }
 0x24a   : > { %7957 = vpow2.f32 %v7419_v36  ;;  %v9693_v24 = vpop.f32.mrf.mxu0  ;;  %v9695_v29 = vpop.f32.mrf.mxu1  ;;  %v2573_v36 = vld [vmem:[%s8243_s9 + $0x83] sm:$0xff] }
 0x24b   : > { %v1713_v2 = vpop.f32.mrf.mxu2  ;;  %v1757_v52 = vpop.f32.mrf.mxu3 }
 0x24c   : > { %v1714_v6 = vadd.f32 %v9665_v47, %v1713_v2 }
 0x24d   : > { %7503 = vmatmul.msk.f32.gmra.mxu0 %vm278_vm0, %v2571_v11  ;;  %7512 = vmatmul.msk.f32.gmra.mxu1 %vm278_vm0, %v2571_v11 }
 0x24e   : > { %v9691_v43 = vadd.f32 %v1757_v52, %v1714_v6 }
 0x250   : > { %v7958_v31 = vpop.eup %7957  ;;  %v7420_v38 = vmul.f32 -1.442695, %v9691_v43  ;;  %7482 = vmatmul.msk.f32.vlgmr.msra.gmra.mxu2 %vm278_vm0, %v9505_v44  ;;  %7491 = vmatmul.msk.f32.vlgmr.msra.gmra.mxu3 %vm278_vm0, %v9505_v44  ;;  %v2747_v44 = vld [vmem:[%s13437_s1 + $0x2e0] sm:$0xff] }
 0x251   : > { %v9703_v5 = vadd.f32 1.0, %v7958_v31  ;;  %2787 = vmatpush.msrb.mxu2 %v2747_v44 }
 0x252   : > { %7959 = vpow2.f32 %v7420_v38  ;;  %v9720_v63 = vpop.f32.mrf.mxu0  ;;  %v9722_v10 = vpop.f32.mrf.mxu1 }
 0x253   : > { %7961 = vrcp.f32 %v9703_v5  ;;  %v1716_v16 = vpop.f32.mrf.mxu2  ;;  %v1760_v49 = vpop.f32.mrf.mxu3  ;;  %v1828_v37 = vand.u32 2147483648, %v9703_v5  ;;  %v1826_v13 = vand.u32 2147483647, %v9703_v5  ;;  %2788 = vmatpush.msrb.mxu2 %v2745_v15  ;;  %vm1822_vm2 = vweird.f32 %v9703_v5 }
 0x254   : > { %v1717_v50 = vadd.f32 %v9665_v47, %v1716_v16 }
 0x255   : > { %7504 = vmatmul.msk.f32.gmra.mxu0 %vm278_vm0, %v2572_v59  ;;  %7513 = vmatmul.msk.f32.gmra.mxu1 %vm278_vm0, %v2572_v59  ;;  %v1829_v2 = vor.u32 1.1754944e-38, %v1828_v37  ;;  %vm1827_vm5 = vcmp.eq.f32.partialorder %v1826_v13, 8.507059e+37 }
 0x256   : > { %v9718_v32 = vadd.f32 %v1760_v49, %v1717_v50  ;;  %v2906_v49 = vld [vmem:[%s13437_s1 + $0x368] sm:$0xff]  ;;  %v2746_v50 = vld [vmem:[%s13437_s1 + $0x2d8] sm:$0xff] }
 0x257   : > { %2989 = vmatpush.msra.mxu1 %v2906_v49  ;;  %2832 = vmatpush.msrb.mxu3 %v2746_v50 }
 0x258   : > { %v7960_v39 = vpop.eup %7959  ;;  %v7421_v41 = vmul.f32 -1.442695, %v9718_v32  ;;  %7483 = vmatmul.msk.f32.gmra.mxu2 %vm278_vm0, %v9527_v17  ;;  %7492 = vmatmul.msk.f32.gmra.mxu3 %vm278_vm0, %v9527_v17 }
 0x259   : > { %v7962_v45 = vpop.eup %7961  ;;  %v9730_v22 = vadd.f32 1.0, %v7960_v39 }
 0x25a   : > { %v1818_v19 = vmul.f32 %v7962_v45, %v9703_v5  ;;  %7963 = vpow2.f32 %v7421_v41  ;;  %vm1823_vm1 = vweird.f32 %v7962_v45  ;;  %v9753_v20 = vpop.f32.mrf.mxu0  ;;  %v9755_v53 = vpop.f32.mrf.mxu1 }
 0x25b   : > { %7965 = vrcp.f32 %v9730_v22  ;;  %v1719_v21 = vpop.f32.mrf.mxu2  ;;  %v1763_v61 = vpop.f32.mrf.mxu3  ;;  %vm1824_vm4 = vmor %vm1822_vm2, %vm1823_vm1  ;;  %v1843_v16 = vand.u32 2147483648, %v9730_v22  ;;  %v1841_v44 = vand.u32 2147483647, %v9730_v22  ;;  %vm1837_vm7 = vweird.f32 %v9730_v22 }
 0x25c   : > { %v1819_v57 = vsub.f32 1.0, %v1818_v19  ;;  %v1720_v17 = vadd.f32 %v9665_v47, %v1719_v21  ;;  %v2574_v19 = vld [vmem:[%s8243_s9 + $0x8b] sm:$0xff] }
 0x25d   : > { %7505 = vmatmul.msk.f32.gmra.mxu0 %vm278_vm0, %v2573_v36  ;;  %7514 = vmatmul.msk.f32.gmra.mxu1 %vm278_vm0, %v2573_v36  ;;  %vm1842_vm9 = vcmp.eq.f32.partialorder %v1841_v44, 8.507059e+37  ;;  %v2739_v44 = vld [vmem:[%s13437_s1 + $0x2a0] sm:$0xff] }
 0x25e   : > { %v1820_v9 = vmul.f32 %v7962_v45, %v1819_v57  ;;  %v9751_v14 = vadd.f32 %v1763_v61, %v1720_v17  ;;  %v1844_v61 = vor.u32 1.1754944e-38, %v1843_v16  ;;  %v2742_v16 = vld [vmem:[%s13437_s1 + $0x2b8] sm:$0xff] }
 0x260   : > { %v7964_v12 = vpop.eup %7963  ;;  %v1821_v4 = vadd.f32 %v7962_v45, %v1820_v9  ;;  %v7422_v7 = vmul.f32 -1.442695, %v9751_v14  ;;  %7484 = vmatmul.msk.f32.gmra.mxu2 %vm278_vm0, %v9549_v55  ;;  %7493 = vmatmul.msk.f32.gmra.mxu3 %vm278_vm0, %v9549_v55 }
 0x261   : > { %v7966_v40 = vpop.eup %7965  ;;  %v9766_v52 = vadd.f32 1.0, %v7964_v12  ;;  %v2743_v12 = vld [vmem:[%s13437_s1 + $0x2c0] sm:$0xff] }
 0x262   : > { %v1825_v6 = vsel %vm1824_vm4, %v7962_v45, %v1821_v4  ;;  %v1833_v51 = vmul.f32 %v7966_v40, %v9730_v22  ;;  %7967 = vpow2.f32 %v7422_v7  ;;  %vm1838_vm6 = vweird.f32 %v7966_v40  ;;  %v9795_v39 = vpop.f32.mrf.mxu0  ;;  %v9797_v41 = vpop.f32.mrf.mxu1  ;;  %v2904_v4 = vld [vmem:[%s13437_s1 + $0x358] sm:$0xff]  ;;  %v2744_v7 = vld [vmem:[%s13437_s1 + $0x2c8] sm:$0xff]  ;;  %2789 = vmatpush.msrb.mxu2 %v2743_v12 }
 0x263   : > { %v1830_v55 = vsel %vm1827_vm5, %v1829_v2, %v1825_v6  ;;  %7969 = vrcp.f32 %v9766_v52  ;;  %v1722_v56 = vpop.f32.mrf.mxu2  ;;  %v1766_v31 = vpop.f32.mrf.mxu3  ;;  %vm1839_vm8 = vmor %vm1837_vm7, %vm1838_vm6  ;;  %v1858_v13 = vand.u32 2147483648, %v9766_v52  ;;  %v1856_v36 = vand.u32 2147483647, %v9766_v52  ;;  %2990 = vmatpush.msra.mxu1 %v2904_v4  ;;  %2833 = vmatpush.msrb.mxu3 %v2744_v7 }
 0x264   : > { %v1954_v38 = vsel %vm227_vm3, %v1830_v55, %v9672_v0  ;;  %v1834_v11 = vsub.f32 1.0, %v1833_v51  ;;  %v1723_v5 = vadd.f32 %v9665_v47, %v1722_v56  ;;  %vm1852_vm11 = vweird.f32 %v9766_v52 }
 0x265   : > { %1963 = vst [vmem:[%s9771_s26] sm:$0xff] %v1954_v38  ;;  %7506 = vmatmul.msk.f32.gmra.mxu0 %vm278_vm0, %v2574_v19  ;;  %7515 = vmatmul.msk.f32.gmra.mxu1 %vm278_vm0, %v2574_v19  ;;  %vm1857_vm13 = vcmp.eq.f32.partialorder %v1856_v36, 8.507059e+37 }
 0x266   : > { %v1835_v0 = vmul.f32 %v7966_v40, %v1834_v11  ;;  %v9793_v54 = vadd.f32 %v1766_v31, %v1723_v5  ;;  %v2575_v31 = vld [vmem:[%s8243_s9 + $0x93] sm:$0xff]  ;;  %v1859_v11 = vor.u32 1.1754944e-38, %v1858_v13  ;;  %2834 = vmatpush.msrb.mxu3 %v2742_v16  ;;  %v2736_v13 = vld [vmem:[%s13437_s1 + $0x288] sm:$0xff] }
 0x268   : > { %v7968_v59 = vpop.eup %7967  ;;  %v1836_v45 = vadd.f32 %v7966_v40, %v1835_v0  ;;  %v7423_v62 = vmul.f32 -1.442695, %v9793_v54  ;;  %7485 = vmatmul.msk.f32.gmra.mxu2 %vm278_vm0, %v9571_v46  ;;  %7494 = vmatmul.msk.f32.gmra.mxu3 %vm278_vm0, %v9571_v46 }
 0x269   : > { %v7970_v21 = vpop.eup %7969  ;;  %v9807_v57 = vadd.f32 1.0, %v7968_v59  ;;  %v2740_v59 = vld [vmem:[%s13437_s1 + $0x2a8] sm:$0xff] }
 0x26a   : > { %v1840_v17 = vsel %vm1839_vm8, %v7966_v40, %v1836_v45  ;;  %v1848_v22 = vmul.f32 %v7970_v21, %v9766_v52  ;;  %7971 = vpow2.f32 %v7423_v62  ;;  %vm1853_vm10 = vweird.f32 %v7970_v21  ;;  %v9831_v2 = vpop.f32.mrf.mxu0  ;;  %v9833_v6 = vpop.f32.mrf.mxu1  ;;  %v2741_v52 = vld [vmem:[%s13437_s1 + $0x2b0] sm:$0xff]  ;;  %2835 = vmatpush.msrb.mxu3 %v2740_v59  ;;  %v2896_v59 = vld [vmem:[%s13437_s1 + $0x318] sm:$0xff] }
 0x26b   : > { %v1845_v37 = vsel %vm1842_vm9, %v1844_v61, %v1840_v17  ;;  %7973 = vrcp.f32 %v9807_v57  ;;  %v1725_v46 = vpop.f32.mrf.mxu2  ;;  %v1769_v26 = vpop.f32.mrf.mxu3  ;;  %vm1854_vm12 = vmor %vm1852_vm11, %vm1853_vm10  ;;  %2790 = vmatpush.msrb.mxu2 %v2741_v52  ;;  %v2901_v61 = vld [vmem:[%s13437_s1 + $0x340] sm:$0xff]  ;;  %v2902_v17 = vld [vmem:[%s13437_s1 + $0x348] sm:$0xff]  ;;  %vm1867_vm15 = vweird.f32 %v9807_v57 }
 0x26c   : > { %v1955_v34 = vsel %vm227_vm3, %v1845_v37, %v9691_v43  ;;  %v1849_v15 = vsub.f32 1.0, %v1848_v22  ;;  %v1726_v9 = vadd.f32 %v9665_v47, %v1725_v46  ;;  %v1871_v37 = vand.u32 2147483647, %v9807_v57  ;;  %2947 = vmatpush.msra.mxu0 %v2901_v61  ;;  %2991 = vmatpush.msra.mxu1 %v2902_v17  ;;  %v2893_v61 = vld [vmem:[%s13437_s1 + $0x300] sm:$0xff]  ;;  %v2894_v17 = vld [vmem:[%s13437_s1 + $0x308] sm:$0xff] }
 0x26d   : > { %1964 = vst [vmem:[%s9771_s26 + $0x8] sm:$0xff] %v1955_v34  ;;  %7507 = vmatmul.msk.f32.gmra.mxu0 %vm278_vm0, %v2575_v31  ;;  %7516 = vmatmul.msk.f32.gmra.mxu1 %vm278_vm0, %v2575_v31 }
 0x26e   : > { %v1850_v43 = vmul.f32 %v7970_v21, %v1849_v15  ;;  %v9829_v40 = vadd.f32 %v1769_v26, %v1726_v9  ;;  %2791 = vmatpush.msrb.mxu2 %v2739_v44  ;;  %v2738_v26 = vld [vmem:[%s13437_s1 + $0x298] sm:$0xff]  ;;  %v2735_v9 = vld [vmem:[%s13437_s1 + $0x280] sm:$0xff]  ;;  %vm1872_vm2 = vcmp.eq.f32.partialorder %v1871_v37, 8.507059e+37  ;;  %v2895_v44 = vld [vmem:[%s13437_s1 + $0x310] sm:$0xff] }
 0x26f   : > { %2836 = vmatpush.msrb.mxu3 %v2738_v26  ;;  %v9958_v26 = vld [vmem:[%s8243_s9 + $0x6c] sm:$0xff] }
 0x270   : > { %v7972_v51 = vpop.eup %7971  ;;  %v1851_v55 = vadd.f32 %v7970_v21, %v1850_v43  ;;  %v7424_v56 = vmul.f32 -1.442695, %v9829_v40  ;;  %7486 = vmatmul.msk.f32.gmra.mxu2 %vm278_vm0, %v9590_v25  ;;  %7495 = vmatmul.msk.f32.gmra.mxu3 %vm278_vm0, %v9590_v25  ;;  %v2576_v43 = vld [vmem:[%s8243_s9 + $0x9b] sm:$0xff] }
 0x271   : > { %v9842_v38 = vpop.eup %7973  ;;  %v9845_v5 = vadd.f32 1.0, %v7972_v51  ;;  %2837 = vmatpush.msrb.mxu3 %v2736_v13 }
 0x272   : > { %v1855_v49 = vsel %vm1854_vm12, %v7970_v21, %v1851_v55  ;;  %v1863_v25 = vmul.f32 %v9842_v38, %v9807_v57  ;;  %7975 = vpow2.f32 %v7424_v56  ;;  %v1873_v21 = vand.u32 2147483648, %v9807_v57  ;;  %v9887_v34 = vpop.f32.mrf.mxu0  ;;  %v9889_v15 = vpop.f32.mrf.mxu1  ;;  %v2899_v57 = vld [vmem:[%s13437_s1 + $0x330] sm:$0xff]  ;;  %v2900_v56 = vld [vmem:[%s13437_s1 + $0x338] sm:$0xff] }
 0x273   : > { %v1860_v50 = vsel %vm1857_vm13, %v1859_v11, %v1855_v49  ;;  %7977 = vrcp.f32 %v9845_v5  ;;  %v1728_v18 = vpop.f32.mrf.mxu2  ;;  %v1772_v0 = vpop.f32.mrf.mxu3  ;;  %vm1868_vm14 = vweird.f32 %v9842_v38  ;;  %2948 = vmatpush.msra.mxu0 %v2899_v57  ;;  %2992 = vmatpush.msra.mxu1 %v2900_v56  ;;  %v2897_v49 = vld [vmem:[%s13437_s1 + $0x320] sm:$0xff]  ;;  %vm1882_vm5 = vweird.f32 %v9845_v5  ;;  %v2417_v56 = vld [vmem:[%s8243_s9 + $0x92] sm:$0xff] }
 0x274   : > { %v1956_v45 = vsel %vm227_vm3, %v1860_v50, %v9718_v32  ;;  %v1864_v62 = vsub.f32 1.0, %v1863_v25  ;;  %v1729_v19 = vadd.f32 %v9665_v47, %v1728_v18  ;;  %v2737_v32 = vld [vmem:[%s13437_s1 + $0x290] sm:$0xff]  ;;  %vm1869_vm1 = vmor %vm1867_vm15, %vm1868_vm14  ;;  %v1874_v51 = vor.u32 1.1754944e-38, %v1873_v21 }
 0x275   : > { %1965 = vst [vmem:[%s9771_s26 + $0x10] sm:$0xff] %v1956_v45  ;;  %2792 = vmatpush.msrb.mxu2 %v2737_v32  ;;  %7508 = vmatmul.msk.f32.gmra.mxu0 %vm278_vm0, %v2576_v43 }
 0x276   : > { %v1865_v22 = vmul.f32 %v9842_v38, %v1864_v62  ;;  %v9882_v46 = vadd.f32 %v1772_v0, %v1729_v19  ;;  %7517 = vmatmul.msk.f32.gmra.mxu1 %vm278_vm0, %v2576_v43  ;;  %2949 = vmatpush.msra.mxu0 %v2897_v49  ;;  %v1888_v0 = vand.u32 2147483648, %v9845_v5  ;;  %v3063_v49 = vld [vmem:[%s13437_s1 + $0x3e0] sm:$0xff] }
 0x277   : > { %2793 = vmatpush.msrb.mxu2 %v2735_v9 }
 0x278   : > { %v7976_v12 = vpop.eup %7975  ;;  %v1866_v4 = vadd.f32 %v9842_v38, %v1865_v22  ;;  %v7425_v7 = vmul.f32 -1.442695, %v9882_v46  ;;  %7487 = vmatmul.msk.f32.gmra.mxu2 %vm278_vm0, %v9607_v60  ;;  %7496 = vmatmul.msk.f32.gmra.mxu3 %vm278_vm0, %v9607_v60  ;;  %v1889_v13 = vor.u32 1.1754944e-38, %v1888_v0 }
 0x279   : > { %v7978_v36 = vpop.eup %7977  ;;  %v9907_v55 = vadd.f32 1.0, %v7976_v12  ;;  %2950 = vmatpush.msra.mxu0 %v2895_v44 }
 0x27a   : > { %v1870_v60 = vsel %vm1869_vm1, %v9842_v38, %v1866_v4  ;;  %v1878_v31 = vmul.f32 %v7978_v36, %v9845_v5  ;;  %7979 = vpow2.f32 %v7425_v7  ;;  %v2898_v38 = vld [vmem:[%s13437_s1 + $0x328] sm:$0xff]  ;;  %vm1883_vm4 = vweird.f32 %v7978_v36  ;;  %v9941_v19 = vpop.f32.mrf.mxu0  ;;  %v9943_v21 = vpop.f32.mrf.mxu1 }
 0x27b   : > { %v1875_v11 = vsel %vm1872_vm2, %v1874_v51, %v1870_v60  ;;  %7981 = vrcp.f32 %v9907_v55  ;;  %v1731_v52 = vpop.f32.mrf.mxu2  ;;  %v1775_v16 = vpop.f32.mrf.mxu3  ;;  %2993 = vmatpush.msra.mxu1 %v2898_v38  ;;  %vm1884_vm6 = vmor %vm1882_vm5, %vm1883_vm4  ;;  %2951 = vmatpush.msra.mxu0 %v2893_v61  ;;  %v1903_v60 = vand.u32 2147483648, %v9907_v55  ;;  %v3224_v38 = vld [vmem:[%s13437_s1 + $0x478] sm:$0xff]  ;;  %vm1897_vm9 = vweird.f32 %v9907_v55 }
 0x27c   : > { %v1957_v25 = vsel %vm227_vm3, %v1875_v11, %v9751_v14  ;;  %v1879_v50 = vsub.f32 1.0, %v1878_v31  ;;  %v1732_v18 = vadd.f32 %v9665_v47, %v1731_v52  ;;  %v1886_v14 = vand.u32 2147483647, %v9845_v5  ;;  %v3065_v31 = vld [vmem:[%s13437_s1 + $0x3f0] sm:$0xff]  ;;  %v3066_v11 = vld [vmem:[%s13437_s1 + $0x3f8] sm:$0xff] }
 0x27d   : > { %1966 = vst [vmem:[%s9771_s26 + $0x18] sm:$0xff] %v1957_v25  ;;  %2994 = vmatpush.msra.mxu1 %v2896_v59  ;;  %7536 = vmatmul.msk.f32.vlgmr.msra.gmra.mxu0 %vm278_vm0, %v9958_v26  ;;  %v3223_v52 = vld [vmem:[%s13437_s1 + $0x470] sm:$0xff]  ;;  %v3064_v25 = vld [vmem:[%s13437_s1 + $0x3e8] sm:$0xff] }
 0x27e   : > { %v1880_v45 = vmul.f32 %v7978_v36, %v1879_v50  ;;  %v9939_v62 = vadd.f32 %v1775_v16, %v1732_v18  ;;  %vm1887_vm7 = vcmp.eq.f32.partialorder %v1886_v14, 8.507059e+37  ;;  %3102 = vmatpush.msra.mxu2 %v3065_v31  ;;  %3146 = vmatpush.msra.mxu3 %v3066_v11  ;;  %v3221_v14 = vld [vmem:[%s13437_s1 + $0x460] sm:$0xff] }
 0x27f   : > { %2995 = vmatpush.msra.mxu1 %v2894_v17  ;;  %3260 = vmatpush.msrb.mxu0 %v3223_v52  ;;  %v1904_v17 = vor.u32 1.1754944e-38, %v1903_v60 }
 0x280   : > { %v7980_v32 = vpop.eup %7979  ;;  %v1881_v22 = vadd.f32 %v7978_v36, %v1880_v45  ;;  %v7426_v37 = vmul.f32 -1.442695, %v9939_v62  ;;  %7488 = vmatmul.msk.f32.gmra.mxu2 %vm278_vm0, %v9627_v58  ;;  %7497 = vmatmul.msk.f32.gmra.mxu3 %vm278_vm0, %v9627_v58  ;;  %v10006_v45 = vld [vmem:[%s8243_s9 + $0x74] sm:$0xff] }
 0x281   : > { %v7982_v9 = vpop.eup %7981  ;;  %v9961_v12 = vadd.f32 1.0, %v7980_v32  ;;  %7545 = vmatmul.msk.f32.vlgmr.msra.gmra.mxu1 %vm278_vm0, %v9958_v26  ;;  %3103 = vmatpush.msra.mxu2 %v3063_v49 }
 0x282   : > { %v1885_v5 = vsel %vm1884_vm6, %v7978_v36, %v1881_v22  ;;  %v1893_v4 = vmul.f32 %v7982_v9, %v9907_v55  ;;  %7983 = vpow2.f32 %v7426_v37  ;;  %vm1898_vm8 = vweird.f32 %v7982_v9  ;;  %v9997_v50 = vpop.f32.mrf.mxu0  ;;  %v9999_v18 = vpop.f32.mrf.mxu1  ;;  %3304 = vmatpush.msrb.mxu1 %v3224_v38  ;;  %3147 = vmatpush.msra.mxu3 %v3064_v25 }
 0x283   : > { %v1890_v7 = vsel %vm1887_vm7, %v1889_v13, %v1885_v5  ;;  %7985 = vrcp.f32 %v9961_v12  ;;  %v1734_v58 = vpop.f32.mrf.mxu2  ;;  %v1778_v43 = vpop.f32.mrf.mxu3  ;;  %vm1899_vm10 = vmor %vm1897_vm9, %vm1898_vm8  ;;  %3261 = vmatpush.msrb.mxu0 %v3221_v14  ;;  %vm1912_vm13 = vweird.f32 %v9961_v12 }
 0x284   : > { %v1958_v51 = vsel %vm227_vm3, %v1890_v7, %v9793_v54  ;;  %v1894_v36 = vsub.f32 1.0, %v1893_v4  ;;  %v1735_v57 = vadd.f32 %v9665_v47, %v1734_v58  ;;  %v1901_v47 = vand.u32 2147483647, %v9907_v55  ;;  %v3061_v55 = vld [vmem:[%s13437_s1 + $0x3d0] sm:$0xff] }
 0x285   : > { %1967 = vst [vmem:[%s9771_s26 + $0x20] sm:$0xff] %v1958_v51  ;;  %7537 = vmatmul.msk.f32.gmra.mxu0 %vm278_vm0, %v10006_v45  ;;  %3104 = vmatpush.msra.mxu2 %v3061_v55  ;;  %v3062_v51 = vld [vmem:[%s13437_s1 + $0x3d8] sm:$0xff]  ;;  %v3059_v55 = vld [vmem:[%s13437_s1 + $0x3c0] sm:$0xff] }
 0x286   : > { %v1895_v54 = vmul.f32 %v7982_v9, %v1894_v36  ;;  %v9986_v16 = vadd.f32 %v1778_v43, %v1735_v57  ;;  %vm1902_vm11 = vcmp.eq.f32.partialorder %v1901_v47, 8.507059e+37  ;;  %v3222_v43 = vld [vmem:[%s13437_s1 + $0x468] sm:$0xff]  ;;  %v1918_v36 = vand.u32 2147483648, %v9961_v12  ;;  %3148 = vmatpush.msra.mxu3 %v3062_v51  ;;  %v10052_v47 = vld [vmem:[%s8243_s9 + $0x7c] sm:$0xff] }
 0x287   : > { %3305 = vmatpush.msrb.mxu1 %v3222_v43  ;;  %3105 = vmatpush.msra.mxu2 %v3059_v55 }
 0x288   : > { %v7984_v0 = vpop.eup %7983  ;;  %v1896_v44 = vadd.f32 %v7982_v9, %v1895_v54  ;;  %v7427_v59 = vmul.f32 -1.442695, %v9986_v16  ;;  %7489 = vmatmul.msk.f32.gmra.mxu2 %vm278_vm0, %v2417_v56  ;;  %7498 = vmatmul.msk.f32.gmra.mxu3 %vm278_vm0, %v2417_v56  ;;  %v2418_v56 = vld [vmem:[%s8243_s9 + $0x9a] sm:$0xff]  ;;  %v1919_v38 = vor.u32 1.1754944e-38, %v1918_v36 }
 0x289   : > { %v7986_v61 = vpop.eup %7985  ;;  %v10012_v32 = vadd.f32 1.0, %v7984_v0  ;;  %7546 = vmatmul.msk.f32.gmra.mxu1 %vm278_vm0, %v10006_v45 }
 0x28a   : > { %v1900_v22 = vsel %vm1899_vm10, %v7982_v9, %v1896_v44  ;;  %v1908_v37 = vmul.f32 %v7986_v61, %v9961_v12  ;;  %7987 = vpow2.f32 %v7427_v59  ;;  %vm1913_vm12 = vweird.f32 %v7986_v61  ;;  %v10041_v31 = vpop.f32.mrf.mxu0  ;;  %v10043_v11 = vpop.f32.mrf.mxu1 }
 0x28b   : > { %v1905_v13 = vsel %vm1902_vm11, %v1904_v17, %v1900_v22  ;;  %7989 = vrcp.f32 %v10012_v32  ;;  %v2181_v5 = vpop.f32.mrf.mxu2  ;;  %v2225_v4 = vpop.f32.mrf.mxu3  ;;  %vm1914_vm14 = vmor %vm1912_vm13, %vm1913_vm12  ;;  %v3220_v22 = vld [vmem:[%s13437_s1 + $0x458] sm:$0xff]  ;;  %vm1927_vm2 = vweird.f32 %v10012_v32 }
 0x28c   : > { %v1959_v9 = vsel %vm227_vm3, %v1905_v13, %v9829_v40  ;;  %v1909_v7 = vsub.f32 1.0, %v1908_v37  ;;  %v2182_v58 = vadd.f32 %v2181_v5, %v9600_v28  ;;  %v2226_v57 = vadd.f32 %v2225_v4, %v9602_v23  ;;  %v2726_v5 = vld [vmem:[%s8243_s9 + $0x5c] sm:$0xff]  ;;  %3306 = vmatpush.msrb.mxu1 %v3220_v22 }
 0x28d   : > { %1968 = vst [vmem:[%s9771_s26 + $0x28] sm:$0xff] %v1959_v9  ;;  %v1916_v28 = vand.u32 2147483647, %v9961_v12  ;;  %7538 = vmatmul.msk.f32.gmra.mxu0 %vm278_vm0, %v10052_v47  ;;  %v1933_v37 = vand.u32 2147483648, %v10012_v32 }
 0x28e   : > { %v1910_v40 = vmul.f32 %v7986_v61, %v1909_v7  ;;  %v10039_v60 = vadd.f32 %v9831_v2, %v2182_v58  ;;  %v10046_v52 = vadd.f32 %v9833_v6, %v2226_v57  ;;  %v3219_v2 = vld [vmem:[%s13437_s1 + $0x450] sm:$0xff]  ;;  %v3060_v58 = vld [vmem:[%s13437_s1 + $0x3c8] sm:$0xff] }
 0x28f   : > { %3262 = vmatpush.msrb.mxu0 %v3219_v2  ;;  %vm1917_vm15 = vcmp.eq.f32.partialorder %v1916_v28, 8.507059e+37  ;;  %3149 = vmatpush.msra.mxu3 %v3060_v58  ;;  %v1934_v36 = vor.u32 1.1754944e-38, %v1933_v37 }
 0x290   : > { %v7988_v54 = vpop.eup %7987  ;;  %v1911_v23 = vadd.f32 %v7986_v61, %v1910_v40  ;;  %7490 = vmatmul.msk.f32.gmra.mxu2 %vm278_vm0, %v2418_v56  ;;  %7499 = vmatmul.msk.f32.gmra.mxu3 %vm278_vm0, %v2418_v56 }
 0x291   : > { %v7990_v49 = vpop.eup %7989  ;;  %v10057_v25 = vadd.f32 1.0, %v7988_v54  ;;  %7547 = vmatmul.msk.f32.gmra.mxu1 %vm278_vm0, %v10052_v47 }
 0x292   : > { %v1915_v6 = vsel %vm1914_vm14, %v7986_v61, %v1911_v23  ;;  %v1923_v12 = vmul.f32 %v7990_v49, %v10012_v32  ;;  %vm1928_vm1 = vweird.f32 %v7990_v49  ;;  %v10083_v9 = vpop.f32.mrf.mxu0  ;;  %v10085_v7 = vpop.f32.mrf.mxu1 }
 0x293   : > { %v1920_v0 = vsel %vm1917_vm15, %v1919_v38, %v1915_v6  ;;  %7991 = vrcp.f32 %v10057_v25  ;;  %v2184_v44 = vpop.f32.mrf.mxu2  ;;  %v2228_v59 = vpop.f32.mrf.mxu3  ;;  %vm1929_vm4 = vmor %vm1927_vm2, %vm1928_vm1  ;;  %v3057_v38 = vld [vmem:[%s13437_s1 + $0x3b0] sm:$0xff]  ;;  %v1946_v6 = vand.u32 2147483647, %v10057_v25  ;;  %vm1942_vm7 = vweird.f32 %v10057_v25 }
 0x294   : > { %v1960_v14 = vsel %vm227_vm3, %v1920_v0, %v9882_v46  ;;  %v1924_v61 = vsub.f32 1.0, %v1923_v12  ;;  %v2185_v17 = vadd.f32 %v2184_v44, %v9614_v1  ;;  %v2229_v13 = vadd.f32 %v2228_v59, %v9616_v33  ;;  %v2727_v0 = vld [vmem:[%s8243_s9 + $0x64] sm:$0xff]  ;;  %3106 = vmatpush.msra.mxu2 %v3057_v38 }
 0x295   : > { %1969 = vst [vmem:[%s9771_s26 + $0x30] sm:$0xff] %v1960_v14  ;;  %v1931_v1 = vand.u32 2147483647, %v10012_v32  ;;  %v1948_v12 = vand.u32 2147483648, %v10057_v25  ;;  %v3218_v14 = vld [vmem:[%s13437_s1 + $0x448] sm:$0xff]  ;;  %vm1947_vm9 = vcmp.eq.f32.partialorder %v1946_v6, 8.507059e+37 }
 0x296   : > { %v1925_v46 = vmul.f32 %v7990_v49, %v1924_v61  ;;  %v10081_v4 = vadd.f32 %v9887_v34, %v2185_v17  ;;  %v10091_v33 = vadd.f32 %v9889_v15, %v2229_v13  ;;  %v10097_v34 = vld [vmem:[%s8243_s9 + $0x84] sm:$0xff]  ;;  %v3058_v61 = vld [vmem:[%s13437_s1 + $0x3b8] sm:$0xff]  ;;  %3307 = vmatpush.msrb.mxu1 %v3218_v14 }
 0x297   : > { %vm1932_vm5 = vcmp.eq.f32.partialorder %v1931_v1, 8.507059e+37  ;;  %7539 = vmatmul.msk.f32.gmra.mxu0 %vm278_vm0, %v10097_v34  ;;  %3150 = vmatpush.msra.mxu3 %v3058_v61  ;;  %v3215_v1 = vld [vmem:[%s13437_s1 + $0x430] sm:$0xff] }
 0x298   : > { %v1926_v43 = vadd.f32 %v7990_v49, %v1925_v46  ;;  %7518 = vmatmul.msk.f32.vlgmr.msrb.gmra.mxu2 %vm278_vm0, %v2726_v5  ;;  %7527 = vmatmul.msk.f32.vlgmr.msrb.gmra.mxu3 %vm278_vm0, %v2726_v5 }
 0x299   : > { %v7992_v51 = vpop.eup %7991  ;;  %7548 = vmatmul.msk.f32.gmra.mxu1 %vm278_vm0, %v10097_v34 }
 0x29a   : > { %v1930_v57 = vsel %vm1929_vm4, %v7990_v49, %v1926_v43  ;;  %v1938_v15 = vmul.f32 %v7992_v51, %v10057_v25  ;;  %v3217_v49 = vld [vmem:[%s13437_s1 + $0x440] sm:$0xff]  ;;  %vm1943_vm6 = vweird.f32 %v7992_v51  ;;  %v10125_v44 = vpop.f32.mrf.mxu0  ;;  %v10127_v59 = vpop.f32.mrf.mxu1 }
 0x29b   : > { %v1935_v56 = vsel %vm1932_vm5, %v1934_v36, %v1930_v57  ;;  %v2187_v40 = vpop.f32.mrf.mxu2  ;;  %v2231_v28 = vpop.f32.mrf.mxu3  ;;  %3263 = vmatpush.msrb.mxu0 %v3217_v49  ;;  %vm1944_vm8 = vmor %vm1942_vm7, %vm1943_vm6 }
 0x29c   : > { %v1961_v32 = vsel %vm227_vm3, %v1935_v56, %v9939_v62  ;;  %v1939_v54 = vsub.f32 1.0, %v1938_v15  ;;  %v2188_v23 = vadd.f32 %v2187_v40, %v9640_v27  ;;  %v2232_v2 = vadd.f32 %v2231_v28, %v9642_v8  ;;  %v3213_v28 = vld [vmem:[%s13437_s1 + $0x420] sm:$0xff] }
 0x29d   : > { %1970 = vst [vmem:[%s9771_s26 + $0x38] sm:$0xff] %v1961_v32  ;;  %3264 = vmatpush.msrb.mxu0 %v3215_v1  ;;  %v3053_v32 = vld [vmem:[%s13437_s1 + $0x390] sm:$0xff] }
 0x29e   : > { %v1940_v27 = vmul.f32 %v7992_v51, %v1939_v54  ;;  %v10120_v8 = vadd.f32 %v9941_v19, %v2188_v23  ;;  %v10123_v62 = vadd.f32 %v9943_v21, %v2232_v2  ;;  %v10139_v19 = vld [vmem:[%s8243_s9 + $0x8c] sm:$0xff]  ;;  %v1949_v21 = vor.u32 1.1754944e-38, %v1948_v12 }
 0x29f   : > { %7540 = vmatmul.msk.f32.gmra.mxu0 %vm278_vm0, %v10139_v19  ;;  %v3211_v12 = vld [vmem:[%s13437_s1 + $0x410] sm:$0xff] }
 0x2a0   : > { %v1941_v17 = vadd.f32 %v7992_v51, %v1940_v27  ;;  %7519 = vmatmul.msk.f32.gmra.mxu2 %vm278_vm0, %v2727_v0  ;;  %7528 = vmatmul.msk.f32.gmra.mxu3 %vm278_vm0, %v2727_v0  ;;  %v3051_v0 = vld [vmem:[%s13437_s1 + $0x380] sm:$0xff] }
 0x2a1   : > { %7549 = vmatmul.msk.f32.gmra.mxu1 %vm278_vm0, %v10139_v19  ;;  %3265 = vmatpush.msrb.mxu0 %v3213_v28 }
 0x2a2   : > { %v1945_v55 = vsel %vm1944_vm8, %v7992_v51, %v1941_v17  ;;  %v10160_v51 = vpop.f32.mrf.mxu0 }
 0x2a3   : > { %v1950_v22 = vsel %vm1947_vm9, %v1949_v21, %v1945_v55  ;;  %v2190_v37 = vpop.f32.mrf.mxu2  ;;  %v2234_v13 = vpop.f32.mrf.mxu3  ;;  %3266 = vmatpush.msrb.mxu0 %v3211_v12 }
 0x2a4   : > { %v1962_v25 = vsel %vm227_vm3, %v1950_v22, %v9986_v16  ;;  %v2191_v5 = vadd.f32 %v2190_v37, %v9656_v42  ;;  %v2235_v46 = vadd.f32 %v2234_v13, %v9658_v3  ;;  %v10162_v16 = vpop.f32.mrf.mxu1  ;;  %v3055_v42 = vld [vmem:[%s13437_s1 + $0x3a0] sm:$0xff]  ;;  %v3216_v3 = vld [vmem:[%s13437_s1 + $0x438] sm:$0xff] }
 0x2a5   : > { %1971 = vst [vmem:[%s9771_s26 + $0x40] sm:$0xff] %v1962_v25  ;;  %3107 = vmatpush.msra.mxu2 %v3055_v42  ;;  %3308 = vmatpush.msrb.mxu1 %v3216_v3  ;;  %v3209_v22 = vld [vmem:[%s13437_s1 + $0x400] sm:$0xff]  ;;  %v3200_v3 = vld [vmem:[%s8243_s9 + $0x6e] sm:$0xff] }
 0x2a6   : > { %v10155_v58 = vadd.f32 %v9997_v50, %v2191_v5  ;;  %v10158_v43 = vadd.f32 %v9999_v18, %v2235_v46  ;;  %v3056_v50 = vld [vmem:[%s13437_s1 + $0x3a8] sm:$0xff]  ;;  %v10178_v18 = vld [vmem:[%s8243_s9 + $0x94] sm:$0xff]  ;;  %3267 = vmatpush.msrb.mxu0 %v3209_v22 }
 0x2a7   : > { %3151 = vmatpush.msra.mxu3 %v3056_v50  ;;  %7541 = vmatmul.msk.f32.gmra.mxu0 %vm278_vm0, %v10178_v18 }
 0x2a8   : > { %7520 = vmatmul.msk.f32.gmra.mxu2 %vm278_vm0, %v9958_v26  ;;  %7529 = vmatmul.msk.f32.gmra.mxu3 %vm278_vm0, %v9958_v26 }
 0x2a9   : > { %7550 = vmatmul.msk.f32.gmra.mxu1 %vm278_vm0, %v10178_v18  ;;  %3108 = vmatpush.msra.mxu2 %v3053_v32 }
 0x2aa   : > { %v10201_v54 = vpop.f32.mrf.mxu0 }
 0x2ab   : > { %v2193_v36 = vpop.f32.mrf.mxu2  ;;  %v2237_v57 = vpop.f32.mrf.mxu3  ;;  %3109 = vmatpush.msra.mxu2 %v3051_v0  ;;  %v3203_v0 = vld [vmem:[%s8243_s9 + $0x86] sm:$0xff] }
 0x2ac   : > { %v2194_v15 = vadd.f32 %v2193_v36, %v9674_v30  ;;  %v2238_v56 = vadd.f32 %v2237_v57, %v9676_v35  ;;  %v3214_v30 = vld [vmem:[%s13437_s1 + $0x428] sm:$0xff]  ;;  %v10203_v35 = vpop.f32.mrf.mxu1 }
 0x2ad   : > { %3309 = vmatpush.msrb.mxu1 %v3214_v30 }
 0x2ae   : > { %v10187_v40 = vadd.f32 %v10041_v31, %v2194_v15  ;;  %v10190_v26 = vadd.f32 %v10043_v11, %v2238_v56  ;;  %v10210_v31 = vld [vmem:[%s8243_s9 + $0x9c] sm:$0xff] }
 0x2af   : > { %v3054_v11 = vld [vmem:[%s13437_s1 + $0x398] sm:$0xff]  ;;  %7542 = vmatmul.msk.f32.gmra.mxu0 %vm278_vm0, %v10210_v31 }
 0x2b0   : > { %7521 = vmatmul.msk.f32.gmra.mxu2 %vm278_vm0, %v10006_v45  ;;  %7530 = vmatmul.msk.f32.gmra.mxu3 %vm278_vm0, %v10006_v45 }
 0x2b1   : > { %3152 = vmatpush.msra.mxu3 %v3054_v11  ;;  %7551 = vmatmul.msk.f32.gmra.mxu1 %vm278_vm0, %v10210_v31 }
 0x2b2   : > { %v2637_v27 = vpop.f32.mrf.mxu0 }
 0x2b3   : > { %v2196_v23 = vpop.f32.mrf.mxu2  ;;  %v2240_v2 = vpop.f32.mrf.mxu3 }
 0x2b4   : > { %v2197_v49 = vadd.f32 %v2196_v23, %v9693_v24  ;;  %v2241_v45 = vadd.f32 %v2240_v2, %v9695_v29  ;;  %v2681_v14 = vpop.f32.mrf.mxu1  ;;  %v2891_v24 = vld [vmem:[%s8243_s9 + $0xa4] sm:$0xff]  ;;  %v3212_v29 = vld [vmem:[%s13437_s1 + $0x418] sm:$0xff]  ;;  %v3042_v2 = vld [vmem:[%s8243_s9 + $0x6d] sm:$0xff] }
 0x2b5   : > { %3310 = vmatpush.msrb.mxu1 %v3212_v29 }
 0x2b6   : > { %v10222_v38 = vadd.f32 %v10083_v9, %v2197_v49  ;;  %v10225_v6 = vadd.f32 %v10085_v7, %v2241_v45  ;;  %v3052_v9 = vld [vmem:[%s13437_s1 + $0x388] sm:$0xff] }
 0x2b7   : > { %3153 = vmatpush.msra.mxu3 %v3052_v9  ;;  %7543 = vmatmul.msk.f32.gmra.mxu0 %vm278_vm0, %v2891_v24 }
 0x2b8   : > { %7522 = vmatmul.msk.f32.gmra.mxu2 %vm278_vm0, %v10052_v47  ;;  %7531 = vmatmul.msk.f32.gmra.mxu3 %vm278_vm0, %v10052_v47 }
 0x2b9   : > { %7552 = vmatmul.msk.f32.gmra.mxu1 %vm278_vm0, %v2891_v24  ;;  %v3043_v24 = vld [vmem:[%s8243_s9 + $0x75] sm:$0xff] }
 0x2ba   : > { %v2640_v37 = vpop.f32.mrf.mxu0 }
 0x2bb   : > { %v2199_v7 = vpop.f32.mrf.mxu2  ;;  %v2243_v61 = vpop.f32.mrf.mxu3 }
 0x2bc   : > { %v2200_v47 = vadd.f32 %v2199_v7, %v9720_v63  ;;  %v2244_v17 = vadd.f32 %v2243_v61, %v9722_v10  ;;  %v2684_v13 = vpop.f32.mrf.mxu1  ;;  %v2892_v63 = vld [vmem:[%s8243_s9 + $0xac] sm:$0xff] }
 0x2bd   : > { %v3210_v10 = vld [vmem:[%s13437_s1 + $0x408] sm:$0xff] }
 0x2be   : > { %v10249_v21 = vadd.f32 %v10125_v44, %v2200_v47  ;;  %v10252_v55 = vadd.f32 %v10127_v59, %v2244_v17  ;;  %3311 = vmatpush.msrb.mxu1 %v3210_v10  ;;  %v3204_v47 = vld [vmem:[%s8243_s9 + $0x8e] sm:$0xff] }
 0x2bf   : > { %7544 = vmatmul.msk.f32.gmra.mxu0 %vm278_vm0, %v2892_v63 }
 0x2c0   : > { %7523 = vmatmul.msk.f32.gmra.mxu2 %vm278_vm0, %v10097_v34  ;;  %7532 = vmatmul.msk.f32.gmra.mxu3 %vm278_vm0, %v10097_v34 }
 0x2c1   : > { %7553 = vmatmul.msk.f32.gmra.mxu1 %vm278_vm0, %v2892_v63 }
 0x2c2   : > { %v2643_v1 = vpop.f32.mrf.mxu0 }
 0x2c3   : > { %v2202_v44 = vpop.f32.mrf.mxu2  ;;  %v2246_v59 = vpop.f32.mrf.mxu3 }
 0x2c4   : > { %v2203_v25 = vadd.f32 %v2202_v44, %v9753_v20  ;;  %v2247_v5 = vadd.f32 %v2246_v59, %v9755_v53  ;;  %v2687_v42 = vpop.f32.mrf.mxu1  ;;  %v3045_v44 = vld [vmem:[%s8243_s9 + $0x85] sm:$0xff] }
 0x2c6   : > { %v10270_v46 = vadd.f32 %v10160_v51, %v2203_v25  ;;  %v10273_v34 = vadd.f32 %v10162_v16, %v2247_v5  ;;  %v3206_v5 = vld [vmem:[%s8243_s9 + $0x9e] sm:$0xff] }
 0x2c7   : > { %7572 = vmatmul.msk.f32.vlgmr.msrb.gmra.mxu0 %vm278_vm0, %v3200_v3 }
 0x2c8   : > { %13539 = vst [vmem:[#allocation37_spill] sm:$0xff] %v10270_v46  ;;  %7524 = vmatmul.msk.f32.gmra.mxu2 %vm278_vm0, %v10139_v19  ;;  %7533 = vmatmul.msk.f32.gmra.mxu3 %vm278_vm0, %v10139_v19 }
 0x2c9   : > { %13540 = vst [vmem:[#allocation14_spill] sm:$0xff] %v10273_v34  ;;  %7581 = vmatmul.msk.f32.vlgmr.msrb.gmra.mxu1 %vm278_vm0, %v3200_v3  ;;  %v3046_v3 = vld [vmem:[%s8243_s9 + $0x8d] sm:$0xff] }
 0x2ca   : > { %v10290_v57 = vpop.f32.mrf.mxu0 }
 0x2cb   : > { %v2205_v50 = vpop.f32.mrf.mxu2  ;;  %v2249_v20 = vpop.f32.mrf.mxu3 }
 0x2cc   : > { %v2206_v53 = vadd.f32 %v2205_v50, %v9795_v39  ;;  %v2250_v51 = vadd.f32 %v2249_v20, %v9797_v41  ;;  %v10292_v19 = vpop.f32.mrf.mxu1  ;;  %v3201_v39 = vld [vmem:[%s8243_s9 + $0x76] sm:$0xff] }
 0x2ce   : > { %v10285_v16 = vadd.f32 %v10201_v54, %v2206_v53  ;;  %v10288_v36 = vadd.f32 %v10203_v35, %v2250_v51  ;;  %v3207_v53 = vld [vmem:[%s8243_s9 + $0xa6] sm:$0xff] }
 0x2cf   : > { %7573 = vmatmul.msk.f32.gmra.mxu0 %vm278_vm0, %v3201_v39 }
 0x2d0   : > { %13541 = vst [vmem:[#allocation15_spill] sm:$0xff] %v10285_v16  ;;  %7525 = vmatmul.msk.f32.gmra.mxu2 %vm278_vm0, %v10178_v18  ;;  %7534 = vmatmul.msk.f32.gmra.mxu3 %vm278_vm0, %v10178_v18  ;;  %v3202_v18 = vld [vmem:[%s8243_s9 + $0x7e] sm:$0xff] }
 0x2d1   : > { %13542 = vst [vmem:[#allocation22_spill] sm:$0xff] %v10288_v36  ;;  %7582 = vmatmul.msk.f32.gmra.mxu1 %vm278_vm0, %v3201_v39 }
 0x2d2   : > { %v10307_v54 = vpop.f32.mrf.mxu0 }
 0x2d3   : > { %v2479_v15 = vpop.f32.mrf.mxu2  ;;  %v2523_v41 = vpop.f32.mrf.mxu3 }
 0x2d4   : > { %v2550_v56 = vadd.f32 %v2479_v15, %v10039_v60  ;;  %v2551_v28 = vadd.f32 %v2523_v41, %v10046_v52  ;;  %v10309_v35 = vpop.f32.mrf.mxu1  ;;  %v3415_v15 = vld [vmem:[%s13439_s3 + $0x78] sm:$0xff] }
 0x2d5   : > { %v3047_v41 = vld [vmem:[%s8243_s9 + $0x95] sm:$0xff]  ;;  %3436 = vmatpush.msrb.mxu2 %v3415_v15 }
 0x2d6   : > { %v10303_v32 = vadd.f32 %v2637_v27, %v2550_v56  ;;  %v10305_v30 = vadd.f32 %v2681_v14, %v2551_v28  ;;  %v3431_v56 = vld [vmem:[%s13439_s3 + $0xf8] sm:$0xff]  ;;  %v3414_v28 = vld [vmem:[%s13439_s3 + $0x70] sm:$0xff] }
 0x2d7   : > { %7574 = vmatmul.msk.f32.gmra.mxu0 %vm278_vm0, %v3202_v18  ;;  %3480 = vmatpush.msrb.mxu3 %v3431_v56  ;;  %v3411_v15 = vld [vmem:[%s13439_s3 + $0x58] sm:$0xff] }
 0x2d8   : > { %7526 = vmatmul.msk.f32.gmra.mxu2 %vm278_vm0, %v10210_v31  ;;  %7535 = vmatmul.msk.f32.gmra.mxu3 %vm278_vm0, %v10210_v31  ;;  %v3427_v56 = vld [vmem:[%s13439_s3 + $0xd8] sm:$0xff] }
 0x2d9   : > { %7583 = vmatmul.msk.f32.gmra.mxu1 %vm278_vm0, %v3202_v18  ;;  %3437 = vmatpush.msrb.mxu2 %v3414_v28 }
 0x2da   : > { %v10325_v12 = vpop.f32.mrf.mxu0 }
 0x2db   : > { %v2482_v11 = vpop.f32.mrf.mxu2  ;;  %v2526_v60 = vpop.f32.mrf.mxu3 }
 0x2dc   : > { %v2552_v52 = vadd.f32 %v2482_v11, %v10081_v4  ;;  %v2553_v23 = vadd.f32 %v2526_v60, %v10091_v33  ;;  %v10327_v31 = vpop.f32.mrf.mxu1  ;;  %v3208_v60 = vld [vmem:[%s8243_s9 + $0xae] sm:$0xff] }
 0x2de   : > { %v10321_v49 = vadd.f32 %v2640_v37, %v2552_v52  ;;  %v10323_v45 = vadd.f32 %v2684_v13, %v2553_v23  ;;  %v3205_v13 = vld [vmem:[%s8243_s9 + $0x96] sm:$0xff] }
 0x2df   : > { %7575 = vmatmul.msk.f32.gmra.mxu0 %vm278_vm0, %v3203_v0 }
 0x2e0   : > { %7554 = vmatmul.msk.f32.vlgmr.msra.gmra.mxu2 %vm278_vm0, %v3042_v2  ;;  %7563 = vmatmul.msk.f32.vlgmr.msra.gmra.mxu3 %vm278_vm0, %v3042_v2  ;;  %v3430_v2 = vld [vmem:[%s13439_s3 + $0xf0] sm:$0xff] }
 0x2e1   : > { %7584 = vmatmul.msk.f32.gmra.mxu1 %vm278_vm0, %v3203_v0  ;;  %v3761_v0 = vld [vmem:[%s13437_s1 + $0xf0] sm:$0xff]  ;;  %3481 = vmatpush.msrb.mxu3 %v3430_v2 }
 0x2e2   : > { %v10341_v7 = vpop.f32.mrf.mxu0  ;;  %3798 = vmatpush.msra.mxu0 %v3761_v0 }
 0x2e3   : > { %v2485_v27 = vpop.f32.mrf.mxu2  ;;  %v2529_v4 = vpop.f32.mrf.mxu3  ;;  %13543 = vst [vmem:[#allocation23_spill] sm:$0xff] %v10341_v7 }
 0x2e4   : > { %v2554_v33 = vadd.f32 %v2485_v27, %v10120_v8  ;;  %v2555_v14 = vadd.f32 %v2529_v4, %v10123_v62  ;;  %v10343_v61 = vpop.f32.mrf.mxu1  ;;  %v3044_v62 = vld [vmem:[%s8243_s9 + $0x7d] sm:$0xff]  ;;  %v3413_v4 = vld [vmem:[%s13439_s3 + $0x68] sm:$0xff] }
 0x2e5   : > { %13544 = vst [vmem:[#allocation30_spill] sm:$0xff] %v10343_v61  ;;  %v3048_v27 = vld [vmem:[%s8243_s9 + $0x9d] sm:$0xff]  ;;  %3438 = vmatpush.msrb.mxu2 %v3413_v4  ;;  %v3050_v4 = vld [vmem:[%s8243_s9 + $0xad] sm:$0xff] }
 0x2e6   : > { %v10337_v29 = vadd.f32 %v2643_v1, %v2554_v33  ;;  %v10339_v9 = vadd.f32 %v2687_v42, %v2555_v14  ;;  %v3762_v33 = vld [vmem:[%s13437_s1 + $0xf8] sm:$0xff]  ;;  %v3429_v14 = vld [vmem:[%s13439_s3 + $0xe8] sm:$0xff] }
 0x2e7   : > { %7576 = vmatmul.msk.f32.gmra.mxu0 %vm278_vm0, %v3204_v47  ;;  %3842 = vmatpush.msra.mxu1 %v3762_v33  ;;  %v3426_v33 = vld [vmem:[%s13439_s3 + $0xd0] sm:$0xff] }
 0x2e8   : > { %7555 = vmatmul.msk.f32.gmra.mxu2 %vm278_vm0, %v3043_v24  ;;  %7564 = vmatmul.msk.f32.gmra.mxu3 %vm278_vm0, %v3043_v24  ;;  %v3412_v24 = vld [vmem:[%s13439_s3 + $0x60] sm:$0xff] }
 0x2e9   : > { %7585 = vmatmul.msk.f32.gmra.mxu1 %vm278_vm0, %v3204_v47  ;;  %3482 = vmatpush.msrb.mxu3 %v3429_v14  ;;  %v3757_v14 = vld [vmem:[%s13437_s1 + $0xd0] sm:$0xff] }
 0x2ea   : > { %v10357_v22 = vpop.f32.mrf.mxu0  ;;  %3439 = vmatpush.msrb.mxu2 %v3412_v24  ;;  %v3409_v24 = vld [vmem:[%s13439_s3 + $0x48] sm:$0xff] }
 0x2eb   : > { %v10348_v17 = vpop.f32.mrf.mxu2  ;;  %v10350_v8 = vpop.f32.mrf.mxu3  ;;  %13545 = vst [vmem:[#allocation31_spill] sm:$0xff] %v10357_v22  ;;  %v3419_v22 = vld [vmem:[%s13439_s3 + $0x98] sm:$0xff] }
 0x2ec   : > { %v10359_v37 = vpop.f32.mrf.mxu1  ;;  %3440 = vmatpush.msrb.mxu2 %v3411_v15 }
 0x2ed   : > { %13546 = vst [vmem:[#allocation2_spill] sm:$0xff] %v10359_v37  ;;  %v3752_v37 = vld [vmem:[%s13437_s1 + $0xa8] sm:$0xff] }
 0x2ef   : > { %7577 = vmatmul.msk.f32.gmra.mxu0 %vm278_vm0, %v3205_v13 }
 0x2f0   : > { %7556 = vmatmul.msk.f32.gmra.mxu2 %vm278_vm0, %v3044_v62  ;;  %7565 = vmatmul.msk.f32.gmra.mxu3 %vm278_vm0, %v3044_v62 }
 0x2f1   : > { %7586 = vmatmul.msk.f32.gmra.mxu1 %vm278_vm0, %v3205_v13 }
 0x2f2   : > { %v10371_v59 = vpop.f32.mrf.mxu0 }
 0x2f3   : > { %v10362_v63 = vpop.f32.mrf.mxu2  ;;  %v10364_v10 = vpop.f32.mrf.mxu3  ;;  %13547 = vst [vmem:[#allocation8_spill] sm:$0xff] %v10371_v59 }
 0x2f4   : > { %v10373_v25 = vpop.f32.mrf.mxu1 }
 0x2f5   : > { %13548 = vst [vmem:[#allocation3_spill] sm:$0xff] %v10373_v25 }
 0x2f7   : > { %7578 = vmatmul.msk.f32.gmra.mxu0 %vm278_vm0, %v3206_v5 }
 0x2f8   : > { %7557 = vmatmul.msk.f32.gmra.mxu2 %vm278_vm0, %v3045_v44  ;;  %7566 = vmatmul.msk.f32.gmra.mxu3 %vm278_vm0, %v3045_v44 }
 0x2f9   : > { %7587 = vmatmul.msk.f32.gmra.mxu1 %vm278_vm0, %v3206_v5  ;;  %v3428_v5 = vld [vmem:[%s13439_s3 + $0xe0] sm:$0xff] }
 0x2fa   : > { %v10385_v50 = vpop.f32.mrf.mxu0  ;;  %3483 = vmatpush.msrb.mxu3 %v3428_v5  ;;  %v3758_v5 = vld [vmem:[%s13437_s1 + $0xd8] sm:$0xff] }
 0x2fb   : > { %v10376_v1 = vpop.f32.mrf.mxu2  ;;  %v10378_v42 = vpop.f32.mrf.mxu3 }
 0x2fc   : > { %3484 = vmatpush.msrb.mxu3 %v3427_v56 }
 0x2fe   : > { %v10387_v20 = vpop.f32.mrf.mxu1  ;;  %3485 = vmatpush.msrb.mxu3 %v3426_v33  ;;  %v3755_v33 = vld [vmem:[%s13437_s1 + $0xc0] sm:$0xff] }
 0x2ff   : > { %7579 = vmatmul.msk.f32.gmra.mxu0 %vm278_vm0, %v3207_v53 }
 0x300   : > { %7558 = vmatmul.msk.f32.gmra.mxu2 %vm278_vm0, %v3046_v3  ;;  %7567 = vmatmul.msk.f32.gmra.mxu3 %vm278_vm0, %v3046_v3  ;;  %v3049_v3 = vld [vmem:[%s8243_s9 + $0xa5] sm:$0xff] }
 0x301   : > { %7588 = vmatmul.msk.f32.gmra.mxu1 %vm278_vm0, %v3207_v53  ;;  %v3759_v53 = vld [vmem:[%s13437_s1 + $0xe0] sm:$0xff] }
 0x302   : > { %v10408_v18 = vpop.f32.mrf.mxu0  ;;  %3799 = vmatpush.msra.mxu0 %v3759_v53 }
 0x303   : > { %v10390_v51 = vpop.f32.mrf.mxu2  ;;  %v10392_v39 = vpop.f32.mrf.mxu3 }
 0x304   : > { %13549 = vst [vmem:[#allocation9_spill] sm:$0xff] %v10392_v39  ;;  %3800 = vmatpush.msra.mxu0 %v3757_v14  ;;  %v3407_v14 = vld [vmem:[%s13439_s3 + $0x38] sm:$0xff] }
 0x306   : > { %v10410_v11 = vpop.f32.mrf.mxu1  ;;  %3801 = vmatpush.msra.mxu0 %v3755_v33  ;;  %v3422_v33 = vld [vmem:[%s13439_s3 + $0xb0] sm:$0xff] }
 0x307   : > { %7580 = vmatmul.msk.f32.gmra.mxu0 %vm278_vm0, %v3208_v60 }
 0x308   : > { %7559 = vmatmul.msk.f32.gmra.mxu2 %vm278_vm0, %v3047_v41  ;;  %7568 = vmatmul.msk.f32.gmra.mxu3 %vm278_vm0, %v3047_v41  ;;  %v3760_v41 = vld [vmem:[%s13437_s1 + $0xe8] sm:$0xff] }
 0x309   : > { %7589 = vmatmul.msk.f32.gmra.mxu1 %vm278_vm0, %v3208_v60 }
 0x30a   : > { %v10440_v47 = vpop.f32.mrf.mxu0  ;;  %3843 = vmatpush.msra.mxu1 %v3760_v41 }
 0x30b   : > { %v10413_v52 = vpop.f32.mrf.mxu2  ;;  %v10415_v23 = vpop.f32.mrf.mxu3 }
 0x30c   : > { %13550 = vst [vmem:[#allocation38_spill] sm:$0xff] %v10413_v52  ;;  %3844 = vmatpush.msra.mxu1 %v3758_v5  ;;  %v3423_v5 = vld [vmem:[%s13439_s3 + $0xb8] sm:$0xff] }
 0x30d   : > { %13551 = vst [vmem:[#allocation39_spill] sm:$0xff] %v10415_v23 }
 0x30e   : > { %v10442_v62 = vpop.f32.mrf.mxu1 }
 0x310   : > { %7560 = vmatmul.msk.f32.gmra.mxu2 %vm278_vm0, %v3048_v27  ;;  %7569 = vmatmul.msk.f32.gmra.mxu3 %vm278_vm0, %v3048_v27  ;;  %v3410_v27 = vld [vmem:[%s13439_s3 + $0x50] sm:$0xff] }
 0x311   : > { %3441 = vmatpush.msrb.mxu2 %v3410_v27  ;;  %v3408_v27 = vld [vmem:[%s13439_s3 + $0x40] sm:$0xff] }
 0x313   : > { %v10444_v13 = vpop.f32.mrf.mxu2  ;;  %v10446_v44 = vpop.f32.mrf.mxu3  ;;  %3442 = vmatpush.msrb.mxu2 %v3409_v24  ;;  %v3756_v24 = vld [vmem:[%s13437_s1 + $0xc8] sm:$0xff] }
 0x314   : > { %13552 = vst [vmem:[#allocation16_spill] sm:$0xff] %v10444_v13  ;;  %v10466_v28 = vpop.f32.mrf.mxu0  ;;  %3845 = vmatpush.msra.mxu1 %v3756_v24  ;;  %v3405_v24 = vld [vmem:[%s13439_s3 + $0x28] sm:$0xff] }
 0x315   : > { %13553 = vst [vmem:[#allocation17_spill] sm:$0xff] %v10446_v44  ;;  %3443 = vmatpush.msrb.mxu2 %v3408_v27 }
 0x316   : > { %v10468_v60 = vpop.f32.mrf.mxu1 }
 0x317   : > { %3444 = vmatpush.msrb.mxu2 %v3407_v14  ;;  %v3753_v14 = vld [vmem:[%s13437_s1 + $0xb0] sm:$0xff] }
 0x318   : > { %7561 = vmatmul.msk.f32.gmra.mxu2 %vm278_vm0, %v3049_v3  ;;  %7570 = vmatmul.msk.f32.gmra.mxu3 %vm278_vm0, %v3049_v3  ;;  %v3425_v3 = vld [vmem:[%s13439_s3 + $0xc8] sm:$0xff] }
 0x319   : > { %3486 = vmatpush.msrb.mxu3 %v3425_v3  ;;  %3802 = vmatpush.msra.mxu0 %v3753_v14  ;;  %v3420_v14 = vld [vmem:[%s13439_s3 + $0xa0] sm:$0xff] }
 0x31b   : > { %v10470_v2 = vpop.f32.mrf.mxu2  ;;  %v10472_v0 = vpop.f32.mrf.mxu3 }
 0x31c   : > { %v10495_v53 = vpop.f32.mrf.mxu0  ;;  %v2866_v61 = vadd.f32 %v10470_v2, %v10303_v32  ;;  %v2867_v7 = vadd.f32 %v10472_v0, %v10305_v30  ;;  %v3733_v32 = vld [vmem:[%s13437_s1 + $0x58] sm:$0xff] }
 0x31e   : > { %v10497_v15 = vpop.f32.mrf.mxu1  ;;  %v3024_v30 = vadd.f32 %v10385_v50, %v2866_v61  ;;  %v3025_v2 = vadd.f32 %v10387_v20, %v2867_v7 }
 0x320   : > { %7562 = vmatmul.msk.f32.gmra.mxu2 %vm278_vm0, %v3050_v4  ;;  %7571 = vmatmul.msk.f32.gmra.mxu3 %vm278_vm0, %v3050_v4  ;;  %v3424_v4 = vld [vmem:[%s13439_s3 + $0xc0] sm:$0xff] }
 0x321   : > { %3487 = vmatpush.msrb.mxu3 %v3424_v4  ;;  %v3406_v4 = vld [vmem:[%s13439_s3 + $0x30] sm:$0xff] }
 0x322   : > { %3445 = vmatpush.msrb.mxu2 %v3406_v4  ;;  %v3421_v4 = vld [vmem:[%s13439_s3 + $0xa8] sm:$0xff] }
 0x323   : > { %v10499_v41 = vpop.f32.mrf.mxu2  ;;  %v10501_v56 = vpop.f32.mrf.mxu3  ;;  %3488 = vmatpush.msrb.mxu3 %v3423_v5  ;;  %v3754_v5 = vld [vmem:[%s13437_s1 + $0xb8] sm:$0xff] }
 0x324   : > { %v10521_v3 = vpop.f32.mrf.mxu0  ;;  %3846 = vmatpush.msra.mxu1 %v3754_v5  ;;  %3446 = vmatpush.msrb.mxu2 %v3405_v24  ;;  %v3751_v24 = vld [vmem:[%s13437_s1 + $0xa0] sm:$0xff]  ;;  %v3403_v5 = vld [vmem:[%s13439_s3 + $0x18] sm:$0xff]  ;;  %v2868_v61 = vadd.f32 %v10499_v41, %v10321_v49  ;;  %v2869_v7 = vadd.f32 %v10501_v56, %v10323_v45 }
 0x325   : > { %13554 = vst [vmem:[#allocation24_spill] sm:$0xff] %v10521_v3  ;;  %3489 = vmatpush.msrb.mxu3 %v3422_v33  ;;  %v3404_v33 = vld [vmem:[%s13439_s3 + $0x20] sm:$0xff]  ;;  %3803 = vmatpush.msra.mxu0 %v3751_v24  ;;  %v3402_v24 = vld [vmem:[%s13439_s3 + $0x10] sm:$0xff]  ;;  %v4013_v49 = vld [vmem:[%s13437_s1 + $0x158] sm:$0xff] }
 0x326   : > { %v10523_v27 = vpop.f32.mrf.mxu1  ;;  %3447 = vmatpush.msrb.mxu2 %v3404_v33  ;;  %3847 = vmatpush.msra.mxu1 %v3752_v37  ;;  %v3026_v45 = vadd.f32 %v10408_v18, %v2868_v61  ;;  %v3027_v41 = vadd.f32 %v10410_v11, %v2869_v7 }
 0x327   : > { %13555 = vst [vmem:[#allocation25_spill] sm:$0xff] %v10523_v27  ;;  %3490 = vmatpush.msrb.mxu3 %v3421_v4 }
 0x328   : > { %3448 = vmatpush.msrb.mxu2 %v3403_v5  ;;  %v3418_v5 = vld [vmem:[%s13439_s3 + $0x90] sm:$0xff] }
 0x329   : > { %3491 = vmatpush.msrb.mxu3 %v3420_v14 }
 0x32a   : > { %3449 = vmatpush.msrb.mxu2 %v3402_v24  ;;  %v3400_v24 = vld [vmem:[%s13439_s3] sm:$0xff] }
 0x32b   : > { %v10525_v48 = vpop.f32.mrf.mxu2  ;;  %v10527_v25 = vpop.f32.mrf.mxu3  ;;  %3492 = vmatpush.msrb.mxu3 %v3419_v22 }
 0x32c   : > { %v10548_v36 = vpop.f32.mrf.mxu0  ;;  %v2870_v18 = vadd.f32 %v10525_v48, %v10337_v29  ;;  %v2871_v11 = vadd.f32 %v10527_v25, %v10339_v9  ;;  %v4010_v48 = vld [vmem:[%s13437_s1 + $0x140] sm:$0xff]  ;;  %v3728_v29 = vld [vmem:[%s13437_s1 + $0x30] sm:$0xff] }
 0x32d   : > { %13556 = vst [vmem:[#allocation32_spill] sm:$0xff] %v10548_v36  ;;  %3493 = vmatpush.msrb.mxu3 %v3418_v5  ;;  %v3416_v5 = vld [vmem:[%s13439_s3 + $0x80] sm:$0xff] }
 0x32e   : > { %v10550_v13 = vpop.f32.mrf.mxu1  ;;  %v3028_v9 = vadd.f32 %v10440_v47, %v2870_v18 }
 0x32f   : > { %13557 = vst [vmem:[#allocation33_spill] sm:$0xff] %v10550_v13  ;;  %v3749_v13 = vld [vmem:[%s13437_s1 + $0x90] sm:$0xff] }
 0x330   : > { %3804 = vmatpush.msra.mxu0 %v3749_v13  ;;  %v3417_v13 = vld [vmem:[%s13439_s3 + $0x88] sm:$0xff] }
 0x331   : > { %3494 = vmatpush.msrb.mxu3 %v3417_v13  ;;  %v3736_v13 = vld [vmem:[%s13437_s1 + $0x70] sm:$0xff] }
 0x333   : > { %v10544_v59 = vpop.f32.mrf.mxu2  ;;  %v10546_v44 = vpop.f32.mrf.mxu3  ;;  %3495 = vmatpush.msrb.mxu3 %v3416_v5 }
 0x334   : > { %v10577_v33 = vpop.f32.mrf.mxu0 }
 0x335   : > { %13558 = vst [vmem:[#allocation4_spill] sm:$0xff] %v10577_v33  ;;  %v3750_v33 = vld [vmem:[%s13437_s1 + $0x98] sm:$0xff] }
 0x336   : > { %v10579_v14 = vpop.f32.mrf.mxu1  ;;  %3848 = vmatpush.msra.mxu1 %v3750_v33 }
 0x337   : > { %13559 = vst [vmem:[#allocation10_spill] sm:$0xff] %v10579_v14  ;;  %v3401_v14 = vld [vmem:[%s13439_s3 + $0x8] sm:$0xff] }
 0x338   : > { %3450 = vmatpush.msrb.mxu2 %v3401_v14  ;;  %v3747_v14 = vld [vmem:[%s13437_s1 + $0x80] sm:$0xff] }
 0x339   : > { %3805 = vmatpush.msra.mxu0 %v3747_v14  ;;  %v4016_v14 = vld [vmem:[%s13437_s1 + $0x170] sm:$0xff] }
 0x33a   : > { %3451 = vmatpush.msrb.mxu2 %v3400_v24 }
 0x33b   : > { %v10567_v4 = vpop.f32.mrf.mxu2  ;;  %v10569_v16 = vpop.f32.mrf.mxu3  ;;  %4053 = vmatpush.msrb.mxu0 %v4016_v14 }
 0x33c   : > { %v10600_v36 = vpop.f32.mrf.mxu0  ;;  %3913 = vmatpush.msra.mxu2 %v3736_v13  ;;  %v3735_v13 = vld [vmem:[%s13437_s1 + $0x68] sm:$0xff] }
 0x33d   : > { %13560 = vst [vmem:[#allocation5_spill] sm:$0xff] %v10600_v36  ;;  %v3737_v36 = vld [vmem:[%s13437_s1 + $0x78] sm:$0xff] }
 0x33e   : > { %v10602_v23 = vpop.f32.mrf.mxu1  ;;  %3957 = vmatpush.msra.mxu3 %v3737_v36  ;;  %v3734_v36 = vld [vmem:[%s13437_s1 + $0x60] sm:$0xff] }
 0x33f   : > { %13561 = vst [vmem:[#allocation11_spill] sm:$0xff] %v10602_v23  ;;  %v3748_v23 = vld [vmem:[%s13437_s1 + $0x88] sm:$0xff]  ;;  %3914 = vmatpush.msra.mxu2 %v3734_v36  ;;  %v4014_v36 = vld [vmem:[%s13437_s1 + $0x160] sm:$0xff] }
 0x340   : > { %3849 = vmatpush.msra.mxu1 %v3748_v23  ;;  %v4017_v23 = vld [vmem:[%s13437_s1 + $0x178] sm:$0xff]  ;;  %3958 = vmatpush.msra.mxu3 %v3735_v13  ;;  %v4015_v13 = vld [vmem:[%s13437_s1 + $0x168] sm:$0xff] }
 0x341   : > { %4054 = vmatpush.msrb.mxu0 %v4014_v36  ;;  %v3740_v36 = vld [vmem:[%s8243_s9 + $0xa1] sm:$0xff] }
 0x342   : > { %4097 = vmatpush.msrb.mxu1 %v4017_v23  ;;  %v3732_v23 = vld [vmem:[%s13437_s1 + $0x50] sm:$0xff]  ;;  %3959 = vmatpush.msra.mxu3 %v3733_v32 }
 0x343   : > { %v10590_v22 = vpop.f32.mrf.mxu2  ;;  %v10592_v37 = vpop.f32.mrf.mxu3  ;;  %3915 = vmatpush.msra.mxu2 %v3732_v23  ;;  %v4012_v32 = vld [vmem:[%s13437_s1 + $0x150] sm:$0xff] }
 0x344   : > { %v3269_v24 = vpop.f32.mrf.mxu0  ;;  %4098 = vmatpush.msrb.mxu1 %v4015_v13  ;;  %4055 = vmatpush.msrb.mxu0 %v4012_v32 }
 0x346   : > { %v3313_v5 = vpop.f32.mrf.mxu1  ;;  %4099 = vmatpush.msrb.mxu1 %v4013_v49  ;;  %4056 = vmatpush.msrb.mxu0 %v4010_v48  ;;  %v2561_v48 = vadd.f32 %v10378_v42, %v10225_v6 }
 0x34b   : > { %v10613_v34 = vpop.f32.mrf.mxu2  ;;  %v10615_v33 = vpop.f32.mrf.mxu3 }
 0x34c   : > { %13562 = vst [vmem:[#allocation42_spill] sm:$0xff] %v10613_v34  ;;  %v3739_v34 = vld [vmem:[%s8243_s9 + $0x99] sm:$0xff] }
 0x34d   : > { %13563 = vst [vmem:[#allocation43_spill] sm:$0xff] %v10615_v33  ;;  %v3738_v33 = vld [vmem:[%s8243_s9 + $0x91] sm:$0xff] }
 0x34e   : > { %7599 = vmatmul.msk.f32.vlgmr.msra.gmra.mxu0 %vm278_vm0, %v3738_v33  ;;  %7608 = vmatmul.msk.f32.vlgmr.msra.gmra.mxu1 %vm278_vm0, %v3738_v33  ;;  %v3272_v33 = vpop.f32.mrf.mxu0  ;;  %v3316_v14 = vpop.f32.mrf.mxu1 }
 0x353   : > { %v10629_v52 = vpop.f32.mrf.mxu2  ;;  %v10631_v46 = vpop.f32.mrf.mxu3 }
 0x354   : > { %13564 = vst [vmem:[#allocation18_spill] sm:$0xff] %v10629_v52 }
 0x355   : > { %13565 = vst [vmem:[#allocation19_spill] sm:$0xff] %v10631_v46 }
 0x356   : > { %7600 = vmatmul.msk.f32.gmra.mxu0 %vm278_vm0, %v3739_v34  ;;  %7609 = vmatmul.msk.f32.gmra.mxu1 %vm278_vm0, %v3739_v34  ;;  %v3358_v34 = vld [vmem:[%s13438_s2] sm:$0x3]  ;;  %v3275_v23 = vpop.f32.mrf.mxu0  ;;  %v3319_v13 = vpop.f32.mrf.mxu1 }
 0x357   : > { %v10676_v3 = vperm.slane %v3358_v34, 0  ;;  %v10678_v39 = vperm.slane %v3358_v34, 1 }
 0x35b   : > { %v10648_v46 = vpop.f32.mrf.mxu2  ;;  %v10650_v52 = vpop.f32.mrf.mxu3 }
 0x35c   : > { %13566 = vst [vmem:[#allocation26_spill] sm:$0xff] %v10648_v46 }
 0x35d   : > { %13567 = vst [vmem:[#allocation27_spill] sm:$0xff] %v10650_v52 }
 0x35e   : > { %7601 = vmatmul.msk.f32.gmra.mxu0 %vm278_vm0, %v3740_v36  ;;  %7610 = vmatmul.msk.f32.gmra.mxu1 %vm278_vm0, %v3740_v36  ;;  %v3741_v36 = vld [vmem:[%s8243_s9 + $0xa9] sm:$0xff]  ;;  %v3278_v32 = vpop.f32.mrf.mxu0 }
 0x363   : > { %v3111_v0 = vpop.f32.mrf.mxu2  ;;  %v3155_v52 = vpop.f32.mrf.mxu3 }
 0x364   : > { %v3182_v46 = vadd.f32 %v3111_v0, %v3024_v30  ;;  %v3183_v27 = vadd.f32 %v3155_v52, %v3025_v2  ;;  %v3730_v30 = vld [vmem:[%s13437_s1 + $0x40] sm:$0xff] }
 0x365   : > { %3916 = vmatpush.msra.mxu2 %v3730_v30  ;;  %v3322_v30 = vpop.f32.mrf.mxu1 }
 0x366   : > { %v3340_v50 = vadd.f32 %v3269_v24, %v3182_v46  ;;  %v3341_v20 = vadd.f32 %v3313_v5, %v3183_v27  ;;  %v3731_v46 = vld [vmem:[%s13437_s1 + $0x48] sm:$0xff]  ;;  %7602 = vmatmul.msk.f32.gmra.mxu0 %vm278_vm0, %v3741_v36  ;;  %7611 = vmatmul.msk.f32.gmra.mxu1 %vm278_vm0, %v3741_v36 }
 0x367   : > { %3960 = vmatpush.msra.mxu3 %v3731_v46  ;;  %3917 = vmatpush.msra.mxu2 %v3728_v29 }
 0x368   : > { %v3364_v52 = vadd.f32 %v10676_v3, %v3340_v50  ;;  %v3365_v34 = vadd.f32 %v10678_v39, %v3341_v20  ;;  %v2556_v50 = vadd.f32 %v10348_v17, %v10155_v58  ;;  %v2557_v20 = vadd.f32 %v10350_v8, %v10158_v43  ;;  %v4011_v58 = vld [vmem:[%s13437_s1 + $0x148] sm:$0xff]  ;;  %v3729_v43 = vld [vmem:[%s13437_s1 + $0x38] sm:$0xff] }
 0x369   : > { %v3029_v17 = vadd.f32 %v10442_v62, %v2871_v11  ;;  %4100 = vmatpush.msrb.mxu1 %v4011_v58  ;;  %3961 = vmatpush.msra.mxu3 %v3729_v43 }
 0x36a   : > { %v3382_v56 = vmax.f32 %v3364_v52, 0.0  ;;  %v3383_v27 = vmax.f32 %v3365_v34, 0.0  ;;  %v2715_v46 = vadd.f32 %v10292_v19, %v2557_v20  ;;  %v2559_v19 = vadd.f32 %v10364_v10, %v10190_v26 }
 0x36b   : > { %v3114_v24 = vpop.f32.mrf.mxu2  ;;  %v3158_v5 = vpop.f32.mrf.mxu3 }
 0x36c   : > { %v3184_v2 = vadd.f32 %v3114_v24, %v3026_v45  ;;  %v3185_v0 = vadd.f32 %v3158_v5, %v3027_v41  ;;  %3452 = vmatmul.f32.vlgmr.msrb.gmra.mxu2 %v3382_v56  ;;  %3496 = vmatmul.f32.vlgmr.msrb.gmra.mxu3 %v3383_v27  ;;  %v3742_v56 = vld [vmem:[%s8243_s9 + $0xb1] sm:$0xff]  ;;  %v2873_v62 = vadd.f32 %v10546_v44, %v2715_v46 }
 0x36d   : > { %v4009_v44 = vld [vmem:[%s13437_s1 + $0x138] sm:$0xff] }
 0x36e   : > { %v3342_v61 = vadd.f32 %v3272_v33, %v3184_v2  ;;  %v3343_v7 = vadd.f32 %v3316_v14, %v3185_v0  ;;  %v2714_v33 = vadd.f32 %v10290_v57, %v2556_v50  ;;  %7603 = vmatmul.msk.f32.gmra.mxu0 %vm278_vm0, %v3742_v56  ;;  %7612 = vmatmul.msk.f32.gmra.mxu1 %vm278_vm0, %v3742_v56  ;;  %v4008_v0 = vld [vmem:[%s13437_s1 + $0x130] sm:$0xff] }
 0x36f   : > { %v2558_v57 = vadd.f32 %v10362_v63, %v10187_v40  ;;  %4057 = vmatpush.msrb.mxu0 %v4008_v0  ;;  %v3031_v26 = vadd.f32 %v10468_v60, %v2873_v62  ;;  %4101 = vmatpush.msrb.mxu1 %v4009_v44  ;;  %v3743_v60 = vld [vmem:[%s8243_s9 + $0xb9] sm:$0xff]  ;;  %v4004_v62 = vld [vmem:[%s13437_s1 + $0x110] sm:$0xff] }
 0x370   : > { %v3366_v52 = vadd.f32 %v10676_v3, %v3342_v61  ;;  %v3367_v34 = vadd.f32 %v10678_v39, %v3343_v7  ;;  %v2872_v47 = vadd.f32 %v10544_v59, %v2714_v33  ;;  %v3726_v59 = vld [vmem:[%s13437_s1 + $0x20] sm:$0xff]  ;;  %v2717_v61 = vadd.f32 %v10309_v35, %v2559_v19  ;;  %v13571_v19 = vld [vmem:[#allocation23_spill] sm:$0xff] }
 0x371   : > { %3918 = vmatpush.msra.mxu2 %v3726_v59  ;;  %v2716_v36 = vadd.f32 %v10307_v54, %v2558_v57  ;;  %v2560_v35 = vadd.f32 %v10376_v1, %v10222_v38  ;;  %v13572_v59 = vld [vmem:[#allocation30_spill] sm:$0xff] }
 0x372   : > { %v3384_v8 = vmax.f32 %v3366_v52, 0.0  ;;  %v3385_v25 = vmax.f32 %v3367_v34, 0.0  ;;  %v3030_v40 = vadd.f32 %v10466_v28, %v2872_v47  ;;  %v3727_v28 = vld [vmem:[%s13437_s1 + $0x28] sm:$0xff]  ;;  %v2875_v54 = vadd.f32 %v10569_v16, %v2717_v61  ;;  %v3724_v16 = vld [vmem:[%s13437_s1 + $0x10] sm:$0xff] }
 0x373   : > { %v3117_v14 = vpop.f32.mrf.mxu2  ;;  %v3161_v49 = vpop.f32.mrf.mxu3  ;;  %3962 = vmatpush.msra.mxu3 %v3727_v28  ;;  %v2874_v20 = vadd.f32 %v10567_v4, %v2716_v36  ;;  %v4006_v4 = vld [vmem:[%s13437_s1 + $0x120] sm:$0xff]  ;;  %3919 = vmatpush.msra.mxu2 %v3724_v16 }
 0x374   : > { %v3186_v45 = vadd.f32 %v3117_v14, %v3028_v9  ;;  %v3187_v41 = vadd.f32 %v3161_v49, %v3029_v17  ;;  %3455 = vmatmul.f32.gmra.mxu2 %v3384_v8  ;;  %3499 = vmatmul.f32.gmra.mxu3 %v3385_v25  ;;  %v3033_v1 = vadd.f32 %v10497_v15, %v2875_v54  ;;  %v3744_v14 = vld [vmem:[%s8243_s9 + $0xc1] sm:$0xff]  ;;  %v3725_v15 = vld [vmem:[%s13437_s1 + $0x18] sm:$0xff] }
 0x375   : > { %4058 = vmatpush.msrb.mxu0 %v4006_v4  ;;  %v3032_v38 = vadd.f32 %v10495_v53, %v2874_v20  ;;  %v2719_v9 = vadd.f32 %v10327_v31, %v2561_v48  ;;  %v4007_v53 = vld [vmem:[%s13437_s1 + $0x128] sm:$0xff]  ;;  %3963 = vmatpush.msra.mxu3 %v3725_v15  ;;  %v13575_v20 = vld [vmem:[#allocation37_spill] sm:$0xff]  ;;  %v13576_v54 = vld [vmem:[#allocation38_spill] sm:$0xff] }
 0x376   : > { %v3344_v27 = vadd.f32 %v3275_v23, %v3186_v45  ;;  %v3345_v24 = vadd.f32 %v3319_v13, %v3187_v41  ;;  %v3281_v23 = vpop.f32.mrf.mxu0  ;;  %v3325_v13 = vpop.f32.mrf.mxu1  ;;  %7604 = vmatmul.msk.f32.gmra.mxu0 %vm278_vm0, %v3743_v60  ;;  %7613 = vmatmul.msk.f32.gmra.mxu1 %vm278_vm0, %v3743_v60  ;;  %v2562_v45 = vadd.f32 %v10390_v51, %v10249_v21  ;;  %v13568_v41 = vld [vmem:[#allocation9_spill] sm:$0xff]  ;;  %v13579_v4 = vld [vmem:[#allocation32_spill] sm:$0xff]  ;;  %v4003_v15 = vld [vmem:[%s13437_s1 + $0x108] sm:$0xff] }
 0x377   : > { %4102 = vmatpush.msrb.mxu1 %v4007_v53  ;;  %v2877_v31 = vadd.f32 %v10592_v37, %v2719_v9  ;;  %v2563_v56 = vadd.f32 %v13568_v41, %v10252_v55  ;;  %v3722_v37 = vld [vmem:[%s13437_s1] sm:$0xff]  ;;  %4059 = vmatpush.msrb.mxu0 %v4004_v62  ;;  %v13570_v51 = vld [vmem:[#allocation25_spill] sm:$0xff] }
 0x378   : > { %v3368_v5 = vadd.f32 %v10676_v3, %v3344_v27  ;;  %v3369_v2 = vadd.f32 %v10678_v39, %v3345_v24  ;;  %3920 = vmatpush.msra.mxu2 %v3722_v37  ;;  %v13569_v27 = vld [vmem:[#allocation24_spill] sm:$0xff]  ;;  %v13587_v37 = vld [vmem:[#allocation22_spill] sm:$0xff] }
 0x379   : > { %v3035_v24 = vadd.f32 %v13570_v51, %v2877_v31  ;;  %v2721_v44 = vadd.f32 %v13572_v59, %v2563_v56  ;;  %v13583_v31 = vld [vmem:[#allocation18_spill] sm:$0xff] }
 0x37a   : > { %v3386_v63 = vmax.f32 %v3368_v5, 0.0  ;;  %v3387_v10 = vmax.f32 %v3369_v2, 0.0  ;;  %v2720_v5 = vadd.f32 %v13571_v19, %v2562_v45  ;;  %v13589_v19 = vld [vmem:[#allocation4_spill] sm:$0xff] }
 0x37b   : > { %v3120_v18 = vpop.f32.mrf.mxu2  ;;  %v3164_v11 = vpop.f32.mrf.mxu3 }
 0x37c   : > { %v3188_v7 = vadd.f32 %v3120_v18, %v3030_v40  ;;  %v3189_v50 = vadd.f32 %v3164_v11, %v3031_v26  ;;  %3458 = vmatmul.f32.gmra.mxu2 %v3386_v63  ;;  %3502 = vmatmul.f32.gmra.mxu3 %v3387_v10  ;;  %v3745_v63 = vld [vmem:[%s8243_s9 + $0xc9] sm:$0xff]  ;;  %v4005_v10 = vld [vmem:[%s13437_s1 + $0x118] sm:$0xff]  ;;  %v4002_v18 = vld [vmem:[%s13437_s1 + $0x100] sm:$0xff] }
 0x37d   : > { %4103 = vmatpush.msrb.mxu1 %v4005_v10  ;;  %v13574_v11 = vld [vmem:[#allocation43_spill] sm:$0xff]  ;;  %4060 = vmatpush.msrb.mxu0 %v4002_v18 }
 0x37e   : > { %v3346_v52 = vadd.f32 %v3278_v32, %v3188_v7  ;;  %v3347_v34 = vadd.f32 %v3322_v30, %v3189_v50  ;;  %v2718_v32 = vadd.f32 %v10325_v12, %v2560_v35  ;;  %v3284_v25 = vpop.f32.mrf.mxu0  ;;  %v3328_v33 = vpop.f32.mrf.mxu1  ;;  %7605 = vmatmul.msk.f32.gmra.mxu0 %vm278_vm0, %v3744_v14  ;;  %7614 = vmatmul.msk.f32.gmra.mxu1 %vm278_vm0, %v3744_v14  ;;  %v13578_v35 = vld [vmem:[#allocation39_spill] sm:$0xff]  ;;  %v4174_v14 = vld [vmem:[%s13437_s1 + $0x1f0] sm:$0xff] }
 0x37f   : > { %v2879_v61 = vadd.f32 %v13574_v11, %v2721_v44  ;;  %4211 = vmatpush.msrb.mxu2 %v4174_v14  ;;  %4104 = vmatpush.msrb.mxu1 %v4003_v15  ;;  %v3993_v11 = vld [vmem:[%s8243_s9 + $0x92] sm:$0xff] }
 0x380   : > { %v3370_v29 = vadd.f32 %v10676_v3, %v3346_v52  ;;  %v3371_v58 = vadd.f32 %v10678_v39, %v3347_v34  ;;  %v2876_v12 = vadd.f32 %v10590_v22, %v2718_v32  ;;  %v2564_v52 = vadd.f32 %v13576_v54, %v13575_v20  ;;  %v13577_v34 = vld [vmem:[#allocation14_spill] sm:$0xff]  ;;  %v3746_v32 = vld [vmem:[%s8243_s9 + $0xd1] sm:$0xff]  ;;  %v4173_v20 = vld [vmem:[%s13437_s1 + $0x1e8] sm:$0xff] }
 0x381   : > { %v2565_v48 = vadd.f32 %v13578_v35, %v13577_v34  ;;  %v13594_v54 = vld [vmem:[#allocation27_spill] sm:$0xff]  ;;  %v4171_v14 = vld [vmem:[%s13437_s1 + $0x1d8] sm:$0xff] }
 0x382   : > { %v3388_v6 = vmax.f32 %v3370_v29, 0.0  ;;  %v3389_v42 = vmax.f32 %v3371_v58, 0.0  ;;  %v3034_v21 = vadd.f32 %v13569_v27, %v2876_v12  ;;  %v4175_v12 = vld [vmem:[%s13437_s1 + $0x1f8] sm:$0xff] }
 0x383   : > { %v3123_v30 = vpop.f32.mrf.mxu2  ;;  %v3167_v43 = vpop.f32.mrf.mxu3  ;;  %v13588_v27 = vld [vmem:[#allocation17_spill] sm:$0xff] }
 0x384   : > { %v3190_v17 = vadd.f32 %v3123_v30, %v3032_v38  ;;  %v3191_v8 = vadd.f32 %v3167_v43, %v3033_v1  ;;  %3461 = vmatmul.f32.gmra.mxu2 %v3388_v6  ;;  %3505 = vmatmul.f32.gmra.mxu3 %v3389_v42  ;;  %v13580_v38 = vld [vmem:[#allocation33_spill] sm:$0xff]  ;;  %v13581_v30 = vld [vmem:[#allocation31_spill] sm:$0xff] }
 0x385   : > { %v3037_v1 = vadd.f32 %v13580_v38, %v2879_v61  ;;  %v2722_v43 = vadd.f32 %v13581_v30, %v2564_v52  ;;  %v4332_v61 = vld [vmem:[%s13437_s1 + $0x270] sm:$0xff] }
 0x386   : > { %v3348_v49 = vadd.f32 %v3281_v23, %v3190_v17  ;;  %v3349_v46 = vadd.f32 %v3325_v13, %v3191_v8  ;;  %v3723_v23 = vld [vmem:[%s13437_s1 + $0x8] sm:$0xff]  ;;  %v13573_v13 = vld [vmem:[#allocation42_spill] sm:$0xff]  ;;  %7606 = vmatmul.msk.f32.gmra.mxu0 %vm278_vm0, %v3745_v63  ;;  %v3287_v28 = vpop.f32.mrf.mxu0  ;;  %v3331_v60 = vpop.f32.mrf.mxu1  ;;  %7615 = vmatmul.msk.f32.gmra.mxu1 %vm278_vm0, %v3745_v63 }
 0x387   : > { %v2878_v36 = vadd.f32 %v13573_v13, %v2720_v5  ;;  %3964 = vmatpush.msra.mxu3 %v3723_v23  ;;  %v13582_v8 = vld [vmem:[#allocation2_spill] sm:$0xff]  ;;  %v13592_v23 = vld [vmem:[#allocation3_spill] sm:$0xff]  ;;  %4369 = vmatpush.msra.mxu0 %v4332_v61  ;;  %v3718_v61 = vld [vmem:[%s8243_s9 + $0xb8] sm:$0xff] }
 0x388   : > { %v3372_v47 = vadd.f32 %v10676_v3, %v3348_v49  ;;  %v3373_v22 = vadd.f32 %v10678_v39, %v3349_v46  ;;  %v2880_v49 = vadd.f32 %v13583_v31, %v2722_v43  ;;  %v13584_v46 = vld [vmem:[#allocation19_spill] sm:$0xff] }
 0x389   : > { %v3036_v16 = vadd.f32 %v13579_v4, %v2878_v36  ;;  %4255 = vmatpush.msrb.mxu3 %v4175_v12 }
 0x38a   : > { %v3390_v55 = vmax.f32 %v3372_v47, 0.0  ;;  %v3391_v57 = vmax.f32 %v3373_v22, 0.0  ;;  %v13585_v47 = vld [vmem:[#allocation15_spill] sm:$0xff]  ;;  %v13586_v22 = vld [vmem:[#allocation16_spill] sm:$0xff]  ;;  %v3038_v5 = vadd.f32 %v13589_v19, %v2880_v49  ;;  %v4164_v19 = vld [vmem:[%s13437_s1 + $0x1a0] sm:$0xff] }
 0x38b   : > { %v3126_v2 = vpop.f32.mrf.mxu2  ;;  %v3170_v0 = vpop.f32.mrf.mxu3  ;;  %v2566_v62 = vadd.f32 %v13586_v22, %v13585_v47  ;;  %4256 = vmatpush.msrb.mxu3 %v4173_v20  ;;  %v4168_v47 = vld [vmem:[%s13437_s1 + $0x1c0] sm:$0xff]  ;;  %v3713_v22 = vld [vmem:[%s8243_s9 + $0x90] sm:$0xff] }
 0x38c   : > { %v3192_v40 = vadd.f32 %v3126_v2, %v3034_v21  ;;  %v3193_v26 = vadd.f32 %v3170_v0, %v3035_v24  ;;  %3464 = vmatmul.f32.gmra.mxu2 %v3390_v55  ;;  %3508 = vmatmul.f32.gmra.mxu3 %v3391_v57  ;;  %v2567_v21 = vadd.f32 %v13588_v27, %v13587_v37  ;;  %v13590_v2 = vld [vmem:[#allocation10_spill] sm:$0xff]  ;;  %v4166_v27 = vld [vmem:[%s13437_s1 + $0x1b0] sm:$0xff] }
 0x38d   : > { %4257 = vmatpush.msrb.mxu3 %v4171_v14  ;;  %v4326_v37 = vld [vmem:[%s13437_s1 + $0x240] sm:$0xff]  ;;  %v11016_v20 = vld [vmem:[%s8243_s9 + $0xd2] sm:$0xff] }
 0x38e   : > { %v3350_v7 = vadd.f32 %v3284_v25, %v3192_v40  ;;  %v3351_v50 = vadd.f32 %v3328_v33, %v3193_v26  ;;  %v2723_v25 = vadd.f32 %v13582_v8, %v2565_v48  ;;  %7607 = vmatmul.msk.f32.gmra.mxu0 %vm278_vm0, %v3746_v32  ;;  %7616 = vmatmul.msk.f32.gmra.mxu1 %vm278_vm0, %v3746_v32  ;;  %v3290_v55 = vpop.f32.mrf.mxu0  ;;  %v3334_v57 = vpop.f32.mrf.mxu1  ;;  %v13591_v40 = vld [vmem:[#allocation8_spill] sm:$0xff]  ;;  %v3994_v8 = vld [vmem:[%s8243_s9 + $0x9a] sm:$0xff] }
 0x38f   : > { %v2724_v26 = vadd.f32 %v13591_v40, %v2566_v62  ;;  %v2725_v13 = vadd.f32 %v13592_v23, %v2567_v21  ;;  %v10916_v62 = vld [vmem:[%s8243_s9 + $0xaa] sm:$0xff]  ;;  %v4163_v23 = vld [vmem:[%s13437_s1 + $0x198] sm:$0xff] }
 0x390   : > { %v3374_v29 = vadd.f32 %v10676_v3, %v3350_v7  ;;  %v3375_v58 = vadd.f32 %v10678_v39, %v3351_v50  ;;  %v2881_v45 = vadd.f32 %v13584_v46, %v2723_v25  ;;  %v4172_v7 = vld [vmem:[%s13437_s1 + $0x1e0] sm:$0xff]  ;;  %v4327_v21 = vld [vmem:[%s13437_s1 + $0x248] sm:$0xff]  ;;  %v4162_v40 = vld [vmem:[%s13437_s1 + $0x190] sm:$0xff] }
 0x391   : > { %v13593_v50 = vld [vmem:[#allocation26_spill] sm:$0xff]  ;;  %4212 = vmatpush.msrb.mxu2 %v4172_v7  ;;  %v2883_v52 = vadd.f32 %v13594_v54, %v2725_v13  ;;  %v3717_v13 = vld [vmem:[%s8243_s9 + $0xb0] sm:$0xff] }
 0x392   : > { %v3392_v6 = vmax.f32 %v3374_v29, 0.0  ;;  %v3393_v42 = vmax.f32 %v3375_v58, 0.0  ;;  %v3039_v0 = vadd.f32 %v13590_v2, %v2881_v45  ;;  %v13595_v58 = vld [vmem:[#allocation5_spill] sm:$0xff]  ;;  %v4330_v25 = vld [vmem:[%s13437_s1 + $0x260] sm:$0xff]  ;;  %v4165_v2 = vld [vmem:[%s13437_s1 + $0x1a8] sm:$0xff] }
 0x393   : > { %v3129_v9 = vpop.f32.mrf.mxu2  ;;  %v3173_v17 = vpop.f32.mrf.mxu3  ;;  %4370 = vmatpush.msra.mxu0 %v4330_v25  ;;  %v3719_v54 = vld [vmem:[%s8243_s9 + $0xc0] sm:$0xff] }
 0x394   : > { %v3194_v33 = vadd.f32 %v3129_v9, %v3036_v16  ;;  %v3195_v53 = vadd.f32 %v3173_v17, %v3037_v1  ;;  %3467 = vmatmul.f32.gmra.mxu2 %v3392_v6  ;;  %3511 = vmatmul.f32.gmra.mxu3 %v3393_v42  ;;  %v13596_v16 = vld [vmem:[#allocation11_spill] sm:$0xff] }
 0x395   : > { %v3041_v38 = vadd.f32 %v13596_v16, %v2883_v52  ;;  %v4320_v52 = vld [vmem:[%s13437_s1 + $0x210] sm:$0xff]  ;;  %v3720_v16 = vld [vmem:[%s8243_s9 + $0xc8] sm:$0xff] }
 0x396   : > { %v3352_v41 = vadd.f32 %v3287_v28, %v3194_v33  ;;  %v3353_v56 = vadd.f32 %v3331_v60, %v3195_v53  ;;  %v2882_v28 = vadd.f32 %v13593_v50, %v2724_v26  ;;  %7635 = vmatmul.msk.f32.vlgmr.msrb.gmra.mxu0 %vm278_vm0, %v3993_v11  ;;  %v4333_v60 = vld [vmem:[%s13437_s1 + $0x278] sm:$0xff]  ;;  %7644 = vmatmul.msk.f32.vlgmr.msrb.gmra.mxu1 %vm278_vm0, %v3993_v11  ;;  %v3293_v42 = vpop.f32.mrf.mxu0  ;;  %v3337_v32 = vpop.f32.mrf.mxu1  ;;  %v4170_v33 = vld [vmem:[%s13437_s1 + $0x1d0] sm:$0xff]  ;;  %v4331_v53 = vld [vmem:[%s13437_s1 + $0x268] sm:$0xff] }
 0x397   : > { %4413 = vmatpush.msra.mxu1 %v4333_v60  ;;  %4213 = vmatpush.msrb.mxu2 %v4170_v33  ;;  %v4323_v26 = vld [vmem:[%s13437_s1 + $0x228] sm:$0xff] }
 0x398   : > { %v3376_v51 = vadd.f32 %v10676_v3, %v3352_v41  ;;  %v3377_v24 = vadd.f32 %v10678_v39, %v3353_v56  ;;  %v3040_v4 = vadd.f32 %v13595_v58, %v2882_v28  ;;  %v10894_v41 = vld [vmem:[%s8243_s9 + $0xa2] sm:$0xff]  ;;  %v4328_v56 = vld [vmem:[%s13437_s1 + $0x250] sm:$0xff] }
 0x399   : > { %4414 = vmatpush.msra.mxu1 %v4331_v53  ;;  %4214 = vmatpush.msrb.mxu2 %v4168_v47  ;;  %v10996_v11 = vld [vmem:[%s8243_s9 + $0xca] sm:$0xff]  ;;  %v4160_v28 = vld [vmem:[%s13437_s1 + $0x180] sm:$0xff]  ;;  %v4311_v53 = vld [vmem:[%s8243_s9 + $0xb3] sm:$0xff] }
 0x39a   : > { %v3394_v59 = vmax.f32 %v3376_v51, 0.0  ;;  %v3395_v44 = vmax.f32 %v3377_v24, 0.0  ;;  %4371 = vmatpush.msra.mxu0 %v4328_v56  ;;  %v4167_v51 = vld [vmem:[%s13437_s1 + $0x1b8] sm:$0xff]  ;;  %v4161_v60 = vld [vmem:[%s13437_s1 + $0x188] sm:$0xff] }
 0x39b   : > { %v3132_v63 = vpop.f32.mrf.mxu2  ;;  %v3176_v10 = vpop.f32.mrf.mxu3  ;;  %4215 = vmatpush.msrb.mxu2 %v4166_v27  ;;  %v3714_v24 = vld [vmem:[%s8243_s9 + $0x98] sm:$0xff]  ;;  %v4319_v58 = vld [vmem:[%s13437_s1 + $0x208] sm:$0xff] }
 0x39c   : > { %v3196_v36 = vadd.f32 %v3132_v63, %v3038_v5  ;;  %v3197_v18 = vadd.f32 %v3176_v10, %v3039_v0  ;;  %3470 = vmatmul.f32.gmra.mxu2 %v3394_v59  ;;  %3514 = vmatmul.f32.gmra.mxu3 %v3395_v44  ;;  %v4325_v5 = vld [vmem:[%s13437_s1 + $0x238] sm:$0xff]  ;;  %v3715_v0 = vld [vmem:[%s8243_s9 + $0xa0] sm:$0xff]  ;;  %v3716_v63 = vld [vmem:[%s8243_s9 + $0xa8] sm:$0xff] }
 0x39d   : > { %4372 = vmatpush.msra.mxu0 %v4326_v37  ;;  %4216 = vmatpush.msrb.mxu2 %v4164_v19  ;;  %v10960_v59 = vld [vmem:[%s8243_s9 + $0xba] sm:$0xff]  ;;  %v10979_v10 = vld [vmem:[%s8243_s9 + $0xc2] sm:$0xff] }
 0x39e   : > { %v3354_v34 = vadd.f32 %v3290_v55, %v3196_v36  ;;  %v3355_v35 = vadd.f32 %v3334_v57, %v3197_v18  ;;  %7636 = vmatmul.msk.f32.gmra.mxu0 %vm278_vm0, %v3994_v8  ;;  %7645 = vmatmul.msk.f32.gmra.mxu1 %vm278_vm0, %v3994_v8  ;;  %v10938_v55 = vld [vmem:[%s8243_s9 + $0xb2] sm:$0xff]  ;;  %v4322_v44 = vld [vmem:[%s13437_s1 + $0x220] sm:$0xff] }
 0x39f   : > { %v4324_v57 = vld [vmem:[%s13437_s1 + $0x230] sm:$0xff]  ;;  %4217 = vmatpush.msrb.mxu2 %v4162_v40 }
 0x3a0   : > { %v3378_v48 = vadd.f32 %v10676_v3, %v3354_v34  ;;  %v3379_v29 = vadd.f32 %v10678_v39, %v3355_v35  ;;  %4373 = vmatpush.msra.mxu0 %v4324_v57  ;;  %v4321_v34 = vld [vmem:[%s13437_s1 + $0x218] sm:$0xff] }
 0x3a1   : > { %4218 = vmatpush.msrb.mxu2 %v4160_v28 }
 0x3a2   : > { %v3396_v1 = vmax.f32 %v3378_v48, 0.0  ;;  %v3397_v6 = vmax.f32 %v3379_v29, 0.0  ;;  %4374 = vmatpush.msra.mxu0 %v4322_v44  ;;  %v4318_v29 = vld [vmem:[%s13437_s1 + $0x200] sm:$0xff] }
 0x3a3   : > { %v3135_v30 = vpop.f32.mrf.mxu2  ;;  %v3179_v43 = vpop.f32.mrf.mxu3  ;;  %v4313_v44 = vld [vmem:[%s8243_s9 + $0xc3] sm:$0xff] }
 0x3a4   : > { %v3198_v9 = vadd.f32 %v3135_v30, %v3040_v4  ;;  %v3199_v17 = vadd.f32 %v3179_v43, %v3041_v38  ;;  %3473 = vmatmul.f32.gmra.mxu2 %v3396_v1  ;;  %3517 = vmatmul.f32.gmra.mxu3 %v3397_v6  ;;  %v4309_v4 = vld [vmem:[%s8243_s9 + $0xa3] sm:$0xff]  ;;  %v11054_v6 = vld [vmem:[%s13440_s4] ss:$0 sm:$0xff] }
 0x3a5   : > { %4375 = vmatpush.msra.mxu0 %v4320_v52  ;;  %v4486_v52 = vld [vmem:[%s13437_s1 + $0x2d0] sm:$0xff] }
 0x3a6   : > { %v3356_v15 = vadd.f32 %v3293_v42, %v3198_v9  ;;  %v3357_v12 = vadd.f32 %v3337_v32, %v3199_v17  ;;  %7637 = vmatmul.msk.f32.gmra.mxu0 %vm278_vm0, %v10894_v41  ;;  %7646 = vmatmul.msk.f32.gmra.mxu1 %vm278_vm0, %v10894_v41  ;;  %v4310_v42 = vld [vmem:[%s8243_s9 + $0xab] sm:$0xff] }
 0x3a7   : > { %4376 = vmatpush.msra.mxu0 %v4318_v29  ;;  %v3721_v9 = vld [vmem:[%s8243_s9 + $0xd0] sm:$0xff] }
 0x3a8   : > { %v3380_v31 = vadd.f32 %v10676_v3, %v3356_v15  ;;  %v3381_v49 = vadd.f32 %v10678_v39, %v3357_v12  ;;  %v4329_v39 = vld [vmem:[%s13437_s1 + $0x258] sm:$0xff]  ;;  %v4169_v3 = vld [vmem:[%s13437_s1 + $0x1c8] sm:$0xff] }
 0x3a9   : > { %4415 = vmatpush.msra.mxu1 %v4329_v39  ;;  %4258 = vmatpush.msrb.mxu3 %v4169_v3  ;;  %v4312_v3 = vld [vmem:[%s8243_s9 + $0xbb] sm:$0xff] }
 0x3aa   : > { %v3398_v46 = vmax.f32 %v3380_v31, 0.0  ;;  %v3399_v45 = vmax.f32 %v3381_v49, 0.0  ;;  %v4490_v31 = vld [vmem:[%s13437_s1 + $0x2f0] sm:$0xff]  ;;  %v4491_v49 = vld [vmem:[%s13437_s1 + $0x2f8] sm:$0xff] }
 0x3ab   : > { %4416 = vmatpush.msra.mxu1 %v4327_v21  ;;  %4259 = vmatpush.msrb.mxu3 %v4167_v51  ;;  %v4648_v51 = vld [vmem:[%s13437_s1 + $0x370] sm:$0xff] }
 0x3ac   : > { %3476 = vmatmul.f32.gmra.mxu2 %v3398_v46  ;;  %3520 = vmatmul.f32.gmra.mxu3 %v3399_v45 }
 0x3ad   : > { %4417 = vmatpush.msra.mxu1 %v4325_v5  ;;  %4260 = vmatpush.msrb.mxu3 %v4165_v2 }
 0x3ae   : > { %7638 = vmatmul.msk.f32.gmra.mxu0 %vm278_vm0, %v10916_v62  ;;  %7647 = vmatmul.msk.f32.gmra.mxu1 %vm278_vm0, %v10916_v62 }
 0x3af   : > { %4418 = vmatpush.msra.mxu1 %v4323_v26  ;;  %4261 = vmatpush.msrb.mxu3 %v4163_v23 }
 0x3b0   : > { %4685 = vmatpush.msrb.mxu0 %v4648_v51 }
 0x3b1   : > { %4262 = vmatpush.msrb.mxu3 %v4161_v60  ;;  %4419 = vmatpush.msra.mxu1 %v4321_v34 }
 0x3b3   : > { %4420 = vmatpush.msra.mxu1 %v4319_v58 }
 0x3b4   : > { %7617 = vmatmul.msk.f32.vlgmr.msra.gmra.mxu2 %vm278_vm0, %v3713_v22  ;;  %7626 = vmatmul.msk.f32.vlgmr.msra.gmra.mxu3 %vm278_vm0, %v3713_v22 }
 0x3b5   : > { %4527 = vmatpush.msra.mxu2 %v4490_v31  ;;  %4571 = vmatpush.msra.mxu3 %v4491_v49 }
 0x3b6   : > { %7639 = vmatmul.msk.f32.gmra.mxu0 %vm278_vm0, %v10938_v55  ;;  %7648 = vmatmul.msk.f32.gmra.mxu1 %vm278_vm0, %v10938_v55 }
 0x3bc   : > { %7618 = vmatmul.msk.f32.gmra.mxu2 %vm278_vm0, %v3714_v24  ;;  %7627 = vmatmul.msk.f32.gmra.mxu3 %vm278_vm0, %v3714_v24  ;;  %v4649_v24 = vld [vmem:[%s13437_s1 + $0x378] sm:$0xff] }
 0x3bd   : > { %4729 = vmatpush.msrb.mxu1 %v4649_v24 }
 0x3be   : > { %7640 = vmatmul.msk.f32.gmra.mxu0 %vm278_vm0, %v10960_v59  ;;  %7649 = vmatmul.msk.f32.gmra.mxu1 %vm278_vm0, %v10960_v59 }
 0x3c4   : > { %7619 = vmatmul.msk.f32.gmra.mxu2 %vm278_vm0, %v3715_v0  ;;  %7628 = vmatmul.msk.f32.gmra.mxu3 %vm278_vm0, %v3715_v0 }
 0x3c6   : > { %7641 = vmatmul.msk.f32.gmra.mxu0 %vm278_vm0, %v10979_v10  ;;  %7650 = vmatmul.msk.f32.gmra.mxu1 %vm278_vm0, %v10979_v10 }
 0x3cb   : > { %v10989_v36 = vpop.f32.mrf.mxu0  ;;  %v10991_v18 = vpop.f32.mrf.mxu1 }
 0x3cc   : > { %7620 = vmatmul.msk.f32.gmra.mxu2 %vm278_vm0, %v3716_v63  ;;  %7629 = vmatmul.msk.f32.gmra.mxu3 %vm278_vm0, %v3716_v63 }
 0x3ce   : > { %7642 = vmatmul.msk.f32.gmra.mxu0 %vm278_vm0, %v10996_v11  ;;  %7651 = vmatmul.msk.f32.gmra.mxu1 %vm278_vm0, %v10996_v11 }
 0x3d3   : > { %v11003_v7 = vpop.f32.mrf.mxu0  ;;  %v11005_v50 = vpop.f32.mrf.mxu1 }
 0x3d4   : > { %7621 = vmatmul.msk.f32.gmra.mxu2 %vm278_vm0, %v3717_v13  ;;  %7630 = vmatmul.msk.f32.gmra.mxu3 %vm278_vm0, %v3717_v13 }
 0x3d6   : > { %7643 = vmatmul.msk.f32.gmra.mxu0 %vm278_vm0, %v11016_v20  ;;  %7652 = vmatmul.msk.f32.gmra.mxu1 %vm278_vm0, %v11016_v20 }
 0x3db   : > { %v11029_v35 = vpop.f32.mrf.mxu0  ;;  %v11031_v48 = vpop.f32.mrf.mxu1 }
 0x3dc   : > { %7622 = vmatmul.msk.f32.gmra.mxu2 %vm278_vm0, %v3718_v61  ;;  %7631 = vmatmul.msk.f32.gmra.mxu3 %vm278_vm0, %v3718_v61 }
 0x3de   : > { %7671 = vmatmul.msk.f32.vlgmr.msra.gmra.mxu0 %vm278_vm0, %v4309_v4  ;;  %7680 = vmatmul.msk.f32.vlgmr.msra.gmra.mxu1 %vm278_vm0, %v4309_v4 }
 0x3e3   : > { %v11045_v38 = vpop.f32.mrf.mxu0  ;;  %v11047_v1 = vpop.f32.mrf.mxu1 }
 0x3e4   : > { %7623 = vmatmul.msk.f32.gmra.mxu2 %vm278_vm0, %v3719_v54  ;;  %7632 = vmatmul.msk.f32.gmra.mxu3 %vm278_vm0, %v3719_v54  ;;  %v4646_v54 = vld [vmem:[%s13437_s1 + $0x360] sm:$0xff] }
 0x3e5   : > { %4686 = vmatpush.msrb.mxu0 %v4646_v54 }
 0x3e6   : > { %7672 = vmatmul.msk.f32.gmra.mxu0 %vm278_vm0, %v4310_v42  ;;  %7681 = vmatmul.msk.f32.gmra.mxu1 %vm278_vm0, %v4310_v42 }
 0x3eb   : > { %v11063_v8 = vpop.f32.mrf.mxu0  ;;  %v11065_v25 = vpop.f32.mrf.mxu1 }
 0x3ec   : > { %7624 = vmatmul.msk.f32.gmra.mxu2 %vm278_vm0, %v3720_v16  ;;  %7633 = vmatmul.msk.f32.gmra.mxu3 %vm278_vm0, %v3720_v16 }
 0x3ee   : > { %7673 = vmatmul.msk.f32.gmra.mxu0 %vm278_vm0, %v4311_v53  ;;  %7682 = vmatmul.msk.f32.gmra.mxu1 %vm278_vm0, %v4311_v53 }
 0x3ef   : > { %v3453_v32 = vpop.f32.mrf.mxu2  ;;  %v3497_v30 = vpop.f32.mrf.mxu3 }
 0x3f0   : > { %v3454_v43 = vadd.f32 %v11054_v6, %v3453_v32 }
 0x3f2   : > { %v11061_v17 = vadd.f32 %v3497_v30, %v3454_v43  ;;  %v4314_v43 = vld [vmem:[%s8243_s9 + $0xcb] sm:$0xff] }
 0x3f3   : > { %v11082_v45 = vpop.f32.mrf.mxu0  ;;  %v11084_v56 = vpop.f32.mrf.mxu1 }
 0x3f4   : > { %v7590_v33 = vmul.f32 -1.442695, %v11061_v17  ;;  %7625 = vmatmul.msk.f32.gmra.mxu2 %vm278_vm0, %v3721_v9  ;;  %7634 = vmatmul.msk.f32.gmra.mxu3 %vm278_vm0, %v3721_v9 }
 0x3f6   : > { %7993 = vpow2.f32 %v7590_v33  ;;  %7674 = vmatmul.msk.f32.gmra.mxu0 %vm278_vm0, %v4312_v3  ;;  %7683 = vmatmul.msk.f32.gmra.mxu1 %vm278_vm0, %v4312_v3 }
 0x3f7   : > { %v3456_v14 = vpop.f32.mrf.mxu2  ;;  %v3500_v15 = vpop.f32.mrf.mxu3 }
 0x3f8   : > { %v3457_v12 = vadd.f32 %v11054_v6, %v3456_v14 }
 0x3fa   : > { %v11080_v46 = vadd.f32 %v3500_v15, %v3457_v12 }
 0x3fb   : > { %v11106_v19 = vpop.f32.mrf.mxu0  ;;  %v11108_v5 = vpop.f32.mrf.mxu1 }
 0x3fc   : > { %v7994_v47 = vpop.eup %7993  ;;  %v7591_v39 = vmul.f32 -1.442695, %v11080_v46  ;;  %7653 = vmatmul.msk.f32.vlgmr.msrb.gmra.mxu2 %vm278_vm0, %v10894_v41  ;;  %7662 = vmatmul.msk.f32.vlgmr.msrb.gmra.mxu3 %vm278_vm0, %v10894_v41  ;;  %v4488_v41 = vld [vmem:[%s13437_s1 + $0x2e0] sm:$0xff] }
 0x3fd   : > { %v3551_v22 = vadd.f32 1.0, %v7994_v47  ;;  %4528 = vmatpush.msra.mxu2 %v4488_v41 }
 0x3fe   : > { %7995 = vpow2.f32 %v7591_v39  ;;  %7675 = vmatmul.msk.f32.gmra.mxu0 %vm278_vm0, %v4313_v44  ;;  %7684 = vmatmul.msk.f32.gmra.mxu1 %vm278_vm0, %v4313_v44 }
 0x3ff   : > { %7997 = vrcp.f32 %v3551_v22  ;;  %v3459_v37 = vpop.f32.mrf.mxu2  ;;  %v3503_v27 = vpop.f32.mrf.mxu3  ;;  %v3571_v60 = vand.u32 2147483648, %v3551_v22  ;;  %v3569_v29 = vand.u32 2147483647, %v3551_v22  ;;  %4529 = vmatpush.msra.mxu2 %v4486_v52  ;;  %vm3565_vm11 = vweird.f32 %v3551_v22 }
 0x400   : > { %v3460_v21 = vadd.f32 %v11054_v6, %v3459_v37  ;;  %v4647_v37 = vld [vmem:[%s13437_s1 + $0x368] sm:$0xff] }
 0x401   : > { %v3572_v33 = vor.u32 1.1754944e-38, %v3571_v60  ;;  %vm3570_vm13 = vcmp.eq.f32.partialorder %v3569_v29, 8.507059e+37  ;;  %4730 = vmatpush.msrb.mxu1 %v4647_v37 }
 0x402   : > { %v11104_v57 = vadd.f32 %v3503_v27, %v3460_v21  ;;  %v4487_v27 = vld [vmem:[%s13437_s1 + $0x2d8] sm:$0xff]  ;;  %v4644_v21 = vld [vmem:[%s13437_s1 + $0x350] sm:$0xff] }
 0x403   : > { %v11133_v4 = vpop.f32.mrf.mxu0  ;;  %v11135_v16 = vpop.f32.mrf.mxu1  ;;  %4687 = vmatpush.msrb.mxu0 %v4644_v21 }
 0x404   : > { %v7996_v2 = vpop.eup %7995  ;;  %v7592_v0 = vmul.f32 -1.442695, %v11104_v57  ;;  %7654 = vmatmul.msk.f32.gmra.mxu2 %vm278_vm0, %v10916_v62  ;;  %7663 = vmatmul.msk.f32.gmra.mxu3 %vm278_vm0, %v10916_v62  ;;  %v4489_v62 = vld [vmem:[%s13437_s1 + $0x2e8] sm:$0xff] }
 0x405   : > { %v7998_v40 = vpop.eup %7997  ;;  %v11116_v26 = vadd.f32 1.0, %v7996_v2  ;;  %4572 = vmatpush.msra.mxu3 %v4489_v62 }
 0x406   : > { %v3561_v63 = vmul.f32 %v7998_v40, %v3551_v22  ;;  %7999 = vpow2.f32 %v7592_v0  ;;  %vm3566_vm10 = vweird.f32 %v7998_v40  ;;  %7676 = vmatmul.msk.f32.gmra.mxu0 %vm278_vm0, %v4314_v43  ;;  %7685 = vmatmul.msk.f32.gmra.mxu1 %vm278_vm0, %v4314_v43 }
 0x407   : > { %8001 = vrcp.f32 %v11116_v26  ;;  %v3462_v23 = vpop.f32.mrf.mxu2  ;;  %v3506_v13 = vpop.f32.mrf.mxu3  ;;  %vm3567_vm12 = vmor %vm3565_vm11, %vm3566_vm10  ;;  %v3586_v22 = vand.u32 2147483648, %v11116_v26  ;;  %v3584_v51 = vand.u32 2147483647, %v11116_v26  ;;  %4573 = vmatpush.msra.mxu3 %v4487_v27  ;;  %vm3580_vm15 = vweird.f32 %v11116_v26 }
 0x408   : > { %v3562_v61 = vsub.f32 1.0, %v3561_v63  ;;  %v3463_v28 = vadd.f32 %v11054_v6, %v3462_v23  ;;  %v4315_v63 = vld [vmem:[%s8243_s9 + $0xd3] sm:$0xff] }
 0x409   : > { %vm3585_vm2 = vcmp.eq.f32.partialorder %v3584_v51, 8.507059e+37  ;;  %v4480_v51 = vld [vmem:[%s13437_s1 + $0x2a0] sm:$0xff] }
 0x40a   : > { %v3563_v34 = vmul.f32 %v7998_v40, %v3562_v61  ;;  %v11131_v58 = vadd.f32 %v3506_v13, %v3463_v28  ;;  %v3587_v13 = vor.u32 1.1754944e-38, %v3586_v22  ;;  %v4483_v22 = vld [vmem:[%s13437_s1 + $0x2b8] sm:$0xff] }
 0x40b   : > { %v11168_v24 = vpop.f32.mrf.mxu0  ;;  %v11170_v2 = vpop.f32.mrf.mxu1 }
 0x40c   : > { %v8000_v42 = vpop.eup %7999  ;;  %v3564_v32 = vadd.f32 %v7998_v40, %v3563_v34  ;;  %v7593_v30 = vmul.f32 -1.442695, %v11131_v58  ;;  %7655 = vmatmul.msk.f32.gmra.mxu2 %vm278_vm0, %v10938_v55  ;;  %7664 = vmatmul.msk.f32.gmra.mxu3 %vm278_vm0, %v10938_v55 }
 0x40d   : > { %v8002_v9 = vpop.eup %8001  ;;  %v11144_v53 = vadd.f32 1.0, %v8000_v42  ;;  %v4484_v42 = vld [vmem:[%s13437_s1 + $0x2c0] sm:$0xff] }
 0x40e   : > { %v3568_v14 = vsel %vm3567_vm12, %v7998_v40, %v3564_v32  ;;  %v3576_v15 = vmul.f32 %v8002_v9, %v11116_v26  ;;  %8003 = vpow2.f32 %v7593_v30  ;;  %vm3581_vm14 = vweird.f32 %v8002_v9  ;;  %7677 = vmatmul.msk.f32.gmra.mxu0 %vm278_vm0, %v4315_v63  ;;  %7686 = vmatmul.msk.f32.gmra.mxu1 %vm278_vm0, %v4315_v63  ;;  %v4645_v32 = vld [vmem:[%s13437_s1 + $0x358] sm:$0xff]  ;;  %v4485_v30 = vld [vmem:[%s13437_s1 + $0x2c8] sm:$0xff] }
 0x40f   : > { %v3573_v12 = vsel %vm3570_vm13, %v3572_v33, %v3568_v14  ;;  %8005 = vrcp.f32 %v11144_v53  ;;  %v3465_v55 = vpop.f32.mrf.mxu2  ;;  %v3509_v31 = vpop.f32.mrf.mxu3  ;;  %vm3582_vm1 = vmor %vm3580_vm15, %vm3581_vm14  ;;  %v3601_v29 = vand.u32 2147483648, %v11144_v53  ;;  %v3599_v43 = vand.u32 2147483647, %v11144_v53  ;;  %4530 = vmatpush.msra.mxu2 %v4484_v42  ;;  %4731 = vmatpush.msrb.mxu1 %v4645_v32 }
 0x410   : > { %v3695_v47 = vsel %vm227_vm3, %v3573_v12, %v11061_v17  ;;  %v3577_v39 = vsub.f32 1.0, %v3576_v15  ;;  %v3466_v3 = vadd.f32 %v11054_v6, %v3465_v55  ;;  %4574 = vmatpush.msra.mxu3 %v4485_v30  ;;  %vm3595_vm5 = vweird.f32 %v11144_v53 }
 0x411   : > { %3704 = vst [vmem:[%s9771_s26 + $0x48] sm:$0xff] %v3695_v47  ;;  %vm3600_vm7 = vcmp.eq.f32.partialorder %v3599_v43, 8.507059e+37 }
 0x412   : > { %v3578_v17 = vmul.f32 %v8002_v9, %v3577_v39  ;;  %v11166_v41 = vadd.f32 %v3509_v31, %v3466_v3  ;;  %v4316_v31 = vld [vmem:[%s8243_s9 + $0xdb] sm:$0xff]  ;;  %v3602_v39 = vor.u32 1.1754944e-38, %v3601_v29  ;;  %4575 = vmatpush.msra.mxu3 %v4483_v22 }
 0x413   : > { %v11204_v33 = vpop.f32.mrf.mxu0  ;;  %v11206_v14 = vpop.f32.mrf.mxu1 }
 0x414   : > { %v8004_v0 = vpop.eup %8003  ;;  %v3579_v44 = vadd.f32 %v8002_v9, %v3578_v17  ;;  %v7594_v40 = vmul.f32 -1.442695, %v11166_v41  ;;  %7656 = vmatmul.msk.f32.gmra.mxu2 %vm278_vm0, %v10960_v59  ;;  %7665 = vmatmul.msk.f32.gmra.mxu3 %vm278_vm0, %v10960_v59 }
 0x415   : > { %v8006_v23 = vpop.eup %8005  ;;  %v11180_v61 = vadd.f32 1.0, %v8004_v0  ;;  %v4481_v0 = vld [vmem:[%s13437_s1 + $0x2a8] sm:$0xff] }
 0x416   : > { %v3583_v28 = vsel %vm3582_vm1, %v8002_v9, %v3579_v44  ;;  %v3591_v26 = vmul.f32 %v8006_v23, %v11144_v53  ;;  %8007 = vpow2.f32 %v7594_v40  ;;  %vm3596_vm4 = vweird.f32 %v8006_v23  ;;  %v4482_v53 = vld [vmem:[%s13437_s1 + $0x2b0] sm:$0xff]  ;;  %7678 = vmatmul.msk.f32.gmra.mxu0 %vm278_vm0, %v4316_v31  ;;  %7687 = vmatmul.msk.f32.gmra.mxu1 %vm278_vm0, %v4316_v31 }
 0x417   : > { %v3588_v60 = vsel %vm3585_vm2, %v3587_v13, %v3583_v28  ;;  %8009 = vrcp.f32 %v11180_v61  ;;  %v3468_v59 = vpop.f32.mrf.mxu2  ;;  %v3512_v62 = vpop.f32.mrf.mxu3  ;;  %vm3597_vm6 = vmor %vm3595_vm5, %vm3596_vm4  ;;  %4531 = vmatpush.msra.mxu2 %v4482_v53  ;;  %4576 = vmatpush.msra.mxu3 %v4481_v0  ;;  %v4642_v13 = vld [vmem:[%s13437_s1 + $0x340] sm:$0xff]  ;;  %v4643_v28 = vld [vmem:[%s13437_s1 + $0x348] sm:$0xff]  ;;  %vm3610_vm9 = vweird.f32 %v11180_v61 }
 0x418   : > { %v3696_v54 = vsel %vm227_vm3, %v3588_v60, %v11080_v46  ;;  %v3592_v52 = vsub.f32 1.0, %v3591_v26  ;;  %v3469_v34 = vadd.f32 %v11054_v6, %v3468_v59  ;;  %v3614_v60 = vand.u32 2147483647, %v11180_v61  ;;  %4688 = vmatpush.msrb.mxu0 %v4642_v13  ;;  %4732 = vmatpush.msrb.mxu1 %v4643_v28  ;;  %v4637_v0 = vld [vmem:[%s13437_s1 + $0x318] sm:$0xff]  ;;  %v4635_v13 = vld [vmem:[%s13437_s1 + $0x308] sm:$0xff] }
 0x419   : > { %3705 = vst [vmem:[%s9771_s26 + $0x50] sm:$0xff] %v3696_v54  ;;  %4532 = vmatpush.msra.mxu2 %v4480_v51  ;;  %v4636_v51 = vld [vmem:[%s13437_s1 + $0x310] sm:$0xff] }
 0x41a   : > { %v3593_v46 = vmul.f32 %v8006_v23, %v3592_v52  ;;  %v11202_v9 = vadd.f32 %v3512_v62, %v3469_v34  ;;  %v4479_v62 = vld [vmem:[%s13437_s1 + $0x298] sm:$0xff]  ;;  %v4476_v52 = vld [vmem:[%s13437_s1 + $0x280] sm:$0xff]  ;;  %v4477_v34 = vld [vmem:[%s13437_s1 + $0x288] sm:$0xff]  ;;  %vm3615_vm11 = vcmp.eq.f32.partialorder %v3614_v60, 8.507059e+37 }
 0x41b   : > { %v11260_v54 = vpop.f32.mrf.mxu0  ;;  %4577 = vmatpush.msra.mxu3 %v4479_v62  ;;  %v11268_v29 = vpop.f32.mrf.mxu1  ;;  %v11331_v62 = vld [vmem:[%s8243_s9 + $0xb4] sm:$0xff] }
 0x41c   : > { %v8008_v15 = vpop.eup %8007  ;;  %v3594_v12 = vadd.f32 %v8006_v23, %v3593_v46  ;;  %v7595_v55 = vmul.f32 -1.442695, %v11202_v9  ;;  %7657 = vmatmul.msk.f32.gmra.mxu2 %vm278_vm0, %v10979_v10  ;;  %7666 = vmatmul.msk.f32.gmra.mxu3 %vm278_vm0, %v10979_v10  ;;  %v4317_v46 = vld [vmem:[%s8243_s9 + $0xe3] sm:$0xff] }
 0x41d   : > { %v11215_v47 = vpop.eup %8009  ;;  %v11218_v3 = vadd.f32 1.0, %v8008_v15  ;;  %4578 = vmatpush.msra.mxu3 %v4477_v34 }
 0x41e   : > { %v3598_v37 = vsel %vm3597_vm6, %v8006_v23, %v3594_v12  ;;  %v3606_v10 = vmul.f32 %v11215_v47, %v11180_v61  ;;  %8011 = vpow2.f32 %v7595_v55  ;;  %v3616_v23 = vand.u32 2147483648, %v11180_v61  ;;  %v4640_v61 = vld [vmem:[%s13437_s1 + $0x330] sm:$0xff]  ;;  %v4641_v55 = vld [vmem:[%s13437_s1 + $0x338] sm:$0xff]  ;;  %7679 = vmatmul.msk.f32.gmra.mxu0 %vm278_vm0, %v4317_v46  ;;  %7688 = vmatmul.msk.f32.gmra.mxu1 %vm278_vm0, %v4317_v46 }
 0x41f   : > { %v3603_v27 = vsel %vm3600_vm7, %v3602_v39, %v3598_v37  ;;  %8013 = vrcp.f32 %v11218_v3  ;;  %v3471_v21 = vpop.f32.mrf.mxu2  ;;  %v3515_v17 = vpop.f32.mrf.mxu3  ;;  %vm3611_vm8 = vweird.f32 %v11215_v47  ;;  %4689 = vmatpush.msrb.mxu0 %v4640_v61  ;;  %4733 = vmatpush.msrb.mxu1 %v4641_v55  ;;  %v4638_v37 = vld [vmem:[%s13437_s1 + $0x320] sm:$0xff]  ;;  %vm3625_vm13 = vweird.f32 %v11218_v3 }
 0x420   : > { %v3697_v44 = vsel %vm227_vm3, %v3603_v27, %v11104_v57  ;;  %v3607_v40 = vsub.f32 1.0, %v3606_v10  ;;  %v3472_v63 = vadd.f32 %v11054_v6, %v3471_v21  ;;  %v4478_v57 = vld [vmem:[%s13437_s1 + $0x290] sm:$0xff]  ;;  %vm3612_vm10 = vmor %vm3610_vm9, %vm3611_vm8  ;;  %v3617_v15 = vor.u32 1.1754944e-38, %v3616_v23  ;;  %v4634_v23 = vld [vmem:[%s13437_s1 + $0x300] sm:$0xff] }
 0x421   : > { %3706 = vst [vmem:[%s9771_s26 + $0x58] sm:$0xff] %v3697_v44  ;;  %4533 = vmatpush.msra.mxu2 %v4478_v57  ;;  %4690 = vmatpush.msrb.mxu0 %v4638_v37  ;;  %v4158_v55 = vld [vmem:[%s8243_s9 + $0xda] sm:$0xff] }
 0x422   : > { %v3608_v26 = vmul.f32 %v11215_v47, %v3607_v40  ;;  %v11255_v59 = vadd.f32 %v3515_v17, %v3472_v63  ;;  %v3631_v17 = vand.u32 2147483648, %v11218_v3  ;;  %v4804_v37 = vld [vmem:[%s13437_s1 + $0x3e0] sm:$0xff] }
 0x423   : > { %4534 = vmatpush.msra.mxu2 %v4476_v52  ;;  %4691 = vmatpush.msrb.mxu0 %v4636_v51  ;;  %v11314_v63 = vpop.f32.mrf.mxu0  ;;  %v11322_v28 = vpop.f32.mrf.mxu1 }
 0x424   : > { %v8012_v42 = vpop.eup %8011  ;;  %v3609_v32 = vadd.f32 %v11215_v47, %v3608_v26  ;;  %v7596_v30 = vmul.f32 -1.442695, %v11255_v59  ;;  %7658 = vmatmul.msk.f32.gmra.mxu2 %vm278_vm0, %v10996_v11  ;;  %7667 = vmatmul.msk.f32.gmra.mxu3 %vm278_vm0, %v10996_v11  ;;  %v3632_v34 = vor.u32 1.1754944e-38, %v3631_v17 }
 0x425   : > { %v8014_v43 = vpop.eup %8013  ;;  %v11280_v12 = vadd.f32 1.0, %v8012_v42  ;;  %4692 = vmatpush.msrb.mxu0 %v4634_v23 }
 0x426   : > { %v3613_v11 = vsel %vm3612_vm10, %v11215_v47, %v3609_v32  ;;  %v3621_v31 = vmul.f32 %v8014_v43, %v11218_v3  ;;  %8015 = vpow2.f32 %v7596_v30  ;;  %v4639_v47 = vld [vmem:[%s13437_s1 + $0x328] sm:$0xff]  ;;  %vm3626_vm12 = vweird.f32 %v8014_v43  ;;  %7707 = vmatmul.msk.f32.vlgmr.msrb.gmra.mxu0 %vm278_vm0, %v11331_v62 }
 0x427   : > { %v3618_v39 = vsel %vm3615_vm11, %v3617_v15, %v3613_v11  ;;  %8017 = vrcp.f32 %v11280_v12  ;;  %v3474_v53 = vpop.f32.mrf.mxu2  ;;  %v3518_v22 = vpop.f32.mrf.mxu3  ;;  %4734 = vmatpush.msrb.mxu1 %v4639_v47  ;;  %vm3627_vm14 = vmor %vm3625_vm13, %vm3626_vm12  ;;  %v3646_v11 = vand.u32 2147483648, %v11280_v12  ;;  %v4965_v47 = vld [vmem:[%s13437_s1 + $0x478] sm:$0xff]  ;;  %vm3640_vm2 = vweird.f32 %v11280_v12 }
 0x428   : > { %v3698_v10 = vsel %vm227_vm3, %v3618_v39, %v11131_v58  ;;  %v3622_v27 = vsub.f32 1.0, %v3621_v31  ;;  %v3475_v21 = vadd.f32 %v11054_v6, %v3474_v53  ;;  %v3629_v58 = vand.u32 2147483647, %v11218_v3  ;;  %v4806_v31 = vld [vmem:[%s13437_s1 + $0x3f0] sm:$0xff]  ;;  %v4807_v39 = vld [vmem:[%s13437_s1 + $0x3f8] sm:$0xff] }
 0x429   : > { %3707 = vst [vmem:[%s9771_s26 + $0x60] sm:$0xff] %v3698_v10  ;;  %4735 = vmatpush.msrb.mxu1 %v4637_v0  ;;  %v4964_v53 = vld [vmem:[%s13437_s1 + $0x470] sm:$0xff]  ;;  %4843 = vmatpush.msrb.mxu2 %v4806_v31  ;;  %v4805_v10 = vld [vmem:[%s13437_s1 + $0x3e8] sm:$0xff] }
 0x42a   : > { %v3623_v44 = vmul.f32 %v8014_v43, %v3622_v27  ;;  %v11312_v40 = vadd.f32 %v3518_v22, %v3475_v21  ;;  %vm3630_vm15 = vcmp.eq.f32.partialorder %v3629_v58, 8.507059e+37  ;;  %4887 = vmatpush.msrb.mxu3 %v4807_v39  ;;  %5001 = vmatpush.msra.mxu0 %v4964_v53  ;;  %v4962_v58 = vld [vmem:[%s13437_s1 + $0x460] sm:$0xff] }
 0x42b   : > { %4736 = vmatpush.msrb.mxu1 %v4635_v13  ;;  %v11370_v27 = vpop.f32.mrf.mxu0  ;;  %v11372_v21 = vpop.f32.mrf.mxu1  ;;  %v3647_v13 = vor.u32 1.1754944e-38, %v3646_v11  ;;  %4844 = vmatpush.msrb.mxu2 %v4804_v37 }
 0x42c   : > { %v8016_v57 = vpop.eup %8015  ;;  %v3624_v26 = vadd.f32 %v8014_v43, %v3623_v44  ;;  %v7597_v60 = vmul.f32 -1.442695, %v11312_v40  ;;  %7659 = vmatmul.msk.f32.gmra.mxu2 %vm278_vm0, %v11016_v20  ;;  %7668 = vmatmul.msk.f32.gmra.mxu3 %vm278_vm0, %v11016_v20  ;;  %v11379_v44 = vld [vmem:[%s8243_s9 + $0xbc] sm:$0xff] }
 0x42d   : > { %v8018_v52 = vpop.eup %8017  ;;  %v11334_v42 = vadd.f32 1.0, %v8016_v57  ;;  %7716 = vmatmul.msk.f32.vlgmr.msrb.gmra.mxu1 %vm278_vm0, %v11331_v62  ;;  %4888 = vmatpush.msrb.mxu3 %v4805_v10 }
 0x42e   : > { %v3628_v3 = vsel %vm3627_vm14, %v8014_v43, %v3624_v26  ;;  %v3636_v32 = vmul.f32 %v8018_v52, %v11280_v12  ;;  %8019 = vpow2.f32 %v7597_v60  ;;  %vm3641_vm1 = vweird.f32 %v8018_v52  ;;  %5045 = vmatpush.msra.mxu1 %v4965_v47  ;;  %5002 = vmatpush.msra.mxu0 %v4962_v58 }
 0x42f   : > { %v3633_v30 = vsel %vm3630_vm15, %v3632_v34, %v3628_v3  ;;  %8021 = vrcp.f32 %v11334_v42  ;;  %v3477_v20 = vpop.f32.mrf.mxu2  ;;  %v3521_v46 = vpop.f32.mrf.mxu3  ;;  %vm3642_vm4 = vmor %vm3640_vm2, %vm3641_vm1  ;;  %7708 = vmatmul.msk.f32.gmra.mxu0 %vm278_vm0, %v11379_v44  ;;  %vm3655_vm7 = vweird.f32 %v11334_v42 }
 0x430   : > { %v3699_v15 = vsel %vm227_vm3, %v3633_v30, %v11166_v41  ;;  %v3637_v43 = vsub.f32 1.0, %v3636_v32  ;;  %v3478_v61 = vadd.f32 %v11054_v6, %v3477_v20  ;;  %v3644_v6 = vand.u32 2147483647, %v11280_v12  ;;  %v4802_v12 = vld [vmem:[%s13437_s1 + $0x3d0] sm:$0xff] }
 0x431   : > { %3708 = vst [vmem:[%s9771_s26 + $0x68] sm:$0xff] %v3699_v15  ;;  %4845 = vmatpush.msrb.mxu2 %v4802_v12  ;;  %v4803_v15 = vld [vmem:[%s13437_s1 + $0x3d8] sm:$0xff]  ;;  %v4800_v12 = vld [vmem:[%s13437_s1 + $0x3c0] sm:$0xff] }
 0x432   : > { %v3638_v41 = vmul.f32 %v8018_v52, %v3637_v43  ;;  %v11359_v22 = vadd.f32 %v3521_v46, %v3478_v61  ;;  %vm3645_vm5 = vcmp.eq.f32.partialorder %v3644_v6, 8.507059e+37  ;;  %v4963_v46 = vld [vmem:[%s13437_s1 + $0x468] sm:$0xff]  ;;  %v3661_v43 = vand.u32 2147483648, %v11334_v42  ;;  %4889 = vmatpush.msrb.mxu3 %v4803_v15 }
 0x433   : > { %5046 = vmatpush.msra.mxu1 %v4963_v46  ;;  %v11414_v31 = vpop.f32.mrf.mxu0  ;;  %v11419_v53 = vpop.f32.mrf.mxu1  ;;  %v11425_v6 = vld [vmem:[%s8243_s9 + $0xc4] sm:$0xff]  ;;  %4846 = vmatpush.msrb.mxu2 %v4800_v12 }
 0x434   : > { %v8020_v17 = vpop.eup %8019  ;;  %v3639_v51 = vadd.f32 %v8018_v52, %v3638_v41  ;;  %v7598_v0 = vmul.f32 -1.442695, %v11359_v22  ;;  %7660 = vmatmul.msk.f32.gmra.mxu2 %vm278_vm0, %v4158_v55  ;;  %7669 = vmatmul.msk.f32.gmra.mxu3 %vm278_vm0, %v4158_v55  ;;  %v4159_v55 = vld [vmem:[%s8243_s9 + $0xe2] sm:$0xff] }
 0x435   : > { %v8022_v23 = vpop.eup %8021  ;;  %v11385_v57 = vadd.f32 1.0, %v8020_v17  ;;  %7717 = vmatmul.msk.f32.gmra.mxu1 %vm278_vm0, %v11379_v44 }
 0x436   : > { %v3643_v26 = vsel %vm3642_vm4, %v8018_v52, %v3639_v51  ;;  %v3651_v60 = vmul.f32 %v8022_v23, %v11334_v42  ;;  %8023 = vpow2.f32 %v7598_v0  ;;  %vm3656_vm6 = vweird.f32 %v8022_v23 }
 0x437   : > { %v3648_v34 = vsel %vm3645_vm5, %v3647_v13, %v3643_v26  ;;  %8025 = vrcp.f32 %v11385_v57  ;;  %v3922_v3 = vpop.f32.mrf.mxu2  ;;  %v3966_v32 = vpop.f32.mrf.mxu3  ;;  %vm3657_vm8 = vmor %vm3655_vm7, %vm3656_vm6  ;;  %7709 = vmatmul.msk.f32.gmra.mxu0 %vm278_vm0, %v11425_v6  ;;  %v4961_v26 = vld [vmem:[%s13437_s1 + $0x458] sm:$0xff]  ;;  %vm3670_vm11 = vweird.f32 %v11385_v57 }
 0x438   : > { %v3700_v52 = vsel %vm227_vm3, %v3648_v34, %v11202_v9  ;;  %v3652_v30 = vsub.f32 1.0, %v3651_v60  ;;  %v3923_v20 = vadd.f32 %v3922_v3, %v10989_v36  ;;  %v3967_v61 = vadd.f32 %v3966_v32, %v10991_v18  ;;  %v4467_v3 = vld [vmem:[%s8243_s9 + $0xa4] sm:$0xff]  ;;  %5047 = vmatpush.msra.mxu1 %v4961_v26 }
 0x439   : > { %3709 = vst [vmem:[%s9771_s26 + $0x70] sm:$0xff] %v3700_v52  ;;  %v3659_v36 = vand.u32 2147483647, %v11334_v42  ;;  %v3676_v60 = vand.u32 2147483648, %v11385_v57 }
 0x43a   : > { %v3653_v9 = vmul.f32 %v8022_v23, %v3652_v30  ;;  %v11412_v11 = vadd.f32 %v11204_v33, %v3923_v20  ;;  %v11417_v39 = vadd.f32 %v11206_v14, %v3967_v61  ;;  %v4960_v33 = vld [vmem:[%s13437_s1 + $0x450] sm:$0xff]  ;;  %v3662_v14 = vor.u32 1.1754944e-38, %v3661_v43  ;;  %v4801_v30 = vld [vmem:[%s13437_s1 + $0x3c8] sm:$0xff] }
 0x43b   : > { %5003 = vmatpush.msra.mxu0 %v4960_v33  ;;  %vm3660_vm9 = vcmp.eq.f32.partialorder %v3659_v36, 8.507059e+37  ;;  %v11456_v52 = vpop.f32.mrf.mxu0  ;;  %4890 = vmatpush.msrb.mxu3 %v4801_v30  ;;  %v3677_v43 = vor.u32 1.1754944e-38, %v3676_v60 }
 0x43c   : > { %v8024_v41 = vpop.eup %8023  ;;  %v3654_v18 = vadd.f32 %v8022_v23, %v3653_v9  ;;  %7661 = vmatmul.msk.f32.gmra.mxu2 %vm278_vm0, %v4159_v55  ;;  %7670 = vmatmul.msk.f32.gmra.mxu3 %vm278_vm0, %v4159_v55 }
 0x43d   : > { %v8026_v37 = vpop.eup %8025  ;;  %v11430_v47 = vadd.f32 1.0, %v8024_v41  ;;  %7718 = vmatmul.msk.f32.gmra.mxu1 %vm278_vm0, %v11425_v6 }
 0x43e   : > { %v3658_v10 = vsel %vm3657_vm8, %v8022_v23, %v3654_v18  ;;  %v3666_v42 = vmul.f32 %v8026_v37, %v11385_v57  ;;  %vm3671_vm10 = vweird.f32 %v8026_v37 }
 0x43f   : > { %v3663_v17 = vsel %vm3660_vm9, %v3662_v14, %v3658_v10  ;;  %8027 = vrcp.f32 %v11430_v47  ;;  %v3925_v51 = vpop.f32.mrf.mxu2  ;;  %v3969_v0 = vpop.f32.mrf.mxu3  ;;  %vm3672_vm12 = vmor %vm3670_vm11, %vm3671_vm10  ;;  %v4798_v14 = vld [vmem:[%s13437_s1 + $0x3b0] sm:$0xff]  ;;  %v3689_v10 = vand.u32 2147483647, %v11430_v47  ;;  %vm3685_vm15 = vweird.f32 %v11430_v47 }
 0x440   : > { %v3701_v58 = vsel %vm227_vm3, %v3663_v17, %v11255_v59  ;;  %v3667_v23 = vsub.f32 1.0, %v3666_v42  ;;  %v3926_v13 = vadd.f32 %v3925_v51, %v11003_v7  ;;  %v3970_v34 = vadd.f32 %v3969_v0, %v11005_v50  ;;  %v11464_v50 = vpop.f32.mrf.mxu1  ;;  %v4468_v17 = vld [vmem:[%s8243_s9 + $0xac] sm:$0xff]  ;;  %4847 = vmatpush.msrb.mxu2 %v4798_v14 }
 0x441   : > { %3710 = vst [vmem:[%s9771_s26 + $0x78] sm:$0xff] %v3701_v58  ;;  %v3674_v7 = vand.u32 2147483647, %v11385_v57  ;;  %v3691_v42 = vand.u32 2147483648, %v11430_v47  ;;  %v4959_v0 = vld [vmem:[%s13437_s1 + $0x448] sm:$0xff]  ;;  %v4799_v58 = vld [vmem:[%s13437_s1 + $0x3b8] sm:$0xff] }
 0x442   : > { %v3668_v59 = vmul.f32 %v8026_v37, %v3667_v23  ;;  %v11454_v32 = vadd.f32 %v11260_v54, %v3926_v13  ;;  %v11462_v20 = vadd.f32 %v11268_v29, %v3970_v34  ;;  %v11470_v54 = vld [vmem:[%s8243_s9 + $0xcc] sm:$0xff]  ;;  %5048 = vmatpush.msra.mxu1 %v4959_v0  ;;  %4891 = vmatpush.msrb.mxu3 %v4799_v58  ;;  %vm3690_vm2 = vcmp.eq.f32.partialorder %v3689_v10, 8.507059e+37 }
 0x443   : > { %vm3675_vm13 = vcmp.eq.f32.partialorder %v3674_v7, 8.507059e+37  ;;  %7710 = vmatmul.msk.f32.gmra.mxu0 %vm278_vm0, %v11470_v54  ;;  %v11498_v51 = vpop.f32.mrf.mxu0  ;;  %v4956_v7 = vld [vmem:[%s13437_s1 + $0x430] sm:$0xff] }
 0x444   : > { %v3669_v46 = vadd.f32 %v8026_v37, %v3668_v59  ;;  %7689 = vmatmul.msk.f32.vlgmr.msra.gmra.mxu2 %vm278_vm0, %v4467_v3  ;;  %7698 = vmatmul.msk.f32.vlgmr.msra.gmra.mxu3 %vm278_vm0, %v4467_v3 }
 0x445   : > { %v8028_v15 = vpop.eup %8027  ;;  %7719 = vmatmul.msk.f32.gmra.mxu1 %vm278_vm0, %v11470_v54 }
 0x446   : > { %v3673_v61 = vsel %vm3672_vm12, %v8026_v37, %v3669_v46  ;;  %v3681_v29 = vmul.f32 %v8028_v15, %v11430_v47  ;;  %v4958_v37 = vld [vmem:[%s13437_s1 + $0x440] sm:$0xff]  ;;  %vm3686_vm14 = vweird.f32 %v8028_v15 }
 0x447   : > { %v3678_v55 = vsel %vm3675_vm13, %v3677_v43, %v3673_v61  ;;  %v3928_v9 = vpop.f32.mrf.mxu2  ;;  %v3972_v36 = vpop.f32.mrf.mxu3  ;;  %5004 = vmatpush.msra.mxu0 %v4958_v37  ;;  %vm3687_vm1 = vmor %vm3685_vm15, %vm3686_vm14 }
 0x448   : > { %v3702_v57 = vsel %vm227_vm3, %v3678_v55, %v11312_v40  ;;  %v3682_v41 = vsub.f32 1.0, %v3681_v29  ;;  %v3929_v18 = vadd.f32 %v3928_v9, %v11029_v35  ;;  %v3973_v33 = vadd.f32 %v3972_v36, %v11031_v48  ;;  %v11506_v23 = vpop.f32.mrf.mxu1  ;;  %v4954_v36 = vld [vmem:[%s13437_s1 + $0x420] sm:$0xff] }
 0x449   : > { %3711 = vst [vmem:[%s9771_s26 + $0x80] sm:$0xff] %v3702_v57  ;;  %5005 = vmatpush.msra.mxu0 %v4956_v7  ;;  %v4794_v57 = vld [vmem:[%s13437_s1 + $0x390] sm:$0xff] }
 0x44a   : > { %v3683_v35 = vmul.f32 %v8028_v15, %v3682_v41  ;;  %v11493_v48 = vadd.f32 %v11314_v63, %v3929_v18  ;;  %v11496_v40 = vadd.f32 %v11322_v28, %v3973_v33  ;;  %v11512_v63 = vld [vmem:[%s8243_s9 + $0xd4] sm:$0xff]  ;;  %v3692_v28 = vor.u32 1.1754944e-38, %v3691_v42 }
 0x44b   : > { %7711 = vmatmul.msk.f32.gmra.mxu0 %vm278_vm0, %v11512_v63  ;;  %v4952_v42 = vld [vmem:[%s13437_s1 + $0x410] sm:$0xff] }
 0x44c   : > { %v3684_v13 = vadd.f32 %v8028_v15, %v3683_v35  ;;  %7690 = vmatmul.msk.f32.gmra.mxu2 %vm278_vm0, %v4468_v17  ;;  %7699 = vmatmul.msk.f32.gmra.mxu3 %vm278_vm0, %v4468_v17  ;;  %v4792_v17 = vld [vmem:[%s13437_s1 + $0x380] sm:$0xff] }
 0x44d   : > { %7720 = vmatmul.msk.f32.gmra.mxu1 %vm278_vm0, %v11512_v63  ;;  %5006 = vmatpush.msra.mxu0 %v4954_v36 }
 0x44e   : > { %v3688_v12 = vsel %vm3687_vm1, %v8028_v15, %v3684_v13  ;;  %v11533_v15 = vpop.f32.mrf.mxu0 }
 0x44f   : > { %v3693_v26 = vsel %vm3690_vm2, %v3692_v28, %v3688_v12  ;;  %v3931_v60 = vpop.f32.mrf.mxu2  ;;  %v3975_v34 = vpop.f32.mrf.mxu3  ;;  %5007 = vmatpush.msra.mxu0 %v4952_v42 }
 0x450   : > { %v3703_v47 = vsel %vm227_vm3, %v3693_v26, %v11359_v22  ;;  %v3932_v3 = vadd.f32 %v3931_v60, %v11045_v38  ;;  %v3976_v59 = vadd.f32 %v3975_v34, %v11047_v1  ;;  %v4796_v38 = vld [vmem:[%s13437_s1 + $0x3a0] sm:$0xff]  ;;  %v4957_v1 = vld [vmem:[%s13437_s1 + $0x438] sm:$0xff]  ;;  %v4797_v22 = vld [vmem:[%s13437_s1 + $0x3a8] sm:$0xff]  ;;  %v11544_v43 = vpop.f32.mrf.mxu1 }
 0x451   : > { %3712 = vst [vmem:[%s9771_s26 + $0x88] sm:$0xff] %v3703_v47  ;;  %4848 = vmatpush.msrb.mxu2 %v4796_v38  ;;  %5049 = vmatpush.msra.mxu1 %v4957_v1  ;;  %v4950_v26 = vld [vmem:[%s13437_s1 + $0x400] sm:$0xff]  ;;  %v4941_v1 = vld [vmem:[%s8243_s9 + $0xb6] sm:$0xff] }
 0x452   : > { %v11528_v30 = vadd.f32 %v11370_v27, %v3932_v3  ;;  %v11531_v46 = vadd.f32 %v11372_v21, %v3976_v59  ;;  %v11551_v27 = vld [vmem:[%s8243_s9 + $0xdc] sm:$0xff]  ;;  %4892 = vmatpush.msrb.mxu3 %v4797_v22  ;;  %5008 = vmatpush.msra.mxu0 %v4950_v26 }
 0x453   : > { %7712 = vmatmul.msk.f32.gmra.mxu0 %vm278_vm0, %v11551_v27  ;;  %4849 = vmatpush.msrb.mxu2 %v4794_v57 }
 0x454   : > { %7691 = vmatmul.msk.f32.gmra.mxu2 %vm278_vm0, %v11331_v62  ;;  %7700 = vmatmul.msk.f32.gmra.mxu3 %vm278_vm0, %v11331_v62 }
 0x455   : > { %7721 = vmatmul.msk.f32.gmra.mxu1 %vm278_vm0, %v11551_v27  ;;  %4850 = vmatpush.msrb.mxu2 %v4792_v17  ;;  %v4944_v17 = vld [vmem:[%s8243_s9 + $0xce] sm:$0xff] }
 0x456   : > { %v11574_v41 = vpop.f32.mrf.mxu0 }
 0x457   : > { %v3934_v21 = vpop.f32.mrf.mxu2  ;;  %v3978_v61 = vpop.f32.mrf.mxu3 }
 0x458   : > { %v3935_v29 = vadd.f32 %v3934_v21, %v11063_v8  ;;  %v3979_v55 = vadd.f32 %v3978_v61, %v11065_v25  ;;  %v4955_v8 = vld [vmem:[%s13437_s1 + $0x428] sm:$0xff]  ;;  %v11576_v25 = vpop.f32.mrf.mxu1 }
 0x459   : > { %5050 = vmatpush.msra.mxu1 %v4955_v8 }
 0x45a   : > { %v11560_v9 = vadd.f32 %v11414_v31, %v3935_v29  ;;  %v11563_v62 = vadd.f32 %v11419_v53, %v3979_v55  ;;  %v11583_v31 = vld [vmem:[%s8243_s9 + $0xe4] sm:$0xff]  ;;  %v4795_v53 = vld [vmem:[%s13437_s1 + $0x398] sm:$0xff] }
 0x45b   : > { %4893 = vmatpush.msrb.mxu3 %v4795_v53  ;;  %7713 = vmatmul.msk.f32.gmra.mxu0 %vm278_vm0, %v11583_v31 }
 0x45c   : > { %7692 = vmatmul.msk.f32.gmra.mxu2 %vm278_vm0, %v11379_v44  ;;  %7701 = vmatmul.msk.f32.gmra.mxu3 %vm278_vm0, %v11379_v44 }
 0x45d   : > { %7722 = vmatmul.msk.f32.gmra.mxu1 %vm278_vm0, %v11583_v31 }
 0x45e   : > { %v4378_v35 = vpop.f32.mrf.mxu0 }
 0x45f   : > { %v3937_v18 = vpop.f32.mrf.mxu2  ;;  %v3981_v33 = vpop.f32.mrf.mxu3 }
 0x460   : > { %v3938_v37 = vadd.f32 %v3937_v18, %v11082_v45  ;;  %v3982_v44 = vadd.f32 %v3981_v33, %v11084_v56  ;;  %v4422_v0 = vpop.f32.mrf.mxu1  ;;  %v4632_v45 = vld [vmem:[%s8243_s9 + $0xec] sm:$0xff]  ;;  %v4953_v56 = vld [vmem:[%s13437_s1 + $0x418] sm:$0xff] }
 0x461   : > { %5051 = vmatpush.msra.mxu1 %v4953_v56  ;;  %v4783_v33 = vld [vmem:[%s8243_s9 + $0xb5] sm:$0xff] }
 0x462   : > { %v11595_v14 = vadd.f32 %v11456_v52, %v3938_v37  ;;  %v11598_v10 = vadd.f32 %v11464_v50, %v3982_v44  ;;  %v4793_v52 = vld [vmem:[%s13437_s1 + $0x388] sm:$0xff] }
 0x463   : > { %4894 = vmatpush.msrb.mxu3 %v4793_v52  ;;  %7714 = vmatmul.msk.f32.gmra.mxu0 %vm278_vm0, %v4632_v45 }
 0x464   : > { %7693 = vmatmul.msk.f32.gmra.mxu2 %vm278_vm0, %v11425_v6  ;;  %7702 = vmatmul.msk.f32.gmra.mxu3 %vm278_vm0, %v11425_v6 }
 0x465   : > { %7723 = vmatmul.msk.f32.gmra.mxu1 %vm278_vm0, %v4632_v45  ;;  %v4784_v45 = vld [vmem:[%s8243_s9 + $0xbd] sm:$0xff] }
 0x466   : > { %v4381_v60 = vpop.f32.mrf.mxu0 }
 0x467   : > { %v3940_v50 = vpop.f32.mrf.mxu2  ;;  %v3984_v58 = vpop.f32.mrf.mxu3 }
 0x468   : > { %v3941_v6 = vadd.f32 %v3940_v50, %v11106_v19  ;;  %v3985_v13 = vadd.f32 %v3984_v58, %v11108_v5  ;;  %v4425_v34 = vpop.f32.mrf.mxu1  ;;  %v4633_v19 = vld [vmem:[%s8243_s9 + $0xf4] sm:$0xff]  ;;  %v4951_v5 = vld [vmem:[%s13437_s1 + $0x408] sm:$0xff] }
 0x469   : > { %5052 = vmatpush.msra.mxu1 %v4951_v5 }
 0x46a   : > { %v11622_v28 = vadd.f32 %v11498_v51, %v3941_v6  ;;  %v11625_v12 = vadd.f32 %v11506_v23, %v3985_v13  ;;  %v4945_v6 = vld [vmem:[%s8243_s9 + $0xd6] sm:$0xff] }
 0x46b   : > { %7715 = vmatmul.msk.f32.gmra.mxu0 %vm278_vm0, %v4633_v19 }
 0x46c   : > { %7694 = vmatmul.msk.f32.gmra.mxu2 %vm278_vm0, %v11470_v54  ;;  %7703 = vmatmul.msk.f32.gmra.mxu3 %vm278_vm0, %v11470_v54 }
 0x46d   : > { %7724 = vmatmul.msk.f32.gmra.mxu1 %vm278_vm0, %v4633_v19 }
 0x46e   : > { %v4384_v7 = vpop.f32.mrf.mxu0 }
 0x46f   : > { %v3943_v51 = vpop.f32.mrf.mxu2  ;;  %v3987_v23 = vpop.f32.mrf.mxu3 }
 0x470   : > { %v3944_v47 = vadd.f32 %v3943_v51, %v11133_v4  ;;  %v3988_v3 = vadd.f32 %v3987_v23, %v11135_v16  ;;  %v4428_v38 = vpop.f32.mrf.mxu1  ;;  %v4786_v51 = vld [vmem:[%s8243_s9 + $0xcd] sm:$0xff] }
 0x472   : > { %v11643_v59 = vadd.f32 %v11533_v15, %v3944_v47  ;;  %v11646_v54 = vadd.f32 %v11544_v43, %v3988_v3  ;;  %v4947_v3 = vld [vmem:[%s8243_s9 + $0xe6] sm:$0xff] }
 0x473   : > { %7743 = vmatmul.msk.f32.vlgmr.msra.gmra.mxu0 %vm278_vm0, %v4941_v1 }
 0x474   : > { %13598 = vst [vmem:[#allocation34_spill] sm:$0xff] %v11643_v59  ;;  %7695 = vmatmul.msk.f32.gmra.mxu2 %vm278_vm0, %v11512_v63  ;;  %7704 = vmatmul.msk.f32.gmra.mxu3 %vm278_vm0, %v11512_v63 }
 0x475   : > { %13599 = vst [vmem:[#allocation35_spill] sm:$0xff] %v11646_v54  ;;  %7752 = vmatmul.msk.f32.vlgmr.msra.gmra.mxu1 %vm278_vm0, %v4941_v1  ;;  %v4787_v1 = vld [vmem:[%s8243_s9 + $0xd5] sm:$0xff] }
 0x476   : > { %v11663_v61 = vpop.f32.mrf.mxu0 }
 0x477   : > { %v3946_v22 = vpop.f32.mrf.mxu2  ;;  %v3990_v4 = vpop.f32.mrf.mxu3 }
 0x478   : > { %v3947_v16 = vadd.f32 %v3946_v22, %v11168_v24  ;;  %v3991_v15 = vadd.f32 %v3990_v4, %v11170_v2  ;;  %v11665_v63 = vpop.f32.mrf.mxu1  ;;  %v4942_v24 = vld [vmem:[%s8243_s9 + $0xbe] sm:$0xff] }
 0x47a   : > { %v11658_v43 = vadd.f32 %v11574_v41, %v3947_v16  ;;  %v11661_v21 = vadd.f32 %v11576_v25, %v3991_v15  ;;  %v4948_v16 = vld [vmem:[%s8243_s9 + $0xee] sm:$0xff] }
 0x47b   : > { %7744 = vmatmul.msk.f32.gmra.mxu0 %vm278_vm0, %v4942_v24 }
 0x47c   : > { %13600 = vst [vmem:[#allocation6_spill] sm:$0xff] %v11658_v43  ;;  %7696 = vmatmul.msk.f32.gmra.mxu2 %vm278_vm0, %v11551_v27  ;;  %7705 = vmatmul.msk.f32.gmra.mxu3 %vm278_vm0, %v11551_v27  ;;  %v4943_v27 = vld [vmem:[%s8243_s9 + $0xc6] sm:$0xff] }
 0x47d   : > { %13601 = vst [vmem:[#allocation12_spill] sm:$0xff] %v11661_v21  ;;  %7753 = vmatmul.msk.f32.gmra.mxu1 %vm278_vm0, %v4942_v24 }
 0x47e   : > { %v11680_v41 = vpop.f32.mrf.mxu0 }
 0x47f   : > { %v4220_v29 = vpop.f32.mrf.mxu2  ;;  %v4264_v2 = vpop.f32.mrf.mxu3 }
 0x480   : > { %v4291_v55 = vadd.f32 %v4220_v29, %v11412_v11  ;;  %v4292_v36 = vadd.f32 %v4264_v2, %v11417_v39  ;;  %v11682_v25 = vpop.f32.mrf.mxu1  ;;  %v5156_v29 = vld [vmem:[%s13439_s3 + $0x78] sm:$0xff] }
 0x481   : > { %v4788_v2 = vld [vmem:[%s8243_s9 + $0xdd] sm:$0xff]  ;;  %5177 = vmatpush.msra.mxu2 %v5156_v29 }
 0x482   : > { %v11676_v57 = vadd.f32 %v4378_v35, %v4291_v55  ;;  %v11678_v8 = vadd.f32 %v4422_v0, %v4292_v36  ;;  %v5172_v55 = vld [vmem:[%s13439_s3 + $0xf8] sm:$0xff]  ;;  %v5155_v36 = vld [vmem:[%s13439_s3 + $0x70] sm:$0xff] }
 0x483   : > { %7745 = vmatmul.msk.f32.gmra.mxu0 %vm278_vm0, %v4943_v27  ;;  %5221 = vmatpush.msra.mxu3 %v5172_v55  ;;  %v5152_v29 = vld [vmem:[%s13439_s3 + $0x58] sm:$0xff] }
 0x484   : > { %7697 = vmatmul.msk.f32.gmra.mxu2 %vm278_vm0, %v11583_v31  ;;  %7706 = vmatmul.msk.f32.gmra.mxu3 %vm278_vm0, %v11583_v31  ;;  %v5168_v55 = vld [vmem:[%s13439_s3 + $0xd8] sm:$0xff] }
 0x485   : > { %7754 = vmatmul.msk.f32.gmra.mxu1 %vm278_vm0, %v4943_v27  ;;  %5178 = vmatpush.msra.mxu2 %v5155_v36 }
 0x486   : > { %v11698_v42 = vpop.f32.mrf.mxu0 }
 0x487   : > { %v4223_v53 = vpop.f32.mrf.mxu2  ;;  %v4267_v11 = vpop.f32.mrf.mxu3 }
 0x488   : > { %v4293_v39 = vadd.f32 %v4223_v53, %v11454_v32  ;;  %v4294_v18 = vadd.f32 %v4267_v11, %v11462_v20  ;;  %v11700_v31 = vpop.f32.mrf.mxu1  ;;  %v4949_v11 = vld [vmem:[%s8243_s9 + $0xf6] sm:$0xff] }
 0x48a   : > { %v11694_v37 = vadd.f32 %v4381_v60, %v4293_v39  ;;  %v11696_v44 = vadd.f32 %v4425_v34, %v4294_v18  ;;  %v4946_v34 = vld [vmem:[%s8243_s9 + $0xde] sm:$0xff] }
 0x48b   : > { %7746 = vmatmul.msk.f32.gmra.mxu0 %vm278_vm0, %v4944_v17 }
 0x48c   : > { %7725 = vmatmul.msk.f32.vlgmr.msrb.gmra.mxu2 %vm278_vm0, %v4783_v33  ;;  %7734 = vmatmul.msk.f32.vlgmr.msrb.gmra.mxu3 %vm278_vm0, %v4783_v33  ;;  %v5171_v33 = vld [vmem:[%s13439_s3 + $0xf0] sm:$0xff] }
 0x48d   : > { %7755 = vmatmul.msk.f32.gmra.mxu1 %vm278_vm0, %v4944_v17  ;;  %v5502_v17 = vld [vmem:[%s13437_s1 + $0xf0] sm:$0xff]  ;;  %5222 = vmatpush.msra.mxu3 %v5171_v33 }
 0x48e   : > { %v11714_v50 = vpop.f32.mrf.mxu0  ;;  %5539 = vmatpush.msrb.mxu0 %v5502_v17 }
 0x48f   : > { %v4226_v35 = vpop.f32.mrf.mxu2  ;;  %v4270_v32 = vpop.f32.mrf.mxu3  ;;  %13602 = vst [vmem:[#allocation7_spill] sm:$0xff] %v11714_v50 }
 0x490   : > { %v4295_v20 = vadd.f32 %v4226_v35, %v11493_v48  ;;  %v4296_v0 = vadd.f32 %v4270_v32, %v11496_v40  ;;  %v11716_v58 = vpop.f32.mrf.mxu1  ;;  %v4785_v40 = vld [vmem:[%s8243_s9 + $0xc5] sm:$0xff] }
 0x491   : > { %13603 = vst [vmem:[#allocation13_spill] sm:$0xff] %v11716_v58  ;;  %v4789_v35 = vld [vmem:[%s8243_s9 + $0xe5] sm:$0xff] }
 0x492   : > { %v11710_v56 = vadd.f32 %v4384_v7, %v4295_v20  ;;  %v11712_v52 = vadd.f32 %v4428_v38, %v4296_v0  ;;  %v5154_v32 = vld [vmem:[%s13439_s3 + $0x68] sm:$0xff]  ;;  %v5503_v20 = vld [vmem:[%s13437_s1 + $0xf8] sm:$0xff] }
 0x493   : > { %7747 = vmatmul.msk.f32.gmra.mxu0 %vm278_vm0, %v4945_v6  ;;  %v5170_v0 = vld [vmem:[%s13439_s3 + $0xe8] sm:$0xff]  ;;  %5179 = vmatpush.msra.mxu2 %v5154_v32  ;;  %v4791_v32 = vld [vmem:[%s8243_s9 + $0xf5] sm:$0xff] }
 0x494   : > { %7726 = vmatmul.msk.f32.gmra.mxu2 %vm278_vm0, %v4784_v45  ;;  %7735 = vmatmul.msk.f32.gmra.mxu3 %vm278_vm0, %v4784_v45  ;;  %v5153_v45 = vld [vmem:[%s13439_s3 + $0x60] sm:$0xff] }
 0x495   : > { %7756 = vmatmul.msk.f32.gmra.mxu1 %vm278_vm0, %v4945_v6  ;;  %5223 = vmatpush.msra.mxu3 %v5170_v0  ;;  %v5498_v0 = vld [vmem:[%s13437_s1 + $0xd0] sm:$0xff] }
 0x496   : > { %v11730_v26 = vpop.f32.mrf.mxu0  ;;  %5583 = vmatpush.msrb.mxu1 %v5503_v20  ;;  %5180 = vmatpush.msra.mxu2 %v5153_v45  ;;  %v5167_v20 = vld [vmem:[%s13439_s3 + $0xd0] sm:$0xff]  ;;  %v5150_v45 = vld [vmem:[%s13439_s3 + $0x48] sm:$0xff] }
 0x497   : > { %v11721_v13 = vpop.f32.mrf.mxu2  ;;  %v11723_v48 = vpop.f32.mrf.mxu3  ;;  %13604 = vst [vmem:[#allocation44_spill] sm:$0xff] %v11730_v26  ;;  %v5160_v26 = vld [vmem:[%s13439_s3 + $0x98] sm:$0xff] }
 0x498   : > { %v11732_v60 = vpop.f32.mrf.mxu1  ;;  %5181 = vmatpush.msra.mxu2 %v5152_v29 }
 0x499   : > { %13605 = vst [vmem:[#allocation45_spill] sm:$0xff] %v11732_v60  ;;  %v5493_v60 = vld [vmem:[%s13437_s1 + $0xa8] sm:$0xff] }
 0x49b   : > { %7748 = vmatmul.msk.f32.gmra.mxu0 %vm278_vm0, %v4946_v34 }
 0x49c   : > { %7727 = vmatmul.msk.f32.gmra.mxu2 %vm278_vm0, %v4785_v40  ;;  %7736 = vmatmul.msk.f32.gmra.mxu3 %vm278_vm0, %v4785_v40 }
 0x49d   : > { %7757 = vmatmul.msk.f32.gmra.mxu1 %vm278_vm0, %v4946_v34 }
 0x49e   : > { %v11744_v23 = vpop.f32.mrf.mxu0 }
 0x49f   : > { %v11735_v19 = vpop.f32.mrf.mxu2  ;;  %v11737_v5 = vpop.f32.mrf.mxu3  ;;  %13606 = vst [vmem:[#allocation20_spill] sm:$0xff] %v11744_v23 }
 0x4a0   : > { %v11746_v47 = vpop.f32.mrf.mxu1 }
 0x4a1   : > { %13607 = vst [vmem:[#allocation21_spill] sm:$0xff] %v11746_v47 }
 0x4a3   : > { %7749 = vmatmul.msk.f32.gmra.mxu0 %vm278_vm0, %v4947_v3 }
 0x4a4   : > { %7728 = vmatmul.msk.f32.gmra.mxu2 %vm278_vm0, %v4786_v51  ;;  %7737 = vmatmul.msk.f32.gmra.mxu3 %vm278_vm0, %v4786_v51 }
 0x4a5   : > { %7758 = vmatmul.msk.f32.gmra.mxu1 %vm278_vm0, %v4947_v3  ;;  %v5169_v3 = vld [vmem:[%s13439_s3 + $0xe0] sm:$0xff] }
 0x4a6   : > { %v11758_v22 = vpop.f32.mrf.mxu0  ;;  %5224 = vmatpush.msra.mxu3 %v5169_v3  ;;  %v5499_v3 = vld [vmem:[%s13437_s1 + $0xd8] sm:$0xff] }
 0x4a7   : > { %v11749_v7 = vpop.f32.mrf.mxu2  ;;  %v11751_v38 = vpop.f32.mrf.mxu3 }
 0x4a8   : > { %5225 = vmatpush.msra.mxu3 %v5168_v55 }
 0x4aa   : > { %v11760_v4 = vpop.f32.mrf.mxu1  ;;  %5226 = vmatpush.msra.mxu3 %v5167_v20  ;;  %v5496_v20 = vld [vmem:[%s13437_s1 + $0xc0] sm:$0xff] }
 0x4ab   : > { %7750 = vmatmul.msk.f32.gmra.mxu0 %vm278_vm0, %v4948_v16 }
 0x4ac   : > { %7729 = vmatmul.msk.f32.gmra.mxu2 %vm278_vm0, %v4787_v1  ;;  %7738 = vmatmul.msk.f32.gmra.mxu3 %vm278_vm0, %v4787_v1  ;;  %v4790_v1 = vld [vmem:[%s8243_s9 + $0xed] sm:$0xff] }
 0x4ad   : > { %7759 = vmatmul.msk.f32.gmra.mxu1 %vm278_vm0, %v4948_v16  ;;  %v5500_v16 = vld [vmem:[%s13437_s1 + $0xe0] sm:$0xff] }
 0x4ae   : > { %v11781_v27 = vpop.f32.mrf.mxu0  ;;  %5540 = vmatpush.msrb.mxu0 %v5500_v16 }
 0x4af   : > { %v11763_v15 = vpop.f32.mrf.mxu2  ;;  %v11765_v24 = vpop.f32.mrf.mxu3 }
 0x4b0   : > { %13608 = vst [vmem:[#allocation28_spill] sm:$0xff] %v11765_v24  ;;  %5541 = vmatpush.msrb.mxu0 %v5498_v0  ;;  %v5148_v0 = vld [vmem:[%s13439_s3 + $0x38] sm:$0xff] }
 0x4b2   : > { %v11783_v53 = vpop.f32.mrf.mxu1  ;;  %5542 = vmatpush.msrb.mxu0 %v5496_v20  ;;  %v5163_v20 = vld [vmem:[%s13439_s3 + $0xb0] sm:$0xff] }
 0x4b3   : > { %7751 = vmatmul.msk.f32.gmra.mxu0 %vm278_vm0, %v4949_v11 }
 0x4b4   : > { %7730 = vmatmul.msk.f32.gmra.mxu2 %vm278_vm0, %v4788_v2  ;;  %7739 = vmatmul.msk.f32.gmra.mxu3 %vm278_vm0, %v4788_v2  ;;  %v5501_v2 = vld [vmem:[%s13437_s1 + $0xe8] sm:$0xff] }
 0x4b5   : > { %7760 = vmatmul.msk.f32.gmra.mxu1 %vm278_vm0, %v4949_v11 }
 0x4b6   : > { %v11813_v6 = vpop.f32.mrf.mxu0  ;;  %5584 = vmatpush.msrb.mxu1 %v5501_v2 }
 0x4b7   : > { %v11786_v39 = vpop.f32.mrf.mxu2  ;;  %v11788_v18 = vpop.f32.mrf.mxu3 }
 0x4b8   : > { %13609 = vst [vmem:[#allocation29_spill] sm:$0xff] %v11786_v39  ;;  %5585 = vmatpush.msrb.mxu1 %v5499_v3  ;;  %v5164_v3 = vld [vmem:[%s13439_s3 + $0xb8] sm:$0xff] }
 0x4b9   : > { %13610 = vst [vmem:[#allocation40_spill] sm:$0xff] %v11788_v18 }
 0x4ba   : > { %v11815_v40 = vpop.f32.mrf.mxu1 }
 0x4bc   : > { %7731 = vmatmul.msk.f32.gmra.mxu2 %vm278_vm0, %v4789_v35  ;;  %7740 = vmatmul.msk.f32.gmra.mxu3 %vm278_vm0, %v4789_v35  ;;  %v5151_v35 = vld [vmem:[%s13439_s3 + $0x50] sm:$0xff] }
 0x4bd   : > { %5182 = vmatpush.msra.mxu2 %v5151_v35  ;;  %v5149_v35 = vld [vmem:[%s13439_s3 + $0x40] sm:$0xff] }
 0x4bf   : > { %v11817_v34 = vpop.f32.mrf.mxu2  ;;  %v11819_v51 = vpop.f32.mrf.mxu3  ;;  %5183 = vmatpush.msra.mxu2 %v5150_v45  ;;  %v5497_v45 = vld [vmem:[%s13437_s1 + $0xc8] sm:$0xff] }
 0x4c0   : > { %13611 = vst [vmem:[#allocation41_spill] sm:$0xff] %v11817_v34  ;;  %v11839_v36 = vpop.f32.mrf.mxu0  ;;  %5586 = vmatpush.msrb.mxu1 %v5497_v45  ;;  %v5146_v45 = vld [vmem:[%s13439_s3 + $0x28] sm:$0xff] }
 0x4c1   : > { %13612 = vst [vmem:[#allocation46_spill] sm:$0xff] %v11819_v51  ;;  %5184 = vmatpush.msra.mxu2 %v5149_v35 }
 0x4c2   : > { %v11841_v11 = vpop.f32.mrf.mxu1 }
 0x4c3   : > { %5185 = vmatpush.msra.mxu2 %v5148_v0  ;;  %v5494_v0 = vld [vmem:[%s13437_s1 + $0xb0] sm:$0xff] }
 0x4c4   : > { %7732 = vmatmul.msk.f32.gmra.mxu2 %vm278_vm0, %v4790_v1  ;;  %7741 = vmatmul.msk.f32.gmra.mxu3 %vm278_vm0, %v4790_v1  ;;  %v5166_v1 = vld [vmem:[%s13439_s3 + $0xc8] sm:$0xff] }
 0x4c5   : > { %5227 = vmatpush.msra.mxu3 %v5166_v1  ;;  %5543 = vmatpush.msrb.mxu0 %v5494_v0  ;;  %v5161_v0 = vld [vmem:[%s13439_s3 + $0xa0] sm:$0xff] }
 0x4c7   : > { %v11843_v33 = vpop.f32.mrf.mxu2  ;;  %v11845_v17 = vpop.f32.mrf.mxu3 }
 0x4c8   : > { %v11868_v16 = vpop.f32.mrf.mxu0  ;;  %v4607_v58 = vadd.f32 %v11843_v33, %v11676_v57  ;;  %v4608_v50 = vadd.f32 %v11845_v17, %v11678_v8  ;;  %v5474_v57 = vld [vmem:[%s13437_s1 + $0x58] sm:$0xff] }
 0x4ca   : > { %v11870_v29 = vpop.f32.mrf.mxu1  ;;  %v4765_v8 = vadd.f32 %v11758_v22, %v4607_v58  ;;  %v4766_v33 = vadd.f32 %v11760_v4, %v4608_v50 }
 0x4cc   : > { %7733 = vmatmul.msk.f32.gmra.mxu2 %vm278_vm0, %v4791_v32  ;;  %7742 = vmatmul.msk.f32.gmra.mxu3 %vm278_vm0, %v4791_v32  ;;  %v5165_v32 = vld [vmem:[%s13439_s3 + $0xc0] sm:$0xff] }
 0x4cd   : > { %5228 = vmatpush.msra.mxu3 %v5165_v32  ;;  %v5147_v32 = vld [vmem:[%s13439_s3 + $0x30] sm:$0xff] }
 0x4ce   : > { %5186 = vmatpush.msra.mxu2 %v5147_v32  ;;  %v5162_v32 = vld [vmem:[%s13439_s3 + $0xa8] sm:$0xff] }
 0x4cf   : > { %v11872_v2 = vpop.f32.mrf.mxu2  ;;  %v11874_v55 = vpop.f32.mrf.mxu3  ;;  %5229 = vmatpush.msra.mxu3 %v5164_v3  ;;  %v5495_v3 = vld [vmem:[%s13437_s1 + $0xb8] sm:$0xff] }
 0x4d0   : > { %v11894_v1 = vpop.f32.mrf.mxu0  ;;  %5587 = vmatpush.msrb.mxu1 %v5495_v3  ;;  %5187 = vmatpush.msra.mxu2 %v5146_v45  ;;  %v5492_v45 = vld [vmem:[%s13437_s1 + $0xa0] sm:$0xff]  ;;  %v5144_v3 = vld [vmem:[%s13439_s3 + $0x18] sm:$0xff]  ;;  %v4609_v58 = vadd.f32 %v11872_v2, %v11694_v37  ;;  %v4610_v50 = vadd.f32 %v11874_v55, %v11696_v44 }
 0x4d1   : > { %13613 = vst [vmem:[#allocation47_spill] sm:$0xff] %v11894_v1  ;;  %5230 = vmatpush.msra.mxu3 %v5163_v20  ;;  %v5145_v20 = vld [vmem:[%s13439_s3 + $0x20] sm:$0xff]  ;;  %5544 = vmatpush.msrb.mxu0 %v5492_v45  ;;  %v5143_v45 = vld [vmem:[%s13439_s3 + $0x10] sm:$0xff]  ;;  %v5754_v37 = vld [vmem:[%s13437_s1 + $0x158] sm:$0xff] }
 0x4d2   : > { %v11896_v35 = vpop.f32.mrf.mxu1  ;;  %5188 = vmatpush.msra.mxu2 %v5145_v20  ;;  %5588 = vmatpush.msrb.mxu1 %v5493_v60  ;;  %v4767_v44 = vadd.f32 %v11781_v27, %v4609_v58  ;;  %v4768_v2 = vadd.f32 %v11783_v53, %v4610_v50 }
 0x4d3   : > { %13614 = vst [vmem:[#allocation9_spill] sm:$0xff] %v11896_v35  ;;  %5231 = vmatpush.msra.mxu3 %v5162_v32 }
 0x4d4   : > { %5189 = vmatpush.msra.mxu2 %v5144_v3  ;;  %v5159_v3 = vld [vmem:[%s13439_s3 + $0x90] sm:$0xff] }
 0x4d5   : > { %5232 = vmatpush.msra.mxu3 %v5161_v0 }
 0x4d6   : > { %5190 = vmatpush.msra.mxu2 %v5143_v45  ;;  %v5141_v45 = vld [vmem:[%s13439_s3] sm:$0xff] }
 0x4d7   : > { %v11898_v49 = vpop.f32.mrf.mxu2  ;;  %v11900_v47 = vpop.f32.mrf.mxu3  ;;  %5233 = vmatpush.msra.mxu3 %v5160_v26 }
 0x4d8   : > { %v11921_v21 = vpop.f32.mrf.mxu0  ;;  %v4611_v27 = vadd.f32 %v11898_v49, %v11710_v56  ;;  %v4612_v53 = vadd.f32 %v11900_v47, %v11712_v52  ;;  %v5751_v49 = vld [vmem:[%s13437_s1 + $0x140] sm:$0xff]  ;;  %v5469_v56 = vld [vmem:[%s13437_s1 + $0x30] sm:$0xff] }
 0x4d9   : > { %13615 = vst [vmem:[#allocation24_spill] sm:$0xff] %v11921_v21  ;;  %5234 = vmatpush.msra.mxu3 %v5159_v3  ;;  %v5157_v3 = vld [vmem:[%s13439_s3 + $0x80] sm:$0xff] }
 0x4da   : > { %v11923_v34 = vpop.f32.mrf.mxu1  ;;  %v4769_v52 = vadd.f32 %v11813_v6, %v4611_v27 }
 0x4db   : > { %13616 = vst [vmem:[#allocation25_spill] sm:$0xff] %v11923_v34  ;;  %v5490_v34 = vld [vmem:[%s13437_s1 + $0x90] sm:$0xff] }
 0x4dc   : > { %5545 = vmatpush.msrb.mxu0 %v5490_v34  ;;  %v5158_v34 = vld [vmem:[%s13439_s3 + $0x88] sm:$0xff] }
 0x4dd   : > { %5235 = vmatpush.msra.mxu3 %v5158_v34  ;;  %v5477_v34 = vld [vmem:[%s13437_s1 + $0x70] sm:$0xff] }
 0x4df   : > { %v11917_v23 = vpop.f32.mrf.mxu2  ;;  %v11919_v51 = vpop.f32.mrf.mxu3  ;;  %5236 = vmatpush.msra.mxu3 %v5157_v3 }
 0x4e0   : > { %v11950_v20 = vpop.f32.mrf.mxu0 }
 0x4e1   : > { %13617 = vst [vmem:[#allocation23_spill] sm:$0xff] %v11950_v20  ;;  %v5491_v20 = vld [vmem:[%s13437_s1 + $0x98] sm:$0xff] }
 0x4e2   : > { %v11952_v0 = vpop.f32.mrf.mxu1  ;;  %5589 = vmatpush.msrb.mxu1 %v5491_v20 }
 0x4e3   : > { %13618 = vst [vmem:[#allocation30_spill] sm:$0xff] %v11952_v0  ;;  %v5142_v0 = vld [vmem:[%s13439_s3 + $0x8] sm:$0xff] }
 0x4e4   : > { %5191 = vmatpush.msra.mxu2 %v5142_v0  ;;  %v5488_v0 = vld [vmem:[%s13437_s1 + $0x80] sm:$0xff] }
 0x4e5   : > { %5546 = vmatpush.msrb.mxu0 %v5488_v0  ;;  %v5757_v0 = vld [vmem:[%s13437_s1 + $0x170] sm:$0xff] }
 0x4e6   : > { %5192 = vmatpush.msra.mxu2 %v5141_v45 }
 0x4e7   : > { %v11940_v32 = vpop.f32.mrf.mxu2  ;;  %v11942_v43 = vpop.f32.mrf.mxu3  ;;  %5794 = vmatpush.msra.mxu0 %v5757_v0 }
 0x4e8   : > { %v11973_v21 = vpop.f32.mrf.mxu0  ;;  %5654 = vmatpush.msrb.mxu2 %v5477_v34  ;;  %v5476_v34 = vld [vmem:[%s13437_s1 + $0x68] sm:$0xff] }
 0x4e9   : > { %13619 = vst [vmem:[#allocation42_spill] sm:$0xff] %v11973_v21  ;;  %v5478_v21 = vld [vmem:[%s13437_s1 + $0x78] sm:$0xff] }
 0x4ea   : > { %v11975_v18 = vpop.f32.mrf.mxu1  ;;  %5698 = vmatpush.msrb.mxu3 %v5478_v21  ;;  %v5475_v21 = vld [vmem:[%s13437_s1 + $0x60] sm:$0xff] }
 0x4eb   : > { %13620 = vst [vmem:[#allocation43_spill] sm:$0xff] %v11975_v18  ;;  %v5489_v18 = vld [vmem:[%s13437_s1 + $0x88] sm:$0xff]  ;;  %5655 = vmatpush.msrb.mxu2 %v5475_v21  ;;  %v5755_v21 = vld [vmem:[%s13437_s1 + $0x160] sm:$0xff] }
 0x4ec   : > { %5590 = vmatpush.msrb.mxu1 %v5489_v18  ;;  %v5758_v18 = vld [vmem:[%s13437_s1 + $0x178] sm:$0xff]  ;;  %5699 = vmatpush.msrb.mxu3 %v5476_v34  ;;  %v5756_v34 = vld [vmem:[%s13437_s1 + $0x168] sm:$0xff] }
 0x4ed   : > { %5795 = vmatpush.msra.mxu0 %v5755_v21  ;;  %v5481_v21 = vld [vmem:[%s8243_s9 + $0xe9] sm:$0xff] }
 0x4ee   : > { %5838 = vmatpush.msra.mxu1 %v5758_v18  ;;  %v5473_v18 = vld [vmem:[%s13437_s1 + $0x50] sm:$0xff]  ;;  %5700 = vmatpush.msrb.mxu3 %v5474_v57 }
 0x4ef   : > { %v11963_v26 = vpop.f32.mrf.mxu2  ;;  %v11965_v60 = vpop.f32.mrf.mxu3  ;;  %5656 = vmatpush.msrb.mxu2 %v5473_v18  ;;  %v5753_v57 = vld [vmem:[%s13437_s1 + $0x150] sm:$0xff] }
 0x4f0   : > { %v5010_v45 = vpop.f32.mrf.mxu0  ;;  %5839 = vmatpush.msra.mxu1 %v5756_v34  ;;  %5796 = vmatpush.msra.mxu0 %v5753_v57 }
 0x4f2   : > { %v5054_v3 = vpop.f32.mrf.mxu1  ;;  %5840 = vmatpush.msra.mxu1 %v5754_v37  ;;  %5797 = vmatpush.msra.mxu0 %v5751_v49  ;;  %v4302_v49 = vadd.f32 %v11751_v38, %v11598_v10 }
 0x4f7   : > { %v11986_v54 = vpop.f32.mrf.mxu2  ;;  %v11988_v20 = vpop.f32.mrf.mxu3 }
 0x4f8   : > { %13621 = vst [vmem:[#allocation37_spill] sm:$0xff] %v11986_v54  ;;  %v5480_v54 = vld [vmem:[%s8243_s9 + $0xe1] sm:$0xff] }
 0x4f9   : > { %13622 = vst [vmem:[#allocation38_spill] sm:$0xff] %v11988_v20  ;;  %v5479_v20 = vld [vmem:[%s8243_s9 + $0xd9] sm:$0xff] }
 0x4fa   : > { %7770 = vmatmul.msk.f32.vlgmr.msrb.gmra.mxu0 %vm278_vm0, %v5479_v20  ;;  %7779 = vmatmul.msk.f32.vlgmr.msrb.gmra.mxu1 %vm278_vm0, %v5479_v20  ;;  %v5013_v20 = vpop.f32.mrf.mxu0  ;;  %v5057_v0 = vpop.f32.mrf.mxu1 }
 0x4ff   : > { %v12002_v39 = vpop.f32.mrf.mxu2  ;;  %v12004_v59 = vpop.f32.mrf.mxu3 }
 0x500   : > { %13623 = vst [vmem:[#allocation14_spill] sm:$0xff] %v12002_v39 }
 0x501   : > { %13624 = vst [vmem:[#allocation39_spill] sm:$0xff] %v12004_v59 }
 0x502   : > { %7771 = vmatmul.msk.f32.gmra.mxu0 %vm278_vm0, %v5480_v54  ;;  %7780 = vmatmul.msk.f32.gmra.mxu1 %vm278_vm0, %v5480_v54  ;;  %v5099_v54 = vld [vmem:[%s13438_s2] sm:$0x3]  ;;  %v5016_v18 = vpop.f32.mrf.mxu0  ;;  %v5060_v34 = vpop.f32.mrf.mxu1 }
 0x503   : > { %v12049_v1 = vperm.slane %v5099_v54, 0  ;;  %v12051_v24 = vperm.slane %v5099_v54, 1 }
 0x507   : > { %v12021_v59 = vpop.f32.mrf.mxu2  ;;  %v12023_v39 = vpop.f32.mrf.mxu3 }
 0x508   : > { %13625 = vst [vmem:[#allocation32_spill] sm:$0xff] %v12021_v59 }
 0x509   : > { %13626 = vst [vmem:[#allocation33_spill] sm:$0xff] %v12023_v39 }
 0x50a   : > { %7772 = vmatmul.msk.f32.gmra.mxu0 %vm278_vm0, %v5481_v21  ;;  %7781 = vmatmul.msk.f32.gmra.mxu1 %vm278_vm0, %v5481_v21  ;;  %v5482_v21 = vld [vmem:[%s8243_s9 + $0xf1] sm:$0xff]  ;;  %v5019_v57 = vpop.f32.mrf.mxu0 }
 0x50f   : > { %v4852_v17 = vpop.f32.mrf.mxu2  ;;  %v4896_v39 = vpop.f32.mrf.mxu3 }
 0x510   : > { %v4923_v59 = vadd.f32 %v4852_v17, %v4765_v8  ;;  %v4924_v35 = vadd.f32 %v4896_v39, %v4766_v33  ;;  %v5471_v8 = vld [vmem:[%s13437_s1 + $0x40] sm:$0xff] }
 0x511   : > { %5657 = vmatpush.msrb.mxu2 %v5471_v8  ;;  %v5063_v8 = vpop.f32.mrf.mxu1 }
 0x512   : > { %v5081_v22 = vadd.f32 %v5010_v45, %v4923_v59  ;;  %v5082_v4 = vadd.f32 %v5054_v3, %v4924_v35  ;;  %v5472_v59 = vld [vmem:[%s13437_s1 + $0x48] sm:$0xff]  ;;  %7773 = vmatmul.msk.f32.gmra.mxu0 %vm278_vm0, %v5482_v21  ;;  %7782 = vmatmul.msk.f32.gmra.mxu1 %vm278_vm0, %v5482_v21 }
 0x513   : > { %5701 = vmatpush.msrb.mxu3 %v5472_v59  ;;  %5658 = vmatpush.msrb.mxu2 %v5469_v56 }
 0x514   : > { %v5105_v39 = vadd.f32 %v12049_v1, %v5081_v22  ;;  %v5106_v54 = vadd.f32 %v12051_v24, %v5082_v4  ;;  %v4297_v22 = vadd.f32 %v11721_v13, %v11528_v30  ;;  %v4298_v4 = vadd.f32 %v11723_v48, %v11531_v46  ;;  %v5752_v30 = vld [vmem:[%s13437_s1 + $0x148] sm:$0xff]  ;;  %v5470_v46 = vld [vmem:[%s13437_s1 + $0x38] sm:$0xff] }
 0x515   : > { %v4770_v13 = vadd.f32 %v11815_v40, %v4612_v53  ;;  %5841 = vmatpush.msra.mxu1 %v5752_v30  ;;  %5702 = vmatpush.msrb.mxu3 %v5470_v46 }
 0x516   : > { %v5123_v55 = vmax.f32 %v5105_v39, 0.0  ;;  %v5124_v35 = vmax.f32 %v5106_v54, 0.0  ;;  %v4456_v59 = vadd.f32 %v11665_v63, %v4298_v4  ;;  %v4300_v63 = vadd.f32 %v11737_v5, %v11563_v62 }
 0x517   : > { %v4855_v45 = vpop.f32.mrf.mxu2  ;;  %v4899_v3 = vpop.f32.mrf.mxu3 }
 0x518   : > { %v4925_v33 = vadd.f32 %v4855_v45, %v4767_v44  ;;  %v4926_v17 = vadd.f32 %v4899_v3, %v4768_v2  ;;  %5193 = vmatmul.f32.vlgmr.msra.gmra.mxu2 %v5123_v55  ;;  %5237 = vmatmul.f32.vlgmr.msra.gmra.mxu3 %v5124_v35  ;;  %v5483_v55 = vld [vmem:[%s8243_s9 + $0xf9] sm:$0xff]  ;;  %v4614_v40 = vadd.f32 %v11919_v51, %v4456_v59 }
 0x519   : > { %v5750_v51 = vld [vmem:[%s13437_s1 + $0x138] sm:$0xff] }
 0x51a   : > { %v5083_v58 = vadd.f32 %v5013_v20, %v4925_v33  ;;  %v5084_v50 = vadd.f32 %v5057_v0, %v4926_v17  ;;  %v4455_v20 = vadd.f32 %v11663_v61, %v4297_v22  ;;  %7774 = vmatmul.msk.f32.gmra.mxu0 %vm278_vm0, %v5483_v55  ;;  %7783 = vmatmul.msk.f32.gmra.mxu1 %vm278_vm0, %v5483_v55  ;;  %v5749_v17 = vld [vmem:[%s13437_s1 + $0x130] sm:$0xff] }
 0x51b   : > { %v4299_v61 = vadd.f32 %v11735_v19, %v11560_v9  ;;  %5798 = vmatpush.msra.mxu0 %v5749_v17  ;;  %v4772_v62 = vadd.f32 %v11841_v11, %v4614_v40  ;;  %5842 = vmatpush.msra.mxu1 %v5750_v51  ;;  %v5484_v11 = vld [vmem:[%s8243_s9 + $0x101] sm:$0xff]  ;;  %v5745_v40 = vld [vmem:[%s13437_s1 + $0x110] sm:$0xff] }
 0x51c   : > { %v5107_v39 = vadd.f32 %v12049_v1, %v5083_v58  ;;  %v5108_v54 = vadd.f32 %v12051_v24, %v5084_v50  ;;  %v4613_v6 = vadd.f32 %v11917_v23, %v4455_v20  ;;  %v5467_v23 = vld [vmem:[%s13437_s1 + $0x20] sm:$0xff]  ;;  %v4458_v58 = vadd.f32 %v11682_v25, %v4300_v63  ;;  %v13630_v63 = vld [vmem:[#allocation7_spill] sm:$0xff] }
 0x51d   : > { %5659 = vmatpush.msrb.mxu2 %v5467_v23  ;;  %v4457_v21 = vadd.f32 %v11680_v41, %v4299_v61  ;;  %v4301_v25 = vadd.f32 %v11749_v7, %v11595_v14  ;;  %v13631_v23 = vld [vmem:[#allocation13_spill] sm:$0xff] }
 0x51e   : > { %v5125_v48 = vmax.f32 %v5107_v39, 0.0  ;;  %v5126_v47 = vmax.f32 %v5108_v54, 0.0  ;;  %v4771_v9 = vadd.f32 %v11839_v36, %v4613_v6  ;;  %v5468_v36 = vld [vmem:[%s13437_s1 + $0x28] sm:$0xff]  ;;  %v4616_v41 = vadd.f32 %v11942_v43, %v4458_v58  ;;  %v5465_v43 = vld [vmem:[%s13437_s1 + $0x10] sm:$0xff] }
 0x51f   : > { %v4858_v0 = vpop.f32.mrf.mxu2  ;;  %v4902_v37 = vpop.f32.mrf.mxu3  ;;  %5703 = vmatpush.msrb.mxu3 %v5468_v36  ;;  %v4615_v4 = vadd.f32 %v11940_v32, %v4457_v21  ;;  %v5747_v32 = vld [vmem:[%s13437_s1 + $0x120] sm:$0xff]  ;;  %5660 = vmatpush.msrb.mxu2 %v5465_v43 }
 0x520   : > { %v4927_v44 = vadd.f32 %v4858_v0, %v4769_v52  ;;  %v4928_v2 = vadd.f32 %v4902_v37, %v4770_v13  ;;  %5196 = vmatmul.f32.gmra.mxu2 %v5125_v48  ;;  %5240 = vmatmul.f32.gmra.mxu3 %v5126_v47  ;;  %v4774_v7 = vadd.f32 %v11870_v29, %v4616_v41  ;;  %v5485_v0 = vld [vmem:[%s8243_s9 + $0x109] sm:$0xff]  ;;  %v5466_v29 = vld [vmem:[%s13437_s1 + $0x18] sm:$0xff] }
 0x521   : > { %5799 = vmatpush.msra.mxu0 %v5747_v32  ;;  %v4773_v14 = vadd.f32 %v11868_v16, %v4615_v4  ;;  %v4460_v52 = vadd.f32 %v11700_v31, %v4302_v49  ;;  %v5748_v16 = vld [vmem:[%s13437_s1 + $0x128] sm:$0xff]  ;;  %5704 = vmatpush.msrb.mxu3 %v5466_v29  ;;  %v13634_v4 = vld [vmem:[#allocation34_spill] sm:$0xff]  ;;  %v13635_v41 = vld [vmem:[#allocation29_spill] sm:$0xff] }
 0x522   : > { %v5085_v35 = vadd.f32 %v5016_v18, %v4927_v44  ;;  %v5086_v45 = vadd.f32 %v5060_v34, %v4928_v2  ;;  %v5022_v18 = vpop.f32.mrf.mxu0  ;;  %v5066_v34 = vpop.f32.mrf.mxu1  ;;  %7775 = vmatmul.msk.f32.gmra.mxu0 %vm278_vm0, %v5484_v11  ;;  %7784 = vmatmul.msk.f32.gmra.mxu1 %vm278_vm0, %v5484_v11  ;;  %v4303_v44 = vadd.f32 %v11763_v15, %v11622_v28  ;;  %v13627_v2 = vld [vmem:[#allocation28_spill] sm:$0xff]  ;;  %v13629_v15 = vld [vmem:[#allocation9_spill] sm:$0xff]  ;;  %v5744_v29 = vld [vmem:[%s13437_s1 + $0x108] sm:$0xff] }
 0x523   : > { %5843 = vmatpush.msra.mxu1 %v5748_v16  ;;  %v4618_v31 = vadd.f32 %v11965_v60, %v4460_v52  ;;  %v4304_v55 = vadd.f32 %v13627_v2, %v11625_v12  ;;  %v5463_v60 = vld [vmem:[%s13437_s1] sm:$0xff]  ;;  %5800 = vmatpush.msra.mxu0 %v5745_v40  ;;  %v13638_v32 = vld [vmem:[#allocation24_spill] sm:$0xff] }
 0x524   : > { %v5109_v3 = vadd.f32 %v12049_v1, %v5085_v35  ;;  %v5110_v33 = vadd.f32 %v12051_v24, %v5086_v45  ;;  %5661 = vmatpush.msrb.mxu2 %v5463_v60  ;;  %v13628_v35 = vld [vmem:[#allocation47_spill] sm:$0xff]  ;;  %v13646_v60 = vld [vmem:[#allocation12_spill] sm:$0xff] }
 0x525   : > { %v4776_v45 = vadd.f32 %v13629_v15, %v4618_v31  ;;  %v4462_v51 = vadd.f32 %v13631_v23, %v4304_v55  ;;  %v13642_v31 = vld [vmem:[#allocation14_spill] sm:$0xff] }
 0x526   : > { %v5127_v19 = vmax.f32 %v5109_v3, 0.0  ;;  %v5128_v5 = vmax.f32 %v5110_v33, 0.0  ;;  %v4461_v3 = vadd.f32 %v13630_v63, %v4303_v44  ;;  %v13648_v63 = vld [vmem:[#allocation23_spill] sm:$0xff] }
 0x527   : > { %v4861_v27 = vpop.f32.mrf.mxu2  ;;  %v4905_v53 = vpop.f32.mrf.mxu3 }
 0x528   : > { %v4929_v50 = vadd.f32 %v4861_v27, %v4771_v9  ;;  %v4930_v22 = vadd.f32 %v4905_v53, %v4772_v62  ;;  %5199 = vmatmul.f32.gmra.mxu2 %v5127_v19  ;;  %5243 = vmatmul.f32.gmra.mxu3 %v5128_v5  ;;  %v5486_v19 = vld [vmem:[%s8243_s9 + $0x111] sm:$0xff]  ;;  %v5743_v27 = vld [vmem:[%s13437_s1 + $0x100] sm:$0xff] }
 0x529   : > { %v5746_v5 = vld [vmem:[%s13437_s1 + $0x118] sm:$0xff]  ;;  %v13633_v53 = vld [vmem:[#allocation38_spill] sm:$0xff]  ;;  %5801 = vmatpush.msra.mxu0 %v5743_v27 }
 0x52a   : > { %v5087_v39 = vadd.f32 %v5019_v57, %v4929_v50  ;;  %v5088_v54 = vadd.f32 %v5063_v8, %v4930_v22  ;;  %v4459_v57 = vadd.f32 %v11698_v42, %v4301_v25  ;;  %v5025_v47 = vpop.f32.mrf.mxu0  ;;  %v5069_v20 = vpop.f32.mrf.mxu1  ;;  %7776 = vmatmul.msk.f32.gmra.mxu0 %vm278_vm0, %v5485_v0  ;;  %7785 = vmatmul.msk.f32.gmra.mxu1 %vm278_vm0, %v5485_v0  ;;  %v13637_v25 = vld [vmem:[#allocation40_spill] sm:$0xff] }
 0x52b   : > { %5844 = vmatpush.msra.mxu1 %v5746_v5  ;;  %v4620_v58 = vadd.f32 %v13633_v53, %v4462_v51  ;;  %v5915_v0 = vld [vmem:[%s13437_s1 + $0x1f0] sm:$0xff]  ;;  %v5734_v53 = vld [vmem:[%s8243_s9 + $0xda] sm:$0xff] }
 0x52c   : > { %v5111_v56 = vadd.f32 %v12049_v1, %v5087_v39  ;;  %v5112_v30 = vadd.f32 %v12051_v24, %v5088_v54  ;;  %v4617_v42 = vadd.f32 %v11963_v26, %v4459_v57  ;;  %v4305_v39 = vadd.f32 %v13635_v41, %v13634_v4  ;;  %v13636_v54 = vld [vmem:[#allocation35_spill] sm:$0xff]  ;;  %v5487_v57 = vld [vmem:[%s8243_s9 + $0x119] sm:$0xff]  ;;  %5952 = vmatpush.msra.mxu2 %v5915_v0 }
 0x52d   : > { %v4306_v49 = vadd.f32 %v13637_v25, %v13636_v54  ;;  %5845 = vmatpush.msra.mxu1 %v5744_v29  ;;  %v5914_v4 = vld [vmem:[%s13437_s1 + $0x1e8] sm:$0xff]  ;;  %v13653_v41 = vld [vmem:[#allocation33_spill] sm:$0xff] }
 0x52e   : > { %v5129_v10 = vmax.f32 %v5111_v56, 0.0  ;;  %v5130_v38 = vmax.f32 %v5112_v30, 0.0  ;;  %v4775_v28 = vadd.f32 %v13628_v35, %v4617_v42  ;;  %v5916_v42 = vld [vmem:[%s13437_s1 + $0x1f8] sm:$0xff]  ;;  %v13647_v35 = vld [vmem:[#allocation46_spill] sm:$0xff] }
 0x52f   : > { %v4864_v8 = vpop.f32.mrf.mxu2  ;;  %v4908_v46 = vpop.f32.mrf.mxu3  ;;  %v5912_v0 = vld [vmem:[%s13437_s1 + $0x1d8] sm:$0xff] }
 0x530   : > { %v4931_v13 = vadd.f32 %v4864_v8, %v4773_v14  ;;  %v4932_v48 = vadd.f32 %v4908_v46, %v4774_v7  ;;  %5202 = vmatmul.f32.gmra.mxu2 %v5129_v10  ;;  %5246 = vmatmul.f32.gmra.mxu3 %v5130_v38  ;;  %v13639_v14 = vld [vmem:[#allocation25_spill] sm:$0xff]  ;;  %v13640_v8 = vld [vmem:[#allocation44_spill] sm:$0xff] }
 0x531   : > { %v4778_v7 = vadd.f32 %v13639_v14, %v4620_v58  ;;  %v4463_v46 = vadd.f32 %v13640_v8, %v4305_v39  ;;  %v6073_v58 = vld [vmem:[%s13437_s1 + $0x270] sm:$0xff] }
 0x532   : > { %v5089_v37 = vadd.f32 %v5022_v18, %v4931_v13  ;;  %v5090_v59 = vadd.f32 %v5066_v34, %v4932_v48  ;;  %v5464_v18 = vld [vmem:[%s13437_s1 + $0x8] sm:$0xff]  ;;  %v13632_v34 = vld [vmem:[#allocation37_spill] sm:$0xff]  ;;  %7777 = vmatmul.msk.f32.gmra.mxu0 %vm278_vm0, %v5486_v19  ;;  %v5028_v36 = vpop.f32.mrf.mxu0  ;;  %v5072_v11 = vpop.f32.mrf.mxu1  ;;  %7786 = vmatmul.msk.f32.gmra.mxu1 %vm278_vm0, %v5486_v19 }
 0x533   : > { %v4619_v21 = vadd.f32 %v13632_v34, %v4461_v3  ;;  %5705 = vmatpush.msrb.mxu3 %v5464_v18  ;;  %v13641_v48 = vld [vmem:[#allocation45_spill] sm:$0xff]  ;;  %6110 = vmatpush.msrb.mxu0 %v6073_v58  ;;  %v5459_v58 = vld [vmem:[%s8243_s9 + $0x100] sm:$0xff] }
 0x534   : > { %v5113_v6 = vadd.f32 %v12049_v1, %v5089_v37  ;;  %v5114_v26 = vadd.f32 %v12051_v24, %v5090_v59  ;;  %v4621_v37 = vadd.f32 %v13642_v31, %v4463_v46  ;;  %v13643_v59 = vld [vmem:[#allocation39_spill] sm:$0xff]  ;;  %v13651_v18 = vld [vmem:[#allocation21_spill] sm:$0xff] }
 0x535   : > { %v4777_v43 = vadd.f32 %v13638_v32, %v4619_v21  ;;  %5996 = vmatpush.msra.mxu3 %v5916_v42 }
 0x536   : > { %v5131_v12 = vmax.f32 %v5113_v6, 0.0  ;;  %v5132_v61 = vmax.f32 %v5114_v26, 0.0  ;;  %v13644_v6 = vld [vmem:[#allocation6_spill] sm:$0xff]  ;;  %v13645_v26 = vld [vmem:[#allocation41_spill] sm:$0xff]  ;;  %v4779_v3 = vadd.f32 %v13648_v63, %v4621_v37 }
 0x537   : > { %v4867_v33 = vpop.f32.mrf.mxu2  ;;  %v4911_v17 = vpop.f32.mrf.mxu3  ;;  %v4307_v40 = vadd.f32 %v13645_v26, %v13644_v6  ;;  %5997 = vmatpush.msra.mxu3 %v5914_v4  ;;  %v5909_v6 = vld [vmem:[%s13437_s1 + $0x1c0] sm:$0xff]  ;;  %v5454_v26 = vld [vmem:[%s8243_s9 + $0xd8] sm:$0xff] }
 0x538   : > { %v4933_v9 = vadd.f32 %v4867_v33, %v4775_v28  ;;  %v4934_v62 = vadd.f32 %v4911_v17, %v4776_v45  ;;  %5205 = vmatmul.f32.gmra.mxu2 %v5131_v12  ;;  %5249 = vmatmul.f32.gmra.mxu3 %v5132_v61  ;;  %v4308_v28 = vadd.f32 %v13647_v35, %v13646_v60  ;;  %v13649_v33 = vld [vmem:[#allocation30_spill] sm:$0xff]  ;;  %v5907_v35 = vld [vmem:[%s13437_s1 + $0x1b0] sm:$0xff] }
 0x539   : > { %5998 = vmatpush.msra.mxu3 %v5912_v0  ;;  %v6067_v60 = vld [vmem:[%s13437_s1 + $0x240] sm:$0xff] }
 0x53a   : > { %v5091_v50 = vadd.f32 %v5025_v47, %v4933_v9  ;;  %v5092_v22 = vadd.f32 %v5069_v20, %v4934_v62  ;;  %v4464_v47 = vadd.f32 %v13641_v48, %v4306_v49  ;;  %7778 = vmatmul.msk.f32.gmra.mxu0 %vm278_vm0, %v5487_v57  ;;  %7787 = vmatmul.msk.f32.gmra.mxu1 %vm278_vm0, %v5487_v57  ;;  %v5031_v12 = vpop.f32.mrf.mxu0  ;;  %v5075_v61 = vpop.f32.mrf.mxu1  ;;  %v13650_v9 = vld [vmem:[#allocation20_spill] sm:$0xff]  ;;  %v5735_v48 = vld [vmem:[%s8243_s9 + $0xe2] sm:$0xff]  ;;  %v12389_v4 = vld [vmem:[%s8243_s9 + $0x11a] sm:$0xff] }
 0x53b   : > { %v4465_v62 = vadd.f32 %v13650_v9, %v4307_v40  ;;  %v4466_v34 = vadd.f32 %v13651_v18, %v4308_v28  ;;  %v12289_v40 = vld [vmem:[%s8243_s9 + $0xf2] sm:$0xff]  ;;  %v6068_v28 = vld [vmem:[%s13437_s1 + $0x248] sm:$0xff]  ;;  %v5905_v63 = vld [vmem:[%s13437_s1 + $0x1a0] sm:$0xff] }
 0x53c   : > { %v5115_v56 = vadd.f32 %v12049_v1, %v5091_v50  ;;  %v5116_v30 = vadd.f32 %v12051_v24, %v5092_v22  ;;  %v4622_v44 = vadd.f32 %v13643_v59, %v4464_v47  ;;  %v5913_v50 = vld [vmem:[%s13437_s1 + $0x1e0] sm:$0xff]  ;;  %v13652_v22 = vld [vmem:[#allocation32_spill] sm:$0xff]  ;;  %v5904_v18 = vld [vmem:[%s13437_s1 + $0x198] sm:$0xff] }
 0x53d   : > { %5953 = vmatpush.msra.mxu2 %v5913_v50  ;;  %v4624_v39 = vadd.f32 %v13653_v41, %v4466_v34  ;;  %v6071_v47 = vld [vmem:[%s13437_s1 + $0x260] sm:$0xff]  ;;  %v5903_v9 = vld [vmem:[%s13437_s1 + $0x190] sm:$0xff]  ;;  %v5458_v34 = vld [vmem:[%s8243_s9 + $0xf8] sm:$0xff] }
 0x53e   : > { %v5133_v10 = vmax.f32 %v5115_v56, 0.0  ;;  %v5134_v38 = vmax.f32 %v5116_v30, 0.0  ;;  %v4780_v17 = vadd.f32 %v13649_v33, %v4622_v44  ;;  %v13654_v30 = vld [vmem:[#allocation42_spill] sm:$0xff]  ;;  %6111 = vmatpush.msrb.mxu0 %v6071_v47  ;;  %v5906_v33 = vld [vmem:[%s13437_s1 + $0x1a8] sm:$0xff] }
 0x53f   : > { %v4870_v52 = vpop.f32.mrf.mxu2  ;;  %v4914_v13 = vpop.f32.mrf.mxu3  ;;  %v5460_v41 = vld [vmem:[%s8243_s9 + $0x108] sm:$0xff] }
 0x540   : > { %v4935_v20 = vadd.f32 %v4870_v52, %v4777_v43  ;;  %v4936_v16 = vadd.f32 %v4914_v13, %v4778_v7  ;;  %5208 = vmatmul.f32.gmra.mxu2 %v5133_v10  ;;  %5252 = vmatmul.f32.gmra.mxu3 %v5134_v38  ;;  %v13655_v43 = vld [vmem:[#allocation43_spill] sm:$0xff] }
 0x541   : > { %v4782_v14 = vadd.f32 %v13655_v43, %v4624_v39  ;;  %v6061_v39 = vld [vmem:[%s13437_s1 + $0x210] sm:$0xff] }
 0x542   : > { %v5093_v2 = vadd.f32 %v5028_v36, %v4935_v20  ;;  %v5094_v55 = vadd.f32 %v5072_v11, %v4936_v16  ;;  %v4623_v36 = vadd.f32 %v13652_v22, %v4465_v62  ;;  %7806 = vmatmul.msk.f32.vlgmr.msra.gmra.mxu0 %vm278_vm0, %v5734_v53  ;;  %v6074_v11 = vld [vmem:[%s13437_s1 + $0x278] sm:$0xff]  ;;  %7815 = vmatmul.msk.f32.vlgmr.msra.gmra.mxu1 %vm278_vm0, %v5734_v53  ;;  %v5034_v38 = vpop.f32.mrf.mxu0  ;;  %v5078_v57 = vpop.f32.mrf.mxu1  ;;  %v5911_v20 = vld [vmem:[%s13437_s1 + $0x1d0] sm:$0xff]  ;;  %v6072_v16 = vld [vmem:[%s13437_s1 + $0x268] sm:$0xff] }
 0x543   : > { %6154 = vmatpush.msrb.mxu1 %v6074_v11  ;;  %5954 = vmatpush.msra.mxu2 %v5911_v20  ;;  %v6064_v62 = vld [vmem:[%s13437_s1 + $0x228] sm:$0xff]  ;;  %v12369_v53 = vld [vmem:[%s8243_s9 + $0x112] sm:$0xff] }
 0x544   : > { %v5117_v15 = vadd.f32 %v12049_v1, %v5093_v2  ;;  %v5118_v45 = vadd.f32 %v12051_v24, %v5094_v55  ;;  %v4781_v32 = vadd.f32 %v13654_v30, %v4623_v36  ;;  %v12267_v2 = vld [vmem:[%s8243_s9 + $0xea] sm:$0xff]  ;;  %v5901_v36 = vld [vmem:[%s13437_s1 + $0x180] sm:$0xff] }
 0x545   : > { %6155 = vmatpush.msrb.mxu1 %v6072_v16  ;;  %v6069_v55 = vld [vmem:[%s13437_s1 + $0x250] sm:$0xff]  ;;  %5955 = vmatpush.msra.mxu2 %v5909_v6  ;;  %v5902_v11 = vld [vmem:[%s13437_s1 + $0x188] sm:$0xff]  ;;  %v6052_v16 = vld [vmem:[%s8243_s9 + $0xfb] sm:$0xff] }
 0x546   : > { %v5135_v23 = vmax.f32 %v5117_v15, 0.0  ;;  %v5136_v51 = vmax.f32 %v5118_v45, 0.0  ;;  %6112 = vmatpush.msrb.mxu0 %v6069_v55  ;;  %v5908_v15 = vld [vmem:[%s13437_s1 + $0x1b8] sm:$0xff]  ;;  %v5455_v45 = vld [vmem:[%s8243_s9 + $0xe0] sm:$0xff]  ;;  %v6060_v30 = vld [vmem:[%s13437_s1 + $0x208] sm:$0xff] }
 0x547   : > { %v4873_v19 = vpop.f32.mrf.mxu2  ;;  %v4917_v5 = vpop.f32.mrf.mxu3  ;;  %5956 = vmatpush.msra.mxu2 %v5907_v35  ;;  %v5461_v43 = vld [vmem:[%s8243_s9 + $0x110] sm:$0xff] }
 0x548   : > { %v4937_v21 = vadd.f32 %v4873_v19, %v4779_v3  ;;  %v4938_v27 = vadd.f32 %v4917_v5, %v4780_v17  ;;  %5211 = vmatmul.f32.gmra.mxu2 %v5135_v23  ;;  %5255 = vmatmul.f32.gmra.mxu3 %v5136_v51  ;;  %v6066_v3 = vld [vmem:[%s13437_s1 + $0x238] sm:$0xff]  ;;  %v5456_v17 = vld [vmem:[%s8243_s9 + $0xe8] sm:$0xff]  ;;  %v6063_v51 = vld [vmem:[%s13437_s1 + $0x220] sm:$0xff] }
 0x549   : > { %6113 = vmatpush.msrb.mxu0 %v6067_v60  ;;  %5957 = vmatpush.msra.mxu2 %v5905_v63  ;;  %v12333_v23 = vld [vmem:[%s8243_s9 + $0x102] sm:$0xff]  ;;  %v5457_v19 = vld [vmem:[%s8243_s9 + $0xf0] sm:$0xff] }
 0x54a   : > { %v5095_v54 = vadd.f32 %v5031_v12, %v4937_v21  ;;  %v5096_v25 = vadd.f32 %v5075_v61, %v4938_v27  ;;  %7807 = vmatmul.msk.f32.gmra.mxu0 %vm278_vm0, %v5735_v48  ;;  %7816 = vmatmul.msk.f32.gmra.mxu1 %vm278_vm0, %v5735_v48  ;;  %v12311_v12 = vld [vmem:[%s8243_s9 + $0xfa] sm:$0xff]  ;;  %v6065_v61 = vld [vmem:[%s13437_s1 + $0x230] sm:$0xff] }
 0x54b   : > { %6114 = vmatpush.msrb.mxu0 %v6065_v61  ;;  %5958 = vmatpush.msra.mxu2 %v5903_v9  ;;  %v12352_v5 = vld [vmem:[%s8243_s9 + $0x10a] sm:$0xff] }
 0x54c   : > { %v5119_v49 = vadd.f32 %v12049_v1, %v5095_v54  ;;  %v5120_v56 = vadd.f32 %v12051_v24, %v5096_v25  ;;  %v6062_v54 = vld [vmem:[%s13437_s1 + $0x218] sm:$0xff] }
 0x54d   : > { %6115 = vmatpush.msrb.mxu0 %v6063_v51  ;;  %5959 = vmatpush.msra.mxu2 %v5901_v36  ;;  %v6054_v51 = vld [vmem:[%s8243_s9 + $0x10b] sm:$0xff] }
 0x54e   : > { %v5137_v7 = vmax.f32 %v5119_v49, 0.0  ;;  %v5138_v10 = vmax.f32 %v5120_v56, 0.0  ;;  %v6059_v56 = vld [vmem:[%s13437_s1 + $0x200] sm:$0xff] }
 0x54f   : > { %v4876_v8 = vpop.f32.mrf.mxu2  ;;  %v4920_v46 = vpop.f32.mrf.mxu3  ;;  %6116 = vmatpush.msrb.mxu0 %v6061_v39  ;;  %v6227_v39 = vld [vmem:[%s13437_s1 + $0x2d0] sm:$0xff] }
 0x550   : > { %v4939_v52 = vadd.f32 %v4876_v8, %v4781_v32  ;;  %v4940_v13 = vadd.f32 %v4920_v46, %v4782_v14  ;;  %5214 = vmatmul.f32.gmra.mxu2 %v5137_v7  ;;  %5258 = vmatmul.f32.gmra.mxu3 %v5138_v10  ;;  %v6050_v32 = vld [vmem:[%s8243_s9 + $0xeb] sm:$0xff]  ;;  %v12427_v10 = vld [vmem:[%s13440_s4] ss:$0 sm:$0xff] }
 0x551   : > { %6117 = vmatpush.msrb.mxu0 %v6059_v56 }
 0x552   : > { %v5097_v29 = vadd.f32 %v5034_v38, %v4939_v52  ;;  %v5098_v42 = vadd.f32 %v5078_v57, %v4940_v13  ;;  %7808 = vmatmul.msk.f32.gmra.mxu0 %vm278_vm0, %v12267_v2  ;;  %7817 = vmatmul.msk.f32.gmra.mxu1 %vm278_vm0, %v12267_v2  ;;  %v6051_v38 = vld [vmem:[%s8243_s9 + $0xf3] sm:$0xff] }
 0x553   : > { %v5462_v52 = vld [vmem:[%s8243_s9 + $0x118] sm:$0xff] }
 0x554   : > { %v5121_v31 = vadd.f32 %v12049_v1, %v5097_v29  ;;  %v5122_v37 = vadd.f32 %v12051_v24, %v5098_v42  ;;  %v6070_v24 = vld [vmem:[%s13437_s1 + $0x258] sm:$0xff]  ;;  %v5910_v1 = vld [vmem:[%s13437_s1 + $0x1c8] sm:$0xff] }
 0x555   : > { %6156 = vmatpush.msrb.mxu1 %v6070_v24  ;;  %5999 = vmatpush.msra.mxu3 %v5910_v1  ;;  %v6053_v1 = vld [vmem:[%s8243_s9 + $0x103] sm:$0xff] }
 0x556   : > { %v5139_v59 = vmax.f32 %v5121_v31, 0.0  ;;  %v5140_v44 = vmax.f32 %v5122_v37, 0.0  ;;  %v6231_v31 = vld [vmem:[%s13437_s1 + $0x2f0] sm:$0xff]  ;;  %v6232_v37 = vld [vmem:[%s13437_s1 + $0x2f8] sm:$0xff] }
 0x557   : > { %6157 = vmatpush.msrb.mxu1 %v6068_v28  ;;  %6000 = vmatpush.msra.mxu3 %v5908_v15  ;;  %v6389_v15 = vld [vmem:[%s13437_s1 + $0x370] sm:$0xff] }
 0x558   : > { %5217 = vmatmul.f32.gmra.mxu2 %v5139_v59  ;;  %5261 = vmatmul.f32.gmra.mxu3 %v5140_v44 }
 0x559   : > { %6158 = vmatpush.msrb.mxu1 %v6066_v3  ;;  %6001 = vmatpush.msra.mxu3 %v5906_v33 }
 0x55a   : > { %7809 = vmatmul.msk.f32.gmra.mxu0 %vm278_vm0, %v12289_v40  ;;  %7818 = vmatmul.msk.f32.gmra.mxu1 %vm278_vm0, %v12289_v40 }
 0x55b   : > { %6159 = vmatpush.msrb.mxu1 %v6064_v62  ;;  %6002 = vmatpush.msra.mxu3 %v5904_v18 }
 0x55c   : > { %6426 = vmatpush.msra.mxu0 %v6389_v15 }
 0x55d   : > { %6003 = vmatpush.msra.mxu3 %v5902_v11  ;;  %6160 = vmatpush.msrb.mxu1 %v6062_v54 }
 0x55f   : > { %6161 = vmatpush.msrb.mxu1 %v6060_v30 }
 0x560   : > { %7788 = vmatmul.msk.f32.vlgmr.msrb.gmra.mxu2 %vm278_vm0, %v5454_v26  ;;  %7797 = vmatmul.msk.f32.vlgmr.msrb.gmra.mxu3 %vm278_vm0, %v5454_v26 }
 0x561   : > { %6268 = vmatpush.msrb.mxu2 %v6231_v31  ;;  %6312 = vmatpush.msrb.mxu3 %v6232_v37 }
 0x562   : > { %7810 = vmatmul.msk.f32.gmra.mxu0 %vm278_vm0, %v12311_v12  ;;  %7819 = vmatmul.msk.f32.gmra.mxu1 %vm278_vm0, %v12311_v12 }
 0x568   : > { %7789 = vmatmul.msk.f32.gmra.mxu2 %vm278_vm0, %v5455_v45  ;;  %7798 = vmatmul.msk.f32.gmra.mxu3 %vm278_vm0, %v5455_v45  ;;  %v6390_v45 = vld [vmem:[%s13437_s1 + $0x378] sm:$0xff] }
 0x569   : > { %6470 = vmatpush.msra.mxu1 %v6390_v45 }
 0x56a   : > { %7811 = vmatmul.msk.f32.gmra.mxu0 %vm278_vm0, %v12333_v23  ;;  %7820 = vmatmul.msk.f32.gmra.mxu1 %vm278_vm0, %v12333_v23 }
 0x570   : > { %7790 = vmatmul.msk.f32.gmra.mxu2 %vm278_vm0, %v5456_v17  ;;  %7799 = vmatmul.msk.f32.gmra.mxu3 %vm278_vm0, %v5456_v17 }
 0x572   : > { %7812 = vmatmul.msk.f32.gmra.mxu0 %vm278_vm0, %v12352_v5  ;;  %7821 = vmatmul.msk.f32.gmra.mxu1 %vm278_vm0, %v12352_v5 }
 0x577   : > { %v12362_v21 = vpop.f32.mrf.mxu0  ;;  %v12364_v27 = vpop.f32.mrf.mxu1 }
 0x578   : > { %7791 = vmatmul.msk.f32.gmra.mxu2 %vm278_vm0, %v5457_v19  ;;  %7800 = vmatmul.msk.f32.gmra.mxu3 %vm278_vm0, %v5457_v19 }
 0x57a   : > { %7813 = vmatmul.msk.f32.gmra.mxu0 %vm278_vm0, %v12369_v53  ;;  %7822 = vmatmul.msk.f32.gmra.mxu1 %vm278_vm0, %v12369_v53 }
 0x57f   : > { %v12376_v50 = vpop.f32.mrf.mxu0  ;;  %v12378_v22 = vpop.f32.mrf.mxu1 }
 0x580   : > { %7792 = vmatmul.msk.f32.gmra.mxu2 %vm278_vm0, %v5458_v34  ;;  %7801 = vmatmul.msk.f32.gmra.mxu3 %vm278_vm0, %v5458_v34 }
 0x582   : > { %7814 = vmatmul.msk.f32.gmra.mxu0 %vm278_vm0, %v12389_v4  ;;  %7823 = vmatmul.msk.f32.gmra.mxu1 %vm278_vm0, %v12389_v4 }
 0x587   : > { %v12402_v25 = vpop.f32.mrf.mxu0  ;;  %v12404_v49 = vpop.f32.mrf.mxu1 }
 0x588   : > { %7793 = vmatmul.msk.f32.gmra.mxu2 %vm278_vm0, %v5459_v58  ;;  %7802 = vmatmul.msk.f32.gmra.mxu3 %vm278_vm0, %v5459_v58 }
 0x58a   : > { %7842 = vmatmul.msk.f32.vlgmr.msrb.gmra.mxu0 %vm278_vm0, %v6050_v32  ;;  %7851 = vmatmul.msk.f32.vlgmr.msrb.gmra.mxu1 %vm278_vm0, %v6050_v32 }
 0x58f   : > { %v12418_v14 = vpop.f32.mrf.mxu0  ;;  %v12420_v7 = vpop.f32.mrf.mxu1 }
 0x590   : > { %7794 = vmatmul.msk.f32.gmra.mxu2 %vm278_vm0, %v5460_v41  ;;  %7803 = vmatmul.msk.f32.gmra.mxu3 %vm278_vm0, %v5460_v41  ;;  %v6387_v41 = vld [vmem:[%s13437_s1 + $0x360] sm:$0xff] }
 0x591   : > { %6427 = vmatpush.msra.mxu0 %v6387_v41 }
 0x592   : > { %7843 = vmatmul.msk.f32.gmra.mxu0 %vm278_vm0, %v6051_v38  ;;  %7852 = vmatmul.msk.f32.gmra.mxu1 %vm278_vm0, %v6051_v38 }
 0x597   : > { %v12436_v48 = vpop.f32.mrf.mxu0  ;;  %v12438_v47 = vpop.f32.mrf.mxu1 }
 0x598   : > { %7795 = vmatmul.msk.f32.gmra.mxu2 %vm278_vm0, %v5461_v43  ;;  %7804 = vmatmul.msk.f32.gmra.mxu3 %vm278_vm0, %v5461_v43 }
 0x59a   : > { %7844 = vmatmul.msk.f32.gmra.mxu0 %vm278_vm0, %v6052_v16  ;;  %7853 = vmatmul.msk.f32.gmra.mxu1 %vm278_vm0, %v6052_v16 }
 0x59b   : > { %v5194_v57 = vpop.f32.mrf.mxu2  ;;  %v5238_v8 = vpop.f32.mrf.mxu3 }
 0x59c   : > { %v5195_v46 = vadd.f32 %v12427_v10, %v5194_v57 }
 0x59e   : > { %v12434_v13 = vadd.f32 %v5238_v8, %v5195_v46  ;;  %v6055_v46 = vld [vmem:[%s8243_s9 + $0x113] sm:$0xff] }
 0x59f   : > { %v12455_v44 = vpop.f32.mrf.mxu0  ;;  %v12457_v55 = vpop.f32.mrf.mxu1 }
 0x5a0   : > { %v7761_v20 = vmul.f32 -1.442695, %v12434_v13  ;;  %7796 = vmatmul.msk.f32.gmra.mxu2 %vm278_vm0, %v5462_v52  ;;  %7805 = vmatmul.msk.f32.gmra.mxu3 %vm278_vm0, %v5462_v52 }
 0x5a2   : > { %8029 = vpow2.f32 %v7761_v20  ;;  %7845 = vmatmul.msk.f32.gmra.mxu0 %vm278_vm0, %v6053_v1  ;;  %7854 = vmatmul.msk.f32.gmra.mxu1 %vm278_vm0, %v6053_v1 }
 0x5a3   : > { %v5197_v0 = vpop.f32.mrf.mxu2  ;;  %v5241_v29 = vpop.f32.mrf.mxu3 }
 0x5a4   : > { %v5198_v42 = vadd.f32 %v12427_v10, %v5197_v0 }
 0x5a6   : > { %v12453_v59 = vadd.f32 %v5241_v29, %v5198_v42 }
 0x5a7   : > { %v12479_v63 = vpop.f32.mrf.mxu0  ;;  %v12481_v3 = vpop.f32.mrf.mxu1 }
 0x5a8   : > { %v8030_v6 = vpop.eup %8029  ;;  %v7762_v24 = vmul.f32 -1.442695, %v12453_v59  ;;  %7824 = vmatmul.msk.f32.vlgmr.msra.gmra.mxu2 %vm278_vm0, %v12267_v2  ;;  %7833 = vmatmul.msk.f32.vlgmr.msra.gmra.mxu3 %vm278_vm0, %v12267_v2  ;;  %v6229_v2 = vld [vmem:[%s13437_s1 + $0x2e0] sm:$0xff] }
 0x5a9   : > { %v5292_v26 = vadd.f32 1.0, %v8030_v6  ;;  %6269 = vmatpush.msrb.mxu2 %v6229_v2 }
 0x5aa   : > { %8031 = vpow2.f32 %v7762_v24  ;;  %7846 = vmatmul.msk.f32.gmra.mxu0 %vm278_vm0, %v6054_v51  ;;  %7855 = vmatmul.msk.f32.gmra.mxu1 %vm278_vm0, %v6054_v51 }
 0x5ab   : > { %8033 = vrcp.f32 %v5292_v26  ;;  %v5200_v60 = vpop.f32.mrf.mxu2  ;;  %v5244_v35 = vpop.f32.mrf.mxu3  ;;  %v5312_v11 = vand.u32 2147483648, %v5292_v26  ;;  %v5310_v56 = vand.u32 2147483647, %v5292_v26  ;;  %6270 = vmatpush.msrb.mxu2 %v6227_v39  ;;  %vm5306_vm5 = vweird.f32 %v5292_v26 }
 0x5ac   : > { %v5201_v28 = vadd.f32 %v12427_v10, %v5200_v60  ;;  %v6388_v60 = vld [vmem:[%s13437_s1 + $0x368] sm:$0xff] }
 0x5ad   : > { %v5313_v20 = vor.u32 1.1754944e-38, %v5312_v11  ;;  %vm5311_vm7 = vcmp.eq.f32.partialorder %v5310_v56, 8.507059e+37  ;;  %6471 = vmatpush.msra.mxu1 %v6388_v60 }
 0x5ae   : > { %v12477_v61 = vadd.f32 %v5244_v35, %v5201_v28  ;;  %v6228_v35 = vld [vmem:[%s13437_s1 + $0x2d8] sm:$0xff]  ;;  %v6385_v28 = vld [vmem:[%s13437_s1 + $0x350] sm:$0xff] }
 0x5af   : > { %v12506_v32 = vpop.f32.mrf.mxu0  ;;  %v12508_v43 = vpop.f32.mrf.mxu1  ;;  %6428 = vmatpush.msra.mxu0 %v6385_v28 }
 0x5b0   : > { %v8032_v33 = vpop.eup %8031  ;;  %v7763_v17 = vmul.f32 -1.442695, %v12477_v61  ;;  %7825 = vmatmul.msk.f32.gmra.mxu2 %vm278_vm0, %v12289_v40  ;;  %7834 = vmatmul.msk.f32.gmra.mxu3 %vm278_vm0, %v12289_v40  ;;  %v6230_v40 = vld [vmem:[%s13437_s1 + $0x2e8] sm:$0xff] }
 0x5b1   : > { %v8034_v9 = vpop.eup %8033  ;;  %v12489_v62 = vadd.f32 1.0, %v8032_v33  ;;  %6313 = vmatpush.msrb.mxu3 %v6230_v40 }
 0x5b2   : > { %v5302_v19 = vmul.f32 %v8034_v9, %v5292_v26  ;;  %8035 = vpow2.f32 %v7763_v17  ;;  %vm5307_vm4 = vweird.f32 %v8034_v9  ;;  %7847 = vmatmul.msk.f32.gmra.mxu0 %vm278_vm0, %v6055_v46  ;;  %7856 = vmatmul.msk.f32.gmra.mxu1 %vm278_vm0, %v6055_v46 }
 0x5b3   : > { %8037 = vrcp.f32 %v12489_v62  ;;  %v5203_v18 = vpop.f32.mrf.mxu2  ;;  %v5247_v34 = vpop.f32.mrf.mxu3  ;;  %vm5308_vm6 = vmor %vm5306_vm5, %vm5307_vm4  ;;  %v5327_v26 = vand.u32 2147483648, %v12489_v62  ;;  %v5325_v15 = vand.u32 2147483647, %v12489_v62  ;;  %6314 = vmatpush.msrb.mxu3 %v6228_v35  ;;  %vm5321_vm9 = vweird.f32 %v12489_v62 }
 0x5b4   : > { %v5303_v58 = vsub.f32 1.0, %v5302_v19  ;;  %v5204_v36 = vadd.f32 %v12427_v10, %v5203_v18  ;;  %v6056_v19 = vld [vmem:[%s8243_s9 + $0x11b] sm:$0xff] }
 0x5b5   : > { %vm5326_vm11 = vcmp.eq.f32.partialorder %v5325_v15, 8.507059e+37  ;;  %v6221_v15 = vld [vmem:[%s13437_s1 + $0x2a0] sm:$0xff] }
 0x5b6   : > { %v5304_v54 = vmul.f32 %v8034_v9, %v5303_v58  ;;  %v12504_v30 = vadd.f32 %v5247_v34, %v5204_v36  ;;  %v5328_v34 = vor.u32 1.1754944e-38, %v5327_v26  ;;  %v6224_v26 = vld [vmem:[%s13437_s1 + $0x2b8] sm:$0xff] }
 0x5b7   : > { %v12541_v45 = vpop.f32.mrf.mxu0  ;;  %v12543_v33 = vpop.f32.mrf.mxu1 }
 0x5b8   : > { %v8036_v38 = vpop.eup %8035  ;;  %v5305_v57 = vadd.f32 %v8034_v9, %v5304_v54  ;;  %v7764_v8 = vmul.f32 -1.442695, %v12504_v30  ;;  %7826 = vmatmul.msk.f32.gmra.mxu2 %vm278_vm0, %v12311_v12  ;;  %7835 = vmatmul.msk.f32.gmra.mxu3 %vm278_vm0, %v12311_v12 }
 0x5b9   : > { %v8038_v52 = vpop.eup %8037  ;;  %v12517_v16 = vadd.f32 1.0, %v8036_v38  ;;  %v6225_v38 = vld [vmem:[%s13437_s1 + $0x2c0] sm:$0xff] }
 0x5ba   : > { %v5309_v0 = vsel %vm5308_vm6, %v8034_v9, %v5305_v57  ;;  %v5317_v29 = vmul.f32 %v8038_v52, %v12489_v62  ;;  %8039 = vpow2.f32 %v7764_v8  ;;  %vm5322_vm8 = vweird.f32 %v8038_v52  ;;  %7848 = vmatmul.msk.f32.gmra.mxu0 %vm278_vm0, %v6056_v19  ;;  %7857 = vmatmul.msk.f32.gmra.mxu1 %vm278_vm0, %v6056_v19  ;;  %v6386_v57 = vld [vmem:[%s13437_s1 + $0x358] sm:$0xff]  ;;  %v6226_v8 = vld [vmem:[%s13437_s1 + $0x2c8] sm:$0xff] }
 0x5bb   : > { %v5314_v42 = vsel %vm5311_vm7, %v5313_v20, %v5309_v0  ;;  %8041 = vrcp.f32 %v12517_v16  ;;  %v5206_v12 = vpop.f32.mrf.mxu2  ;;  %v5250_v31 = vpop.f32.mrf.mxu3  ;;  %vm5323_vm10 = vmor %vm5321_vm9, %vm5322_vm8  ;;  %v5342_v56 = vand.u32 2147483648, %v12517_v16  ;;  %v5340_v46 = vand.u32 2147483647, %v12517_v16  ;;  %6271 = vmatpush.msrb.mxu2 %v6225_v38  ;;  %6472 = vmatpush.msra.mxu1 %v6386_v57 }
 0x5bc   : > { %v5436_v6 = vsel %vm227_vm3, %v5314_v42, %v12434_v13  ;;  %v5318_v24 = vsub.f32 1.0, %v5317_v29  ;;  %v5207_v1 = vadd.f32 %v12427_v10, %v5206_v12  ;;  %6315 = vmatpush.msrb.mxu3 %v6226_v8  ;;  %vm5336_vm13 = vweird.f32 %v12517_v16 }
 0x5bd   : > { %5445 = vst [vmem:[%s9771_s26 + $0x90] sm:$0xff] %v5436_v6  ;;  %vm5341_vm15 = vcmp.eq.f32.partialorder %v5340_v46, 8.507059e+37 }
 0x5be   : > { %v5319_v13 = vmul.f32 %v8038_v52, %v5318_v24  ;;  %v12539_v2 = vadd.f32 %v5250_v31, %v5207_v1  ;;  %v6057_v31 = vld [vmem:[%s8243_s9 + $0x123] sm:$0xff]  ;;  %v5343_v24 = vor.u32 1.1754944e-38, %v5342_v56  ;;  %6316 = vmatpush.msrb.mxu3 %v6224_v26 }
 0x5bf   : > { %v12577_v20 = vpop.f32.mrf.mxu0  ;;  %v12579_v0 = vpop.f32.mrf.mxu1 }
 0x5c0   : > { %v8040_v17 = vpop.eup %8039  ;;  %v5320_v51 = vadd.f32 %v8038_v52, %v5319_v13  ;;  %v7765_v9 = vmul.f32 -1.442695, %v12539_v2  ;;  %7827 = vmatmul.msk.f32.gmra.mxu2 %vm278_vm0, %v12333_v23  ;;  %7836 = vmatmul.msk.f32.gmra.mxu3 %vm278_vm0, %v12333_v23 }
 0x5c1   : > { %v8042_v18 = vpop.eup %8041  ;;  %v12553_v58 = vadd.f32 1.0, %v8040_v17  ;;  %v6222_v17 = vld [vmem:[%s13437_s1 + $0x2a8] sm:$0xff] }
 0x5c2   : > { %v5324_v36 = vsel %vm5323_vm10, %v8038_v52, %v5320_v51  ;;  %v5332_v62 = vmul.f32 %v8042_v18, %v12517_v16  ;;  %8043 = vpow2.f32 %v7765_v9  ;;  %vm5337_vm12 = vweird.f32 %v8042_v18  ;;  %v6223_v16 = vld [vmem:[%s13437_s1 + $0x2b0] sm:$0xff]  ;;  %7849 = vmatmul.msk.f32.gmra.mxu0 %vm278_vm0, %v6057_v31  ;;  %7858 = vmatmul.msk.f32.gmra.mxu1 %vm278_vm0, %v6057_v31 }
 0x5c3   : > { %v5329_v11 = vsel %vm5326_vm11, %v5328_v34, %v5324_v36  ;;  %8045 = vrcp.f32 %v12553_v58  ;;  %v5209_v23 = vpop.f32.mrf.mxu2  ;;  %v5253_v40 = vpop.f32.mrf.mxu3  ;;  %vm5338_vm14 = vmor %vm5336_vm13, %vm5337_vm12  ;;  %6272 = vmatpush.msrb.mxu2 %v6223_v16  ;;  %6317 = vmatpush.msrb.mxu3 %v6222_v17  ;;  %v6383_v34 = vld [vmem:[%s13437_s1 + $0x340] sm:$0xff]  ;;  %v6384_v36 = vld [vmem:[%s13437_s1 + $0x348] sm:$0xff]  ;;  %vm5351_vm2 = vweird.f32 %v12553_v58 }
 0x5c4   : > { %v5437_v41 = vsel %vm227_vm3, %v5329_v11, %v12453_v59  ;;  %v5333_v39 = vsub.f32 1.0, %v5332_v62  ;;  %v5210_v54 = vadd.f32 %v12427_v10, %v5209_v23  ;;  %v5355_v11 = vand.u32 2147483647, %v12553_v58  ;;  %6429 = vmatpush.msra.mxu0 %v6383_v34  ;;  %6473 = vmatpush.msra.mxu1 %v6384_v36  ;;  %v6378_v17 = vld [vmem:[%s13437_s1 + $0x318] sm:$0xff]  ;;  %v6376_v34 = vld [vmem:[%s13437_s1 + $0x308] sm:$0xff] }
 0x5c5   : > { %5446 = vst [vmem:[%s9771_s26 + $0x98] sm:$0xff] %v5437_v41  ;;  %6273 = vmatpush.msrb.mxu2 %v6221_v15  ;;  %v6377_v15 = vld [vmem:[%s13437_s1 + $0x310] sm:$0xff] }
 0x5c6   : > { %v5334_v59 = vmul.f32 %v8042_v18, %v5333_v39  ;;  %v12575_v52 = vadd.f32 %v5253_v40, %v5210_v54  ;;  %v6220_v40 = vld [vmem:[%s13437_s1 + $0x298] sm:$0xff]  ;;  %v6217_v39 = vld [vmem:[%s13437_s1 + $0x280] sm:$0xff]  ;;  %v6218_v54 = vld [vmem:[%s13437_s1 + $0x288] sm:$0xff]  ;;  %vm5356_vm5 = vcmp.eq.f32.partialorder %v5355_v11, 8.507059e+37 }
 0x5c7   : > { %v12633_v41 = vpop.f32.mrf.mxu0  ;;  %6318 = vmatpush.msrb.mxu3 %v6220_v40  ;;  %v12641_v56 = vpop.f32.mrf.mxu1  ;;  %v12704_v40 = vld [vmem:[%s8243_s9 + $0xfc] sm:$0xff] }
 0x5c8   : > { %v8044_v29 = vpop.eup %8043  ;;  %v5335_v42 = vadd.f32 %v8042_v18, %v5334_v59  ;;  %v7766_v12 = vmul.f32 -1.442695, %v12575_v52  ;;  %7828 = vmatmul.msk.f32.gmra.mxu2 %vm278_vm0, %v12352_v5  ;;  %7837 = vmatmul.msk.f32.gmra.mxu3 %vm278_vm0, %v12352_v5  ;;  %v6058_v59 = vld [vmem:[%s8243_s9 + $0x12b] sm:$0xff] }
 0x5c9   : > { %v12588_v6 = vpop.eup %8045  ;;  %v12591_v1 = vadd.f32 1.0, %v8044_v29  ;;  %6319 = vmatpush.msrb.mxu3 %v6218_v54 }
 0x5ca   : > { %v5339_v60 = vsel %vm5338_vm14, %v8042_v18, %v5335_v42  ;;  %v5347_v5 = vmul.f32 %v12588_v6, %v12553_v58  ;;  %8047 = vpow2.f32 %v7766_v12  ;;  %v5357_v18 = vand.u32 2147483648, %v12553_v58  ;;  %v6381_v58 = vld [vmem:[%s13437_s1 + $0x330] sm:$0xff]  ;;  %v6382_v12 = vld [vmem:[%s13437_s1 + $0x338] sm:$0xff]  ;;  %7850 = vmatmul.msk.f32.gmra.mxu0 %vm278_vm0, %v6058_v59  ;;  %7859 = vmatmul.msk.f32.gmra.mxu1 %vm278_vm0, %v6058_v59 }
 0x5cb   : > { %v5344_v35 = vsel %vm5341_vm15, %v5343_v24, %v5339_v60  ;;  %8049 = vrcp.f32 %v12591_v1  ;;  %v5212_v28 = vpop.f32.mrf.mxu2  ;;  %v5256_v13 = vpop.f32.mrf.mxu3  ;;  %vm5352_vm1 = vweird.f32 %v12588_v6  ;;  %6430 = vmatpush.msra.mxu0 %v6381_v58  ;;  %6474 = vmatpush.msra.mxu1 %v6382_v12  ;;  %v6379_v60 = vld [vmem:[%s13437_s1 + $0x320] sm:$0xff]  ;;  %vm5366_vm7 = vweird.f32 %v12591_v1 }
 0x5cc   : > { %v5438_v51 = vsel %vm227_vm3, %v5344_v35, %v12477_v61  ;;  %v5348_v9 = vsub.f32 1.0, %v5347_v5  ;;  %v5213_v19 = vadd.f32 %v12427_v10, %v5212_v28  ;;  %v6219_v61 = vld [vmem:[%s13437_s1 + $0x290] sm:$0xff]  ;;  %vm5353_vm4 = vmor %vm5351_vm2, %vm5352_vm1  ;;  %v5358_v29 = vor.u32 1.1754944e-38, %v5357_v18  ;;  %v6375_v18 = vld [vmem:[%s13437_s1 + $0x300] sm:$0xff] }
 0x5cd   : > { %5447 = vst [vmem:[%s9771_s26 + $0xa0] sm:$0xff] %v5438_v51  ;;  %6274 = vmatpush.msrb.mxu2 %v6219_v61  ;;  %6431 = vmatpush.msra.mxu0 %v6379_v60  ;;  %v5899_v12 = vld [vmem:[%s8243_s9 + $0x122] sm:$0xff] }
 0x5ce   : > { %v5349_v62 = vmul.f32 %v12588_v6, %v5348_v9  ;;  %v12628_v23 = vadd.f32 %v5256_v13, %v5213_v19  ;;  %v5372_v13 = vand.u32 2147483648, %v12591_v1  ;;  %v6545_v60 = vld [vmem:[%s13437_s1 + $0x3e0] sm:$0xff] }
 0x5cf   : > { %6275 = vmatpush.msrb.mxu2 %v6217_v39  ;;  %6432 = vmatpush.msra.mxu0 %v6377_v15  ;;  %v12687_v19 = vpop.f32.mrf.mxu0  ;;  %v12695_v36 = vpop.f32.mrf.mxu1 }
 0x5d0   : > { %v8048_v38 = vpop.eup %8047  ;;  %v5350_v57 = vadd.f32 %v12588_v6, %v5349_v62  ;;  %v7767_v8 = vmul.f32 -1.442695, %v12628_v23  ;;  %7829 = vmatmul.msk.f32.gmra.mxu2 %vm278_vm0, %v12369_v53  ;;  %7838 = vmatmul.msk.f32.gmra.mxu3 %vm278_vm0, %v12369_v53  ;;  %v5373_v54 = vor.u32 1.1754944e-38, %v5372_v13 }
 0x5d1   : > { %v8050_v46 = vpop.eup %8049  ;;  %v12653_v42 = vadd.f32 1.0, %v8048_v38  ;;  %6433 = vmatpush.msra.mxu0 %v6375_v18 }
 0x5d2   : > { %v5354_v53 = vsel %vm5353_vm4, %v12588_v6, %v5350_v57  ;;  %v5362_v31 = vmul.f32 %v8050_v46, %v12591_v1  ;;  %8051 = vpow2.f32 %v7767_v8  ;;  %v6380_v6 = vld [vmem:[%s13437_s1 + $0x328] sm:$0xff]  ;;  %vm5367_vm6 = vweird.f32 %v8050_v46  ;;  %7878 = vmatmul.msk.f32.vlgmr.msra.gmra.mxu0 %vm278_vm0, %v12704_v40 }
 0x5d3   : > { %v5359_v24 = vsel %vm5356_vm5, %v5358_v29, %v5354_v53  ;;  %8053 = vrcp.f32 %v12653_v42  ;;  %v5215_v16 = vpop.f32.mrf.mxu2  ;;  %v5259_v26 = vpop.f32.mrf.mxu3  ;;  %6475 = vmatpush.msra.mxu1 %v6380_v6  ;;  %vm5368_vm8 = vmor %vm5366_vm7, %vm5367_vm6  ;;  %v5387_v53 = vand.u32 2147483648, %v12653_v42  ;;  %v6706_v6 = vld [vmem:[%s13437_s1 + $0x478] sm:$0xff]  ;;  %vm5381_vm11 = vweird.f32 %v12653_v42 }
 0x5d4   : > { %v5439_v5 = vsel %vm227_vm3, %v5359_v24, %v12504_v30  ;;  %v5363_v35 = vsub.f32 1.0, %v5362_v31  ;;  %v5216_v28 = vadd.f32 %v12427_v10, %v5215_v16  ;;  %v5370_v30 = vand.u32 2147483647, %v12591_v1  ;;  %v6547_v31 = vld [vmem:[%s13437_s1 + $0x3f0] sm:$0xff]  ;;  %v6548_v24 = vld [vmem:[%s13437_s1 + $0x3f8] sm:$0xff] }
 0x5d5   : > { %5448 = vst [vmem:[%s9771_s26 + $0xa8] sm:$0xff] %v5439_v5  ;;  %6476 = vmatpush.msra.mxu1 %v6378_v17  ;;  %v6705_v16 = vld [vmem:[%s13437_s1 + $0x470] sm:$0xff]  ;;  %6584 = vmatpush.msra.mxu2 %v6547_v31  ;;  %v6546_v5 = vld [vmem:[%s13437_s1 + $0x3e8] sm:$0xff] }
 0x5d6   : > { %v5364_v51 = vmul.f32 %v8050_v46, %v5363_v35  ;;  %v12685_v9 = vadd.f32 %v5259_v26, %v5216_v28  ;;  %vm5371_vm9 = vcmp.eq.f32.partialorder %v5370_v30, 8.507059e+37  ;;  %6628 = vmatpush.msra.mxu3 %v6548_v24  ;;  %6742 = vmatpush.msrb.mxu0 %v6705_v16  ;;  %v6703_v30 = vld [vmem:[%s13437_s1 + $0x460] sm:$0xff] }
 0x5d7   : > { %6477 = vmatpush.msra.mxu1 %v6376_v34  ;;  %v12743_v35 = vpop.f32.mrf.mxu0  ;;  %v12745_v28 = vpop.f32.mrf.mxu1  ;;  %v5388_v34 = vor.u32 1.1754944e-38, %v5387_v53  ;;  %6585 = vmatpush.msra.mxu2 %v6545_v60 }
 0x5d8   : > { %v8052_v61 = vpop.eup %8051  ;;  %v5365_v62 = vadd.f32 %v8050_v46, %v5364_v51  ;;  %v7768_v11 = vmul.f32 -1.442695, %v12685_v9  ;;  %7830 = vmatmul.msk.f32.gmra.mxu2 %vm278_vm0, %v12389_v4  ;;  %7839 = vmatmul.msk.f32.gmra.mxu3 %vm278_vm0, %v12389_v4  ;;  %v12752_v51 = vld [vmem:[%s8243_s9 + $0x104] sm:$0xff] }
 0x5d9   : > { %v8054_v39 = vpop.eup %8053  ;;  %v12707_v38 = vadd.f32 1.0, %v8052_v61  ;;  %7887 = vmatmul.msk.f32.vlgmr.msra.gmra.mxu1 %vm278_vm0, %v12704_v40  ;;  %6629 = vmatpush.msra.mxu3 %v6546_v5 }
 0x5da   : > { %v5369_v1 = vsel %vm5368_vm8, %v8050_v46, %v5365_v62  ;;  %v5377_v57 = vmul.f32 %v8054_v39, %v12653_v42  ;;  %8055 = vpow2.f32 %v7768_v11  ;;  %vm5382_vm10 = vweird.f32 %v8054_v39  ;;  %6786 = vmatpush.msrb.mxu1 %v6706_v6  ;;  %6743 = vmatpush.msrb.mxu0 %v6703_v30 }
 0x5db   : > { %v5374_v8 = vsel %vm5371_vm9, %v5373_v54, %v5369_v1  ;;  %8057 = vrcp.f32 %v12707_v38  ;;  %v5218_v4 = vpop.f32.mrf.mxu2  ;;  %v5262_v59 = vpop.f32.mrf.mxu3  ;;  %vm5383_vm12 = vmor %vm5381_vm11, %vm5382_vm10  ;;  %7879 = vmatmul.msk.f32.gmra.mxu0 %vm278_vm0, %v12752_v51  ;;  %vm5396_vm15 = vweird.f32 %v12707_v38 }
 0x5dc   : > { %v5440_v29 = vsel %vm227_vm3, %v5374_v8, %v12539_v2  ;;  %v5378_v46 = vsub.f32 1.0, %v5377_v57  ;;  %v5219_v58 = vadd.f32 %v12427_v10, %v5218_v4  ;;  %v5385_v10 = vand.u32 2147483647, %v12653_v42  ;;  %v6543_v42 = vld [vmem:[%s13437_s1 + $0x3d0] sm:$0xff] }
 0x5dd   : > { %5449 = vst [vmem:[%s9771_s26 + $0xb0] sm:$0xff] %v5440_v29  ;;  %6586 = vmatpush.msra.mxu2 %v6543_v42  ;;  %v6544_v29 = vld [vmem:[%s13437_s1 + $0x3d8] sm:$0xff]  ;;  %v6541_v42 = vld [vmem:[%s13437_s1 + $0x3c0] sm:$0xff] }
 0x5de   : > { %v5379_v2 = vmul.f32 %v8054_v39, %v5378_v46  ;;  %v12732_v26 = vadd.f32 %v5262_v59, %v5219_v58  ;;  %vm5386_vm13 = vcmp.eq.f32.partialorder %v5385_v10, 8.507059e+37  ;;  %v6704_v59 = vld [vmem:[%s13437_s1 + $0x468] sm:$0xff]  ;;  %v5402_v46 = vand.u32 2147483648, %v12707_v38  ;;  %6630 = vmatpush.msra.mxu3 %v6544_v29 }
 0x5df   : > { %6787 = vmatpush.msrb.mxu1 %v6704_v59  ;;  %v12787_v31 = vpop.f32.mrf.mxu0  ;;  %v12792_v16 = vpop.f32.mrf.mxu1  ;;  %v12798_v10 = vld [vmem:[%s8243_s9 + $0x10c] sm:$0xff]  ;;  %6587 = vmatpush.msra.mxu2 %v6541_v42 }
 0x5e0   : > { %v8056_v13 = vpop.eup %8055  ;;  %v5380_v15 = vadd.f32 %v8054_v39, %v5379_v2  ;;  %v7769_v17 = vmul.f32 -1.442695, %v12732_v26  ;;  %7831 = vmatmul.msk.f32.gmra.mxu2 %vm278_vm0, %v5899_v12  ;;  %7840 = vmatmul.msk.f32.gmra.mxu3 %vm278_vm0, %v5899_v12  ;;  %v5900_v12 = vld [vmem:[%s8243_s9 + $0x12a] sm:$0xff] }
 0x5e1   : > { %v8058_v18 = vpop.eup %8057  ;;  %v12758_v61 = vadd.f32 1.0, %v8056_v13  ;;  %7888 = vmatmul.msk.f32.gmra.mxu1 %vm278_vm0, %v12752_v51 }
 0x5e2   : > { %v5384_v62 = vsel %vm5383_vm12, %v8054_v39, %v5380_v15  ;;  %v5392_v11 = vmul.f32 %v8058_v18, %v12707_v38  ;;  %8059 = vpow2.f32 %v7769_v17  ;;  %vm5397_vm14 = vweird.f32 %v8058_v18 }
 0x5e3   : > { %v5389_v54 = vsel %vm5386_vm13, %v5388_v34, %v5384_v62  ;;  %8061 = vrcp.f32 %v12758_v61  ;;  %v5663_v1 = vpop.f32.mrf.mxu2  ;;  %v5707_v57 = vpop.f32.mrf.mxu3  ;;  %vm5398_vm1 = vmor %vm5396_vm15, %vm5397_vm14  ;;  %7880 = vmatmul.msk.f32.gmra.mxu0 %vm278_vm0, %v12798_v10  ;;  %v6702_v62 = vld [vmem:[%s13437_s1 + $0x458] sm:$0xff]  ;;  %vm5411_vm5 = vweird.f32 %v12758_v61 }
 0x5e4   : > { %v5441_v39 = vsel %vm227_vm3, %v5389_v54, %v12575_v52  ;;  %v5393_v8 = vsub.f32 1.0, %v5392_v11  ;;  %v5664_v4 = vadd.f32 %v5663_v1, %v12362_v21  ;;  %v5708_v58 = vadd.f32 %v5707_v57, %v12364_v27  ;;  %v6208_v1 = vld [vmem:[%s8243_s9 + $0xec] sm:$0xff]  ;;  %6788 = vmatpush.msrb.mxu1 %v6702_v62 }
 0x5e5   : > { %5450 = vst [vmem:[%s9771_s26 + $0xb8] sm:$0xff] %v5441_v39  ;;  %v5400_v21 = vand.u32 2147483647, %v12707_v38  ;;  %v5417_v11 = vand.u32 2147483648, %v12758_v61 }
 0x5e6   : > { %v5394_v52 = vmul.f32 %v8058_v18, %v5393_v8  ;;  %v12785_v53 = vadd.f32 %v12577_v20, %v5664_v4  ;;  %v12790_v24 = vadd.f32 %v12579_v0, %v5708_v58  ;;  %v6701_v20 = vld [vmem:[%s13437_s1 + $0x450] sm:$0xff]  ;;  %v5403_v0 = vor.u32 1.1754944e-38, %v5402_v46  ;;  %v6542_v8 = vld [vmem:[%s13437_s1 + $0x3c8] sm:$0xff] }
 0x5e7   : > { %6744 = vmatpush.msrb.mxu0 %v6701_v20  ;;  %vm5401_vm2 = vcmp.eq.f32.partialorder %v5400_v21, 8.507059e+37  ;;  %v12829_v39 = vpop.f32.mrf.mxu0  ;;  %6631 = vmatpush.msra.mxu3 %v6542_v8  ;;  %v5418_v46 = vor.u32 1.1754944e-38, %v5417_v11 }
 0x5e8   : > { %v8060_v2 = vpop.eup %8059  ;;  %v5395_v27 = vadd.f32 %v8058_v18, %v5394_v52  ;;  %7832 = vmatmul.msk.f32.gmra.mxu2 %vm278_vm0, %v5900_v12  ;;  %7841 = vmatmul.msk.f32.gmra.mxu3 %vm278_vm0, %v5900_v12 }
 0x5e9   : > { %v8062_v60 = vpop.eup %8061  ;;  %v12803_v6 = vadd.f32 1.0, %v8060_v2  ;;  %7889 = vmatmul.msk.f32.gmra.mxu1 %vm278_vm0, %v12798_v10 }
 0x5ea   : > { %v5399_v5 = vsel %vm5398_vm1, %v8058_v18, %v5395_v27  ;;  %v5407_v38 = vmul.f32 %v8062_v60, %v12758_v61  ;;  %vm5412_vm4 = vweird.f32 %v8062_v60 }
 0x5eb   : > { %v5404_v13 = vsel %vm5401_vm2, %v5403_v0, %v5399_v5  ;;  %8063 = vrcp.f32 %v12803_v6  ;;  %v5666_v15 = vpop.f32.mrf.mxu2  ;;  %v5710_v17 = vpop.f32.mrf.mxu3  ;;  %vm5413_vm6 = vmor %vm5411_vm5, %vm5412_vm4  ;;  %v6539_v0 = vld [vmem:[%s13437_s1 + $0x3b0] sm:$0xff]  ;;  %v5430_v5 = vand.u32 2147483647, %v12803_v6  ;;  %vm5426_vm9 = vweird.f32 %v12803_v6 }
 0x5ec   : > { %v5442_v30 = vsel %vm227_vm3, %v5404_v13, %v12628_v23  ;;  %v5408_v18 = vsub.f32 1.0, %v5407_v38  ;;  %v5667_v34 = vadd.f32 %v5666_v15, %v12376_v50  ;;  %v5711_v54 = vadd.f32 %v5710_v17, %v12378_v22  ;;  %v12837_v22 = vpop.f32.mrf.mxu1  ;;  %v6209_v13 = vld [vmem:[%s8243_s9 + $0xf4] sm:$0xff]  ;;  %6588 = vmatpush.msra.mxu2 %v6539_v0  ;;  %v6700_v17 = vld [vmem:[%s13437_s1 + $0x448] sm:$0xff] }
 0x5ed   : > { %5451 = vst [vmem:[%s9771_s26 + $0xc0] sm:$0xff] %v5442_v30  ;;  %v5415_v50 = vand.u32 2147483647, %v12758_v61  ;;  %v5432_v38 = vand.u32 2147483648, %v12803_v6  ;;  %v6540_v30 = vld [vmem:[%s13437_s1 + $0x3b8] sm:$0xff]  ;;  %6789 = vmatpush.msrb.mxu1 %v6700_v17  ;;  %vm5431_vm11 = vcmp.eq.f32.partialorder %v5430_v5, 8.507059e+37 }
 0x5ee   : > { %v5409_v23 = vmul.f32 %v8062_v60, %v5408_v18  ;;  %v12827_v57 = vadd.f32 %v12633_v41, %v5667_v34  ;;  %v12835_v4 = vadd.f32 %v12641_v56, %v5711_v54  ;;  %v12843_v41 = vld [vmem:[%s8243_s9 + $0x114] sm:$0xff]  ;;  %6632 = vmatpush.msra.mxu3 %v6540_v30 }
 0x5ef   : > { %vm5416_vm7 = vcmp.eq.f32.partialorder %v5415_v50, 8.507059e+37  ;;  %7881 = vmatmul.msk.f32.gmra.mxu0 %vm278_vm0, %v12843_v41  ;;  %v12871_v15 = vpop.f32.mrf.mxu0  ;;  %v6697_v50 = vld [vmem:[%s13437_s1 + $0x430] sm:$0xff] }
 0x5f0   : > { %v5410_v59 = vadd.f32 %v8062_v60, %v5409_v23  ;;  %7860 = vmatmul.msk.f32.vlgmr.msrb.gmra.mxu2 %vm278_vm0, %v6208_v1  ;;  %7869 = vmatmul.msk.f32.vlgmr.msrb.gmra.mxu3 %vm278_vm0, %v6208_v1 }
 0x5f1   : > { %v8064_v29 = vpop.eup %8063  ;;  %7890 = vmatmul.msk.f32.gmra.mxu1 %vm278_vm0, %v12843_v41 }
 0x5f2   : > { %v5414_v58 = vsel %vm5413_vm6, %v8062_v60, %v5410_v59  ;;  %v5422_v56 = vmul.f32 %v8064_v29, %v12803_v6  ;;  %v6699_v60 = vld [vmem:[%s13437_s1 + $0x440] sm:$0xff]  ;;  %vm5427_vm8 = vweird.f32 %v8064_v29 }
 0x5f3   : > { %v5419_v12 = vsel %vm5416_vm7, %v5418_v46, %v5414_v58  ;;  %v5669_v52 = vpop.f32.mrf.mxu2  ;;  %v5713_v21 = vpop.f32.mrf.mxu3  ;;  %6745 = vmatpush.msrb.mxu0 %v6699_v60  ;;  %vm5428_vm10 = vmor %vm5426_vm9, %vm5427_vm8 }
 0x5f4   : > { %v5443_v61 = vsel %vm227_vm3, %v5419_v12, %v12685_v9  ;;  %v5423_v2 = vsub.f32 1.0, %v5422_v56  ;;  %v5670_v27 = vadd.f32 %v5669_v52, %v12402_v25  ;;  %v5714_v20 = vadd.f32 %v5713_v21, %v12404_v49  ;;  %v12879_v18 = vpop.f32.mrf.mxu1  ;;  %v6695_v21 = vld [vmem:[%s13437_s1 + $0x420] sm:$0xff] }
 0x5f5   : > { %5452 = vst [vmem:[%s9771_s26 + $0xc8] sm:$0xff] %v5443_v61  ;;  %6746 = vmatpush.msrb.mxu0 %v6697_v50  ;;  %v6535_v61 = vld [vmem:[%s13437_s1 + $0x390] sm:$0xff] }
 0x5f6   : > { %v5424_v25 = vmul.f32 %v8064_v29, %v5423_v2  ;;  %v12866_v49 = vadd.f32 %v12687_v19, %v5670_v27  ;;  %v12869_v9 = vadd.f32 %v12695_v36, %v5714_v20  ;;  %v12885_v19 = vld [vmem:[%s8243_s9 + $0x11c] sm:$0xff]  ;;  %v5433_v36 = vor.u32 1.1754944e-38, %v5432_v38  ;;  %v6693_v38 = vld [vmem:[%s13437_s1 + $0x410] sm:$0xff] }
 0x5f7   : > { %7882 = vmatmul.msk.f32.gmra.mxu0 %vm278_vm0, %v12885_v19 }
 0x5f8   : > { %v5425_v34 = vadd.f32 %v8064_v29, %v5424_v25  ;;  %7861 = vmatmul.msk.f32.gmra.mxu2 %vm278_vm0, %v6209_v13  ;;  %7870 = vmatmul.msk.f32.gmra.mxu3 %vm278_vm0, %v6209_v13  ;;  %v6533_v13 = vld [vmem:[%s13437_s1 + $0x380] sm:$0xff] }
 0x5f9   : > { %7891 = vmatmul.msk.f32.gmra.mxu1 %vm278_vm0, %v12885_v19  ;;  %6747 = vmatpush.msrb.mxu0 %v6695_v21 }
 0x5fa   : > { %v5429_v42 = vsel %vm5428_vm10, %v8064_v29, %v5425_v34  ;;  %v12906_v29 = vpop.f32.mrf.mxu0 }
 0x5fb   : > { %v5434_v62 = vsel %vm5431_vm11, %v5433_v36, %v5429_v42  ;;  %v5672_v11 = vpop.f32.mrf.mxu2  ;;  %v5716_v54 = vpop.f32.mrf.mxu3  ;;  %6748 = vmatpush.msrb.mxu0 %v6693_v38 }
 0x5fc   : > { %v5444_v6 = vsel %vm227_vm3, %v5434_v62, %v12732_v26  ;;  %v5673_v1 = vadd.f32 %v5672_v11, %v12418_v14  ;;  %v5717_v23 = vadd.f32 %v5716_v54, %v12420_v7  ;;  %v6537_v14 = vld [vmem:[%s13437_s1 + $0x3a0] sm:$0xff]  ;;  %v6698_v7 = vld [vmem:[%s13437_s1 + $0x438] sm:$0xff]  ;;  %v6538_v26 = vld [vmem:[%s13437_s1 + $0x3a8] sm:$0xff]  ;;  %v12917_v46 = vpop.f32.mrf.mxu1 }
 0x5fd   : > { %5453 = vst [vmem:[%s9771_s26 + $0xd0] sm:$0xff] %v5444_v6  ;;  %6589 = vmatpush.msra.mxu2 %v6537_v14  ;;  %6790 = vmatpush.msrb.mxu1 %v6698_v7  ;;  %v6691_v62 = vld [vmem:[%s13437_s1 + $0x400] sm:$0xff] }
 0x5fe   : > { %v12901_v8 = vadd.f32 %v12743_v35, %v5673_v1  ;;  %v12904_v59 = vadd.f32 %v12745_v28, %v5717_v23  ;;  %v12924_v35 = vld [vmem:[%s8243_s9 + $0x124] sm:$0xff]  ;;  %6633 = vmatpush.msra.mxu3 %v6538_v26  ;;  %6749 = vmatpush.msrb.mxu0 %v6691_v62 }
 0x5ff   : > { %7883 = vmatmul.msk.f32.gmra.mxu0 %vm278_vm0, %v12924_v35  ;;  %6590 = vmatpush.msra.mxu2 %v6535_v61  ;;  %v6682_v7 = vld [vmem:[%s8243_s9 + $0xfe] sm:$0xff] }
 0x600   : > { %7862 = vmatmul.msk.f32.gmra.mxu2 %vm278_vm0, %v12704_v40  ;;  %7871 = vmatmul.msk.f32.gmra.mxu3 %vm278_vm0, %v12704_v40 }
 0x601   : > { %7892 = vmatmul.msk.f32.gmra.mxu1 %vm278_vm0, %v12924_v35  ;;  %6591 = vmatpush.msra.mxu2 %v6533_v13 }
 0x602   : > { %v12947_v2 = vpop.f32.mrf.mxu0 }
 0x603   : > { %v5675_v28 = vpop.f32.mrf.mxu2  ;;  %v5719_v58 = vpop.f32.mrf.mxu3 }
 0x604   : > { %v5676_v56 = vadd.f32 %v5675_v28, %v12436_v48  ;;  %v5720_v12 = vadd.f32 %v5719_v58, %v12438_v47  ;;  %v6696_v48 = vld [vmem:[%s13437_s1 + $0x428] sm:$0xff]  ;;  %v12949_v47 = vpop.f32.mrf.mxu1 }
 0x605   : > { %6791 = vmatpush.msrb.mxu1 %v6696_v48 }
 0x606   : > { %v12933_v52 = vadd.f32 %v12787_v31, %v5676_v56  ;;  %v12936_v40 = vadd.f32 %v12792_v16, %v5720_v12  ;;  %v12956_v31 = vld [vmem:[%s8243_s9 + $0x12c] sm:$0xff]  ;;  %v6536_v16 = vld [vmem:[%s13437_s1 + $0x398] sm:$0xff] }
 0x607   : > { %6634 = vmatpush.msra.mxu3 %v6536_v16  ;;  %7884 = vmatmul.msk.f32.gmra.mxu0 %vm278_vm0, %v12956_v31 }
 0x608   : > { %7863 = vmatmul.msk.f32.gmra.mxu2 %vm278_vm0, %v12752_v51  ;;  %7872 = vmatmul.msk.f32.gmra.mxu3 %vm278_vm0, %v12752_v51 }
 0x609   : > { %7893 = vmatmul.msk.f32.gmra.mxu1 %vm278_vm0, %v12956_v31 }
 0x60a   : > { %v6119_v25 = vpop.f32.mrf.mxu0 }
 0x60b   : > { %v5678_v27 = vpop.f32.mrf.mxu2  ;;  %v5722_v20 = vpop.f32.mrf.mxu3 }
 0x60c   : > { %v5679_v60 = vadd.f32 %v5678_v27, %v12455_v44  ;;  %v5723_v51 = vadd.f32 %v5722_v20, %v12457_v55  ;;  %v6163_v17 = vpop.f32.mrf.mxu1  ;;  %v6373_v44 = vld [vmem:[%s8243_s9 + $0x134] sm:$0xff]  ;;  %v6524_v20 = vld [vmem:[%s8243_s9 + $0xfd] sm:$0xff] }
 0x60d   : > { %v6694_v55 = vld [vmem:[%s13437_s1 + $0x418] sm:$0xff] }
 0x60e   : > { %v12968_v0 = vadd.f32 %v12829_v39, %v5679_v60  ;;  %v12971_v5 = vadd.f32 %v12837_v22, %v5723_v51  ;;  %v6534_v39 = vld [vmem:[%s13437_s1 + $0x388] sm:$0xff]  ;;  %6792 = vmatpush.msrb.mxu1 %v6694_v55 }
 0x60f   : > { %6635 = vmatpush.msra.mxu3 %v6534_v39  ;;  %7885 = vmatmul.msk.f32.gmra.mxu0 %vm278_vm0, %v6373_v44 }
 0x610   : > { %7864 = vmatmul.msk.f32.gmra.mxu2 %vm278_vm0, %v12798_v10  ;;  %7873 = vmatmul.msk.f32.gmra.mxu3 %vm278_vm0, %v12798_v10 }
 0x611   : > { %7894 = vmatmul.msk.f32.gmra.mxu1 %vm278_vm0, %v6373_v44  ;;  %v6525_v44 = vld [vmem:[%s8243_s9 + $0x105] sm:$0xff] }
 0x612   : > { %v6122_v11 = vpop.f32.mrf.mxu0 }
 0x613   : > { %v5681_v22 = vpop.f32.mrf.mxu2  ;;  %v5725_v30 = vpop.f32.mrf.mxu3 }
 0x614   : > { %v5682_v10 = vadd.f32 %v5681_v22, %v12479_v63  ;;  %v5726_v34 = vadd.f32 %v5725_v30, %v12481_v3  ;;  %v6166_v54 = vpop.f32.mrf.mxu1  ;;  %v6374_v63 = vld [vmem:[%s8243_s9 + $0x13c] sm:$0xff]  ;;  %v6692_v3 = vld [vmem:[%s13437_s1 + $0x408] sm:$0xff] }
 0x615   : > { %6793 = vmatpush.msrb.mxu1 %v6692_v3 }
 0x616   : > { %v12995_v36 = vadd.f32 %v12871_v15, %v5682_v10  ;;  %v12998_v42 = vadd.f32 %v12879_v18, %v5726_v34  ;;  %v6686_v10 = vld [vmem:[%s8243_s9 + $0x11e] sm:$0xff] }
 0x617   : > { %7886 = vmatmul.msk.f32.gmra.mxu0 %vm278_vm0, %v6374_v63 }
 0x618   : > { %7865 = vmatmul.msk.f32.gmra.mxu2 %vm278_vm0, %v12843_v41  ;;  %7874 = vmatmul.msk.f32.gmra.mxu3 %vm278_vm0, %v12843_v41 }
 0x619   : > { %7895 = vmatmul.msk.f32.gmra.mxu1 %vm278_vm0, %v6374_v63 }
 0x61a   : > { %v6125_v50 = vpop.f32.mrf.mxu0 }
 0x61b   : > { %v5684_v15 = vpop.f32.mrf.mxu2  ;;  %v5728_v18 = vpop.f32.mrf.mxu3 }
 0x61c   : > { %v5685_v6 = vadd.f32 %v5684_v15, %v12506_v32  ;;  %v5729_v1 = vadd.f32 %v5728_v18, %v12508_v43  ;;  %v6169_v14 = vpop.f32.mrf.mxu1  ;;  %v6687_v18 = vld [vmem:[%s8243_s9 + $0x126] sm:$0xff] }
 0x61e   : > { %v13016_v23 = vadd.f32 %v12906_v29, %v5685_v6  ;;  %v13019_v41 = vadd.f32 %v12917_v46, %v5729_v1 }
 0x61f   : > { %7914 = vmatmul.msk.f32.vlgmr.msrb.gmra.mxu0 %vm278_vm0, %v6682_v7 }
 0x620   : > { %7866 = vmatmul.msk.f32.gmra.mxu2 %vm278_vm0, %v12885_v19  ;;  %7875 = vmatmul.msk.f32.gmra.mxu3 %vm278_vm0, %v12885_v19  ;;  %v6683_v19 = vld [vmem:[%s8243_s9 + $0x106] sm:$0xff] }
 0x621   : > { %7923 = vmatmul.msk.f32.vlgmr.msrb.gmra.mxu1 %vm278_vm0, %v6682_v7 }
 0x622   : > { %v6128_v58 = vpop.f32.mrf.mxu0 }
 0x623   : > { %v5687_v26 = vpop.f32.mrf.mxu2  ;;  %v5731_v32 = vpop.f32.mrf.mxu3 }
 0x624   : > { %v5688_v43 = vadd.f32 %v5687_v26, %v12541_v45  ;;  %v5732_v29 = vadd.f32 %v5731_v32, %v12543_v33  ;;  %v6172_v56 = vpop.f32.mrf.mxu1 }
 0x626   : > { %v13031_v46 = vadd.f32 %v12947_v2, %v5688_v43  ;;  %v13034_v28 = vadd.f32 %v12949_v47, %v5732_v29  ;;  %v6688_v43 = vld [vmem:[%s8243_s9 + $0x12e] sm:$0xff] }
 0x627   : > { %7915 = vmatmul.msk.f32.gmra.mxu0 %vm278_vm0, %v6683_v19 }
 0x628   : > { %7867 = vmatmul.msk.f32.gmra.mxu2 %vm278_vm0, %v12924_v35  ;;  %7876 = vmatmul.msk.f32.gmra.mxu3 %vm278_vm0, %v12924_v35  ;;  %v6684_v35 = vld [vmem:[%s8243_s9 + $0x10e] sm:$0xff] }
 0x629   : > { %7924 = vmatmul.msk.f32.gmra.mxu1 %vm278_vm0, %v6683_v19 }
 0x62a   : > { %v6131_v2 = vpop.f32.mrf.mxu0 }
 0x62b   : > { %v5961_v12 = vpop.f32.mrf.mxu2  ;;  %v6005_v45 = vpop.f32.mrf.mxu3 }
 0x62c   : > { %v6032_v33 = vadd.f32 %v5961_v12, %v12785_v53  ;;  %v6033_v21 = vadd.f32 %v6005_v45, %v12790_v24  ;;  %v6175_v47 = vpop.f32.mrf.mxu1 }
 0x62e   : > { %v13045_v61 = vadd.f32 %v6119_v25, %v6032_v33  ;;  %v13047_v48 = vadd.f32 %v6163_v17, %v6033_v21  ;;  %v6689_v21 = vld [vmem:[%s8243_s9 + $0x136] sm:$0xff] }
 0x62f   : > { %7916 = vmatmul.msk.f32.gmra.mxu0 %vm278_vm0, %v6684_v35 }
 0x630   : > { %7868 = vmatmul.msk.f32.gmra.mxu2 %vm278_vm0, %v12956_v31  ;;  %7877 = vmatmul.msk.f32.gmra.mxu3 %vm278_vm0, %v12956_v31  ;;  %v6685_v31 = vld [vmem:[%s8243_s9 + $0x116] sm:$0xff] }
 0x631   : > { %7925 = vmatmul.msk.f32.gmra.mxu1 %vm278_vm0, %v6684_v35  ;;  %v6897_v35 = vld [vmem:[%s13439_s3 + $0x78] sm:$0xff] }
 0x632   : > { %v6134_v38 = vpop.f32.mrf.mxu0  ;;  %6918 = vmatpush.msrb.mxu2 %v6897_v35 }
 0x633   : > { %v5964_v16 = vpop.f32.mrf.mxu2  ;;  %v6008_v27 = vpop.f32.mrf.mxu3 }
 0x634   : > { %v6034_v53 = vadd.f32 %v5964_v16, %v12827_v57  ;;  %v6035_v24 = vadd.f32 %v6008_v27, %v12835_v4  ;;  %v6178_v13 = vpop.f32.mrf.mxu1  ;;  %v6529_v16 = vld [vmem:[%s8243_s9 + $0x125] sm:$0xff] }
 0x636   : > { %v13059_v60 = vadd.f32 %v6122_v11, %v6034_v53  ;;  %v13061_v51 = vadd.f32 %v6166_v54, %v6035_v24  ;;  %v6526_v11 = vld [vmem:[%s8243_s9 + $0x10d] sm:$0xff]  ;;  %v6913_v24 = vld [vmem:[%s13439_s3 + $0xf8] sm:$0xff] }
 0x637   : > { %7917 = vmatmul.msk.f32.gmra.mxu0 %vm278_vm0, %v6685_v31  ;;  %6962 = vmatpush.msrb.mxu3 %v6913_v24 }
 0x638   : > { %7896 = vmatmul.msk.f32.vlgmr.msra.gmra.mxu2 %vm278_vm0, %v6524_v20  ;;  %7905 = vmatmul.msk.f32.vlgmr.msra.gmra.mxu3 %vm278_vm0, %v6524_v20 }
 0x639   : > { %7926 = vmatmul.msk.f32.gmra.mxu1 %vm278_vm0, %v6685_v31 }
 0x63a   : > { %v6137_v22 = vpop.f32.mrf.mxu0 }
 0x63b   : > { %v5967_v25 = vpop.f32.mrf.mxu2  ;;  %v6011_v17 = vpop.f32.mrf.mxu3 }
 0x63c   : > { %v6036_v57 = vadd.f32 %v5967_v25, %v12866_v49  ;;  %v6037_v4 = vadd.f32 %v6011_v17, %v12869_v9  ;;  %v6181_v30 = vpop.f32.mrf.mxu1 }
 0x63e   : > { %v13071_v55 = vadd.f32 %v6125_v50, %v6036_v57  ;;  %v13073_v39 = vadd.f32 %v6169_v14, %v6037_v4  ;;  %v6527_v50 = vld [vmem:[%s8243_s9 + $0x115] sm:$0xff]  ;;  %v6530_v4 = vld [vmem:[%s8243_s9 + $0x12d] sm:$0xff] }
 0x63f   : > { %7918 = vmatmul.msk.f32.gmra.mxu0 %vm278_vm0, %v6686_v10  ;;  %v6912_v57 = vld [vmem:[%s13439_s3 + $0xf0] sm:$0xff] }
 0x640   : > { %7897 = vmatmul.msk.f32.gmra.mxu2 %vm278_vm0, %v6525_v44  ;;  %7906 = vmatmul.msk.f32.gmra.mxu3 %vm278_vm0, %v6525_v44 }
 0x641   : > { %7927 = vmatmul.msk.f32.gmra.mxu1 %vm278_vm0, %v6686_v10  ;;  %6963 = vmatpush.msrb.mxu3 %v6912_v57  ;;  %v6904_v57 = vld [vmem:[%s13439_s3 + $0xb0] sm:$0xff] }
 0x642   : > { %v6140_v3 = vpop.f32.mrf.mxu0 }
 0x643   : > { %v5970_v34 = vpop.f32.mrf.mxu2  ;;  %v6014_v62 = vpop.f32.mrf.mxu3 }
 0x644   : > { %v6038_v49 = vadd.f32 %v5970_v34, %v12901_v8  ;;  %v6039_v9 = vadd.f32 %v6014_v62, %v12904_v59  ;;  %v6184_v15 = vpop.f32.mrf.mxu1 }
 0x646   : > { %v13083_v54 = vadd.f32 %v6128_v58, %v6038_v49  ;;  %v13085_v63 = vadd.f32 %v6172_v56, %v6039_v9  ;;  %v6528_v56 = vld [vmem:[%s8243_s9 + $0x11d] sm:$0xff] }
 0x647   : > { %7919 = vmatmul.msk.f32.gmra.mxu0 %vm278_vm0, %v6687_v18 }
 0x648   : > { %7898 = vmatmul.msk.f32.gmra.mxu2 %vm278_vm0, %v6526_v11  ;;  %7907 = vmatmul.msk.f32.gmra.mxu3 %vm278_vm0, %v6526_v11 }
 0x649   : > { %7928 = vmatmul.msk.f32.gmra.mxu1 %vm278_vm0, %v6687_v18 }
 0x64a   : > { %v13101_v26 = vpop.f32.mrf.mxu0 }
 0x64b   : > { %v5973_v6 = vpop.f32.mrf.mxu2  ;;  %v6017_v1 = vpop.f32.mrf.mxu3 }
 0x64c   : > { %v6040_v8 = vadd.f32 %v5973_v6, %v12933_v52  ;;  %v6041_v59 = vadd.f32 %v6017_v1, %v12936_v40  ;;  %v13103_v32 = vpop.f32.mrf.mxu1  ;;  %v6893_v1 = vld [vmem:[%s13439_s3 + $0x58] sm:$0xff] }
 0x64e   : > { %v13095_v14 = vadd.f32 %v6131_v2, %v6040_v8  ;;  %v13097_v7 = vadd.f32 %v6175_v47, %v6041_v59 }
 0x64f   : > { %7920 = vmatmul.msk.f32.gmra.mxu0 %vm278_vm0, %v6688_v43 }
 0x650   : > { %7899 = vmatmul.msk.f32.gmra.mxu2 %vm278_vm0, %v6527_v50  ;;  %7908 = vmatmul.msk.f32.gmra.mxu3 %vm278_vm0, %v6527_v50 }
 0x651   : > { %7929 = vmatmul.msk.f32.gmra.mxu1 %vm278_vm0, %v6688_v43  ;;  %v6892_v43 = vld [vmem:[%s13439_s3 + $0x50] sm:$0xff] }
 0x652   : > { %v13117_v45 = vpop.f32.mrf.mxu0 }
 0x653   : > { %v5976_v29 = vpop.f32.mrf.mxu2  ;;  %v6020_v52 = vpop.f32.mrf.mxu3 }
 0x654   : > { %v6042_v40 = vadd.f32 %v5976_v29, %v12968_v0  ;;  %v6043_v58 = vadd.f32 %v6020_v52, %v12971_v5  ;;  %v6532_v29 = vld [vmem:[%s8243_s9 + $0x13d] sm:$0xff] }
 0x656   : > { %v13111_v19 = vadd.f32 %v6134_v38, %v6042_v40  ;;  %v13113_v12 = vadd.f32 %v6178_v13, %v6043_v58  ;;  %v13119_v33 = vpop.f32.mrf.mxu1  ;;  %v6690_v38 = vld [vmem:[%s8243_s9 + $0x13e] sm:$0xff]  ;;  %v6908_v58 = vld [vmem:[%s13439_s3 + $0xd0] sm:$0xff] }
 0x657   : > { %7921 = vmatmul.msk.f32.gmra.mxu0 %vm278_vm0, %v6689_v21 }
 0x658   : > { %7900 = vmatmul.msk.f32.gmra.mxu2 %vm278_vm0, %v6528_v56  ;;  %7909 = vmatmul.msk.f32.gmra.mxu3 %vm278_vm0, %v6528_v56 }
 0x659   : > { %7930 = vmatmul.msk.f32.gmra.mxu1 %vm278_vm0, %v6689_v21 }
 0x65b   : > { %v5979_v2 = vpop.f32.mrf.mxu2  ;;  %v6023_v47 = vpop.f32.mrf.mxu3 }
 0x65c   : > { %v6044_v0 = vadd.f32 %v5979_v2, %v12995_v36  ;;  %v6045_v5 = vadd.f32 %v6023_v47, %v12998_v42  ;;  %v6896_v36 = vld [vmem:[%s13439_s3 + $0x70] sm:$0xff]  ;;  %v13142_v42 = vpop.f32.mrf.mxu0 }
 0x65d   : > { %6919 = vmatpush.msrb.mxu2 %v6896_v36 }
 0x65e   : > { %v13130_v27 = vadd.f32 %v6137_v22, %v6044_v0  ;;  %v13132_v53 = vadd.f32 %v6181_v30, %v6045_v5  ;;  %v13144_v20 = vpop.f32.mrf.mxu1  ;;  %v6895_v30 = vld [vmem:[%s13439_s3 + $0x68] sm:$0xff]  ;;  %v6890_v0 = vld [vmem:[%s13439_s3 + $0x40] sm:$0xff] }
 0x65f   : > { %7922 = vmatmul.msk.f32.gmra.mxu0 %vm278_vm0, %v6690_v38  ;;  %6920 = vmatpush.msrb.mxu2 %v6895_v30 }
 0x660   : > { %7901 = vmatmul.msk.f32.gmra.mxu2 %vm278_vm0, %v6529_v16  ;;  %7910 = vmatmul.msk.f32.gmra.mxu3 %vm278_vm0, %v6529_v16  ;;  %v6906_v16 = vld [vmem:[%s13439_s3 + $0xc0] sm:$0xff] }
 0x661   : > { %7931 = vmatmul.msk.f32.gmra.mxu1 %vm278_vm0, %v6690_v38 }
 0x663   : > { %v5982_v13 = vpop.f32.mrf.mxu2  ;;  %v6026_v31 = vpop.f32.mrf.mxu3 }
 0x664   : > { %v6046_v25 = vadd.f32 %v5982_v13, %v13016_v23  ;;  %v6047_v17 = vadd.f32 %v6026_v31, %v13019_v41  ;;  %v6911_v23 = vld [vmem:[%s13439_s3 + $0xe8] sm:$0xff]  ;;  %v6894_v41 = vld [vmem:[%s13439_s3 + $0x60] sm:$0xff]  ;;  %v6441_v10 = vpop.f32.mrf.mxu0 }
 0x665   : > { %6964 = vmatpush.msrb.mxu3 %v6911_v23  ;;  %6921 = vmatpush.msrb.mxu2 %v6894_v41 }
 0x666   : > { %v13155_v44 = vadd.f32 %v6140_v3, %v6046_v25  ;;  %v13157_v22 = vadd.f32 %v6184_v15, %v6047_v17  ;;  %v6485_v34 = vpop.f32.mrf.mxu1  ;;  %v6910_v3 = vld [vmem:[%s13439_s3 + $0xe0] sm:$0xff]  ;;  %v6531_v15 = vld [vmem:[%s8243_s9 + $0x135] sm:$0xff] }
 0x667   : > { %6965 = vmatpush.msrb.mxu3 %v6910_v3  ;;  %6922 = vmatpush.msrb.mxu2 %v6893_v1  ;;  %v6888_v17 = vld [vmem:[%s13439_s3 + $0x30] sm:$0xff] }
 0x668   : > { %7902 = vmatmul.msk.f32.gmra.mxu2 %vm278_vm0, %v6530_v4  ;;  %7911 = vmatmul.msk.f32.gmra.mxu3 %vm278_vm0, %v6530_v4  ;;  %v6887_v4 = vld [vmem:[%s13439_s3 + $0x28] sm:$0xff] }
 0x669   : > { %6923 = vmatpush.msrb.mxu2 %v6892_v43 }
 0x66b   : > { %v5985_v62 = vpop.f32.mrf.mxu2  ;;  %v6029_v49 = vpop.f32.mrf.mxu3 }
 0x66c   : > { %v6048_v9 = vadd.f32 %v5985_v62, %v13031_v46  ;;  %v6049_v11 = vadd.f32 %v6029_v49, %v13034_v28  ;;  %v6909_v46 = vld [vmem:[%s13439_s3 + $0xd8] sm:$0xff]  ;;  %v6444_v28 = vpop.f32.mrf.mxu0 }
 0x66d   : > { %6966 = vmatpush.msrb.mxu3 %v6909_v46  ;;  %v6901_v46 = vld [vmem:[%s13439_s3 + $0x98] sm:$0xff] }
 0x66e   : > { %v13177_v18 = vadd.f32 %v13101_v26, %v6048_v9  ;;  %v13180_v6 = vadd.f32 %v13103_v32, %v6049_v11  ;;  %v6488_v8 = vpop.f32.mrf.mxu1  ;;  %v6886_v9 = vld [vmem:[%s13439_s3 + $0x20] sm:$0xff] }
 0x66f   : > { %6967 = vmatpush.msrb.mxu3 %v6908_v58  ;;  %v6883_v58 = vld [vmem:[%s13439_s3 + $0x8] sm:$0xff] }
 0x670   : > { %7903 = vmatmul.msk.f32.gmra.mxu2 %vm278_vm0, %v6531_v15  ;;  %7912 = vmatmul.msk.f32.gmra.mxu3 %vm278_vm0, %v6531_v15 }
 0x673   : > { %v6277_v59 = vpop.f32.mrf.mxu2  ;;  %v6321_v50 = vpop.f32.mrf.mxu3 }
 0x674   : > { %v6348_v26 = vadd.f32 %v6277_v59, %v13045_v61  ;;  %v6349_v32 = vadd.f32 %v6321_v50, %v13047_v48  ;;  %v6891_v61 = vld [vmem:[%s13439_s3 + $0x48] sm:$0xff]  ;;  %v6447_v56 = vpop.f32.mrf.mxu0 }
 0x675   : > { %v6907_v48 = vld [vmem:[%s13439_s3 + $0xc8] sm:$0xff]  ;;  %6924 = vmatpush.msrb.mxu2 %v6891_v61 }
 0x676   : > { %v13197_v52 = vadd.f32 %v13117_v45, %v6348_v26  ;;  %v13200_v40 = vadd.f32 %v13119_v33, %v6349_v32  ;;  %v6491_v45 = vpop.f32.mrf.mxu1  ;;  %6968 = vmatpush.msrb.mxu3 %v6907_v48  ;;  %v6884_v26 = vld [vmem:[%s13439_s3 + $0x10] sm:$0xff] }
 0x677   : > { %6925 = vmatpush.msrb.mxu2 %v6890_v0 }
 0x678   : > { %7904 = vmatmul.msk.f32.gmra.mxu2 %vm278_vm0, %v6532_v29  ;;  %7913 = vmatmul.msk.f32.gmra.mxu3 %vm278_vm0, %v6532_v29 }
 0x679   : > { %6969 = vmatpush.msrb.mxu3 %v6906_v16 }
 0x67b   : > { %v6280_v33 = vpop.f32.mrf.mxu2  ;;  %v6324_v21 = vpop.f32.mrf.mxu3 }
 0x67c   : > { %v6350_v2 = vadd.f32 %v6280_v33, %v13059_v60  ;;  %v6351_v47 = vadd.f32 %v6324_v21, %v13061_v51  ;;  %v6889_v60 = vld [vmem:[%s13439_s3 + $0x38] sm:$0xff]  ;;  %v6450_v24 = vpop.f32.mrf.mxu0  ;;  %v6899_v33 = vld [vmem:[%s13439_s3 + $0x88] sm:$0xff] }
 0x67d   : > { %v6905_v51 = vld [vmem:[%s13439_s3 + $0xb8] sm:$0xff]  ;;  %6926 = vmatpush.msrb.mxu2 %v6889_v60 }
 0x67e   : > { %v13219_v5 = vadd.f32 %v13142_v42, %v6350_v2  ;;  %v13222_v35 = vadd.f32 %v13144_v20, %v6351_v47  ;;  %6970 = vmatpush.msrb.mxu3 %v6905_v51  ;;  %v6494_v36 = vpop.f32.mrf.mxu1 }
 0x67f   : > { %6927 = vmatpush.msrb.mxu2 %v6888_v17 }
 0x680   : > { %6971 = vmatpush.msrb.mxu3 %v6904_v57 }
 0x681   : > { %6928 = vmatpush.msrb.mxu2 %v6887_v4 }
 0x683   : > { %v6283_v42 = vpop.f32.mrf.mxu2  ;;  %v6327_v20 = vpop.f32.mrf.mxu3  ;;  %6929 = vmatpush.msrb.mxu2 %v6886_v9 }
 0x684   : > { %v6352_v38 = vadd.f32 %v6283_v42, %v13071_v55  ;;  %v6353_v13 = vadd.f32 %v6327_v20, %v13073_v39  ;;  %v6453_v41 = vpop.f32.mrf.mxu0 }
 0x686   : > { %v13235_v31 = vadd.f32 %v6441_v10, %v6352_v38  ;;  %v13237_v25 = vadd.f32 %v6485_v34, %v6353_v13  ;;  %v6497_v10 = vpop.f32.mrf.mxu1  ;;  %v6903_v34 = vld [vmem:[%s13439_s3 + $0xa8] sm:$0xff] }
 0x687   : > { %6972 = vmatpush.msrb.mxu3 %v6903_v34 }
 0x68b   : > { %v6286_v55 = vpop.f32.mrf.mxu2  ;;  %v6330_v39 = vpop.f32.mrf.mxu3 }
 0x68c   : > { %v6354_v30 = vadd.f32 %v6286_v55, %v13083_v54  ;;  %v6355_v23 = vadd.f32 %v6330_v39, %v13085_v63  ;;  %v6902_v54 = vld [vmem:[%s13439_s3 + $0xa0] sm:$0xff]  ;;  %v6885_v63 = vld [vmem:[%s13439_s3 + $0x18] sm:$0xff]  ;;  %v6456_v59 = vpop.f32.mrf.mxu0 }
 0x68d   : > { %6973 = vmatpush.msrb.mxu3 %v6902_v54  ;;  %6930 = vmatpush.msrb.mxu2 %v6885_v63 }
 0x68e   : > { %v13253_v62 = vadd.f32 %v6444_v28, %v6354_v30  ;;  %v13255_v49 = vadd.f32 %v6488_v8, %v6355_v23  ;;  %v6500_v50 = vpop.f32.mrf.mxu1 }
 0x68f   : > { %6974 = vmatpush.msrb.mxu3 %v6901_v46  ;;  %6931 = vmatpush.msrb.mxu2 %v6884_v26 }
 0x691   : > { %6932 = vmatpush.msrb.mxu2 %v6883_v58 }
 0x693   : > { %v6289_v11 = vpop.f32.mrf.mxu2  ;;  %v6333_v3 = vpop.f32.mrf.mxu3 }
 0x694   : > { %v6356_v15 = vadd.f32 %v6289_v11, %v13095_v14  ;;  %v6357_v1 = vadd.f32 %v6333_v3, %v13097_v7  ;;  %v6900_v14 = vld [vmem:[%s13439_s3 + $0x90] sm:$0xff] }
 0x695   : > { %6975 = vmatpush.msrb.mxu3 %v6900_v14 }
 0x696   : > { %v13271_v28 = vadd.f32 %v6447_v56, %v6356_v15  ;;  %v13273_v8 = vadd.f32 %v6491_v45, %v6357_v1  ;;  %v6459_v56 = vpop.f32.mrf.mxu0  ;;  %v6503_v45 = vpop.f32.mrf.mxu1 }
 0x697   : > { %6976 = vmatpush.msrb.mxu3 %v6899_v33 }
 0x69b   : > { %v6292_v7 = vpop.f32.mrf.mxu2  ;;  %v6336_v32 = vpop.f32.mrf.mxu3 }
 0x69c   : > { %v6358_v43 = vadd.f32 %v6292_v7, %v13111_v19  ;;  %v6359_v29 = vadd.f32 %v6336_v32, %v13113_v12  ;;  %v6882_v19 = vld [vmem:[%s13439_s3] sm:$0xff] }
 0x69d   : > { %v6898_v12 = vld [vmem:[%s13439_s3 + $0x80] sm:$0xff]  ;;  %6933 = vmatpush.msrb.mxu2 %v6882_v19 }
 0x69e   : > { %v13286_v61 = vadd.f32 %v6450_v24, %v6358_v43  ;;  %v13288_v48 = vadd.f32 %v6494_v36, %v6359_v29  ;;  %6977 = vmatpush.msrb.mxu3 %v6898_v12  ;;  %v6751_v51 = vpop.f32.mrf.mxu0  ;;  %v6795_v24 = vpop.f32.mrf.mxu1 }
 0x6a3   : > { %v6295_v21 = vpop.f32.mrf.mxu2  ;;  %v6339_v2 = vpop.f32.mrf.mxu3 }
 0x6a4   : > { %v6360_v47 = vadd.f32 %v6295_v21, %v13130_v27  ;;  %v6361_v0 = vadd.f32 %v6339_v2, %v13132_v53 }
 0x6a6   : > { %v13301_v16 = vadd.f32 %v6453_v41, %v6360_v47  ;;  %v13303_v60 = vadd.f32 %v6497_v10, %v6361_v0  ;;  %v6754_v55 = vpop.f32.mrf.mxu0  ;;  %v6798_v39 = vpop.f32.mrf.mxu1 }
 0x6ab   : > { %v6298_v36 = vpop.f32.mrf.mxu2  ;;  %v6342_v42 = vpop.f32.mrf.mxu3 }
 0x6ac   : > { %v6362_v20 = vadd.f32 %v6298_v36, %v13155_v44  ;;  %v6363_v38 = vadd.f32 %v6342_v42, %v13157_v22  ;;  %v6840_v44 = vld [vmem:[%s13438_s2] sm:$0x3] }
 0x6ad   : > { %v13322_v9 = vperm.slane %v6840_v44, 0 }
 0x6ae   : > { %v13307_v13 = vadd.f32 %v6456_v59, %v6362_v20  ;;  %v13309_v17 = vadd.f32 %v6500_v50, %v6363_v38  ;;  %v6757_v63 = vpop.f32.mrf.mxu0  ;;  %v6801_v11 = vpop.f32.mrf.mxu1 }
 0x6b3   : > { %v6301_v27 = vpop.f32.mrf.mxu2  ;;  %v6345_v57 = vpop.f32.mrf.mxu3 }
 0x6b4   : > { %v6364_v53 = vadd.f32 %v6301_v27, %v13177_v18  ;;  %v6365_v4 = vadd.f32 %v6345_v57, %v13180_v6  ;;  %v13324_v18 = vperm.slane %v6840_v44, 1 }
 0x6b6   : > { %v13313_v30 = vadd.f32 %v6459_v56, %v6364_v53  ;;  %v13315_v23 = vadd.f32 %v6503_v45, %v6365_v4  ;;  %v6760_v43 = vpop.f32.mrf.mxu0  ;;  %v6804_v29 = vpop.f32.mrf.mxu1 }
 0x6bb   : > { %v6593_v22 = vpop.f32.mrf.mxu2  ;;  %v6637_v41 = vpop.f32.mrf.mxu3 }
 0x6bc   : > { %v6664_v10 = vadd.f32 %v6593_v22, %v13197_v52  ;;  %v6665_v34 = vadd.f32 %v6637_v41, %v13200_v40 }
 0x6be   : > { %v6822_v6 = vadd.f32 %v6751_v51, %v6664_v10  ;;  %v6823_v54 = vadd.f32 %v6795_v24, %v6665_v34  ;;  %v6763_v51 = vpop.f32.mrf.mxu0  ;;  %v6807_v24 = vpop.f32.mrf.mxu1 }
 0x6c0   : > { %v6846_v3 = vadd.f32 %v13322_v9, %v6822_v6  ;;  %v6847_v15 = vadd.f32 %v13324_v18, %v6823_v54 }
 0x6c2   : > { %v6864_v1 = vmax.f32 %v6846_v3, 0.0  ;;  %v6865_v46 = vmax.f32 %v6847_v15, 0.0 }
 0x6c3   : > { %v6596_v59 = vpop.f32.mrf.mxu2  ;;  %v6640_v50 = vpop.f32.mrf.mxu3 }
 0x6c4   : > { %v6666_v52 = vadd.f32 %v6596_v59, %v13219_v5  ;;  %v6667_v40 = vadd.f32 %v6640_v50, %v13222_v35  ;;  %6934 = vmatmul.f32.vlgmr.msrb.gmra.mxu2 %v6864_v1  ;;  %6978 = vmatmul.f32.vlgmr.msrb.gmra.mxu3 %v6865_v46 }
 0x6c6   : > { %v6824_v26 = vadd.f32 %v6754_v55, %v6666_v52  ;;  %v6825_v14 = vadd.f32 %v6798_v39, %v6667_v40 }
 0x6c8   : > { %v6848_v7 = vadd.f32 %v13322_v9, %v6824_v26  ;;  %v6849_v32 = vadd.f32 %v13324_v18, %v6825_v14 }
 0x6ca   : > { %v6866_v58 = vmax.f32 %v6848_v7, 0.0  ;;  %v6867_v56 = vmax.f32 %v6849_v32, 0.0 }
 0x6cb   : > { %v6599_v45 = vpop.f32.mrf.mxu2  ;;  %v6643_v33 = vpop.f32.mrf.mxu3 }
 0x6cc   : > { %v6668_v19 = vadd.f32 %v6599_v45, %v13235_v31  ;;  %v6669_v5 = vadd.f32 %v6643_v33, %v13237_v25  ;;  %6937 = vmatmul.f32.gmra.mxu2 %v6866_v58  ;;  %6981 = vmatmul.f32.gmra.mxu3 %v6867_v56 }
 0x6ce   : > { %v6826_v35 = vadd.f32 %v6757_v63, %v6668_v19  ;;  %v6827_v12 = vadd.f32 %v6801_v11, %v6669_v5 }
 0x6d0   : > { %v6850_v21 = vadd.f32 %v13322_v9, %v6826_v35  ;;  %v6851_v2 = vadd.f32 %v13324_v18, %v6827_v12 }
 0x6d2   : > { %v6868_v47 = vmax.f32 %v6850_v21, 0.0  ;;  %v6869_v0 = vmax.f32 %v6851_v2, 0.0 }
 0x6d3   : > { %v6602_v36 = vpop.f32.mrf.mxu2  ;;  %v6646_v42 = vpop.f32.mrf.mxu3 }
 0x6d4   : > { %v6670_v20 = vadd.f32 %v6602_v36, %v13253_v62  ;;  %v6671_v31 = vadd.f32 %v6646_v42, %v13255_v49  ;;  %6940 = vmatmul.f32.gmra.mxu2 %v6868_v47  ;;  %6984 = vmatmul.f32.gmra.mxu3 %v6869_v0  ;;  %v6766_v62 = vpop.f32.mrf.mxu0  ;;  %v6810_v49 = vpop.f32.mrf.mxu1 }
 0x6d6   : > { %v6828_v25 = vadd.f32 %v6760_v43, %v6670_v20  ;;  %v6829_v38 = vadd.f32 %v6804_v29, %v6671_v31 }
 0x6d8   : > { %v6852_v27 = vadd.f32 %v13322_v9, %v6828_v25  ;;  %v6853_v57 = vadd.f32 %v13324_v18, %v6829_v38 }
 0x6da   : > { %v6870_v53 = vmax.f32 %v6852_v27, 0.0  ;;  %v6871_v4 = vmax.f32 %v6853_v57, 0.0 }
 0x6db   : > { %v6605_v55 = vpop.f32.mrf.mxu2  ;;  %v6649_v39 = vpop.f32.mrf.mxu3 }
 0x6dc   : > { %v6672_v44 = vadd.f32 %v6605_v55, %v13271_v28  ;;  %v6673_v22 = vadd.f32 %v6649_v39, %v13273_v8  ;;  %6943 = vmatmul.f32.gmra.mxu2 %v6870_v53  ;;  %6987 = vmatmul.f32.gmra.mxu3 %v6871_v4  ;;  %v6769_v46 = vpop.f32.mrf.mxu0  ;;  %v6813_v59 = vpop.f32.mrf.mxu1  ;;  %v13363_v4 = vld [vmem:[%s13440_s4] ss:$0 sm:$0xff] }
 0x6de   : > { %v6830_v41 = vadd.f32 %v6763_v51, %v6672_v44  ;;  %v6831_v10 = vadd.f32 %v6807_v24, %v6673_v22 }
 0x6e0   : > { %v6854_v34 = vadd.f32 %v13322_v9, %v6830_v41  ;;  %v6855_v6 = vadd.f32 %v13324_v18, %v6831_v10 }
 0x6e2   : > { %v6872_v54 = vmax.f32 %v6854_v34, 0.0  ;;  %v6873_v63 = vmax.f32 %v6855_v6, 0.0 }
 0x6e3   : > { %v6608_v11 = vpop.f32.mrf.mxu2  ;;  %v6652_v3 = vpop.f32.mrf.mxu3 }
 0x6e4   : > { %v6674_v15 = vadd.f32 %v6608_v11, %v13286_v61  ;;  %v6675_v28 = vadd.f32 %v6652_v3, %v13288_v48  ;;  %6946 = vmatmul.f32.gmra.mxu2 %v6872_v54  ;;  %6990 = vmatmul.f32.gmra.mxu3 %v6873_v63  ;;  %v6772_v56 = vpop.f32.mrf.mxu0  ;;  %v6816_v45 = vpop.f32.mrf.mxu1 }
 0x6e6   : > { %v6832_v8 = vadd.f32 %v6766_v62, %v6674_v15  ;;  %v6833_v1 = vadd.f32 %v6810_v49, %v6675_v28 }
 0x6e8   : > { %v6856_v50 = vadd.f32 %v13322_v9, %v6832_v8  ;;  %v6857_v52 = vadd.f32 %v13324_v18, %v6833_v1 }
 0x6ea   : > { %v6874_v40 = vmax.f32 %v6856_v50, 0.0  ;;  %v6875_v26 = vmax.f32 %v6857_v52, 0.0 }
 0x6eb   : > { %v6611_v14 = vpop.f32.mrf.mxu2  ;;  %v6655_v7 = vpop.f32.mrf.mxu3 }
 0x6ec   : > { %v6676_v32 = vadd.f32 %v6611_v14, %v13301_v16  ;;  %v6677_v61 = vadd.f32 %v6655_v7, %v13303_v60  ;;  %6949 = vmatmul.f32.gmra.mxu2 %v6874_v40  ;;  %6993 = vmatmul.f32.gmra.mxu3 %v6875_v26  ;;  %v6775_v24 = vpop.f32.mrf.mxu0  ;;  %v6819_v36 = vpop.f32.mrf.mxu1 }
 0x6ee   : > { %v6834_v48 = vadd.f32 %v6769_v46, %v6676_v32  ;;  %v6835_v43 = vadd.f32 %v6813_v59, %v6677_v61 }
 0x6f0   : > { %v6858_v29 = vadd.f32 %v13322_v9, %v6834_v48  ;;  %v6859_v58 = vadd.f32 %v13324_v18, %v6835_v43 }
 0x6f2   : > { %v6876_v33 = vmax.f32 %v6858_v29, 0.0  ;;  %v6877_v19 = vmax.f32 %v6859_v58, 0.0 }
 0x6f3   : > { %v6614_v5 = vpop.f32.mrf.mxu2  ;;  %v6658_v35 = vpop.f32.mrf.mxu3 }
 0x6f4   : > { %v6678_v12 = vadd.f32 %v6614_v5, %v13307_v13  ;;  %v6679_v16 = vadd.f32 %v6658_v35, %v13309_v17  ;;  %6952 = vmatmul.f32.gmra.mxu2 %v6876_v33  ;;  %6996 = vmatmul.f32.gmra.mxu3 %v6877_v19 }
 0x6f6   : > { %v6836_v60 = vadd.f32 %v6772_v56, %v6678_v12  ;;  %v6837_v21 = vadd.f32 %v6816_v45, %v6679_v16 }
 0x6f8   : > { %v6860_v2 = vadd.f32 %v13322_v9, %v6836_v60  ;;  %v6861_v47 = vadd.f32 %v13324_v18, %v6837_v21 }
 0x6fa   : > { %v6878_v0 = vmax.f32 %v6860_v2, 0.0  ;;  %v6879_v51 = vmax.f32 %v6861_v47, 0.0 }
 0x6fb   : > { %v6617_v42 = vpop.f32.mrf.mxu2  ;;  %v6661_v20 = vpop.f32.mrf.mxu3 }
 0x6fc   : > { %v6680_v31 = vadd.f32 %v6617_v42, %v13313_v30  ;;  %v6681_v13 = vadd.f32 %v6661_v20, %v13315_v23  ;;  %6955 = vmatmul.f32.gmra.mxu2 %v6878_v0  ;;  %6999 = vmatmul.f32.gmra.mxu3 %v6879_v51 }
 0x6fe   : > { %v6838_v17 = vadd.f32 %v6775_v24, %v6680_v31  ;;  %v6839_v25 = vadd.f32 %v6819_v36, %v6681_v13 }
 0x700   : > { %v6862_v38 = vadd.f32 %v13322_v9, %v6838_v17  ;;  %v6863_v27 = vadd.f32 %v13324_v18, %v6839_v25 }
 0x702   : > { %v6880_v57 = vmax.f32 %v6862_v38, 0.0  ;;  %v6881_v53 = vmax.f32 %v6863_v27, 0.0 }
 0x704   : > { %6958 = vmatmul.f32.gmra.mxu2 %v6880_v57  ;;  %7002 = vmatmul.f32.gmra.mxu3 %v6881_v53 }
 0x747   : > { %v6935_v30 = vpop.f32.mrf.mxu2  ;;  %v6979_v55 = vpop.f32.mrf.mxu3 }
 0x748   : > { %v6936_v23 = vadd.f32 %v13363_v4, %v6935_v30 }
 0x74a   : > { %v6980_v39 = vadd.f32 %v6979_v55, %v6936_v23 }
 0x74c   : > { %v7932_v44 = vmul.f32 -1.442695, %v6980_v39 }
 0x74e   : > { %8065 = vpow2.f32 %v7932_v44 }
 0x74f   : > { %v6938_v22 = vpop.f32.mrf.mxu2  ;;  %v6982_v9 = vpop.f32.mrf.mxu3 }
 0x750   : > { %v6939_v18 = vadd.f32 %v13363_v4, %v6938_v22 }
 0x752   : > { %v13367_v62 = vadd.f32 %v6982_v9, %v6939_v18 }
 0x754   : > { %v8066_v49 = vpop.eup %8065  ;;  %v7933_v41 = vmul.f32 -1.442695, %v13367_v62 }
 0x755   : > { %v7033_v10 = vadd.f32 1.0, %v8066_v49 }
 0x756   : > { %8067 = vpow2.f32 %v7933_v41 }
 0x757   : > { %8069 = vrcp.f32 %v7033_v10  ;;  %v6941_v34 = vpop.f32.mrf.mxu2  ;;  %v6985_v6 = vpop.f32.mrf.mxu3  ;;  %v7053_v52 = vand.u32 2147483648, %v7033_v10  ;;  %v7051_v26 = vand.u32 2147483647, %v7033_v10  ;;  %vm7047_vm12 = vweird.f32 %v7033_v10 }
 0x758   : > { %v6942_v54 = vadd.f32 %v13363_v4, %v6941_v34 }
 0x759   : > { %v7054_v43 = vor.u32 1.1754944e-38, %v7053_v52  ;;  %vm7052_vm14 = vcmp.eq.f32.partialorder %v7051_v26, 8.507059e+37 }
 0x75a   : > { %v13371_v63 = vadd.f32 %v6985_v6, %v6942_v54 }
 0x75c   : > { %v8068_v11 = vpop.eup %8067  ;;  %v7934_v3 = vmul.f32 -1.442695, %v13371_v63 }
 0x75d   : > { %v8070_v15 = vpop.eup %8069  ;;  %v7034_v28 = vadd.f32 1.0, %v8068_v11 }
 0x75e   : > { %v7043_v8 = vmul.f32 %v8070_v15, %v7033_v10  ;;  %8071 = vpow2.f32 %v7934_v3  ;;  %vm7048_vm0 = vweird.f32 %v8070_v15 }
 0x75f   : > { %8073 = vrcp.f32 %v7034_v28  ;;  %v6944_v1 = vpop.f32.mrf.mxu2  ;;  %v6988_v46 = vpop.f32.mrf.mxu3  ;;  %vm7049_vm13 = vmor %vm7047_vm12, %vm7048_vm0  ;;  %v7068_v16 = vand.u32 2147483648, %v7034_v28  ;;  %v7066_v21 = vand.u32 2147483647, %v7034_v28  ;;  %vm7062_vm1 = vweird.f32 %v7034_v28 }
 0x760   : > { %v7044_v59 = vsub.f32 1.0, %v7043_v8  ;;  %v6945_v50 = vadd.f32 %v13363_v4, %v6944_v1 }
 0x761   : > { %v7069_v36 = vor.u32 1.1754944e-38, %v7068_v16  ;;  %vm7067_vm4 = vcmp.eq.f32.partialorder %v7066_v21, 8.507059e+37 }
 0x762   : > { %v7045_v40 = vmul.f32 %v8070_v15, %v7044_v59  ;;  %v13375_v14 = vadd.f32 %v6988_v46, %v6945_v50 }
 0x764   : > { %v8072_v7 = vpop.eup %8071  ;;  %v7046_v32 = vadd.f32 %v8070_v15, %v7045_v40  ;;  %v7935_v61 = vmul.f32 -1.442695, %v13375_v14 }
 0x765   : > { %v8074_v48 = vpop.eup %8073  ;;  %v7035_v29 = vadd.f32 1.0, %v8072_v7 }
 0x766   : > { %v7050_v58 = vsel %vm7049_vm13, %v8070_v15, %v7046_v32  ;;  %v7058_v56 = vmul.f32 %v8074_v48, %v7034_v28  ;;  %8075 = vpow2.f32 %v7935_v61  ;;  %vm7063_vm15 = vweird.f32 %v8074_v48 }
 0x767   : > { %v7055_v45 = vsel %vm7052_vm14, %v7054_v43, %v7050_v58  ;;  %8077 = vrcp.f32 %v7035_v29  ;;  %v6947_v33 = vpop.f32.mrf.mxu2  ;;  %v6991_v19 = vpop.f32.mrf.mxu3  ;;  %vm7064_vm2 = vmor %vm7062_vm1, %vm7063_vm15  ;;  %v7083_v53 = vand.u32 2147483648, %v7035_v29  ;;  %v7081_v55 = vand.u32 2147483647, %v7035_v29 }
 0x768   : > { %v7177_v5 = vsel %vm227_vm3, %v7055_v45, %v6980_v39  ;;  %v7059_v35 = vsub.f32 1.0, %v7058_v56  ;;  %v6948_v12 = vadd.f32 %v13363_v4, %v6947_v33  ;;  %vm7077_vm6 = vweird.f32 %v7035_v29 }
 0x769   : > { %7186 = vst [vmem:[%s9771_s26 + $0xd8] sm:$0xff] %v7177_v5  ;;  %v7084_v18 = vor.u32 1.1754944e-38, %v7083_v53  ;;  %vm7082_vm8 = vcmp.eq.f32.partialorder %v7081_v55, 8.507059e+37 }
 0x76a   : > { %v7060_v60 = vmul.f32 %v8074_v48, %v7059_v35  ;;  %v13382_v2 = vadd.f32 %v6991_v19, %v6948_v12 }
 0x76c   : > { %v8076_v47 = vpop.eup %8075  ;;  %v7061_v0 = vadd.f32 %v8074_v48, %v7060_v60  ;;  %v7936_v51 = vmul.f32 -1.442695, %v13382_v2 }
 0x76d   : > { %v8078_v24 = vpop.eup %8077  ;;  %v7036_v42 = vadd.f32 1.0, %v8076_v47 }
 0x76e   : > { %v7065_v20 = vsel %vm7064_vm2, %v8074_v48, %v7061_v0  ;;  %v7073_v31 = vmul.f32 %v8078_v24, %v7035_v29  ;;  %8079 = vpow2.f32 %v7936_v51  ;;  %vm7078_vm5 = vweird.f32 %v8078_v24 }
 0x76f   : > { %v7070_v13 = vsel %vm7067_vm4, %v7069_v36, %v7065_v20  ;;  %8081 = vrcp.f32 %v7036_v42  ;;  %v6950_v17 = vpop.f32.mrf.mxu2  ;;  %v6994_v25 = vpop.f32.mrf.mxu3  ;;  %vm7079_vm7 = vmor %vm7077_vm6, %vm7078_vm5  ;;  %v7098_v15 = vand.u32 2147483648, %v7036_v42  ;;  %v7096_v8 = vand.u32 2147483647, %v7036_v42 }
 0x770   : > { %v7178_v38 = vsel %vm227_vm3, %v7070_v13, %v13367_v62  ;;  %v7074_v27 = vsub.f32 1.0, %v7073_v31  ;;  %v6951_v57 = vadd.f32 %v13363_v4, %v6950_v17  ;;  %vm7092_vm10 = vweird.f32 %v7036_v42 }
 0x771   : > { %7187 = vst [vmem:[%s9771_s26 + $0xe0] sm:$0xff] %v7178_v38  ;;  %v7099_v40 = vor.u32 1.1754944e-38, %v7098_v15  ;;  %vm7097_vm0 = vcmp.eq.f32.partialorder %v7096_v8, 8.507059e+37 }
 0x772   : > { %v7075_v30 = vmul.f32 %v8078_v24, %v7074_v27  ;;  %v13390_v23 = vadd.f32 %v6994_v25, %v6951_v57 }
 0x774   : > { %v8080_v39 = vpop.eup %8079  ;;  %v7076_v44 = vadd.f32 %v8078_v24, %v7075_v30  ;;  %v7937_v22 = vmul.f32 -1.442695, %v13390_v23 }
 0x775   : > { %v8082_v9 = vpop.eup %8081  ;;  %v7037_v62 = vadd.f32 1.0, %v8080_v39 }
 0x776   : > { %v7080_v49 = vsel %vm7079_vm7, %v8078_v24, %v7076_v44  ;;  %v7088_v41 = vmul.f32 %v8082_v9, %v7036_v42  ;;  %8083 = vpow2.f32 %v7937_v22  ;;  %vm7093_vm9 = vweird.f32 %v8082_v9 }
 0x777   : > { %v7085_v10 = vsel %vm7082_vm8, %v7084_v18, %v7080_v49  ;;  %8085 = vrcp.f32 %v7037_v62  ;;  %v6953_v34 = vpop.f32.mrf.mxu2  ;;  %v6997_v6 = vpop.f32.mrf.mxu3  ;;  %vm7094_vm11 = vmor %vm7092_vm10, %vm7093_vm9  ;;  %v7113_v56 = vand.u32 2147483648, %v7037_v62  ;;  %v7111_v33 = vand.u32 2147483647, %v7037_v62 }
 0x778   : > { %v7179_v54 = vsel %vm227_vm3, %v7085_v10, %v13371_v63  ;;  %v7089_v11 = vsub.f32 1.0, %v7088_v41  ;;  %v6954_v3 = vadd.f32 %v13363_v4, %v6953_v34  ;;  %vm7107_vm13 = vweird.f32 %v7037_v62 }
 0x779   : > { %7188 = vst [vmem:[%s9771_s26 + $0xe8] sm:$0xff] %v7179_v54  ;;  %v7114_v60 = vor.u32 1.1754944e-38, %v7113_v56  ;;  %vm7112_vm15 = vcmp.eq.f32.partialorder %v7111_v33, 8.507059e+37 }
 0x77a   : > { %v7090_v28 = vmul.f32 %v8082_v9, %v7089_v11  ;;  %v13398_v1 = vadd.f32 %v6997_v6, %v6954_v3 }
 0x77c   : > { %v8084_v46 = vpop.eup %8083  ;;  %v7091_v59 = vadd.f32 %v8082_v9, %v7090_v28  ;;  %v7938_v50 = vmul.f32 -1.442695, %v13398_v1 }
 0x77d   : > { %v8086_v52 = vpop.eup %8085  ;;  %v7038_v63 = vadd.f32 1.0, %v8084_v46 }
 0x77e   : > { %v7095_v26 = vsel %vm7094_vm11, %v8082_v9, %v7091_v59  ;;  %v7103_v7 = vmul.f32 %v8086_v52, %v7037_v62  ;;  %8087 = vpow2.f32 %v7938_v50  ;;  %vm7108_vm12 = vweird.f32 %v8086_v52 }
 0x77f   : > { %v7100_v32 = vsel %vm7097_vm0, %v7099_v40, %v7095_v26  ;;  %8089 = vrcp.f32 %v7038_v63  ;;  %v6956_v61 = vpop.f32.mrf.mxu2  ;;  %v7000_v48 = vpop.f32.mrf.mxu3  ;;  %vm7109_vm14 = vmor %vm7107_vm13, %vm7108_vm12  ;;  %v7128_v20 = vand.u32 2147483648, %v7038_v63  ;;  %v7126_v17 = vand.u32 2147483647, %v7038_v63 }
 0x780   : > { %v7180_v43 = vsel %vm227_vm3, %v7100_v32, %v13375_v14  ;;  %v7104_v29 = vsub.f32 1.0, %v7103_v7  ;;  %v6957_v58 = vadd.f32 %v13363_v4, %v6956_v61  ;;  %vm7122_vm2 = vweird.f32 %v7038_v63 }
 0x781   : > { %7189 = vst [vmem:[%s9771_s26 + $0xf0] sm:$0xff] %v7180_v43  ;;  %vm7127_vm5 = vcmp.eq.f32.partialorder %v7126_v17, 8.507059e+37 }
 0x782   : > { %v7105_v45 = vmul.f32 %v8086_v52, %v7104_v29  ;;  %v13406_v19 = vadd.f32 %v7000_v48, %v6957_v58 }
 0x784   : > { %v8088_v5 = vpop.eup %8087  ;;  %v7106_v35 = vadd.f32 %v8086_v52, %v7105_v45  ;;  %v7939_v12 = vmul.f32 -1.442695, %v13406_v19 }
 0x785   : > { %v8090_v16 = vpop.eup %8089  ;;  %v7039_v14 = vadd.f32 1.0, %v8088_v5 }
 0x786   : > { %v7110_v21 = vsel %vm7109_vm14, %v8086_v52, %v7106_v35  ;;  %v7118_v47 = vmul.f32 %v8090_v16, %v7038_v63  ;;  %8091 = vpow2.f32 %v7939_v12  ;;  %vm7123_vm1 = vweird.f32 %v8090_v16 }
 0x787   : > { %v7115_v0 = vsel %vm7112_vm15, %v7114_v60, %v7110_v21  ;;  %8093 = vrcp.f32 %v7039_v14  ;;  %v6959_v51 = vpop.f32.mrf.mxu2  ;;  %v7003_v31 = vpop.f32.mrf.mxu3  ;;  %vm7124_vm4 = vmor %vm7122_vm2, %vm7123_vm1  ;;  %v7143_v9 = vand.u32 2147483648, %v7039_v14  ;;  %v7141_v62 = vand.u32 2147483647, %v7039_v14 }
 0x788   : > { %v7181_v24 = vsel %vm227_vm3, %v7115_v0, %v13382_v2  ;;  %v7119_v36 = vsub.f32 1.0, %v7118_v47  ;;  %v6960_v42 = vadd.f32 %v13363_v4, %v6959_v51  ;;  %v7129_v2 = vor.u32 1.1754944e-38, %v7128_v20 }
 0x789   : > { %7190 = vst [vmem:[%s9771_s26 + $0xf8] sm:$0xff] %v7181_v24  ;;  %vm7137_vm7 = vweird.f32 %v7039_v14  ;;  %v7144_v34 = vor.u32 1.1754944e-38, %v7143_v9  ;;  %vm7142_vm9 = vcmp.eq.f32.partialorder %v7141_v62, 8.507059e+37 }
 0x78a   : > { %v7120_v13 = vmul.f32 %v8090_v16, %v7119_v36  ;;  %v13414_v25 = vadd.f32 %v7003_v31, %v6960_v42 }
 0x78c   : > { %v8092_v38 = vpop.eup %8091  ;;  %v7121_v27 = vadd.f32 %v8090_v16, %v7120_v13  ;;  %v7940_v57 = vmul.f32 -1.442695, %v13414_v25 }
 0x78d   : > { %v8094_v53 = vpop.eup %8093  ;;  %v7040_v30 = vadd.f32 1.0, %v8092_v38 }
 0x78e   : > { %v7125_v55 = vsel %vm7124_vm4, %v8090_v16, %v7121_v27  ;;  %v7133_v4 = vmul.f32 %v8094_v53, %v7039_v14  ;;  %8095 = vpow2.f32 %v7940_v57  ;;  %vm7138_vm6 = vweird.f32 %v8094_v53 }
 0x78f   : > { %v7130_v39 = vsel %vm7127_vm5, %v7129_v2, %v7125_v55  ;;  %8097 = vrcp.f32 %v7040_v30  ;;  %vm7139_vm8 = vmor %vm7137_vm7, %vm7138_vm6  ;;  %v7158_v28 = vand.u32 2147483648, %v7040_v30  ;;  %v7156_v46 = vand.u32 2147483647, %v7040_v30 }
 0x790   : > { %v7182_v44 = vsel %vm227_vm3, %v7130_v39, %v13390_v23  ;;  %v7134_v22 = vsub.f32 1.0, %v7133_v4  ;;  %vm7152_vm11 = vweird.f32 %v7040_v30 }
 0x791   : > { %7191 = vst [vmem:[%s9771_s26 + $0x100] sm:$0xff] %v7182_v44  ;;  %v7159_v52 = vor.u32 1.1754944e-38, %v7158_v28  ;;  %vm7157_vm12 = vcmp.eq.f32.partialorder %v7156_v46, 8.507059e+37 }
 0x792   : > { %v7135_v18 = vmul.f32 %v8094_v53, %v7134_v22 }
 0x794   : > { %v8096_v49 = vpop.eup %8095  ;;  %v7136_v41 = vadd.f32 %v8094_v53, %v7135_v18 }
 0x795   : > { %v8098_v10 = vpop.eup %8097  ;;  %v7041_v6 = vadd.f32 1.0, %v8096_v49 }
 0x796   : > { %v7140_v54 = vsel %vm7139_vm8, %v8094_v53, %v7136_v41  ;;  %v7148_v11 = vmul.f32 %v8098_v10, %v7040_v30  ;;  %vm7153_vm10 = vweird.f32 %v8098_v10 }
 0x797   : > { %v7145_v3 = vsel %vm7142_vm9, %v7144_v34, %v7140_v54  ;;  %8099 = vrcp.f32 %v7041_v6  ;;  %vm7154_vm0 = vmor %vm7152_vm11, %vm7153_vm10  ;;  %v7173_v32 = vand.u32 2147483648, %v7041_v6  ;;  %v7171_v48 = vand.u32 2147483647, %v7041_v6 }
 0x798   : > { %v7183_v23 = vsel %vm227_vm3, %v7145_v3, %v13398_v1  ;;  %v7149_v15 = vsub.f32 1.0, %v7148_v11  ;;  %vm7167_vm14 = vweird.f32 %v7041_v6 }
 0x799   : > { %7192 = vst [vmem:[%s9771_s26 + $0x108] sm:$0xff] %v7183_v23  ;;  %v7174_v29 = vor.u32 1.1754944e-38, %v7173_v32  ;;  %vm7172_vm1 = vcmp.eq.f32.partialorder %v7171_v48, 8.507059e+37 }
 0x79a   : > { %v7150_v8 = vmul.f32 %v8098_v10, %v7149_v15 }
 0x79c   : > { %v7151_v59 = vadd.f32 %v8098_v10, %v7150_v8 }
 0x79d   : > { %v8100_v50 = vpop.eup %8099 }
 0x79e   : > { %v7155_v40 = vsel %vm7154_vm0, %v8098_v10, %v7151_v59  ;;  %v7163_v63 = vmul.f32 %v8100_v50, %v7041_v6  ;;  %vm7168_vm13 = vweird.f32 %v8100_v50 }
 0x79f   : > { %v7160_v26 = vsel %vm7157_vm12, %v7159_v52, %v7155_v40  ;;  %vm7169_vm15 = vmor %vm7167_vm14, %vm7168_vm13 }
 0x7a0   : > { %v7184_v1 = vsel %vm227_vm3, %v7160_v26, %v13406_v19  ;;  %v7164_v7 = vsub.f32 1.0, %v7163_v63 }
 0x7a1   : > { %7193 = vst [vmem:[%s9771_s26 + $0x110] sm:$0xff] %v7184_v1 }
 0x7a2   : > { %v7165_v61 = vmul.f32 %v8100_v50, %v7164_v7 }
 0x7a4   : > { %v7166_v43 = vadd.f32 %v8100_v50, %v7165_v61 }
 0x7a6   : > { %v7170_v58 = vsel %vm7169_vm15, %v8100_v50, %v7166_v43 }
 0x7a7   : > { %v7175_v56 = vsel %vm7172_vm1, %v7174_v29, %v7170_v58 }
 0x7a8   : > { %v7185_v45 = vsel %vm227_vm3, %v7175_v56, %v13414_v25 }
 0x7a9   : > { %7194 = vst [vmem:[%s9771_s26 + $0x118] sm:$0xff] %v7185_v45 }
 0x7aa PF: > { %s15_s18 = sadd.s32 1, %s8107_s18  }
 0x7ab   : > { %p12_p4 = scmp.ge.s32.totalorder %s15_s18, 4  }
 0x7ad   :  { %14 = sbr.rel (!%p12_p4) target bundleno = 1 (0x1), region = 70 }

</bundles_post_ra>
